<compile_context>
chip_gen: v7x
topology: tpu7x:2x2x1
jax: 0.10.0
libtpu: 0.0.40
codegen_flags: <defaults>
</compile_context>

<pallas_src>
import jax
import jax.numpy as jnp
from jax import lax
from jax.experimental import pallas as pl
from jax.experimental.pallas import tpu as pltpu

_LANE = 128                       # lane width: pad channels to a multiple of this
_COMPUTE_DTYPE = jnp.bfloat16     # MXU operand dtype (accumulation stays f32)
_EPS = 1e-5                       # InstanceNorm2d default eps


def _resnet_kernel(x_ref, w1_ref, w2_ref, b2_ref, o_ref, hpad_ref, acc_ref):
    # x_ref block: (Bb, H, W, Cp) for the current batch group (channels-last).
    Bb, H, W, Cp = x_ref.shape
    _, Hp2, Wp, _ = hpad_ref.shape
    n_rows = Bb * H * Wp

    # Zero only the halo the convs actually read: the two border rows and the width-pad
    # columns.  Done every step (cheap, a few KiB) instead of a full-scratch zero or an
    # @pl.when(program_id == 0) init -- step-local, so it stays correct when the
    # "parallel" batch axis is split across TensorCores (each core has its own scratch).
    z_row = jnp.zeros((Bb, 1, Wp, Cp), hpad_ref.dtype)
    hpad_ref[:, 0:1, :, :] = z_row
    hpad_ref[:, Hp2 - 1:Hp2, :, :] = z_row
    hpad_ref[:, 1:H + 1, W:Wp, :] = jnp.zeros((Bb, H, Wp - W, Cp), hpad_ref.dtype)

    def inorm_relu(h):
        # InstanceNorm2d (affine=False, eps=1e-5): per-image, per-channel stats over
        # H x W.  Two-pass (mean-subtracted) variance matches the reference numerics
        # and avoids E[x^2]-E[x]^2 cancellation.  Fused with ReLU.
        mean = jnp.mean(h, axis=(1, 2), keepdims=True)
        d = h - mean
        var = jnp.mean(d * d, axis=(1, 2), keepdims=True)
        return jnp.maximum(d * lax.rsqrt(var + _EPS), 0.0)

    def stage(act):
        # Single bf16 cast on the interior store (columns [0:W], sublane-aligned start).
        hpad_ref[:, 1:H + 1, 0:W, :] = act.astype(hpad_ref.dtype)

    def conv3x3(w_ref):
        # 3x3 / stride-1 / pad-1 conv.  For each horizontal tap dx, sum the three
        # vertical taps with lane-aligned full-width (Bb*H*Wp, Cp) @ (Cp, Cp) MXU
        # matmuls, then shift the f32 partial sum by the +/-1 column offset of the
        # dx != 1 groups with one XLU sublane roll (the circular wrap lands on zeroed
        # pad columns, so it contributes exact zeros).  No unaligned window slices.
        # TODO(synk): tap-pack pairs along the contraction axis (K=2*Cp) on v6e/v7x
        #             when Cp == 128 to fill the 256-deep MXU.
        for dx in range(3):
            part = None
            for dy in range(3):
                op = hpad_ref[:, dy:dy + H, :, :].reshape(n_rows, Cp)   # aligned bf16
                p = jnp.dot(op, w_ref[3 * dy + dx],
                            preferred_element_type=jnp.float32)
                part = p if part is None else part + p
            if dx != 1:
                part = pltpu.roll(part, shift=(1 - dx) % n_rows, axis=0)
            if dx == 0:
                acc_ref[...] = part          # f32 VMEM accumulator
            else:
                acc_ref[...] += part
        acc = acc_ref[...].reshape(Bb, H, Wp, Cp)
        return acc[:, :, :W, :]              # drop the width-pad columns

    # norm1 -> ReLU -> conv1.  conv1's bias is not shipped: a per-channel constant
    # added uniformly over space is exactly cancelled by norm2's mean subtraction.
    h = inorm_relu(x_ref[...].astype(jnp.float32))
    stage(h)
    h = conv3x3(w1_ref)

    # norm2 -> ReLU -> dropout(p=0, identity) -> conv2 (+ bias).
    h = inorm_relu(h)
    stage(h)
    h = conv3x3(w2_ref) + b2_ref[...]        # bias broadcast (1, Cp)

    # Identity residual (in_channels == out_channels); re-read x from the resident
    # input block instead of keeping an f32 copy live across the whole kernel.
    o_ref[...] = (x_ref[...].astype(jnp.float32) + h).astype(o_ref.dtype)


def _ceil_to(n, m):
    return ((n + m - 1) // m) * m


def _vmem_capacity_bytes():
    try:
        return int(pltpu.get_tpu_info().vmem_capacity_bytes)
    except Exception:
        return 64 * 2**20          # v7x per-TensorCore VMEM: most conservative fallback


def resnet_block_pallas(x_nchw, params):
    """ResnetBlock forward. x_nchw: (B, C, H, W) f32. params: PyTorch-layout conv params.

    NOTE: channels are lane-padded to a multiple of 128; the kernel is intended for
    C >= 128 -- for much smaller C the padding wastes (Cp/C)^2 MXU FLOPs.
    # TODO(synk): dedicated small-C (VPU / multi-image lane-packed) path.
    """
    B, C, H, W = x_nchw.shape
    w1, w2, b2 = params["w1"], params["w2"], params["b2"]
    assert w1.shape == (C, C, 3, 3) and w2.shape == (C, C, 3, 3)
    # TODO(synk): conv_shortcut / nin_shortcut path for in_channels != out_channels.

    Cp = _ceil_to(C, _LANE)        # lane-dense channel padding
    Wp = _ceil_to(W + 1, 8)        # halo width: >=1 zero pad column, sublane-aligned

    # NCHW -> NHWC (channels on the lane axis).  In a full model carry activations
    # channels-last and pre-padded end-to-end and drop these extra HBM passes
    # (proportionally worst on v5e's HBM bandwidth).
    # TODO(synk): channels-last model-level plumbing.
    x = jnp.transpose(x_nchw, (0, 2, 3, 1))
    if Cp != C:
        x = jnp.pad(x, ((0, 0), (0, 0), (0, 0), (0, Cp - C)))

    def prep_w(w):
        # (Cout, Cin, 3, 3) -> (9, Cin, Cout): tap-major, contraction on the natural
        # channel (lane) axis, zero-padded channels, bf16 MXU operands.
        w = jnp.transpose(w, (2, 3, 1, 0)).reshape(9, C, C)
        w = jnp.pad(w, ((0, 0), (0, Cp - C), (0, Cp - C)))
        return w.astype(_COMPUTE_DTYPE)

    w1p, w2p = prep_w(w1), prep_w(w2)
    b2p = jnp.pad(b2, (0, Cp - C)).reshape(1, Cp).astype(jnp.float32)
    # conv1 bias intentionally not prepared / shipped (cancelled by norm2).

    # --- generation-aware VMEM budget and batch blocking ---------------------------
    vmem_cap = _vmem_capacity_bytes()
    itemsize = jnp.dtype(x.dtype).itemsize
    bytes_per_image = (
        2 * 2 * H * W * Cp * itemsize        # in + out blocks, double-buffered
        + (H + 2) * Wp * Cp * 2              # bf16 halo scratch
        + H * Wp * Cp * 4                    # f32 conv accumulator scratch
        + 4 * H * W * Cp * 4                 # live f32 temporaries (norm / partial sums)
    )
    weight_bytes = 2 * 2 * 9 * Cp * Cp * 2 + 2 * Cp * 4   # double-buffered weights + bias
    budget = int(0.45 * vmem_cap)

    fitting = [d for d in range(1, B + 1)
               if B % d == 0 and weight_bytes + d * bytes_per_image <= budget]
    if not fitting:
        Bb = 1
        # TODO(synk): spatial tiling (stats pass + conv pass) when one image's working
        #             set exceeds the per-core VMEM budget (e.g. large H*W*Cp on v7x).
    elif B >= 4:
        multi = [d for d in fitting if B // d >= 2]       # keep >=2 grid steps so the
        Bb = max(multi) if multi else max(fitting)        # pipeline / v7x megacore split
    else:
        Bb = max(fitting)                                 # tiny batch: amortize overhead

    vmem_limit = int(min(0.9 * vmem_cap, 112 * 2**20))

    x_spec = pl.BlockSpec((Bb, H, W, Cp), lambda i: (i, 0, 0, 0))
    # Weights/bias are grid-invariant; single-buffering them (pipeline_mode=Buffered(1))
    # would save ~one copy of 9*Cp^2 bytes each of VMEM if needed for headroom.
    w_spec = pl.BlockSpec((9, Cp, Cp), lambda i: (0, 0, 0))
    b_spec = pl.BlockSpec((1, Cp), lambda i: (0, 0))

    out = pl.pallas_call(
        _resnet_kernel,
        out_shape=jax.ShapeDtypeStruct((B, H, W, Cp), x.dtype),
        grid_spec=pltpu.PrefetchScalarGridSpec(
            num_scalar_prefetch=0,
            grid=(B // Bb,),
            in_specs=[x_spec, w_spec, w_spec, b_spec],
            out_specs=x_spec,
            scratch_shapes=[
                pltpu.VMEM((Bb, H + 2, Wp, Cp), _COMPUTE_DTYPE),   # bf16 halo scratch
                pltpu.VMEM((Bb * H * Wp, Cp), jnp.float32),        # f32 conv accumulator
            ],
        ),
        compiler_params=pltpu.CompilerParams(
            dimension_semantics=("parallel",),
            vmem_limit_bytes=vmem_limit),
    )(x, w1p, w2p, b2p)

    out = out[..., :C]                           # drop channel padding
    return jnp.transpose(out, (0, 3, 1, 2))      # NHWC -> NCHW


def resnet_block_ref(x, params):
    """Pure-JAX (XLA) reference of the PyTorch ResnetBlock forward, NCHW, f32."""
    def inorm(h):
        mean = jnp.mean(h, axis=(2, 3), keepdims=True)
        var = jnp.mean((h - mean) ** 2, axis=(2, 3), keepdims=True)
        return (h - mean) * lax.rsqrt(var + _EPS)

    def conv(h, w, b):
        y = lax.conv_general_dilated(h, w, (1, 1), "SAME",
                                     dimension_numbers=("NCHW", "OIHW", "NCHW"))
        return y + b[None, :, None, None]

    h = jnp.maximum(inorm(x), 0.0)
    h = conv(h, params["w1"], params["b1"])
    h = jnp.maximum(inorm(h), 0.0)
    h = conv(h, params["w2"], params["b2"])
    return x + h


def init_params(key, C):
    """PyTorch-layout Conv2d params: weight (Cout, Cin, 3, 3), bias (Cout,)."""
    ks = jax.random.split(key, 4)
    k = 1.0 / float(C * 9) ** 0.5      # default Conv2d fan-in scaling
    def w(kk):
        return jax.random.uniform(kk, (C, C, 3, 3), jnp.float32, -k, k)
    def b(kk):
        return jax.random.uniform(kk, (C,), jnp.float32, -k, k)
    return {"w1": w(ks[0]), "b1": b(ks[1]), "w2": w(ks[2]), "b2": b(ks[3])}


if __name__ == "__main__":
    key = jax.random.PRNGKey(0)
    k_x, k_p = jax.random.split(key)

    B, C, H, W = 2, 4, 16, 16
    x = jax.random.normal(k_x, (B, C, H, W), jnp.float32)
    params = init_params(k_p, C)

    out = jax.block_until_ready(resnet_block_pallas(x, params))
    assert out.shape == (B, C, H, W) and out.dtype == x.dtype

    ref = jax.block_until_ready(resnet_block_ref(x, params))
    err = float(jnp.max(jnp.abs(out - ref)))
    # Accuracy contract: bf16 MXU operands across two chained convs, f32 accumulation.
    assert err < 5e-2, f"max |err| = {err}"
    print("KERNEL_OK")
</pallas_src>

<mosaic_0001>
module attributes {stable_mosaic.version = 11 : i64} {
  func.func @_resnet_kernel(%arg0: i32, %arg1: memref<2x16x16x128xf32, #tpu.memory_space<vmem>>, %arg2: memref<9x128x128xbf16, #tpu.memory_space<vmem>>, %arg3: memref<9x128x128xbf16, #tpu.memory_space<vmem>>, %arg4: memref<1x128xf32, #tpu.memory_space<vmem>>, %arg5: memref<2x16x16x128xf32, #tpu.memory_space<vmem>>, %arg6: memref<2x18x24x128xbf16, #tpu.memory_space<vmem>>, %arg7: memref<768x128xf32, #tpu.memory_space<vmem>>) attributes {dimension_semantics = [#tpu.dimension_semantics<parallel>], iteration_bounds = array<i64: 1>, scalar_prefetch = 0 : i64, scratch_operands = 2 : i64, tpu.core_type = #tpu.core_type<tc>, window_params = [{transform_indices = @transform_0, window_bounds = array<i64: 2, 16, 16, 128>}, {pipeline_mode = #tpu.pipeline_mode<synchronous>, transform_indices = @transform_1, window_bounds = array<i64: 9, 128, 128>}, {pipeline_mode = #tpu.pipeline_mode<synchronous>, transform_indices = @transform_2, window_bounds = array<i64: 9, 128, 128>}, {pipeline_mode = #tpu.pipeline_mode<synchronous>, transform_indices = @transform_3, window_bounds = array<i64: 1, 128>}, {transform_indices = @transform_4, window_bounds = array<i64: 2, 16, 16, 128>}]} {
    %cst = arith.constant 0.000000e+00 : bf16
    %0 = vector.broadcast %cst : bf16 to vector<2x1x24x128xbf16>
    %c0 = arith.constant 0 : index
    %c0_0 = arith.constant 0 : index
    %c0_1 = arith.constant 0 : index
    %c0_2 = arith.constant 0 : index
    %1 = vector.load %arg6[%c0, %c0_0, %c0_1, %c0_2] : memref<2x18x24x128xbf16, #tpu.memory_space<vmem>>, vector<2x1x24x128xbf16>
    tpu.vector_store %arg6[%c0, %c0_0, %c0_1, %c0_2], %0 {strides = array<i32>} : memref<2x18x24x128xbf16, #tpu.memory_space<vmem>>, vector<2x1x24x128xbf16>,
    %c0_3 = arith.constant 0 : index
    %c17 = arith.constant 17 : index
    %c0_4 = arith.constant 0 : index
    %c0_5 = arith.constant 0 : index
    %2 = vector.load %arg6[%c0_3, %c17, %c0_4, %c0_5] : memref<2x18x24x128xbf16, #tpu.memory_space<vmem>>, vector<2x1x24x128xbf16>
    tpu.vector_store %arg6[%c0_3, %c17, %c0_4, %c0_5], %0 {strides = array<i32>} : memref<2x18x24x128xbf16, #tpu.memory_space<vmem>>, vector<2x1x24x128xbf16>,
    %cst_6 = arith.constant 0.000000e+00 : bf16
    %3 = vector.broadcast %cst_6 : bf16 to vector<2x16x8x128xbf16>
    %c0_7 = arith.constant 0 : index
    %c1 = arith.constant 1 : index
    %c16 = arith.constant 16 : index
    %c0_8 = arith.constant 0 : index
    %4 = vector.load %arg6[%c0_7, %c1, %c16, %c0_8] : memref<2x18x24x128xbf16, #tpu.memory_space<vmem>>, vector<2x16x8x128xbf16>
    tpu.vector_store %arg6[%c0_7, %c1, %c16, %c0_8], %3 {strides = array<i32>} : memref<2x18x24x128xbf16, #tpu.memory_space<vmem>>, vector<2x16x8x128xbf16>,
    %c0_9 = arith.constant 0 : index
    %c0_10 = arith.constant 0 : index
    %c0_11 = arith.constant 0 : index
    %c0_12 = arith.constant 0 : index
    %5 = vector.load %arg1[%c0_9, %c0_10, %c0_11, %c0_12] : memref<2x16x16x128xf32, #tpu.memory_space<vmem>>, vector<2x16x16x128xf32>
    %cst_13 = arith.constant dense<0.000000e+00> : vector<2x128xf32>
    %6 = vector.multi_reduction <add>, %5, %cst_13 [1, 2] : vector<2x16x16x128xf32> to vector<2x128xf32>
    %7 = vector.shape_cast %6 : vector<2x128xf32> to vector<2x1x1x128xf32>
    %cst_14 = arith.constant 2.560000e+02 : f32
    %8 = vector.broadcast %cst_14 : f32 to vector<2x1x1x128xf32>
    %9 = arith.divf %7, %8 : vector<2x1x1x128xf32>
    %10 = vector.broadcast %9 : vector<2x1x1x128xf32> to vector<2x16x16x128xf32>
    %11 = arith.subf %5, %10 : vector<2x16x16x128xf32>
    %12 = arith.mulf %11, %11 : vector<2x16x16x128xf32>
    %cst_15 = arith.constant dense<0.000000e+00> : vector<2x128xf32>
    %13 = vector.multi_reduction <add>, %12, %cst_15 [1, 2] : vector<2x16x16x128xf32> to vector<2x128xf32>
    %14 = vector.shape_cast %13 : vector<2x128xf32> to vector<2x1x1x128xf32>
    %cst_16 = arith.constant 2.560000e+02 : f32
    %15 = vector.broadcast %cst_16 : f32 to vector<2x1x1x128xf32>
    %16 = arith.divf %14, %15 : vector<2x1x1x128xf32>
    %cst_17 = arith.constant 9.99999974E-6 : f32
    %17 = vector.broadcast %cst_17 : f32 to vector<2x1x1x128xf32>
    %18 = arith.addf %16, %17 : vector<2x1x1x128xf32>
    %19 = math.rsqrt %18 : vector<2x1x1x128xf32>
    %20 = vector.broadcast %19 : vector<2x1x1x128xf32> to vector<2x16x16x128xf32>
    %21 = arith.mulf %11, %20 : vector<2x16x16x128xf32>
    %cst_18 = arith.constant 0.000000e+00 : f32
    %22 = vector.broadcast %cst_18 : f32 to vector<2x16x16x128xf32>
    %23 = arith.maximumf %21, %22 : vector<2x16x16x128xf32>
    %24 = arith.truncf %23 : vector<2x16x16x128xf32> to vector<2x16x16x128xbf16>
    %c0_19 = arith.constant 0 : index
    %c1_20 = arith.constant 1 : index
    %c0_21 = arith.constant 0 : index
    %c0_22 = arith.constant 0 : index
    %25 = vector.load %arg6[%c0_19, %c1_20, %c0_21, %c0_22] : memref<2x18x24x128xbf16, #tpu.memory_space<vmem>>, vector<2x16x16x128xbf16>
    tpu.vector_store %arg6[%c0_19, %c1_20, %c0_21, %c0_22], %24 {strides = array<i32>} : memref<2x18x24x128xbf16, #tpu.memory_space<vmem>>, vector<2x16x16x128xbf16>,
    %c0_23 = arith.constant 0 : index
    %c0_24 = arith.constant 0 : index
    %c0_25 = arith.constant 0 : index
    %c0_26 = arith.constant 0 : index
    %26 = vector.load %arg6[%c0_23, %c0_24, %c0_25, %c0_26] : memref<2x18x24x128xbf16, #tpu.memory_space<vmem>>, vector<2x16x24x128xbf16>
    %27 = vector.shape_cast %26 : vector<2x16x24x128xbf16> to vector<768x128xbf16>
    %c0_27 = arith.constant 0 : index
    %c0_28 = arith.constant 0 : index
    %c0_29 = arith.constant 0 : index
    %28 = vector.load %arg2[%c0_27, %c0_28, %c0_29] : memref<9x128x128xbf16, #tpu.memory_space<vmem>>, vector<1x128x128xbf16>
    %29 = vector.shape_cast %28 : vector<1x128x128xbf16> to vector<128x128xbf16>
    %cst_30 = arith.constant dense<0.000000e+00> : vector<768x128xf32>
    %30 = tpu.matmul %27, %29, %cst_30 {dimension_numbers = #tpu.dot_dimension_numbers<[1], [0], [0], [1], [0, 0, 1, 1], [], []>} : vector<768x128xbf16>, vector<128x128xbf16>, vector<768x128xf32> -> vector<768x128xf32>
    %c0_31 = arith.constant 0 : index
    %c1_32 = arith.constant 1 : index
    %c0_33 = arith.constant 0 : index
    %c0_34 = arith.constant 0 : index
    %31 = vector.load %arg6[%c0_31, %c1_32, %c0_33, %c0_34] : memref<2x18x24x128xbf16, #tpu.memory_space<vmem>>, vector<2x16x24x128xbf16>
    %32 = vector.shape_cast %31 : vector<2x16x24x128xbf16> to vector<768x128xbf16>
    %c3 = arith.constant 3 : index
    %c0_35 = arith.constant 0 : index
    %c0_36 = arith.constant 0 : index
    %33 = vector.load %arg2[%c3, %c0_35, %c0_36] : memref<9x128x128xbf16, #tpu.memory_space<vmem>>, vector<1x128x128xbf16>
    %34 = vector.shape_cast %33 : vector<1x128x128xbf16> to vector<128x128xbf16>
    %cst_37 = arith.constant dense<0.000000e+00> : vector<768x128xf32>
    %35 = tpu.matmul %32, %34, %cst_37 {dimension_numbers = #tpu.dot_dimension_numbers<[1], [0], [0], [1], [0, 0, 1, 1], [], []>} : vector<768x128xbf16>, vector<128x128xbf16>, vector<768x128xf32> -> vector<768x128xf32>
    %36 = arith.addf %30, %35 : vector<768x128xf32>
    %c0_38 = arith.constant 0 : index
    %c2 = arith.constant 2 : index
    %c0_39 = arith.constant 0 : index
    %c0_40 = arith.constant 0 : index
    %37 = vector.load %arg6[%c0_38, %c2, %c0_39, %c0_40] : memref<2x18x24x128xbf16, #tpu.memory_space<vmem>>, vector<2x16x24x128xbf16>
    %38 = vector.shape_cast %37 : vector<2x16x24x128xbf16> to vector<768x128xbf16>
    %c6 = arith.constant 6 : index
    %c0_41 = arith.constant 0 : index
    %c0_42 = arith.constant 0 : index
    %39 = vector.load %arg2[%c6, %c0_41, %c0_42] : memref<9x128x128xbf16, #tpu.memory_space<vmem>>, vector<1x128x128xbf16>
    %40 = vector.shape_cast %39 : vector<1x128x128xbf16> to vector<128x128xbf16>
    %cst_43 = arith.constant dense<0.000000e+00> : vector<768x128xf32>
    %41 = tpu.matmul %38, %40, %cst_43 {dimension_numbers = #tpu.dot_dimension_numbers<[1], [0], [0], [1], [0, 0, 1, 1], [], []>} : vector<768x128xbf16>, vector<128x128xbf16>, vector<768x128xf32> -> vector<768x128xf32>
    %42 = arith.addf %36, %41 : vector<768x128xf32>
    %c1_i32 = arith.constant 1 : i32
    %43 = tpu.dynamic_rotate %42 by %c1_i32 dim 0 : vector<768x128xf32>, i32 -> vector<768x128xf32>
    %c0_44 = arith.constant 0 : index
    %c0_45 = arith.constant 0 : index
    %44 = vector.load %arg7[%c0_44, %c0_45] : memref<768x128xf32, #tpu.memory_space<vmem>>, vector<768x128xf32>
    tpu.vector_store %arg7[%c0_44, %c0_45], %43 {strides = array<i32>} : memref<768x128xf32, #tpu.memory_space<vmem>>, vector<768x128xf32>,
    %c0_46 = arith.constant 0 : index
    %c0_47 = arith.constant 0 : index
    %c0_48 = arith.constant 0 : index
    %c0_49 = arith.constant 0 : index
    %45 = vector.load %arg6[%c0_46, %c0_47, %c0_48, %c0_49] : memref<2x18x24x128xbf16, #tpu.memory_space<vmem>>, vector<2x16x24x128xbf16>
    %46 = vector.shape_cast %45 : vector<2x16x24x128xbf16> to vector<768x128xbf16>
    %c1_50 = arith.constant 1 : index
    %c0_51 = arith.constant 0 : index
    %c0_52 = arith.constant 0 : index
    %47 = vector.load %arg2[%c1_50, %c0_51, %c0_52] : memref<9x128x128xbf16, #tpu.memory_space<vmem>>, vector<1x128x128xbf16>
    %48 = vector.shape_cast %47 : vector<1x128x128xbf16> to vector<128x128xbf16>
    %cst_53 = arith.constant dense<0.000000e+00> : vector<768x128xf32>
    %49 = tpu.matmul %46, %48, %cst_53 {dimension_numbers = #tpu.dot_dimension_numbers<[1], [0], [0], [1], [0, 0, 1, 1], [], []>} : vector<768x128xbf16>, vector<128x128xbf16>, vector<768x128xf32> -> vector<768x128xf32>
    %c0_54 = arith.constant 0 : index
    %c1_55 = arith.constant 1 : index
    %c0_56 = arith.constant 0 : index
    %c0_57 = arith.constant 0 : index
    %50 = vector.load %arg6[%c0_54, %c1_55, %c0_56, %c0_57] : memref<2x18x24x128xbf16, #tpu.memory_space<vmem>>, vector<2x16x24x128xbf16>
    %51 = vector.shape_cast %50 : vector<2x16x24x128xbf16> to vector<768x128xbf16>
    %c4 = arith.constant 4 : index
    %c0_58 = arith.constant 0 : index
    %c0_59 = arith.constant 0 : index
    %52 = vector.load %arg2[%c4, %c0_58, %c0_59] : memref<9x128x128xbf16, #tpu.memory_space<vmem>>, vector<1x128x128xbf16>
    %53 = vector.shape_cast %52 : vector<1x128x128xbf16> to vector<128x128xbf16>
    %cst_60 = arith.constant dense<0.000000e+00> : vector<768x128xf32>
    %54 = tpu.matmul %51, %53, %cst_60 {dimension_numbers = #tpu.dot_dimension_numbers<[1], [0], [0], [1], [0, 0, 1, 1], [], []>} : vector<768x128xbf16>, vector<128x128xbf16>, vector<768x128xf32> -> vector<768x128xf32>
    %55 = arith.addf %49, %54 : vector<768x128xf32>
    %c0_61 = arith.constant 0 : index
    %c2_62 = arith.constant 2 : index
    %c0_63 = arith.constant 0 : index
    %c0_64 = arith.constant 0 : index
    %56 = vector.load %arg6[%c0_61, %c2_62, %c0_63, %c0_64] : memref<2x18x24x128xbf16, #tpu.memory_space<vmem>>, vector<2x16x24x128xbf16>
    %57 = vector.shape_cast %56 : vector<2x16x24x128xbf16> to vector<768x128xbf16>
    %c7 = arith.constant 7 : index
    %c0_65 = arith.constant 0 : index
    %c0_66 = arith.constant 0 : index
    %58 = vector.load %arg2[%c7, %c0_65, %c0_66] : memref<9x128x128xbf16, #tpu.memory_space<vmem>>, vector<1x128x128xbf16>
    %59 = vector.shape_cast %58 : vector<1x128x128xbf16> to vector<128x128xbf16>
    %cst_67 = arith.constant dense<0.000000e+00> : vector<768x128xf32>
    %60 = tpu.matmul %57, %59, %cst_67 {dimension_numbers = #tpu.dot_dimension_numbers<[1], [0], [0], [1], [0, 0, 1, 1], [], []>} : vector<768x128xbf16>, vector<128x128xbf16>, vector<768x128xf32> -> vector<768x128xf32>
    %61 = arith.addf %55, %60 : vector<768x128xf32>
    %c0_68 = arith.constant 0 : index
    %c0_69 = arith.constant 0 : index
    %62 = vector.load %arg7[%c0_68, %c0_69] : memref<768x128xf32, #tpu.memory_space<vmem>>, vector<768x128xf32>
    %63 = arith.addf %62, %61 : vector<768x128xf32>
    %c0_70 = arith.constant 0 : index
    %c0_71 = arith.constant 0 : index
    %64 = vector.load %arg7[%c0_70, %c0_71] : memref<768x128xf32, #tpu.memory_space<vmem>>, vector<768x128xf32>
    tpu.vector_store %arg7[%c0_70, %c0_71], %63 {strides = array<i32>} : memref<768x128xf32, #tpu.memory_space<vmem>>, vector<768x128xf32>,
    %c0_72 = arith.constant 0 : index
    %c0_73 = arith.constant 0 : index
    %c0_74 = arith.constant 0 : index
    %c0_75 = arith.constant 0 : index
    %65 = vector.load %arg6[%c0_72, %c0_73, %c0_74, %c0_75] : memref<2x18x24x128xbf16, #tpu.memory_space<vmem>>, vector<2x16x24x128xbf16>
    %66 = vector.shape_cast %65 : vector<2x16x24x128xbf16> to vector<768x128xbf16>
    %c2_76 = arith.constant 2 : index
    %c0_77 = arith.constant 0 : index
    %c0_78 = arith.constant 0 : index
    %67 = vector.load %arg2[%c2_76, %c0_77, %c0_78] : memref<9x128x128xbf16, #tpu.memory_space<vmem>>, vector<1x128x128xbf16>
    %68 = vector.shape_cast %67 : vector<1x128x128xbf16> to vector<128x128xbf16>
    %cst_79 = arith.constant dense<0.000000e+00> : vector<768x128xf32>
    %69 = tpu.matmul %66, %68, %cst_79 {dimension_numbers = #tpu.dot_dimension_numbers<[1], [0], [0], [1], [0, 0, 1, 1], [], []>} : vector<768x128xbf16>, vector<128x128xbf16>, vector<768x128xf32> -> vector<768x128xf32>
    %c0_80 = arith.constant 0 : index
    %c1_81 = arith.constant 1 : index
    %c0_82 = arith.constant 0 : index
    %c0_83 = arith.constant 0 : index
    %70 = vector.load %arg6[%c0_80, %c1_81, %c0_82, %c0_83] : memref<2x18x24x128xbf16, #tpu.memory_space<vmem>>, vector<2x16x24x128xbf16>
    %71 = vector.shape_cast %70 : vector<2x16x24x128xbf16> to vector<768x128xbf16>
    %c5 = arith.constant 5 : index
    %c0_84 = arith.constant 0 : index
    %c0_85 = arith.constant 0 : index
    %72 = vector.load %arg2[%c5, %c0_84, %c0_85] : memref<9x128x128xbf16, #tpu.memory_space<vmem>>, vector<1x128x128xbf16>
    %73 = vector.shape_cast %72 : vector<1x128x128xbf16> to vector<128x128xbf16>
    %cst_86 = arith.constant dense<0.000000e+00> : vector<768x128xf32>
    %74 = tpu.matmul %71, %73, %cst_86 {dimension_numbers = #tpu.dot_dimension_numbers<[1], [0], [0], [1], [0, 0, 1, 1], [], []>} : vector<768x128xbf16>, vector<128x128xbf16>, vector<768x128xf32> -> vector<768x128xf32>
    %75 = arith.addf %69, %74 : vector<768x128xf32>
    %c0_87 = arith.constant 0 : index
    %c2_88 = arith.constant 2 : index
    %c0_89 = arith.constant 0 : index
    %c0_90 = arith.constant 0 : index
    %76 = vector.load %arg6[%c0_87, %c2_88, %c0_89, %c0_90] : memref<2x18x24x128xbf16, #tpu.memory_space<vmem>>, vector<2x16x24x128xbf16>
    %77 = vector.shape_cast %76 : vector<2x16x24x128xbf16> to vector<768x128xbf16>
    %c8 = arith.constant 8 : index
    %c0_91 = arith.constant 0 : index
    %c0_92 = arith.constant 0 : index
    %78 = vector.load %arg2[%c8, %c0_91, %c0_92] : memref<9x128x128xbf16, #tpu.memory_space<vmem>>, vector<1x128x128xbf16>
    %79 = vector.shape_cast %78 : vector<1x128x128xbf16> to vector<128x128xbf16>
    %cst_93 = arith.constant dense<0.000000e+00> : vector<768x128xf32>
    %80 = tpu.matmul %77, %79, %cst_93 {dimension_numbers = #tpu.dot_dimension_numbers<[1], [0], [0], [1], [0, 0, 1, 1], [], []>} : vector<768x128xbf16>, vector<128x128xbf16>, vector<768x128xf32> -> vector<768x128xf32>
    %81 = arith.addf %75, %80 : vector<768x128xf32>
    %c767_i32 = arith.constant 767 : i32
    %82 = tpu.dynamic_rotate %81 by %c767_i32 dim 0 : vector<768x128xf32>, i32 -> vector<768x128xf32>
    %c0_94 = arith.constant 0 : index
    %c0_95 = arith.constant 0 : index
    %83 = vector.load %arg7[%c0_94, %c0_95] : memref<768x128xf32, #tpu.memory_space<vmem>>, vector<768x128xf32>
    %84 = arith.addf %83, %82 : vector<768x128xf32>
    %c0_96 = arith.constant 0 : index
    %c0_97 = arith.constant 0 : index
    %85 = vector.load %arg7[%c0_96, %c0_97] : memref<768x128xf32, #tpu.memory_space<vmem>>, vector<768x128xf32>
    tpu.vector_store %arg7[%c0_96, %c0_97], %84 {strides = array<i32>} : memref<768x128xf32, #tpu.memory_space<vmem>>, vector<768x128xf32>,
    %c0_98 = arith.constant 0 : index
    %c0_99 = arith.constant 0 : index
    %86 = vector.load %arg7[%c0_98, %c0_99] : memref<768x128xf32, #tpu.memory_space<vmem>>, vector<768x128xf32>
    %87 = vector.shape_cast %86 : vector<768x128xf32> to vector<2x16x24x128xf32>
    %88 = vector.extract_strided_slice %87 {offsets = [0, 0, 0, 0], sizes = [2, 16, 16, 128], strides = [1, 1, 1, 1]} : vector<2x16x24x128xf32> to vector<2x16x16x128xf32>
    %cst_100 = arith.constant dense<0.000000e+00> : vector<2x128xf32>
    %89 = vector.multi_reduction <add>, %88, %cst_100 [1, 2] : vector<2x16x16x128xf32> to vector<2x128xf32>
    %90 = vector.shape_cast %89 : vector<2x128xf32> to vector<2x1x1x128xf32>
    %cst_101 = arith.constant 2.560000e+02 : f32
    %91 = vector.broadcast %cst_101 : f32 to vector<2x1x1x128xf32>
    %92 = arith.divf %90, %91 : vector<2x1x1x128xf32>
    %93 = vector.broadcast %92 : vector<2x1x1x128xf32> to vector<2x16x16x128xf32>
    %94 = arith.subf %88, %93 : vector<2x16x16x128xf32>
    %95 = arith.mulf %94, %94 : vector<2x16x16x128xf32>
    %cst_102 = arith.constant dense<0.000000e+00> : vector<2x128xf32>
    %96 = vector.multi_reduction <add>, %95, %cst_102 [1, 2] : vector<2x16x16x128xf32> to vector<2x128xf32>
    %97 = vector.shape_cast %96 : vector<2x128xf32> to vector<2x1x1x128xf32>
    %cst_103 = arith.constant 2.560000e+02 : f32
    %98 = vector.broadcast %cst_103 : f32 to vector<2x1x1x128xf32>
    %99 = arith.divf %97, %98 : vector<2x1x1x128xf32>
    %cst_104 = arith.constant 9.99999974E-6 : f32
    %100 = vector.broadcast %cst_104 : f32 to vector<2x1x1x128xf32>
    %101 = arith.addf %99, %100 : vector<2x1x1x128xf32>
    %102 = math.rsqrt %101 : vector<2x1x1x128xf32>
    %103 = vector.broadcast %102 : vector<2x1x1x128xf32> to vector<2x16x16x128xf32>
    %104 = arith.mulf %94, %103 : vector<2x16x16x128xf32>
    %cst_105 = arith.constant 0.000000e+00 : f32
    %105 = vector.broadcast %cst_105 : f32 to vector<2x16x16x128xf32>
    %106 = arith.maximumf %104, %105 : vector<2x16x16x128xf32>
    %107 = arith.truncf %106 : vector<2x16x16x128xf32> to vector<2x16x16x128xbf16>
    %c0_106 = arith.constant 0 : index
    %c1_107 = arith.constant 1 : index
    %c0_108 = arith.constant 0 : index
    %c0_109 = arith.constant 0 : index
    %108 = vector.load %arg6[%c0_106, %c1_107, %c0_108, %c0_109] : memref<2x18x24x128xbf16, #tpu.memory_space<vmem>>, vector<2x16x16x128xbf16>
    tpu.vector_store %arg6[%c0_106, %c1_107, %c0_108, %c0_109], %107 {strides = array<i32>} : memref<2x18x24x128xbf16, #tpu.memory_space<vmem>>, vector<2x16x16x128xbf16>,
    %c0_110 = arith.constant 0 : index
    %c0_111 = arith.constant 0 : index
    %c0_112 = arith.constant 0 : index
    %c0_113 = arith.constant 0 : index
    %109 = vector.load %arg6[%c0_110, %c0_111, %c0_112, %c0_113] : memref<2x18x24x128xbf16, #tpu.memory_space<vmem>>, vector<2x16x24x128xbf16>
    %110 = vector.shape_cast %109 : vector<2x16x24x128xbf16> to vector<768x128xbf16>
    %c0_114 = arith.constant 0 : index
    %c0_115 = arith.constant 0 : index
    %c0_116 = arith.constant 0 : index
    %111 = vector.load %arg3[%c0_114, %c0_115, %c0_116] : memref<9x128x128xbf16, #tpu.memory_space<vmem>>, vector<1x128x128xbf16>
    %112 = vector.shape_cast %111 : vector<1x128x128xbf16> to vector<128x128xbf16>
    %cst_117 = arith.constant dense<0.000000e+00> : vector<768x128xf32>
    %113 = tpu.matmul %110, %112, %cst_117 {dimension_numbers = #tpu.dot_dimension_numbers<[1], [0], [0], [1], [0, 0, 1, 1], [], []>} : vector<768x128xbf16>, vector<128x128xbf16>, vector<768x128xf32> -> vector<768x128xf32>
    %c0_118 = arith.constant 0 : index
    %c1_119 = arith.constant 1 : index
    %c0_120 = arith.constant 0 : index
    %c0_121 = arith.constant 0 : index
    %114 = vector.load %arg6[%c0_118, %c1_119, %c0_120, %c0_121] : memref<2x18x24x128xbf16, #tpu.memory_space<vmem>>, vector<2x16x24x128xbf16>
    %115 = vector.shape_cast %114 : vector<2x16x24x128xbf16> to vector<768x128xbf16>
    %c3_122 = arith.constant 3 : index
    %c0_123 = arith.constant 0 : index
    %c0_124 = arith.constant 0 : index
    %116 = vector.load %arg3[%c3_122, %c0_123, %c0_124] : memref<9x128x128xbf16, #tpu.memory_space<vmem>>, vector<1x128x128xbf16>
    %117 = vector.shape_cast %116 : vector<1x128x128xbf16> to vector<128x128xbf16>
    %cst_125 = arith.constant dense<0.000000e+00> : vector<768x128xf32>
    %118 = tpu.matmul %115, %117, %cst_125 {dimension_numbers = #tpu.dot_dimension_numbers<[1], [0], [0], [1], [0, 0, 1, 1], [], []>} : vector<768x128xbf16>, vector<128x128xbf16>, vector<768x128xf32> -> vector<768x128xf32>
    %119 = arith.addf %113, %118 : vector<768x128xf32>
    %c0_126 = arith.constant 0 : index
    %c2_127 = arith.constant 2 : index
    %c0_128 = arith.constant 0 : index
    %c0_129 = arith.constant 0 : index
    %120 = vector.load %arg6[%c0_126, %c2_127, %c0_128, %c0_129] : memref<2x18x24x128xbf16, #tpu.memory_space<vmem>>, vector<2x16x24x128xbf16>
    %121 = vector.shape_cast %120 : vector<2x16x24x128xbf16> to vector<768x128xbf16>
    %c6_130 = arith.constant 6 : index
    %c0_131 = arith.constant 0 : index
    %c0_132 = arith.constant 0 : index
    %122 = vector.load %arg3[%c6_130, %c0_131, %c0_132] : memref<9x128x128xbf16, #tpu.memory_space<vmem>>, vector<1x128x128xbf16>
    %123 = vector.shape_cast %122 : vector<1x128x128xbf16> to vector<128x128xbf16>
    %cst_133 = arith.constant dense<0.000000e+00> : vector<768x128xf32>
    %124 = tpu.matmul %121, %123, %cst_133 {dimension_numbers = #tpu.dot_dimension_numbers<[1], [0], [0], [1], [0, 0, 1, 1], [], []>} : vector<768x128xbf16>, vector<128x128xbf16>, vector<768x128xf32> -> vector<768x128xf32>
    %125 = arith.addf %119, %124 : vector<768x128xf32>
    %c1_i32_134 = arith.constant 1 : i32
    %126 = tpu.dynamic_rotate %125 by %c1_i32_134 dim 0 : vector<768x128xf32>, i32 -> vector<768x128xf32>
    %c0_135 = arith.constant 0 : index
    %c0_136 = arith.constant 0 : index
    %127 = vector.load %arg7[%c0_135, %c0_136] : memref<768x128xf32, #tpu.memory_space<vmem>>, vector<768x128xf32>
    tpu.vector_store %arg7[%c0_135, %c0_136], %126 {strides = array<i32>} : memref<768x128xf32, #tpu.memory_space<vmem>>, vector<768x128xf32>,
    %c0_137 = arith.constant 0 : index
    %c0_138 = arith.constant 0 : index
    %c0_139 = arith.constant 0 : index
    %c0_140 = arith.constant 0 : index
    %128 = vector.load %arg6[%c0_137, %c0_138, %c0_139, %c0_140] : memref<2x18x24x128xbf16, #tpu.memory_space<vmem>>, vector<2x16x24x128xbf16>
    %129 = vector.shape_cast %128 : vector<2x16x24x128xbf16> to vector<768x128xbf16>
    %c1_141 = arith.constant 1 : index
    %c0_142 = arith.constant 0 : index
    %c0_143 = arith.constant 0 : index
    %130 = vector.load %arg3[%c1_141, %c0_142, %c0_143] : memref<9x128x128xbf16, #tpu.memory_space<vmem>>, vector<1x128x128xbf16>
    %131 = vector.shape_cast %130 : vector<1x128x128xbf16> to vector<128x128xbf16>
    %cst_144 = arith.constant dense<0.000000e+00> : vector<768x128xf32>
    %132 = tpu.matmul %129, %131, %cst_144 {dimension_numbers = #tpu.dot_dimension_numbers<[1], [0], [0], [1], [0, 0, 1, 1], [], []>} : vector<768x128xbf16>, vector<128x128xbf16>, vector<768x128xf32> -> vector<768x128xf32>
    %c0_145 = arith.constant 0 : index
    %c1_146 = arith.constant 1 : index
    %c0_147 = arith.constant 0 : index
    %c0_148 = arith.constant 0 : index
    %133 = vector.load %arg6[%c0_145, %c1_146, %c0_147, %c0_148] : memref<2x18x24x128xbf16, #tpu.memory_space<vmem>>, vector<2x16x24x128xbf16>
    %134 = vector.shape_cast %133 : vector<2x16x24x128xbf16> to vector<768x128xbf16>
    %c4_149 = arith.constant 4 : index
    %c0_150 = arith.constant 0 : index
    %c0_151 = arith.constant 0 : index
    %135 = vector.load %arg3[%c4_149, %c0_150, %c0_151] : memref<9x128x128xbf16, #tpu.memory_space<vmem>>, vector<1x128x128xbf16>
    %136 = vector.shape_cast %135 : vector<1x128x128xbf16> to vector<128x128xbf16>
    %cst_152 = arith.constant dense<0.000000e+00> : vector<768x128xf32>
    %137 = tpu.matmul %134, %136, %cst_152 {dimension_numbers = #tpu.dot_dimension_numbers<[1], [0], [0], [1], [0, 0, 1, 1], [], []>} : vector<768x128xbf16>, vector<128x128xbf16>, vector<768x128xf32> -> vector<768x128xf32>
    %138 = arith.addf %132, %137 : vector<768x128xf32>
    %c0_153 = arith.constant 0 : index
    %c2_154 = arith.constant 2 : index
    %c0_155 = arith.constant 0 : index
    %c0_156 = arith.constant 0 : index
    %139 = vector.load %arg6[%c0_153, %c2_154, %c0_155, %c0_156] : memref<2x18x24x128xbf16, #tpu.memory_space<vmem>>, vector<2x16x24x128xbf16>
    %140 = vector.shape_cast %139 : vector<2x16x24x128xbf16> to vector<768x128xbf16>
    %c7_157 = arith.constant 7 : index
    %c0_158 = arith.constant 0 : index
    %c0_159 = arith.constant 0 : index
    %141 = vector.load %arg3[%c7_157, %c0_158, %c0_159] : memref<9x128x128xbf16, #tpu.memory_space<vmem>>, vector<1x128x128xbf16>
    %142 = vector.shape_cast %141 : vector<1x128x128xbf16> to vector<128x128xbf16>
    %cst_160 = arith.constant dense<0.000000e+00> : vector<768x128xf32>
    %143 = tpu.matmul %140, %142, %cst_160 {dimension_numbers = #tpu.dot_dimension_numbers<[1], [0], [0], [1], [0, 0, 1, 1], [], []>} : vector<768x128xbf16>, vector<128x128xbf16>, vector<768x128xf32> -> vector<768x128xf32>
    %144 = arith.addf %138, %143 : vector<768x128xf32>
    %c0_161 = arith.constant 0 : index
    %c0_162 = arith.constant 0 : index
    %145 = vector.load %arg7[%c0_161, %c0_162] : memref<768x128xf32, #tpu.memory_space<vmem>>, vector<768x128xf32>
    %146 = arith.addf %145, %144 : vector<768x128xf32>
    %c0_163 = arith.constant 0 : index
    %c0_164 = arith.constant 0 : index
    %147 = vector.load %arg7[%c0_163, %c0_164] : memref<768x128xf32, #tpu.memory_space<vmem>>, vector<768x128xf32>
    tpu.vector_store %arg7[%c0_163, %c0_164], %146 {strides = array<i32>} : memref<768x128xf32, #tpu.memory_space<vmem>>, vector<768x128xf32>,
    %c0_165 = arith.constant 0 : index
    %c0_166 = arith.constant 0 : index
    %c0_167 = arith.constant 0 : index
    %c0_168 = arith.constant 0 : index
    %148 = vector.load %arg6[%c0_165, %c0_166, %c0_167, %c0_168] : memref<2x18x24x128xbf16, #tpu.memory_space<vmem>>, vector<2x16x24x128xbf16>
    %149 = vector.shape_cast %148 : vector<2x16x24x128xbf16> to vector<768x128xbf16>
    %c2_169 = arith.constant 2 : index
    %c0_170 = arith.constant 0 : index
    %c0_171 = arith.constant 0 : index
    %150 = vector.load %arg3[%c2_169, %c0_170, %c0_171] : memref<9x128x128xbf16, #tpu.memory_space<vmem>>, vector<1x128x128xbf16>
    %151 = vector.shape_cast %150 : vector<1x128x128xbf16> to vector<128x128xbf16>
    %cst_172 = arith.constant dense<0.000000e+00> : vector<768x128xf32>
    %152 = tpu.matmul %149, %151, %cst_172 {dimension_numbers = #tpu.dot_dimension_numbers<[1], [0], [0], [1], [0, 0, 1, 1], [], []>} : vector<768x128xbf16>, vector<128x128xbf16>, vector<768x128xf32> -> vector<768x128xf32>
    %c0_173 = arith.constant 0 : index
    %c1_174 = arith.constant 1 : index
    %c0_175 = arith.constant 0 : index
    %c0_176 = arith.constant 0 : index
    %153 = vector.load %arg6[%c0_173, %c1_174, %c0_175, %c0_176] : memref<2x18x24x128xbf16, #tpu.memory_space<vmem>>, vector<2x16x24x128xbf16>
    %154 = vector.shape_cast %153 : vector<2x16x24x128xbf16> to vector<768x128xbf16>
    %c5_177 = arith.constant 5 : index
    %c0_178 = arith.constant 0 : index
    %c0_179 = arith.constant 0 : index
    %155 = vector.load %arg3[%c5_177, %c0_178, %c0_179] : memref<9x128x128xbf16, #tpu.memory_space<vmem>>, vector<1x128x128xbf16>
    %156 = vector.shape_cast %155 : vector<1x128x128xbf16> to vector<128x128xbf16>
    %cst_180 = arith.constant dense<0.000000e+00> : vector<768x128xf32>
    %157 = tpu.matmul %154, %156, %cst_180 {dimension_numbers = #tpu.dot_dimension_numbers<[1], [0], [0], [1], [0, 0, 1, 1], [], []>} : vector<768x128xbf16>, vector<128x128xbf16>, vector<768x128xf32> -> vector<768x128xf32>
    %158 = arith.addf %152, %157 : vector<768x128xf32>
    %c0_181 = arith.constant 0 : index
    %c2_182 = arith.constant 2 : index
    %c0_183 = arith.constant 0 : index
    %c0_184 = arith.constant 0 : index
    %159 = vector.load %arg6[%c0_181, %c2_182, %c0_183, %c0_184] : memref<2x18x24x128xbf16, #tpu.memory_space<vmem>>, vector<2x16x24x128xbf16>
    %160 = vector.shape_cast %159 : vector<2x16x24x128xbf16> to vector<768x128xbf16>
    %c8_185 = arith.constant 8 : index
    %c0_186 = arith.constant 0 : index
    %c0_187 = arith.constant 0 : index
    %161 = vector.load %arg3[%c8_185, %c0_186, %c0_187] : memref<9x128x128xbf16, #tpu.memory_space<vmem>>, vector<1x128x128xbf16>
    %162 = vector.shape_cast %161 : vector<1x128x128xbf16> to vector<128x128xbf16>
    %cst_188 = arith.constant dense<0.000000e+00> : vector<768x128xf32>
    %163 = tpu.matmul %160, %162, %cst_188 {dimension_numbers = #tpu.dot_dimension_numbers<[1], [0], [0], [1], [0, 0, 1, 1], [], []>} : vector<768x128xbf16>, vector<128x128xbf16>, vector<768x128xf32> -> vector<768x128xf32>
    %164 = arith.addf %158, %163 : vector<768x128xf32>
    %c767_i32_189 = arith.constant 767 : i32
    %165 = tpu.dynamic_rotate %164 by %c767_i32_189 dim 0 : vector<768x128xf32>, i32 -> vector<768x128xf32>
    %c0_190 = arith.constant 0 : index
    %c0_191 = arith.constant 0 : index
    %166 = vector.load %arg7[%c0_190, %c0_191] : memref<768x128xf32, #tpu.memory_space<vmem>>, vector<768x128xf32>
    %167 = arith.addf %166, %165 : vector<768x128xf32>
    %c0_192 = arith.constant 0 : index
    %c0_193 = arith.constant 0 : index
    %168 = vector.load %arg7[%c0_192, %c0_193] : memref<768x128xf32, #tpu.memory_space<vmem>>, vector<768x128xf32>
    tpu.vector_store %arg7[%c0_192, %c0_193], %167 {strides = array<i32>} : memref<768x128xf32, #tpu.memory_space<vmem>>, vector<768x128xf32>,
    %c0_194 = arith.constant 0 : index
    %c0_195 = arith.constant 0 : index
    %169 = vector.load %arg7[%c0_194, %c0_195] : memref<768x128xf32, #tpu.memory_space<vmem>>, vector<768x128xf32>
    %170 = vector.shape_cast %169 : vector<768x128xf32> to vector<2x16x24x128xf32>
    %171 = vector.extract_strided_slice %170 {offsets = [0, 0, 0, 0], sizes = [2, 16, 16, 128], strides = [1, 1, 1, 1]} : vector<2x16x24x128xf32> to vector<2x16x16x128xf32>
    %c0_196 = arith.constant 0 : index
    %c0_197 = arith.constant 0 : index
    %172 = vector.load %arg4[%c0_196, %c0_197] : memref<1x128xf32, #tpu.memory_space<vmem>>, vector<1x128xf32>
    %173 = vector.shape_cast %172 : vector<1x128xf32> to vector<1x1x1x128xf32>
    %174 = vector.broadcast %173 : vector<1x1x1x128xf32> to vector<2x16x16x128xf32>
    %175 = arith.addf %171, %174 : vector<2x16x16x128xf32>
    %c0_198 = arith.constant 0 : index
    %c0_199 = arith.constant 0 : index
    %c0_200 = arith.constant 0 : index
    %c0_201 = arith.constant 0 : index
    %176 = vector.load %arg1[%c0_198, %c0_199, %c0_200, %c0_201] : memref<2x16x16x128xf32, #tpu.memory_space<vmem>>, vector<2x16x16x128xf32>
    %177 = arith.addf %176, %175 : vector<2x16x16x128xf32>
    %c0_202 = arith.constant 0 : index
    %c0_203 = arith.constant 0 : index
    %c0_204 = arith.constant 0 : index
    %c0_205 = arith.constant 0 : index
    %178 = vector.load %arg5[%c0_202, %c0_203, %c0_204, %c0_205] : memref<2x16x16x128xf32, #tpu.memory_space<vmem>>, vector<2x16x16x128xf32>
    tpu.vector_store %arg5[%c0_202, %c0_203, %c0_204, %c0_205], %177 {strides = array<i32>} : memref<2x16x16x128xf32, #tpu.memory_space<vmem>>, vector<2x16x16x128xf32>,
    return
  }
  func.func @transform_0(%arg0: i32) -> (i32, i32, i32, i32) {
    %c0_i32 = arith.constant 0 : i32
    %c0_i32_0 = arith.constant 0 : i32
    %c0_i32_1 = arith.constant 0 : i32
    %c0_i32_2 = arith.constant 0 : i32
    return %arg0, %c0_i32, %c0_i32_0, %c0_i32_1 : i32, i32, i32, i32
  }
  func.func @transform_1(%arg0: i32) -> (i32, i32, i32) {
    %c0_i32 = arith.constant 0 : i32
    %c0_i32_0 = arith.constant 0 : i32
    %c0_i32_1 = arith.constant 0 : i32
    %c0_i32_2 = arith.constant 0 : i32
    return %c0_i32, %c0_i32_0, %c0_i32_1 : i32, i32, i32
  }
  func.func @transform_2(%arg0: i32) -> (i32, i32, i32) {
    %c0_i32 = arith.constant 0 : i32
    %c0_i32_0 = arith.constant 0 : i32
    %c0_i32_1 = arith.constant 0 : i32
    %c0_i32_2 = arith.constant 0 : i32
    return %c0_i32, %c0_i32_0, %c0_i32_1 : i32, i32, i32
  }
  func.func @transform_3(%arg0: i32) -> (i32, i32) {
    %c0_i32 = arith.constant 0 : i32
    %c0_i32_0 = arith.constant 0 : i32
    %c0_i32_1 = arith.constant 0 : i32
    return %c0_i32, %c0_i32_0 : i32, i32
  }
  func.func @transform_4(%arg0: i32) -> (i32, i32, i32, i32) {
    %c0_i32 = arith.constant 0 : i32
    %c0_i32_0 = arith.constant 0 : i32
    %c0_i32_1 = arith.constant 0 : i32
    %c0_i32_2 = arith.constant 0 : i32
    return %arg0, %c0_i32, %c0_i32_0, %c0_i32_1 : i32, i32, i32, i32
  }
}

</mosaic_0001>

<bundles_post_ra>
// kernel: tpu_custom_call.1
= control target key start
LH: loop header
LB: loop body
LE: loop exit
PB: predicated region body
PF: predicated region fallthrough
CT: control target
= control target key end

     0   :  { %9 = vsyncpa [#allocation5], 0  ;;  %s30478_s0 = inlined_call_operand.hbm [shape: f32[2,16,16,128], index: 0, kind: input, shape index: {}]   ;;  %s30479_s1 = inlined_call_operand.hbm [shape: bf16[9,128,128], index: 1, kind: input, shape index: {}]   ;;  %s30480_s2 = inlined_call_operand.hbm [shape: bf16[9,128,128], index: 2, kind: input, shape index: {}]   ;;  %s30481_s3 = inlined_call_operand.vmem [shape: f32[1,128], index: 3, kind: input, shape index: {}]   ;;  %s30482_s4 = inlined_call_operand.hbm [shape: f32[2,16,16,128], index: 4, kind: output, shape index: {}]  }
   0x1   :  { %10 = vsyncpa [#allocation8], 0 }
   0x2   :  { %11 = vsyncpa [#allocation6], 0  ;;  %s26714_s15 = smov [#allocation7]   ;;  %s26620_s19 = scalar_lea.hbm %s30479_s1, 9216 }
   0x3   :  { %s29_s16 = sshll.u32 %s26714_s15, 4  ;;  %p26621_p0 = scmp.ne.s32.totalorder %s30479_s1, %s26620_s19  ;;  %s30_s16 = int_to_ptr.vmem [resolvable:$true] %s29_s16 }
   0x4   :  { %p26624_p1 = scmp.lt.u32.totalorder %s26620_s19, %s30479_s1 }
   0x6   :  { %p26626_p2 = pnand %p26624_p1, %p26621_p0 }
   0x8   :  { %26629 = shalt.err (!%p26626_p2)
}
   0x9   :  { %s26630_s24 = scalar_lea.vmem %s30_s16, 9216  ;;  %p26635_p4 = scmp.lt.s32.totalorder %s30_s16, %s30_s16 }
   0xa   :  { %p26631_p3 = scmp.ne.s32.totalorder %s30_s16, %s26630_s24  ;;  %p26636_p5 = scmp.lt.s32.totalorder %s26630_s24, %s26630_s24 }
   0xc   :  { %p26637_p6 = por %p26636_p5, %p26635_p4 }
   0xe   :  { %p26638_p7 = pnand %p26637_p6, %p26631_p3 }
  0x10   :  { %26641 = shalt.err (!%p26638_p7)
}
  0x11   :  { %s26715_s25 = smov 64   ;;  %s26716_s26 = smov 4  }
  0x12   :  { %35 = dma.hbm_to_vmem [thread:$0]  %s30479_s1, 9216, %s30_s16, [#allocation8], %s26715_s25, %s26715_s25, %s26716_s26  }
  0x13   :  { %s26717_s29 = smov [#allocation4]   ;;  %s26642_s7 = scalar_lea.hbm %s30478_s0, 8192 }
  0x14   :  { %s17_s30 = sshll.u32 %s26717_s29, 4  ;;  %p26643_p8 = scmp.ne.s32.totalorder %s30478_s0, %s26642_s7  ;;  %s18_s30 = int_to_ptr.vmem [resolvable:$true] %s17_s30 }
  0x15   :  { %p26646_p9 = scmp.lt.u32.totalorder %s26642_s7, %s30478_s0 }
  0x17   :  { %p26648_p10 = pnand %p26646_p9, %p26643_p8 }
  0x19   :  { %26651 = shalt.err (!%p26648_p10)
}
  0x1a   :  { %s26652_s12 = scalar_lea.vmem %s18_s30, 8192  ;;  %p26657_p12 = scmp.lt.s32.totalorder %s18_s30, %s18_s30 }
  0x1b   :  { %p26653_p11 = scmp.ne.s32.totalorder %s18_s30, %s26652_s12  ;;  %p26658_p13 = scmp.lt.s32.totalorder %s26652_s12, %s26652_s12 }
  0x1d   :  { %p26659_p0 = por %p26658_p13, %p26657_p12 }
  0x1f   :  { %p26660_p1 = pnand %p26659_p0, %p26653_p11 }
  0x21   :  { %26663 = shalt.err (!%p26660_p1)
}
  0x22   :  { %s26718_s1 = smov 128   ;;  %s26719_s13 = smov 8  }
  0x23   :  { %23 = dma.hbm_to_vmem [thread:$0]  %s30478_s0, 8192, %s18_s30, [#allocation5], %s26718_s1, %s26718_s1, %s26719_s13  }
  0x24   :  { %s26720_s16 = smov [#allocation9]   ;;  %s26664_s20 = scalar_lea.hbm %s30480_s2, 9216 }
  0x25   :  { %s41_s17 = sshll.u32 %s26720_s16, 4  ;;  %p26665_p2 = scmp.ne.s32.totalorder %s30480_s2, %s26664_s20  ;;  %s42_s17 = int_to_ptr.vmem [resolvable:$true] %s41_s17 }
  0x26   :  { %p26668_p3 = scmp.lt.u32.totalorder %s26664_s20, %s30480_s2 }
  0x28   :  { %p26670_p4 = pnand %p26668_p3, %p26665_p2 }
  0x2a   :  { %26673 = shalt.err (!%p26670_p4)
}
  0x2b   :  { %s26674_s27 = scalar_lea.vmem %s42_s17, 9216  ;;  %p26679_p6 = scmp.lt.s32.totalorder %s42_s17, %s42_s17 }
  0x2c   :  { %p26675_p5 = scmp.ne.s32.totalorder %s42_s17, %s26674_s27  ;;  %p26680_p7 = scmp.lt.s32.totalorder %s26674_s27, %s26674_s27 }
  0x2e   :  { %p26681_p8 = por %p26680_p7, %p26679_p6 }
  0x30   :  { %p26682_p9 = pnand %p26681_p8, %p26675_p5 }
  0x32   :  { %26685 = shalt.err (!%p26682_p9)
}
  0x33   :  { %47 = dma.hbm_to_vmem [thread:$0]  %s30480_s2, 9216, %s42_s17, [#allocation8], %s26715_s25, %s26715_s25, %s26716_s26  }
  0x34   :  { %26708 = dma.done.wait [#allocation5], 8192  }
  0x35   :  { %26709 = vsyncadd [#allocation5], 4294959104 }
  0x36   :  { %26710 = dma.done.wait [#allocation8], 18432  }
  0x37   :  { %26711 = vsyncadd [#allocation8], 4294948864  ;;  %v25581_v0 = vld [vmem:[#allocation7 + $0xc0] sm:$0xff]   ;;  %v25582_v1 = vld [vmem:[#allocation7 + $0xc8] sm:$0xff]  }
  0x38   :  { %22788 = vmatprep.subr.bf16.mxu0 %v25581_v0  ;;  %v25583_v2 = vld [vmem:[#allocation7 + $0xd0] sm:$0xff]   ;;  %v25584_v3 = vld [vmem:[#allocation7 + $0xd8] sm:$0xff]   ;;  %v26793_v4 = vld [vmem:[#allocation4] sm:$0xff] }
  0x39   :  { %22789 = vmatpush3.bf16.msra.mxu0 %v25581_v0  ;;  %v26795_v5 = vld [vmem:[#allocation4 + $0x8] sm:$0xff]  ;;  %v26797_v6 = vld [vmem:[#allocation4 + $0x10] sm:$0xff]  ;;  %v26801_v8 = vld [vmem:[#allocation4 + $0x18] sm:$0xff] }
  0x3a   :  { %22790 = vmatprep.subr.bf16.mxu0 %v25582_v1  ;;  %v170_v7 = vadd.f32 %v26795_v5, %v26793_v4  ;;  %v25585_v10 = vld [vmem:[#allocation7 + $0xe0] sm:$0xff]   ;;  %v26807_v13 = vld [vmem:[#allocation4 + $0x28] sm:$0xff]  ;;  %v26810_v16 = vld [vmem:[#allocation4 + $0x30] sm:$0xff] }
  0x3b   :  { %v26804_v11 = vld [vmem:[#allocation4 + $0x20] sm:$0xff]  ;;  %v25586_v15 = vld [vmem:[#allocation7 + $0xe8] sm:$0xff]   ;;  %v25587_v18 = vld [vmem:[#allocation7 + $0xf0] sm:$0xff]  }
  0x3c   :  { %v171_v9 = vadd.f32 %v170_v7, %v26797_v6  ;;  %v26813_v19 = vld [vmem:[#allocation4 + $0x38] sm:$0xff]  ;;  %v26815_v20 = vld [vmem:[#allocation4 + $0x40] sm:$0xff]  ;;  %v26821_v24 = vld [vmem:[#allocation4 + $0x108] sm:$0xff] }
  0x3d   :  { %22791 = vmatpush3.bf16.msra.mxu0 %v25582_v1  ;;  %v26819_v23 = vld [vmem:[#allocation4 + $0x100] sm:$0xff]  ;;  %v26823_v25 = vld [vmem:[#allocation4 + $0x48] sm:$0xff]  ;;  %v26825_v26 = vld [vmem:[#allocation4 + $0x110] sm:$0xff] }
  0x3e   :  { %22792 = vmatprep.subr.bf16.mxu0 %v25583_v2  ;;  %v172_v12 = vadd.f32 %v171_v9, %v26801_v8  ;;  %v207_v27 = vadd.f32 %v26821_v24, %v26819_v23  ;;  %v26830_v29 = vld [vmem:[#allocation4 + $0x118] sm:$0xff]  ;;  %v26832_v31 = vld [vmem:[#allocation4 + $0x50] sm:$0xff]  ;;  %v26836_v34 = vld [vmem:[#allocation4 + $0x120] sm:$0xff] }
  0x3f   :  { %v25588_v30 = vld [vmem:[#allocation7 + $0xf8] sm:$0xff]   ;;  %v26841_v37 = vld [vmem:[#allocation4 + $0x60] sm:$0xff]  ;;  %v26844_v39 = vld [vmem:[#allocation4 + $0x128] sm:$0xff] }
  0x40   :  { %v173_v14 = vadd.f32 %v172_v12, %v26804_v11  ;;  %v208_v32 = vadd.f32 %v207_v27, %v26825_v26  ;;  %v26838_v35 = vld [vmem:[#allocation4 + $0x58] sm:$0xff]  ;;  %v26846_v40 = vld [vmem:[#allocation4 + $0x68] sm:$0xff]  ;;  %v144_v41 = vld [vmem:[#allocation4 + $0x130] sm:$0xff] }
  0x41   :  { %22793 = vmatpush3.bf16.msra.mxu0 %v25583_v2  ;;  %v26850_v44 = vld [vmem:[#allocation4 + $0x70] sm:$0xff]  ;;  %v145_v45 = vld [vmem:[#allocation4 + $0x138] sm:$0xff]  ;;  %v146_v49 = vld [vmem:[#allocation4 + $0x140] sm:$0xff] }
  0x42   :  { %22794 = vmatprep.subr.bf16.mxu0 %v25584_v3  ;;  %v174_v17 = vadd.f32 %v173_v14, %v26807_v13  ;;  %v209_v36 = vadd.f32 %v208_v32, %v26830_v29  ;;  %v26854_v48 = vld [vmem:[#allocation4 + $0x78] sm:$0xff]  ;;  %v26857_v52 = vld [vmem:[#allocation4 + $0x80] sm:$0xff]  ;;  %v147_v53 = vld [vmem:[#allocation4 + $0x148] sm:$0xff] }
  0x43   :  { %v26860_v56 = vld [vmem:[#allocation4 + $0x88] sm:$0xff]  ;;  %v148_v57 = vld [vmem:[#allocation4 + $0x150] sm:$0xff]  ;;  %v149_v61 = vld [vmem:[#allocation4 + $0x158] sm:$0xff] }
  0x44   :  { %v175_v21 = vadd.f32 %v174_v17, %v26810_v16  ;;  %v210_v42 = vadd.f32 %v209_v36, %v26836_v34  ;;  %v26863_v60 = vld [vmem:[#allocation4 + $0x90] sm:$0xff]  ;;  %v26866_v0 = vld [vmem:[#allocation4 + $0x98] sm:$0xff]  ;;  %v150_v1 = vld [vmem:[#allocation4 + $0x160] sm:$0xff] }
  0x45   :  { %22795 = vmatpush3.bf16.msra.mxu0 %v25584_v3  ;;  %v26869_v7 = vld [vmem:[#allocation4 + $0xa0] sm:$0xff]  ;;  %v151_v9 = vld [vmem:[#allocation4 + $0x168] sm:$0xff] }
  0x46   :  { %22796 = vmatprep.subr.bf16.mxu0 %v25585_v10  ;;  %v176_v22 = vadd.f32 %v175_v21, %v26813_v19  ;;  %v211_v46 = vadd.f32 %v210_v42, %v26844_v39  ;;  %v26872_v14 = vld [vmem:[#allocation4 + $0xa8] sm:$0xff]  ;;  %v26875_v21 = vld [vmem:[#allocation4 + $0xb0] sm:$0xff]  ;;  %v154_v32 = vld [vmem:[#allocation4 + $0x180] sm:$0xff] }
  0x48   :  { %v177_v28 = vadd.f32 %v176_v22, %v26815_v20  ;;  %v212_v50 = vadd.f32 %v211_v46, %v144_v41  ;;  %v153_v22 = vld [vmem:[#allocation4 + $0x178] sm:$0xff]  ;;  %v26881_v41 = vld [vmem:[#allocation4 + $0xc0] sm:$0xff]  ;;  %v26884_v46 = vld [vmem:[#allocation4 + $0xc8] sm:$0xff] }
  0x49   :  { %22797 = vmatpush3.bf16.msra.mxu0 %v25585_v10 }
  0x4a   :  { %22798 = vmatprep.subr.bf16.mxu0 %v25586_v15  ;;  %v178_v33 = vadd.f32 %v177_v28, %v26823_v25  ;;  %v213_v54 = vadd.f32 %v212_v50, %v145_v45  ;;  %v156_v45 = vld [vmem:[#allocation4 + $0x190] sm:$0xff]  ;;  %v157_v50 = vld [vmem:[#allocation4 + $0x198] sm:$0xff] }
  0x4c   :  { %v179_v38 = vadd.f32 %v178_v33, %v26832_v31  ;;  %v214_v58 = vadd.f32 %v213_v54, %v146_v49 }
  0x4d   :  { %22799 = vmatpush3.bf16.msra.mxu0 %v25586_v15  ;;  %v152_v15 = vld [vmem:[#allocation4 + $0x170] sm:$0xff] }
  0x4e   :  { %22800 = vmatprep.subr.bf16.mxu0 %v25587_v18  ;;  %v180_v43 = vadd.f32 %v179_v38, %v26838_v35  ;;  %v215_v62 = vadd.f32 %v214_v58, %v147_v53  ;;  %v155_v38 = vld [vmem:[#allocation4 + $0x188] sm:$0xff] }
  0x50   :  { %v181_v47 = vadd.f32 %v180_v43, %v26841_v37  ;;  %v216_v2 = vadd.f32 %v215_v62, %v148_v57  ;;  %v26890_v57 = vld [vmem:[#allocation4 + $0xd8] sm:$0xff]  ;;  %v26893_v62 = vld [vmem:[#allocation4 + $0xe0] sm:$0xff] }
  0x51   :  { %22801 = vmatpush3.bf16.msra.mxu0 %v25587_v18 }
  0x52   :  { %22802 = vmatprep.subr.bf16.mxu0 %v25588_v30  ;;  %v182_v51 = vadd.f32 %v181_v47, %v26846_v40  ;;  %v217_v10 = vadd.f32 %v216_v2, %v149_v61  ;;  %v159_v61 = vld [vmem:[#allocation4 + $0x1a8] sm:$0xff]  ;;  %v160_v2 = vld [vmem:[#allocation4 + $0x1b0] sm:$0xff] }
  0x54   :  { %v183_v55 = vadd.f32 %v182_v51, %v26850_v44  ;;  %v218_v17 = vadd.f32 %v217_v10, %v150_v1  ;;  %v26887_v51 = vld [vmem:[#allocation4 + $0xd0] sm:$0xff] }
  0x55   :  { %22803 = vmatpush3.bf16.msra.mxu0 %v25588_v30  ;;  %v26878_v30 = vld [vmem:[#allocation4 + $0xb8] sm:$0xff] }
  0x56   :  { %v184_v59 = vadd.f32 %v183_v55, %v26854_v48  ;;  %v219_v27 = vadd.f32 %v218_v17, %v151_v9  ;;  %v158_v55 = vld [vmem:[#allocation4 + $0x1a0] sm:$0xff] }
  0x58   :  { %v185_v63 = vadd.f32 %v184_v59, %v26857_v52  ;;  %v220_v33 = vadd.f32 %v219_v27, %v152_v15  ;;  %v26899_v15 = vld [vmem:[#allocation4 + $0xf0] sm:$0xff]  ;;  %v26902_v27 = vld [vmem:[#allocation4 + $0xf8] sm:$0xff] }
  0x5a   :  { %v186_v3 = vadd.f32 %v185_v63, %v26860_v56  ;;  %v221_v42 = vadd.f32 %v220_v33, %v153_v22  ;;  %v162_v22 = vld [vmem:[#allocation4 + $0x1c0] sm:$0xff]  ;;  %v163_v33 = vld [vmem:[#allocation4 + $0x1c8] sm:$0xff] }
  0x5c   :  { %v187_v12 = vadd.f32 %v186_v3, %v26863_v60  ;;  %v222_v47 = vadd.f32 %v221_v42, %v154_v32  ;;  %v26896_v3 = vld [vmem:[#allocation4 + $0xe8] sm:$0xff]  ;;  %v164_v42 = vld [vmem:[#allocation4 + $0x1d0] sm:$0xff] }
  0x5e   :  { %v188_v18 = vadd.f32 %v187_v12, %v26866_v0  ;;  %v223_v53 = vadd.f32 %v222_v47, %v155_v38  ;;  %v161_v12 = vld [vmem:[#allocation4 + $0x1b8] sm:$0xff]  ;;  %v26721_v47 = vmov 0  }
  0x5f   :  { %74 = vst [vmem:[#allocation2 + $0x14] sm:$0xf] %v26721_v47  ;;  %60 = vst [vmem:[#allocation2] sm:$0xf] %v26721_v47 }
  0x60   :  { %v189_v28 = vadd.f32 %v188_v18, %v26869_v7  ;;  %v224_v58 = vadd.f32 %v223_v53, %v156_v45  ;;  %61 = vst [vmem:[#allocation2 + $0x4] sm:$0xf] %v26721_v47  ;;  %62 = vst [vmem:[#allocation2 + $0x8] sm:$0xf] %v26721_v47  ;;  %v26907_v53 = vld [vmem:[#allocation4 + $0x1d8] sm:$0xff] }
  0x61   :  { %63 = vst [vmem:[#allocation2 + $0xd8] sm:$0xf] %v26721_v47  ;;  %64 = vst [vmem:[#allocation2 + $0xdc] sm:$0xf] %v26721_v47 }
  0x62   :  { %v190_v36 = vadd.f32 %v189_v28, %v26872_v14  ;;  %v225_v63 = vadd.f32 %v224_v58, %v157_v50  ;;  %65 = vst [vmem:[#allocation2 + $0xe0] sm:$0xf] %v26721_v47  ;;  %67 = vst [vmem:[#allocation2 + $0xcc] sm:$0xf] %v26721_v47 }
  0x63   :  { %68 = vst [vmem:[#allocation2 + $0xd0] sm:$0xf] %v26721_v47  ;;  %69 = vst [vmem:[#allocation2 + $0xd4] sm:$0xf] %v26721_v47 }
  0x64   :  { %v191_v43 = vadd.f32 %v190_v36, %v26875_v21  ;;  %v226_v9 = vadd.f32 %v225_v63, %v158_v55  ;;  %70 = vst [vmem:[#allocation2 + $0x1a4] sm:$0xf] %v26721_v47  ;;  %71 = vst [vmem:[#allocation2 + $0x1a8] sm:$0xf] %v26721_v47 }
  0x65   :  { %72 = vst [vmem:[#allocation2 + $0x1ac] sm:$0xf] %v26721_v47  ;;  %75 = vst [vmem:[#allocation2 + $0x20] sm:$0xf] %v26721_v47 }
  0x66   :  { %v192_v49 = vadd.f32 %v191_v43, %v26878_v30  ;;  %v227_v17 = vadd.f32 %v226_v9, %v159_v61  ;;  %76 = vst [vmem:[#allocation2 + $0x2c] sm:$0xf] %v26721_v47  ;;  %77 = vst [vmem:[#allocation2 + $0x38] sm:$0xf] %v26721_v47  ;;  %v26912_v9 = vld [vmem:[#allocation4 + $0x1e8] sm:$0xff] }
  0x67   :  { %78 = vst [vmem:[#allocation2 + $0x44] sm:$0xf] %v26721_v47  ;;  %79 = vst [vmem:[#allocation2 + $0x50] sm:$0xf] %v26721_v47 }
  0x68   :  { %v193_v54 = vadd.f32 %v192_v49, %v26881_v41  ;;  %v228_v28 = vadd.f32 %v227_v17, %v160_v2  ;;  %80 = vst [vmem:[#allocation2 + $0x5c] sm:$0xf] %v26721_v47  ;;  %81 = vst [vmem:[#allocation2 + $0x68] sm:$0xf] %v26721_v47 }
  0x69   :  { %82 = vst [vmem:[#allocation2 + $0x74] sm:$0xf] %v26721_v47  ;;  %83 = vst [vmem:[#allocation2 + $0x80] sm:$0xf] %v26721_v47 }
  0x6a   :  { %v194_v59 = vadd.f32 %v193_v54, %v26884_v46  ;;  %v229_v36 = vadd.f32 %v228_v28, %v161_v12  ;;  %84 = vst [vmem:[#allocation2 + $0x8c] sm:$0xf] %v26721_v47  ;;  %85 = vst [vmem:[#allocation2 + $0x98] sm:$0xf] %v26721_v47  ;;  %v26920_v28 = vld [vmem:[#allocation4 + $0x1f8] sm:$0xff] }
  0x6b   :  { %86 = vst [vmem:[#allocation2 + $0xa4] sm:$0xf] %v26721_v47  ;;  %87 = vst [vmem:[#allocation2 + $0xb0] sm:$0xf] %v26721_v47 }
  0x6c   :  { %v195_v1 = vadd.f32 %v194_v59, %v26887_v51  ;;  %v230_v43 = vadd.f32 %v229_v36, %v162_v22  ;;  %88 = vst [vmem:[#allocation2 + $0xbc] sm:$0xf] %v26721_v47  ;;  %89 = vst [vmem:[#allocation2 + $0xc8] sm:$0xf] %v26721_v47  ;;  %v26909_v59 = vld [vmem:[#allocation4 + $0x1e0] sm:$0xff]  ;;  %v26918_v22 = vld [vmem:[#allocation4 + $0x1f0] sm:$0xff] }
  0x6d   :  { %90 = vst [vmem:[#allocation2 + $0xec] sm:$0xf] %v26721_v47  ;;  %91 = vst [vmem:[#allocation2 + $0xf8] sm:$0xf] %v26721_v47 }
  0x6e   :  { %v196_v10 = vadd.f32 %v195_v1, %v26890_v57  ;;  %92 = vst [vmem:[#allocation2 + $0x104] sm:$0xf] %v26721_v47  ;;  %93 = vst [vmem:[#allocation2 + $0x110] sm:$0xf] %v26721_v47  ;;  %v231_v49 = vadd.f32 %v230_v43, %v163_v33  ;;  %v25590_v1 = vld [vmem:[#allocation7] sm:$0xff]  }
  0x6f   :  { %94 = vst [vmem:[#allocation2 + $0x11c] sm:$0xf] %v26721_v47  ;;  %95 = vst [vmem:[#allocation2 + $0x128] sm:$0xf] %v26721_v47  ;;  %22900 = vmatprep.subr.bf16.mxu0 %v25590_v1 }
  0x70   :  { %v197_v18 = vadd.f32 %v196_v10, %v26893_v62  ;;  %96 = vst [vmem:[#allocation2 + $0x134] sm:$0xf] %v26721_v47  ;;  %97 = vst [vmem:[#allocation2 + $0x140] sm:$0xf] %v26721_v47  ;;  %v232_v54 = vadd.f32 %v231_v49, %v164_v42 }
  0x71   :  { %98 = vst [vmem:[#allocation2 + $0x14c] sm:$0xf] %v26721_v47  ;;  %99 = vst [vmem:[#allocation2 + $0x158] sm:$0xf] %v26721_v47 }
  0x72   :  { %v198_v32 = vadd.f32 %v197_v18, %v26896_v3  ;;  %100 = vst [vmem:[#allocation2 + $0x164] sm:$0xf] %v26721_v47  ;;  %101 = vst [vmem:[#allocation2 + $0x170] sm:$0xf] %v26721_v47  ;;  %v233_v61 = vadd.f32 %v232_v54, %v26907_v53 }
  0x73   :  { %102 = vst [vmem:[#allocation2 + $0x17c] sm:$0xf] %v26721_v47  ;;  %103 = vst [vmem:[#allocation2 + $0x188] sm:$0xf] %v26721_v47 }
  0x74   :  { %v199_v38 = vadd.f32 %v198_v32, %v26899_v15  ;;  %104 = vst [vmem:[#allocation2 + $0x194] sm:$0xf] %v26721_v47  ;;  %105 = vst [vmem:[#allocation2 + $0x1a0] sm:$0xf] %v26721_v47  ;;  %v234_v10 = vadd.f32 %v233_v61, %v26909_v59 }
  0x76   :  { %v200_v45 = vadd.f32 %v199_v38, %v26902_v27  ;;  %v235_v17 = vadd.f32 %v234_v10, %v26912_v9 }
  0x78   :  { %v201_v50 = vrot.slane %v200_v45, 4  ;;  %v236_v32 = vadd.f32 %v235_v17, %v26918_v22 }
  0x7a   :  { %v202_v55 = vadd.f32 %v201_v50, %v200_v45  ;;  %v237_v33 = vadd.f32 %v236_v32, %v26920_v28 }
  0x7c   :  { %v203_v58 = vrot.slane %v202_v55, 2  ;;  %v238_v43 = vrot.slane %v237_v33, 4 }
  0x7e   :  { %v204_v63 = vadd.f32 %v203_v58, %v202_v55  ;;  %v239_v54 = vadd.f32 %v238_v43, %v237_v33 }
  0x80   :  { %v205_v2 = vrot.slane %v204_v63, 1  ;;  %v240_v61 = vrot.slane %v239_v54, 2 }
  0x82   :  { %v206_v12 = vadd.f32 %v205_v2, %v204_v63 }
  0x84   :  { %v26916_v18 = vmul.f32 0.00390625, %v206_v12  ;;  %v241_v12 = vadd.f32 %v240_v61, %v239_v54 }
  0x86   :  { %v26926_v36 = vsub.f32 %v26793_v4, %v26916_v18  ;;  %v26930_v38 = vsub.f32 %v26795_v5, %v26916_v18  ;;  %v26934_v42 = vsub.f32 %v26797_v6, %v26916_v18  ;;  %v26938_v45 = vsub.f32 %v26801_v8, %v26916_v18 }
  0x87   :  { %v26946_v49 = vsub.f32 %v26804_v11, %v26916_v18  ;;  %v26952_v6 = vsub.f32 %v26807_v13, %v26916_v18  ;;  %v26958_v55 = vsub.f32 %v26810_v16, %v26916_v18  ;;  %v26964_v63 = vsub.f32 %v26813_v19, %v26916_v18 }
  0x88   :  { %v311_v47 = vmul.f32 %v26926_v36, %v26926_v36  ;;  %v312_v4 = vmul.f32 %v26930_v38, %v26930_v38  ;;  %v313_v5 = vmul.f32 %v26934_v42, %v26934_v42  ;;  %v314_v8 = vmul.f32 %v26938_v45, %v26938_v45 }
  0x89   :  { %v315_v11 = vmul.f32 %v26946_v49, %v26946_v49  ;;  %v316_v13 = vmul.f32 %v26952_v6, %v26952_v6  ;;  %v26970_v2 = vsub.f32 %v26815_v20, %v26916_v18  ;;  %v317_v16 = vmul.f32 %v26958_v55, %v26958_v55 }
  0x8a   :  { %v375_v50 = vadd.f32 %v312_v4, %v311_v47  ;;  %v26976_v17 = vsub.f32 %v26823_v25, %v26916_v18  ;;  %v318_v19 = vmul.f32 %v26964_v63, %v26964_v63  ;;  %v26982_v33 = vsub.f32 %v26832_v31, %v26916_v18 }
  0x8b   :  { %v319_v20 = vmul.f32 %v26970_v2, %v26970_v2  ;;  %v242_v47 = vrot.slane %v241_v12, 1  ;;  %v26988_v4 = vsub.f32 %v26838_v35, %v26916_v18  ;;  %v27006_v61 = vsub.f32 %v26850_v44, %v26916_v18 }
  0x8c   :  { %v376_v58 = vadd.f32 %v375_v50, %v313_v5  ;;  %v320_v25 = vmul.f32 %v26976_v17, %v26976_v17  ;;  %v321_v31 = vmul.f32 %v26982_v33, %v26982_v33 }
  0x8d   :  { %v243_v54 = vadd.f32 %v242_v47, %v241_v12  ;;  %v322_v35 = vmul.f32 %v26988_v4, %v26988_v4  ;;  %v27020_v12 = vsub.f32 %v26857_v52, %v26916_v18  ;;  %v325_v44 = vmul.f32 %v27006_v61, %v27006_v61 }
  0x8e   :  { %v377_v1 = vadd.f32 %v376_v58, %v314_v8  ;;  %v26994_v8 = vsub.f32 %v26841_v37, %v26916_v18 }
  0x90   :  { %v378_v10 = vadd.f32 %v377_v1, %v315_v11  ;;  %v27000_v11 = vsub.f32 %v26846_v40, %v26916_v18  ;;  %v323_v37 = vmul.f32 %v26994_v8, %v26994_v8  ;;  %v27010_v1 = vmul.f32 0.00390625, %v243_v54 }
  0x92   :  { %v379_v32 = vadd.f32 %v378_v10, %v316_v13  ;;  %v324_v40 = vmul.f32 %v27000_v11, %v27000_v11  ;;  %v27040_v47 = vsub.f32 %v26825_v26, %v27010_v1  ;;  %v27058_v26 = vsub.f32 %v26866_v0, %v26916_v18 }
  0x93   :  { %v27064_v54 = vsub.f32 %v26836_v34, %v27010_v1 }
  0x94   :  { %v380_v43 = vadd.f32 %v379_v32, %v317_v16  ;;  %v27014_v16 = vsub.f32 %v26854_v48, %v26916_v18  ;;  %v27026_v32 = vsub.f32 %v26819_v23, %v27010_v1  ;;  %v27030_v48 = vsub.f32 %v26821_v24, %v27010_v1 }
  0x95   :  { %v27044_v23 = vsub.f32 %v26863_v60, %v26916_v18  ;;  %v327_v24 = vmul.f32 %v27020_v12, %v27020_v12 }
  0x96   :  { %v381_v5 = vadd.f32 %v380_v43, %v318_v19  ;;  %v326_v52 = vmul.f32 %v27014_v16, %v27014_v16 }
  0x98   :  { %v382_v50 = vadd.f32 %v381_v5, %v319_v20  ;;  %v27034_v20 = vsub.f32 %v26860_v56, %v26916_v18  ;;  %v27050_v56 = vsub.f32 %v26830_v29, %v27010_v1  ;;  %v343_v5 = vmul.f32 %v27026_v32, %v27026_v32 }
  0x99   :  { %v345_v29 = vmul.f32 %v27040_v47, %v27040_v47 }
  0x9a   :  { %v383_v58 = vadd.f32 %v382_v50, %v320_v25  ;;  %v328_v60 = vmul.f32 %v27034_v20, %v27034_v20 }
  0x9c   :  { %v384_v13 = vadd.f32 %v383_v58, %v321_v31  ;;  %v344_v31 = vmul.f32 %v27030_v48, %v27030_v48  ;;  %v329_v58 = vmul.f32 %v27044_v23, %v27044_v23 }
  0x9e   :  { %v385_v10 = vadd.f32 %v384_v13, %v322_v35  ;;  %v27070_v35 = vsub.f32 %v26869_v7, %v26916_v18  ;;  %v346_v13 = vmul.f32 %v27050_v56, %v27050_v56  ;;  %v412_v34 = vadd.f32 %v344_v31, %v343_v5 }
  0x9f   :  { %v330_v7 = vmul.f32 %v27058_v26, %v27058_v26 }
  0xa0   :  { %v386_v19 = vadd.f32 %v385_v10, %v323_v37  ;;  %v27076_v37 = vsub.f32 %v26844_v39, %v27010_v1  ;;  %v347_v39 = vmul.f32 %v27064_v54, %v27064_v54 }
  0xa2   :  { %v387_v43 = vadd.f32 %v386_v19, %v324_v40  ;;  %30541 = vst [vmem:[#allocation14_spill] sm:$0xff] %v27076_v37  ;;  %v27082_v40 = vsub.f32 %v26872_v14, %v26916_v18  ;;  %v331_v14 = vmul.f32 %v27070_v35, %v27070_v35  ;;  %v348_v31 = vmul.f32 %v27076_v37, %v27076_v37  ;;  %v26611_v37 = vld [vmem:[#allocation4 + $0x1a0] sm:$0xff] }
  0xa4   :  { %v388_v25 = vadd.f32 %v387_v43, %v325_v44  ;;  %v26597_v44 = vld [vmem:[#allocation4 + $0x130] sm:$0xff]  ;;  %v27093_v43 = vsub.f32 %v26875_v21, %v26916_v18  ;;  %v332_v21 = vmul.f32 %v27082_v40, %v27082_v40 }
  0xa5   :  { %v27087_v19 = vsub.f32 %v26597_v44, %v27010_v1  ;;  %v27115_v44 = vsub.f32 %v26881_v41, %v26916_v18 }
  0xa6   :  { %v389_v50 = vadd.f32 %v388_v25, %v326_v52  ;;  %v413_v52 = vadd.f32 %v412_v34, %v345_v29  ;;  %v26598_v25 = vld [vmem:[#allocation4 + $0x138] sm:$0xff] }
  0xa7   :  { %30542 = vst [vmem:[#allocation15_spill] sm:$0xff] %v27087_v19  ;;  %v27098_v5 = vsub.f32 %v26598_v25, %v27010_v1 }
  0xa8   :  { %v390_v0 = vadd.f32 %v389_v50, %v327_v24  ;;  %v27104_v50 = vsub.f32 %v26878_v30, %v26916_v18  ;;  %v333_v30 = vmul.f32 %v27093_v43, %v27093_v43 }
  0xa9   :  { %30543 = vst [vmem:[#allocation16_spill] sm:$0xff] %v27098_v5 }
  0xaa   :  { %v391_v10 = vadd.f32 %v390_v0, %v328_v60  ;;  %v414_v60 = vadd.f32 %v413_v52, %v346_v13  ;;  %v26599_v0 = vld [vmem:[#allocation4 + $0x140] sm:$0xff]  ;;  %v26600_v52 = vld [vmem:[#allocation4 + $0x148] sm:$0xff]  ;;  %v334_v41 = vmul.f32 %v27104_v50, %v27104_v50 }
  0xab   :  { %v27109_v34 = vsub.f32 %v26599_v0, %v27010_v1  ;;  %v27120_v25 = vsub.f32 %v26600_v52, %v27010_v1  ;;  %v27126_v0 = vsub.f32 %v26884_v46, %v26916_v18  ;;  %v27137_v52 = vsub.f32 %v26887_v51, %v26916_v18 }
  0xac   :  { %v392_v24 = vadd.f32 %v391_v10, %v329_v58  ;;  %v349_v58 = vmul.f32 %v27087_v19, %v27087_v19  ;;  %v415_v10 = vadd.f32 %v414_v60, %v347_v39  ;;  %v26601_v60 = vld [vmem:[#allocation4 + $0x150] sm:$0xff]  ;;  %v335_v46 = vmul.f32 %v27115_v44, %v27115_v44 }
  0xad   :  { %30544 = vst [vmem:[#allocation17_spill] sm:$0xff] %v27109_v34  ;;  %30545 = vst [vmem:[#allocation18_spill] sm:$0xff] %v27120_v25  ;;  %v27131_v19 = vsub.f32 %v26601_v60, %v27010_v1  ;;  %v27148_v60 = vsub.f32 %v26890_v57, %v26916_v18  ;;  %v336_v51 = vmul.f32 %v27126_v0, %v27126_v0 }
  0xae   :  { %v393_v29 = vadd.f32 %v392_v24, %v330_v7  ;;  %v350_v7 = vmul.f32 %v27098_v5, %v27098_v5  ;;  %v416_v24 = vadd.f32 %v415_v10, %v348_v31  ;;  %v26602_v10 = vld [vmem:[#allocation4 + $0x158] sm:$0xff]  ;;  %v337_v57 = vmul.f32 %v27137_v52, %v27137_v52 }
  0xaf   :  { %30546 = vst [vmem:[#allocation19_spill] sm:$0xff] %v27131_v19  ;;  %v27142_v5 = vsub.f32 %v26602_v10, %v27010_v1  ;;  %v27159_v10 = vsub.f32 %v26893_v62, %v26916_v18  ;;  %v338_v62 = vmul.f32 %v27148_v60, %v27148_v60 }
  0xb0   :  { %v394_v13 = vadd.f32 %v393_v29, %v331_v14  ;;  %v351_v14 = vmul.f32 %v27109_v34, %v27109_v34  ;;  %v417_v29 = vadd.f32 %v416_v24, %v349_v58  ;;  %v26603_v24 = vld [vmem:[#allocation4 + $0x160] sm:$0xff] }
  0xb1   :  { %30547 = vst [vmem:[#allocation20_spill] sm:$0xff] %v27142_v5  ;;  %v27153_v34 = vsub.f32 %v26603_v24, %v27010_v1  ;;  %v27170_v24 = vsub.f32 %v26896_v3, %v26916_v18  ;;  %v339_v3 = vmul.f32 %v27159_v10, %v27159_v10 }
  0xb2   :  { %v395_v39 = vadd.f32 %v394_v13, %v332_v21  ;;  %v352_v21 = vmul.f32 %v27120_v25, %v27120_v25  ;;  %v418_v13 = vadd.f32 %v417_v29, %v350_v7  ;;  %v26604_v29 = vld [vmem:[#allocation4 + $0x168] sm:$0xff] }
  0xb3   :  { %30548 = vst [vmem:[#allocation21_spill] sm:$0xff] %v27153_v34  ;;  %v27164_v25 = vsub.f32 %v26604_v29, %v27010_v1  ;;  %v27181_v29 = vsub.f32 %v26899_v15, %v26916_v18  ;;  %v340_v15 = vmul.f32 %v27170_v24, %v27170_v24 }
  0xb4   :  { %v396_v31 = vadd.f32 %v395_v39, %v333_v30  ;;  %v353_v30 = vmul.f32 %v27131_v19, %v27131_v19  ;;  %v419_v39 = vadd.f32 %v418_v13, %v351_v14  ;;  %v26605_v13 = vld [vmem:[#allocation4 + $0x170] sm:$0xff] }
  0xb5   :  { %30549 = vst [vmem:[#allocation22_spill] sm:$0xff] %v27164_v25  ;;  %v27175_v19 = vsub.f32 %v26605_v13, %v27010_v1  ;;  %v27192_v13 = vsub.f32 %v26902_v27, %v26916_v18 }
  0xb6   :  { %v397_v58 = vadd.f32 %v396_v31, %v334_v41  ;;  %v354_v41 = vmul.f32 %v27142_v5, %v27142_v5  ;;  %v420_v31 = vadd.f32 %v419_v39, %v352_v21  ;;  %v26606_v39 = vld [vmem:[#allocation4 + $0x178] sm:$0xff] }
  0xb7   :  { %30550 = vst [vmem:[#allocation23_spill] sm:$0xff] %v27175_v19  ;;  %v27186_v5 = vsub.f32 %v26606_v39, %v27010_v1  ;;  %v341_v39 = vmul.f32 %v27181_v29, %v27181_v29 }
  0xb8   :  { %v398_v7 = vadd.f32 %v397_v58, %v335_v46  ;;  %v355_v46 = vmul.f32 %v27153_v34, %v27153_v34  ;;  %v421_v58 = vadd.f32 %v420_v31, %v353_v30  ;;  %v26607_v31 = vld [vmem:[#allocation4 + $0x180] sm:$0xff] }
  0xb9   :  { %30551 = vst [vmem:[#allocation24_spill] sm:$0xff] %v27186_v5  ;;  %v27197_v34 = vsub.f32 %v26607_v31, %v27010_v1  ;;  %v358_v18 = vmul.f32 %v27186_v5, %v27186_v5 }
  0xba   :  { %v399_v14 = vadd.f32 %v398_v7, %v336_v51  ;;  %v356_v51 = vmul.f32 %v27164_v25, %v27164_v25  ;;  %v422_v7 = vadd.f32 %v421_v58, %v354_v41  ;;  %v26608_v58 = vld [vmem:[#allocation4 + $0x188] sm:$0xff]  ;;  %v26609_v25 = vld [vmem:[#allocation4 + $0x190] sm:$0xff] }
  0xbb   :  { %30552 = vst [vmem:[#allocation25_spill] sm:$0xff] %v27197_v34  ;;  %v27204_v27 = vsub.f32 %v26608_v58, %v27010_v1 }
  0xbc   :  { %v400_v21 = vadd.f32 %v399_v14, %v337_v57  ;;  %v357_v57 = vmul.f32 %v27175_v19, %v27175_v19  ;;  %v423_v14 = vadd.f32 %v422_v7, %v355_v46  ;;  %v27211_v19 = vsub.f32 %v26609_v25, %v27010_v1 }
  0xbd   :  { %v359_v46 = vmul.f32 %v27197_v34, %v27197_v34 }
  0xbe   :  { %v401_v30 = vadd.f32 %v400_v21, %v338_v62  ;;  %v424_v62 = vadd.f32 %v423_v14, %v356_v51  ;;  %v342_v21 = vmul.f32 %v27192_v13, %v27192_v13  ;;  %30553 = vst [vmem:[#allocation26_spill] sm:$0xff] %v27211_v19  ;;  %v360_v51 = vmul.f32 %v27204_v27, %v27204_v27 }
  0xbf   :  { %v361_v25 = vmul.f32 %v27211_v19, %v27211_v19 }
  0xc0   :  { %v402_v41 = vadd.f32 %v401_v30, %v339_v3  ;;  %v425_v3 = vadd.f32 %v424_v62, %v357_v57  ;;  %v26610_v30 = vld [vmem:[#allocation4 + $0x198] sm:$0xff]  ;;  %v26612_v57 = vld [vmem:[#allocation4 + $0x1a8] sm:$0xff] }
  0xc1   :  { %v27216_v58 = vsub.f32 %v26610_v30, %v27010_v1 }
  0xc2   :  { %v403_v31 = vadd.f32 %v402_v41, %v340_v15  ;;  %v426_v14 = vadd.f32 %v425_v3, %v358_v18  ;;  %v27221_v15 = vsub.f32 %v26611_v37, %v27010_v1  ;;  %v26613_v18 = vld [vmem:[#allocation4 + $0x1b0] sm:$0xff] }
  0xc3   :  { %30554 = vst [vmem:[#allocation27_spill] sm:$0xff] %v27216_v58  ;;  %v362_v62 = vmul.f32 %v27216_v58, %v27216_v58 }
  0xc4   :  { %v404_v7 = vadd.f32 %v403_v31, %v341_v39  ;;  %30555 = vst [vmem:[#allocation28_spill] sm:$0xff] %v27221_v15  ;;  %v427_v41 = vadd.f32 %v426_v14, %v359_v46  ;;  %v27226_v39 = vsub.f32 %v26612_v57, %v27010_v1  ;;  %v363_v37 = vmul.f32 %v27221_v15, %v27221_v15  ;;  %v26614_v46 = vld [vmem:[#allocation4 + $0x1b8] sm:$0xff] }
  0xc5   :  { %v27236_v14 = vsub.f32 %v26614_v46, %v27010_v1 }
  0xc6   :  { %v405_v5 = vadd.f32 %v404_v7, %v342_v21  ;;  %30556 = vst [vmem:[#allocation29_spill] sm:$0xff] %v27226_v39  ;;  %v428_v31 = vadd.f32 %v427_v41, %v360_v51  ;;  %v27231_v21 = vsub.f32 %v26613_v18, %v27010_v1  ;;  %v364_v57 = vmul.f32 %v27226_v39, %v27226_v39  ;;  %v26615_v51 = vld [vmem:[#allocation4 + $0x1c0] sm:$0xff] }
  0xc7   :  { %30557 = vst [vmem:[#allocation30_spill] sm:$0xff] %v27236_v14  ;;  %v366_v46 = vmul.f32 %v27236_v14, %v27236_v14 }
  0xc8   :  { %v406_v34 = vrot.slane %v405_v5, 4  ;;  %v429_v3 = vadd.f32 %v428_v31, %v361_v25  ;;  %v26616_v25 = vld [vmem:[#allocation4 + $0x1c8] sm:$0xff] }
  0xc9   :  { %v27246_v31 = vsub.f32 %v26616_v25, %v27010_v1 }
  0xca   :  { %v407_v30 = vadd.f32 %v406_v34, %v405_v5  ;;  %v430_v19 = vadd.f32 %v429_v3, %v362_v62  ;;  %v27241_v5 = vsub.f32 %v26615_v51, %v27010_v1  ;;  %v365_v34 = vmul.f32 %v27231_v21, %v27231_v21  ;;  %v26617_v62 = vld [vmem:[#allocation4 + $0x1d0] sm:$0xff] }
  0xcc   :  { %v408_v7 = vrot.slane %v407_v30, 2  ;;  %v431_v41 = vadd.f32 %v430_v19, %v363_v37  ;;  %v367_v3 = vmul.f32 %v27241_v5, %v27241_v5  ;;  %v27257_v19 = vsub.f32 %v26907_v53, %v27010_v1 }
  0xcd   :  { %v368_v37 = vmul.f32 %v27246_v31, %v27246_v31 }
  0xce   :  { %v409_v58 = vadd.f32 %v408_v7, %v407_v30  ;;  %v432_v15 = vadd.f32 %v431_v41, %v364_v57  ;;  %v27251_v30 = vsub.f32 %v26617_v62, %v27010_v1  ;;  %v370_v53 = vmul.f32 %v27257_v19, %v27257_v19 }
  0xd0   :  { %v410_v18 = vrot.slane %v409_v58, 1  ;;  %v433_v7 = vadd.f32 %v432_v15, %v365_v34  ;;  %v369_v57 = vmul.f32 %v27251_v30, %v27251_v30  ;;  %v27269_v15 = vsub.f32 %v26912_v9, %v27010_v1 }
  0xd1   :  { %v27275_v34 = vsub.f32 %v26918_v22, %v27010_v1  ;;  %v27283_v9 = vsub.f32 %v26920_v28, %v27010_v1 }
  0xd2   :  { %v411_v39 = vadd.f32 %v410_v18, %v409_v58  ;;  %v434_v25 = vadd.f32 %v433_v7, %v366_v46  ;;  %v27263_v58 = vsub.f32 %v26909_v59, %v27010_v1  ;;  %v372_v46 = vmul.f32 %v27269_v15, %v27269_v15 }
  0xd3   :  { %30558 = vst [vmem:[#allocation31_spill] sm:$0xff] %v27275_v34  ;;  %30559 = vst [vmem:[#allocation32_spill] sm:$0xff] %v27283_v9  ;;  %v373_v62 = vmul.f32 %v27275_v34, %v27275_v34  ;;  %v27291_v22 = vmul.f32 %v27283_v9, %v27283_v9 }
  0xd4   :  { %v449_v51 = vmul.f32 0.00390625, %v411_v39  ;;  %v435_v41 = vadd.f32 %v434_v25, %v367_v3  ;;  %v371_v59 = vmul.f32 %v27263_v58, %v27263_v58 }
  0xd6   :  { %v451_v14 = vadd.f32 1e-05, %v449_v51  ;;  %v436_v39 = vadd.f32 %v435_v41, %v368_v37 }
  0xd8   :  { %26589 = vrsqrt.f32 %v451_v14  ;;  %v437_v18 = vadd.f32 %v436_v39, %v369_v57 }
  0xda   :  { %v438_v14 = vadd.f32 %v437_v18, %v370_v53 }
  0xdc   :  { %v439_v3 = vadd.f32 %v438_v14, %v371_v59 }
  0xde   :  { %v440_v7 = vadd.f32 %v439_v3, %v372_v46 }
  0xe0   :  { %v27293_v37 = vadd.f32 %v440_v7, %v373_v62 }
  0xe2   :  { %v27287_v51 = vpop.eup %26589 }
  0xe3   :  { %v455_v25 = vmul.f32 %v27287_v51, %v26926_v36  ;;  %v456_v28 = vmul.f32 %v27287_v51, %v26930_v38  ;;  %v457_v1 = vmul.f32 %v27287_v51, %v26934_v42  ;;  %v458_v57 = vmul.f32 %v27287_v51, %v26938_v45 }
  0xe4   :  { %v459_v41 = vmul.f32 %v27287_v51, %v26946_v49  ;;  %v460_v53 = vmul.f32 %v27287_v51, %v26952_v6  ;;  %v461_v39 = vmul.f32 %v27287_v51, %v26958_v55  ;;  %v462_v36 = vmul.f32 %v27287_v51, %v26964_v63 }
  0xe5   :  { %v519_v59 = vmax.f32 %v455_v25, 0.0  ;;  %v520_v38 = vmax.f32 %v456_v28, 0.0  ;;  %v521_v18 = vmax.f32 %v457_v1, 0.0  ;;  %v522_v46 = vmax.f32 %v458_v57, 0.0 }
  0xe6   :  { %v523_v42 = vmax.f32 %v459_v41, 0.0  ;;  %v524_v14 = vmax.f32 %v460_v53, 0.0  ;;  %v525_v62 = vmax.f32 %v461_v39, 0.0  ;;  %v526_v45 = vmax.f32 %v462_v36, 0.0 }
  0xe7   :  { %v21460_v3 = vpack.c.bf16 %v519_v59, %v519_v59  ;;  %v21461_v7 = vpack.c.bf16 %v520_v38, %v520_v38  ;;  %v21591_v49 = vpack.c.bf16 %v522_v46, %v521_v18  ;;  %v463_v6 = vmul.f32 %v27287_v51, %v26970_v2 }
  0xe8   :  { %v21464_v9 = vpack.c.bf16 %v523_v42, %v523_v42  ;;  %v21465_v34 = vpack.c.bf16 %v524_v14, %v524_v14  ;;  %v21596_v55 = vpack.c.bf16 %v526_v45, %v525_v62  ;;  %v464_v63 = vmul.f32 %v27287_v51, %v26976_v17  ;;  %v25597_v62 = vld [vmem:[#allocation7 + $0x8] sm:$0xff]  }
  0xe9   :  { %839 = vst [vmem:[#allocation2 + $0xc] sm:$0xf] %v21460_v3  ;;  %840 = vst [vmem:[#allocation2 + $0x10] sm:$0xf] %v21461_v7  ;;  %v527_v25 = vmax.f32 %v463_v6, 0.0  ;;  %v465_v28 = vmul.f32 %v27287_v51, %v26982_v33  ;;  %v466_v1 = vmul.f32 %v27287_v51, %v26988_v4  ;;  %v467_v57 = vmul.f32 %v27287_v51, %v26994_v8 }
  0xea   :  { %21748 = vst [vmem:[#allocation2 + $0x18] sm:$0xff] %v21591_v49   ;;  %843 = vst [vmem:[#allocation2 + $0x24] sm:$0xf] %v21464_v9  ;;  %v528_v2 = vmax.f32 %v464_v63, 0.0  ;;  %v468_v17 = vmul.f32 %v27287_v51, %v27000_v11  ;;  %v469_v41 = vmul.f32 %v27287_v51, %v27006_v61  ;;  %v470_v53 = vmul.f32 %v27287_v51, %v27014_v16 }
  0xeb   :  { %844 = vst [vmem:[#allocation2 + $0x28] sm:$0xf] %v21465_v34  ;;  %21749 = vst [vmem:[#allocation2 + $0x30] sm:$0xff] %v21596_v55   ;;  %v21468_v33 = vpack.c.bf16 %v527_v25, %v527_v25  ;;  %v529_v39 = vmax.f32 %v465_v28, 0.0  ;;  %v530_v36 = vmax.f32 %v466_v1, 0.0  ;;  %v531_v4 = vmax.f32 %v467_v57, 0.0 }
  0xec   :  { %v21469_v59 = vpack.c.bf16 %v528_v2, %v528_v2  ;;  %v532_v38 = vmax.f32 %v468_v17, 0.0  ;;  %v533_v8 = vmax.f32 %v469_v41, 0.0  ;;  %v534_v9 = vmax.f32 %v470_v53, 0.0  ;;  %v26618_v41 = vld [vmem:[#allocation7] sm:$0xff]  }
  0xed   :  { %847 = vst [vmem:[#allocation2 + $0x3c] sm:$0xf] %v21468_v33  ;;  %v21601_v34 = vpack.c.bf16 %v530_v36, %v529_v39  ;;  %v21472_v18 = vpack.c.bf16 %v531_v4, %v531_v4  ;;  %v471_v11 = vmul.f32 %v27287_v51, %v27020_v12  ;;  %v472_v61 = vmul.f32 %v27287_v51, %v27034_v20  ;;  %v25604_v33 = vld [vmem:[#allocation7 + $0x10] sm:$0xff]  }
  0xee   :  { %848 = vst [vmem:[#allocation2 + $0x40] sm:$0xf] %v21469_v59  ;;  %v21473_v46 = vpack.c.bf16 %v532_v38, %v532_v38  ;;  %v21606_v16 = vpack.c.bf16 %v534_v9, %v533_v8  ;;  %v473_v42 = vmul.f32 %v27287_v51, %v27044_v23  ;;  %v474_v14 = vmul.f32 %v27287_v51, %v27058_v26 }
  0xef   :  { %21750 = vst [vmem:[#allocation2 + $0x48] sm:$0xff] %v21601_v34   ;;  %851 = vst [vmem:[#allocation2 + $0x54] sm:$0xf] %v21472_v18  ;;  %v535_v45 = vmax.f32 %v471_v11, 0.0  ;;  %v536_v3 = vmax.f32 %v472_v61, 0.0  ;;  %v475_v12 = vmul.f32 %v27287_v51, %v27070_v35  ;;  %v476_v20 = vmul.f32 %v27287_v51, %v27082_v40 }
  0xf0   :  { %v25589_v7 = vld [vmem:[#allocation2 + $0xc] sm:$0xff]   ;;  %852 = vst [vmem:[#allocation2 + $0x58] sm:$0xf] %v21473_v46  ;;  %21751 = vst [vmem:[#allocation2 + $0x60] sm:$0xff] %v21606_v16   ;;  %v537_v49 = vmax.f32 %v473_v42, 0.0  ;;  %v477_v23 = vmul.f32 %v27287_v51, %v27093_v43  ;;  %v478_v26 = vmul.f32 %v27287_v51, %v27104_v50  ;;  %v479_v6 = vmul.f32 %v27287_v51, %v27115_v44 }
  0xf1   :  { %v25591_v55 = vld [vmem:[#allocation2 + $0x14] sm:$0xff]   ;;  %v21476_v63 = vpack.c.bf16 %v535_v45, %v535_v45  ;;  %v21477_v25 = vpack.c.bf16 %v536_v3, %v536_v3  ;;  %v538_v35 = vmax.f32 %v474_v14, 0.0  ;;  %v480_v40 = vmul.f32 %v27287_v51, %v27126_v0  ;;  %22804 = vmatprep.mubr.bf16.mxu0 %v25589_v7  ;;  %v25592_v28 = vld [vmem:[#allocation2 + $0x1c] sm:$0xff]   ;;  %v25611_v46 = vld [vmem:[#allocation7 + $0x18] sm:$0xff]  }
  0xf2   :  { %v539_v1 = vmax.f32 %v475_v12, 0.0  ;;  %v481_v57 = vmul.f32 %v27287_v51, %v27137_v52  ;;  %v482_v43 = vmul.f32 %v27287_v51, %v27148_v60  ;;  %v483_v50 = vmul.f32 %v27287_v51, %v27159_v10  ;;  %22805 = vmatmul.mubr.bf16.vlgmr.msra.gmra.mrb[0].mxu0 %v25591_v55  ;;  %v25593_v9 = vld [vmem:[#allocation2 + $0x24] sm:$0xff]   ;;  %v25594_v11 = vld [vmem:[#allocation2 + $0x2c] sm:$0xff]   ;;  %v25595_v12 = vld [vmem:[#allocation2 + $0x34] sm:$0xff]  }
  0xf3   :  { %855 = vst [vmem:[#allocation2 + $0x6c] sm:$0xf] %v21476_v63  ;;  %856 = vst [vmem:[#allocation2 + $0x70] sm:$0xf] %v21477_v25  ;;  %v21611_v44 = vpack.c.bf16 %v538_v35, %v537_v49  ;;  %v540_v2 = vmax.f32 %v476_v20, 0.0  ;;  %v541_v17 = vmax.f32 %v477_v23, 0.0  ;;  %v484_v0 = vmul.f32 %v27287_v51, %v27170_v24  ;;  %22901 = vmatpush3.bf16.msra.mxu0 %v26618_v41 }
  0xf4   :  { %22808 = vmatprep.mubr.bf16.mxu0 %v25592_v28  ;;  %v21480_v53 = vpack.c.bf16 %v539_v1, %v539_v1  ;;  %v542_v52 = vmax.f32 %v478_v26, 0.0  ;;  %v485_v60 = vmul.f32 %v27287_v51, %v27181_v29  ;;  %v486_v10 = vmul.f32 %v27287_v51, %v27192_v13  ;;  %22902 = vmatprep.subr.bf16.mxu0 %v25597_v62  ;;  %v25618_v3 = vld [vmem:[#allocation7 + $0x20] sm:$0xff]   ;;  %v25625_v23 = vld [vmem:[#allocation7 + $0x28] sm:$0xff]   ;;  %v25632_v63 = vld [vmem:[#allocation7 + $0x30] sm:$0xff]  }
  0xf5   :  { %21752 = vst [vmem:[#allocation2 + $0x78] sm:$0xff] %v21611_v44   ;;  %v21481_v39 = vpack.c.bf16 %v540_v2, %v540_v2  ;;  %v543_v36 = vmax.f32 %v479_v6, 0.0  ;;  %v544_v4 = vmax.f32 %v480_v40, 0.0  ;;  %v545_v59 = vmax.f32 %v481_v57, 0.0  ;;  %v25596_v7 = vld [vmem:[#allocation2 + $0x3c] sm:$0xff]   ;;  %v25639_v2 = vld [vmem:[#allocation7 + $0x38] sm:$0xff]  }
  0xf6   :  { %859 = vst [vmem:[#allocation2 + $0x84] sm:$0xf] %v21480_v53  ;;  %v21616_v24 = vpack.c.bf16 %v542_v52, %v541_v17  ;;  %v546_v38 = vmax.f32 %v482_v43, 0.0  ;;  %v442_v8 = vadd.f32 %v27293_v37, %v27291_v22  ;;  %v547_v18 = vmax.f32 %v483_v50, 0.0  ;;  %v25598_v6 = vld [vmem:[#allocation2 + $0x44] sm:$0xff]   ;;  %v25599_v25 = vld [vmem:[#allocation2 + $0x4c] sm:$0xff]  }
  0xf7   :  { %860 = vst [vmem:[#allocation2 + $0x88] sm:$0xf] %v21481_v39  ;;  %v21484_v34 = vpack.c.bf16 %v543_v36, %v543_v36  ;;  %v21485_v29 = vpack.c.bf16 %v544_v4, %v544_v4  ;;  %22903 = vmatpush3.bf16.msra.mxu0 %v25597_v62  ;;  %v548_v51 = vmax.f32 %v484_v0, 0.0  ;;  %v549_v61 = vmax.f32 %v485_v60, 0.0  ;;  %v25600_v40 = vld [vmem:[#allocation2 + $0x54] sm:$0xff]   ;;  %v25601_v28 = vld [vmem:[#allocation2 + $0x5c] sm:$0xff]  }
  0xf8   :  { %21753 = vst [vmem:[#allocation2 + $0x90] sm:$0xff] %v21616_v24   ;;  %v21621_v13 = vpack.c.bf16 %v546_v38, %v545_v59  ;;  %22904 = vmatprep.subr.bf16.mxu0 %v25604_v33  ;;  %v21488_v16 = vpack.c.bf16 %v547_v18, %v547_v18  ;;  %v550_v42 = vmax.f32 %v486_v10, 0.0  ;;  %v443_v14 = vrot.slane %v442_v8, 4  ;;  %v25602_v17 = vld [vmem:[#allocation2 + $0x64] sm:$0xff]   ;;  %v30560_v41 = vld [vmem:[#allocation14_spill] sm:$0xff]  ;;  %v30561_v52 = vld [vmem:[#allocation15_spill] sm:$0xff] }
  0xf9   :  { %863 = vst [vmem:[#allocation2 + $0x9c] sm:$0xf] %v21484_v34  ;;  %864 = vst [vmem:[#allocation2 + $0xa0] sm:$0xf] %v21485_v29  ;;  %v21489_v22 = vpack.c.bf16 %v548_v51, %v548_v51  ;;  %v30562_v60 = vld [vmem:[#allocation16_spill] sm:$0xff] }
  0xfa   :  { %21754 = vst [vmem:[#allocation2 + $0xa8] sm:$0xff] %v21621_v13   ;;  %22809 = vmatmul.mubr.bf16.gmra.mrb[4].mxu0 %v25593_v9  ;;  %867 = vst [vmem:[#allocation2 + $0xb4] sm:$0xf] %v21488_v16  ;;  %v21626_v37 = vpack.c.bf16 %v550_v42, %v549_v61  ;;  %v444_v45 = vadd.f32 %v443_v14, %v442_v8  ;;  %v25603_v10 = vld [vmem:[#allocation2 + $0x6c] sm:$0xff]   ;;  %v30566_v42 = vld [vmem:[#allocation20_spill] sm:$0xff] }
  0xfb   :  { %22812 = vmatprep.mubr.bf16.mxu0 %v25594_v11  ;;  %22905 = vmatpush3.bf16.msra.mxu0 %v25604_v33  ;;  %868 = vst [vmem:[#allocation2 + $0xb8] sm:$0xf] %v21489_v22  ;;  %v30563_v9 = vld [vmem:[#allocation17_spill] sm:$0xff]  ;;  %v30564_v13 = vld [vmem:[#allocation18_spill] sm:$0xff] }
  0xfc   :  { %22906 = vmatprep.subr.bf16.mxu0 %v25611_v46  ;;  %21755 = vst [vmem:[#allocation2 + $0xc0] sm:$0xff] %v21626_v37   ;;  %v445_v62 = vrot.slane %v444_v45, 2  ;;  %v30567_v22 = vld [vmem:[#allocation21_spill] sm:$0xff] }
  0xfe   :  { %v446_v20 = vadd.f32 %v445_v62, %v444_v45  ;;  %v30568_v62 = vld [vmem:[#allocation22_spill] sm:$0xff] }
  0xff   :  { %22907 = vmatpush3.bf16.msra.mxu0 %v25611_v46  ;;  %v30565_v46 = vld [vmem:[#allocation19_spill] sm:$0xff] }
 0x100   :  { %v447_v49 = vrot.slane %v446_v20, 1  ;;  %22908 = vmatprep.subr.bf16.mxu0 %v25618_v3 }
 0x102   :  { %22813 = vmatmul.mubr.bf16.gmra.mrb[8].mxu0 %v25595_v12  ;;  %v448_v26 = vadd.f32 %v447_v49, %v446_v20  ;;  %v30569_v12 = vld [vmem:[#allocation23_spill] sm:$0xff] }
 0x103   :  { %22816 = vmatprep.mubr.bf16.mxu0 %v25596_v7  ;;  %22909 = vmatpush3.bf16.msra.mxu0 %v25618_v3  ;;  %v30570_v7 = vld [vmem:[#allocation24_spill] sm:$0xff] }
 0x104   :  { %v450_v55 = vmul.f32 0.00390625, %v448_v26  ;;  %22910 = vmatprep.subr.bf16.mxu0 %v25625_v23 }
 0x106   :  { %v452_v35 = vadd.f32 1e-05, %v450_v55 }
 0x107   :  { %22911 = vmatpush3.bf16.msra.mxu0 %v25625_v23 }
 0x108   :  { %26591 = vrsqrt.f32 %v452_v35  ;;  %22912 = vmatprep.subr.bf16.mxu0 %v25632_v63 }
 0x10a   :  { %22817 = vmatmul.mubr.bf16.gmra.mrb[12].mxu0 %v25598_v6 }
 0x10b   :  { %22820 = vmatprep.mubr.bf16.mxu0 %v25599_v25  ;;  %22913 = vmatpush3.bf16.msra.mxu0 %v25632_v63  ;;  %v25605_v63 = vld [vmem:[#allocation2 + $0x74] sm:$0xff]  }
 0x10c   :  { %22914 = vmatprep.subr.bf16.mxu0 %v25639_v2 }
 0x10f   :  { %22915 = vmatpush3.bf16.msra.mxu0 %v25639_v2 }
 0x112   :  { %v27361_v1 = vpop.eup %26591  ;;  %22821 = vmatmul.mubr.bf16.gmra.mrb[16].mxu0 %v25600_v40 }
 0x113   :  { %22824 = vmatprep.mubr.bf16.mxu0 %v25601_v28  ;;  %v487_v57 = vmul.f32 %v27361_v1, %v27026_v32  ;;  %v488_v43 = vmul.f32 %v27361_v1, %v27030_v48  ;;  %v489_v50 = vmul.f32 %v27361_v1, %v27040_v47  ;;  %v490_v44 = vmul.f32 %v27361_v1, %v27050_v56 }
 0x114   :  { %v491_v0 = vmul.f32 %v27361_v1, %v27064_v54  ;;  %v492_v53 = vmul.f32 %v27361_v1, %v30560_v41  ;;  %v493_v32 = vmul.f32 %v27361_v1, %v30561_v52  ;;  %v494_v48 = vmul.f32 %v27361_v1, %v30562_v60 }
 0x115   :  { %v551_v33 = vmax.f32 %v487_v57, 0.0  ;;  %v552_v47 = vmax.f32 %v488_v43, 0.0  ;;  %v553_v39 = vmax.f32 %v489_v50, 0.0  ;;  %v554_v36 = vmax.f32 %v490_v44, 0.0  ;;  %v25606_v57 = vld [vmem:[#allocation2 + $0x7c] sm:$0xff]   ;;  %v30571_v44 = vld [vmem:[#allocation25_spill] sm:$0xff] }
 0x116   :  { %v555_v56 = vmax.f32 %v491_v0, 0.0  ;;  %v556_v4 = vmax.f32 %v492_v53, 0.0  ;;  %v557_v59 = vmax.f32 %v493_v32, 0.0  ;;  %v558_v24 = vmax.f32 %v494_v48, 0.0  ;;  %v30572_v53 = vld [vmem:[#allocation26_spill] sm:$0xff]  ;;  %v30573_v32 = vld [vmem:[#allocation27_spill] sm:$0xff] }
 0x117   :  { %v21492_v54 = vpack.c.bf16 %v551_v33, %v551_v33  ;;  %v21493_v38 = vpack.c.bf16 %v552_v47, %v552_v47  ;;  %v21631_v8 = vpack.c.bf16 %v554_v36, %v553_v39  ;;  %v495_v34 = vmul.f32 %v27361_v1, %v30563_v9  ;;  %v30574_v33 = vld [vmem:[#allocation28_spill] sm:$0xff]  ;;  %v30575_v39 = vld [vmem:[#allocation29_spill] sm:$0xff] }
 0x118   :  { %v21496_v29 = vpack.c.bf16 %v555_v56, %v555_v56  ;;  %v21497_v18 = vpack.c.bf16 %v556_v4, %v556_v4  ;;  %v21636_v11 = vpack.c.bf16 %v558_v24, %v557_v59  ;;  %v496_v51 = vmul.f32 %v27361_v1, %v30564_v13  ;;  %v30576_v4 = vld [vmem:[#allocation30_spill] sm:$0xff] }
 0x119   :  { %871 = vst [vmem:[#allocation2 + $0xe4] sm:$0xf] %v21492_v54  ;;  %872 = vst [vmem:[#allocation2 + $0xe8] sm:$0xf] %v21493_v38  ;;  %v559_v61 = vmax.f32 %v495_v34, 0.0  ;;  %v497_v16 = vmul.f32 %v27361_v1, %v30565_v46  ;;  %v498_v14 = vmul.f32 %v27361_v1, %v30566_v42  ;;  %v499_v37 = vmul.f32 %v27361_v1, %v30567_v22  ;;  %v30577_v46 = vld [vmem:[#allocation31_spill] sm:$0xff] }
 0x11a   :  { %21756 = vst [vmem:[#allocation2 + $0xf0] sm:$0xff] %v21631_v8   ;;  %22825 = vmatmul.mubr.bf16.gmra.mrb[20].mxu0 %v25602_v17  ;;  %875 = vst [vmem:[#allocation2 + $0xfc] sm:$0xf] %v21496_v29  ;;  %v560_v45 = vmax.f32 %v496_v51, 0.0  ;;  %v500_v3 = vmul.f32 %v27361_v1, %v30568_v62  ;;  %v501_v20 = vmul.f32 %v27361_v1, %v30569_v12 }
 0x11b   :  { %876 = vst [vmem:[#allocation2 + $0x100] sm:$0xf] %v21497_v18  ;;  %21757 = vst [vmem:[#allocation2 + $0x108] sm:$0xff] %v21636_v11   ;;  %v502_v49 = vmul.f32 %v27361_v1, %v30570_v7  ;;  %22828 = vmatprep.mubr.bf16.mxu0 %v25603_v10  ;;  %v21500_v23 = vpack.c.bf16 %v559_v61, %v559_v61  ;;  %v561_v26 = vmax.f32 %v497_v16, 0.0  ;;  %v562_v6 = vmax.f32 %v498_v14, 0.0  ;;  %v30578_v16 = vld [vmem:[#allocation32_spill] sm:$0xff] }
 0x11c   :  { %v563_v55 = vmax.f32 %v499_v37, 0.0  ;;  %v21501_v25 = vpack.c.bf16 %v560_v45, %v560_v45  ;;  %v564_v35 = vmax.f32 %v500_v3, 0.0  ;;  %v565_v40 = vmax.f32 %v501_v20, 0.0  ;;  %v25607_v37 = vld [vmem:[#allocation2 + $0x84] sm:$0xff]   ;;  %v25608_v3 = vld [vmem:[#allocation2 + $0x8c] sm:$0xff]  }
 0x11d   :  { %v566_v28 = vmax.f32 %v502_v49, 0.0  ;;  %879 = vst [vmem:[#allocation2 + $0x114] sm:$0xf] %v21500_v23  ;;  %v21641_v43 = vpack.c.bf16 %v562_v6, %v561_v26  ;;  %v503_v2 = vmul.f32 %v27361_v1, %v30571_v44  ;;  %v504_v17 = vmul.f32 %v27361_v1, %v27204_v27 }
 0x11e   :  { %v21504_v50 = vpack.c.bf16 %v563_v55, %v563_v55  ;;  %880 = vst [vmem:[#allocation2 + $0x118] sm:$0xf] %v21501_v25  ;;  %v21505_v0 = vpack.c.bf16 %v564_v35, %v564_v35  ;;  %v505_v52 = vmul.f32 %v27361_v1, %v30572_v53  ;;  %v506_v60 = vmul.f32 %v27361_v1, %v30573_v32  ;;  %v25609_v25 = vld [vmem:[#allocation2 + $0x94] sm:$0xff]   ;;  %v25610_v35 = vld [vmem:[#allocation2 + $0x9c] sm:$0xff]  }
 0x11f   :  { %v21646_v41 = vpack.c.bf16 %v566_v28, %v565_v40  ;;  %21758 = vst [vmem:[#allocation2 + $0x120] sm:$0xff] %v21641_v43   ;;  %v567_v48 = vmax.f32 %v503_v2, 0.0  ;;  %v568_v10 = vmax.f32 %v504_v17, 0.0  ;;  %v507_v47 = vmul.f32 %v27361_v1, %v30574_v33  ;;  %v25612_v40 = vld [vmem:[#allocation2 + $0xa4] sm:$0xff]   ;;  %v25613_v28 = vld [vmem:[#allocation2 + $0xac] sm:$0xff]   ;;  %v25615_v43 = vld [vmem:[#allocation2 + $0xbc] sm:$0xff]  }
 0x120   :  { %883 = vst [vmem:[#allocation2 + $0x12c] sm:$0xf] %v21504_v50  ;;  %v508_v36 = vmul.f32 %v27361_v1, %v30575_v39  ;;  %884 = vst [vmem:[#allocation2 + $0x130] sm:$0xf] %v21505_v0  ;;  %v569_v27 = vmax.f32 %v505_v52, 0.0  ;;  %v509_v56 = vmul.f32 %v27361_v1, %v27231_v21  ;;  %v510_v59 = vmul.f32 %v27361_v1, %v30576_v4  ;;  %v25616_v50 = vld [vmem:[#allocation2 + $0xc4] sm:$0xff]  }
 0x121   :  { %21759 = vst [vmem:[#allocation2 + $0x138] sm:$0xff] %v21646_v41   ;;  %v511_v24 = vmul.f32 %v27361_v1, %v27241_v5  ;;  %v21508_v54 = vpack.c.bf16 %v567_v48, %v567_v48  ;;  %v21509_v38 = vpack.c.bf16 %v568_v10, %v568_v10  ;;  %v570_v8 = vmax.f32 %v506_v60, 0.0  ;;  %v25617_v44 = vld [vmem:[#allocation2 + $0xe4] sm:$0xff]   ;;  %v25619_v2 = vld [vmem:[#allocation2 + $0xec] sm:$0xff]   ;;  %v25620_v17 = vld [vmem:[#allocation2 + $0xf4] sm:$0xff]  }
 0x122   :  { %v512_v9 = vmul.f32 %v27361_v1, %v27246_v31  ;;  %22829 = vmatmul.mubr.bf16.gmra.mrb[24].mxu0 %v25605_v63  ;;  %v571_v34 = vmax.f32 %v507_v47, 0.0  ;;  %v513_v29 = vmul.f32 %v27361_v1, %v27251_v30  ;;  %v514_v21 = vmul.f32 %v27361_v1, %v27257_v19  ;;  %v27427_v63 = vld [vmem:[#allocation7 + $0x180] sm:$0xff]   ;;  %v25621_v0 = vld [vmem:[#allocation2 + $0xfc] sm:$0xff]   ;;  %v25622_v41 = vld [vmem:[#allocation2 + $0x104] sm:$0xff]  }
 0x123   :  { %v515_v18 = vmul.f32 %v27361_v1, %v27263_v58  ;;  %22832 = vmatprep.mubr.bf16.mxu0 %v25606_v57  ;;  %887 = vst [vmem:[#allocation2 + $0x144] sm:$0xf] %v21508_v54  ;;  %888 = vst [vmem:[#allocation2 + $0x148] sm:$0xf] %v21509_v38  ;;  %v21651_v5 = vpack.c.bf16 %v570_v8, %v569_v27  ;;  %v572_v11 = vmax.f32 %v508_v36, 0.0  ;;  %v573_v13 = vmax.f32 %v509_v56, 0.0 }
 0x124   :  { %v516_v31 = vmul.f32 %v27361_v1, %v27269_v15  ;;  %v21512_v51 = vpack.c.bf16 %v571_v34, %v571_v34  ;;  %v574_v61 = vmax.f32 %v510_v59, 0.0  ;;  %v517_v30 = vmul.f32 %v27361_v1, %v30577_v46  ;;  %23012 = vmatprep.subr.bf16.mxu0 %v27427_v63  ;;  %v25614_v57 = vld [vmem:[#allocation2 + $0xb4] sm:$0xff]   ;;  %v25623_v53 = vld [vmem:[#allocation2 + $0x10c] sm:$0xff]   ;;  %v25645_v34 = vld [vmem:[#allocation2] sm:$0xff]  }
 0x125   :  { %v518_v19 = vmul.f32 %v27361_v1, %v30578_v16  ;;  %21760 = vst [vmem:[#allocation2 + $0x150] sm:$0xff] %v21651_v5   ;;  %v21513_v42 = vpack.c.bf16 %v572_v11, %v572_v11  ;;  %v575_v58 = vmax.f32 %v511_v24, 0.0  ;;  %v576_v14 = vmax.f32 %v512_v9, 0.0  ;;  %v25624_v52 = vld [vmem:[#allocation2 + $0x114] sm:$0xff]   ;;  %v25660_v5 = vld [vmem:[#allocation7 + $0x190] sm:$0xff]  }
 0x126   :  { %v577_v22 = vmax.f32 %v513_v29, 0.0  ;;  %891 = vst [vmem:[#allocation2 + $0x15c] sm:$0xf] %v21512_v51  ;;  %v21656_v45 = vpack.c.bf16 %v574_v61, %v573_v13  ;;  %v578_v62 = vmax.f32 %v514_v21, 0.0  ;;  %v579_v20 = vmax.f32 %v515_v18, 0.0  ;;  %v25626_v32 = vld [vmem:[#allocation2 + $0x11c] sm:$0xff]  }
 0x127   :  { %892 = vst [vmem:[#allocation2 + $0x160] sm:$0xf] %v21513_v42  ;;  %v21516_v15 = vpack.c.bf16 %v575_v58, %v575_v58  ;;  %v21517_v12 = vpack.c.bf16 %v576_v14, %v576_v14  ;;  %v580_v49 = vmax.f32 %v516_v31, 0.0  ;;  %v581_v23 = vmax.f32 %v517_v30, 0.0  ;;  %v25627_v60 = vld [vmem:[#allocation2 + $0x124] sm:$0xff]   ;;  %v25628_v48 = vld [vmem:[#allocation2 + $0x12c] sm:$0xff]  }
 0x128   :  { %21761 = vst [vmem:[#allocation2 + $0x168] sm:$0xff] %v21656_v45   ;;  %v21661_v7 = vpack.c.bf16 %v578_v62, %v577_v22  ;;  %v21520_v1 = vpack.c.bf16 %v579_v20, %v579_v20  ;;  %v582_v26 = vmax.f32 %v518_v19, 0.0  ;;  %v25629_v10 = vld [vmem:[#allocation2 + $0x134] sm:$0xff]   ;;  %v25630_v33 = vld [vmem:[#allocation2 + $0x13c] sm:$0xff]   ;;  %v25647_v29 = vld [vmem:[#allocation2 + $0x8] sm:$0xff]  }
 0x129   :  { %895 = vst [vmem:[#allocation2 + $0x174] sm:$0xf] %v21516_v15  ;;  %896 = vst [vmem:[#allocation2 + $0x178] sm:$0xf] %v21517_v12  ;;  %v21521_v6 = vpack.c.bf16 %v580_v49, %v580_v49  ;;  %v25648_v21 = vld [vmem:[#allocation2 + $0x10] sm:$0xff]   ;;  %v25653_v18 = vld [vmem:[#allocation7 + $0x188] sm:$0xff]  }
 0x12a   :  { %22833 = vmatmul.mubr.bf16.gmra.mrb[28].mxu0 %v25607_v37  ;;  %21762 = vst [vmem:[#allocation2 + $0x180] sm:$0xff] %v21661_v7   ;;  %899 = vst [vmem:[#allocation2 + $0x18c] sm:$0xf] %v21520_v1  ;;  %v21666_v55 = vpack.c.bf16 %v582_v26, %v581_v23  ;;  %v25631_v47 = vld [vmem:[#allocation2 + $0x144] sm:$0xff]   ;;  %v25649_v11 = vld [vmem:[#allocation2 + $0x18] sm:$0xff]  }
 0x12b   :  { %22836 = vmatprep.mubr.bf16.mxu0 %v25608_v3  ;;  %900 = vst [vmem:[#allocation2 + $0x190] sm:$0xf] %v21521_v6  ;;  %v25650_v13 = vld [vmem:[#allocation2 + $0x20] sm:$0xff]   ;;  %v25667_v31 = vld [vmem:[#allocation7 + $0x198] sm:$0xff]   ;;  %v25674_v51 = vld [vmem:[#allocation7 + $0x1a0] sm:$0xff]  }
 0x12c   :  { %21763 = vst [vmem:[#allocation2 + $0x198] sm:$0xff] %v21666_v55   ;;  %v25633_v39 = vld [vmem:[#allocation2 + $0x14c] sm:$0xff]   ;;  %v25634_v36 = vld [vmem:[#allocation2 + $0x154] sm:$0xff]   ;;  %v25688_v16 = vld [vmem:[#allocation7 + $0x1b0] sm:$0xff]  }
 0x12d   :  { %v25651_v61 = vld [vmem:[#allocation2 + $0x28] sm:$0xff]   ;;  %v25652_v46 = vld [vmem:[#allocation2 + $0x30] sm:$0xff]   ;;  %v25681_v30 = vld [vmem:[#allocation7 + $0x1a8] sm:$0xff]  }
 0x12e   :  { %v25635_v27 = vld [vmem:[#allocation2 + $0x15c] sm:$0xff]   ;;  %v25656_v58 = vld [vmem:[#allocation2 + $0x48] sm:$0xff]   ;;  %v25657_v14 = vld [vmem:[#allocation2 + $0x50] sm:$0xff]  }
 0x12f   :  { %v25636_v56 = vld [vmem:[#allocation2 + $0x164] sm:$0xff]   ;;  %v25637_v4 = vld [vmem:[#allocation2 + $0x16c] sm:$0xff]   ;;  %v25654_v19 = vld [vmem:[#allocation2 + $0x38] sm:$0xff]  }
 0x130   :  { %v25638_v59 = vld [vmem:[#allocation2 + $0x174] sm:$0xff]   ;;  %v25655_v42 = vld [vmem:[#allocation2 + $0x40] sm:$0xff]   ;;  %v25697_v45 = vld [vmem:[#allocation7 + $0x1b8] sm:$0xff]  }
 0x131   :  { %v25640_v24 = vld [vmem:[#allocation2 + $0x17c] sm:$0xff]   ;;  %v25641_v54 = vld [vmem:[#allocation2 + $0x184] sm:$0xff]   ;;  %v25694_v22 = vld [vmem:[#allocation7 + $0x40] sm:$0xff]  }
 0x132   :  { %22837 = vmatmul.mubr.bf16.gmra.mrb[32].mxu0 %v25609_v25  ;;  %v25642_v38 = vld [vmem:[#allocation2 + $0x18c] sm:$0xff]   ;;  %v25695_v37 = vld [vmem:[#allocation7 + $0x48] sm:$0xff]   ;;  %23236 = vmatprep.subr.bf16.mxu1 %v25694_v22  ;;  %v25659_v3 = vld [vmem:[#allocation2 + $0x60] sm:$0xff]  }
 0x133   :  { %22840 = vmatprep.mubr.bf16.mxu0 %v25610_v35  ;;  %v25643_v8 = vld [vmem:[#allocation2 + $0x194] sm:$0xff]   ;;  %v25644_v9 = vld [vmem:[#allocation2 + $0x19c] sm:$0xff]   ;;  %23237 = vmatpush3.bf16.msra.mxu1 %v25694_v22  ;;  %v25700_v12 = vld [vmem:[#allocation7 + $0x58] sm:$0xff]  }
 0x134   :  { %v25658_v62 = vld [vmem:[#allocation2 + $0x58] sm:$0xff]   ;;  %23238 = vmatprep.subr.bf16.mxu1 %v25695_v37  ;;  %v25699_v15 = vld [vmem:[#allocation7 + $0x50] sm:$0xff]   ;;  %v25661_v20 = vld [vmem:[#allocation2 + $0x68] sm:$0xff]  }
 0x135   :  { %v25662_v7 = vld [vmem:[#allocation2 + $0x70] sm:$0xff]   ;;  %v25704_v23 = vld [vmem:[#allocation7 + $0x68] sm:$0xff]   ;;  %v25664_v26 = vld [vmem:[#allocation2 + $0x80] sm:$0xff]  }
 0x136   :  { %v25703_v49 = vld [vmem:[#allocation7 + $0x60] sm:$0xff]   ;;  %v25663_v1 = vld [vmem:[#allocation2 + $0x78] sm:$0xff]   ;;  %v25707_v6 = vld [vmem:[#allocation7 + $0x70] sm:$0xff]  }
 0x137   :  { %23239 = vmatpush3.bf16.msra.mxu1 %v25695_v37  ;;  %v25708_v55 = vld [vmem:[#allocation7 + $0x78] sm:$0xff]   ;;  %v25666_v35 = vld [vmem:[#allocation2 + $0x90] sm:$0xff]   ;;  %v25693_v22 = vld [vmem:[#allocation2 + $0x160] sm:$0xff]  }
 0x138   :  { %23240 = vmatprep.subr.bf16.mxu1 %v25699_v15  ;;  %v25665_v25 = vld [vmem:[#allocation2 + $0x88] sm:$0xff]  }
 0x139   :  { %v25696_v37 = vld [vmem:[#allocation2 + $0x168] sm:$0xff]  }
 0x13a   :  { %22841 = vmatmul.mubr.bf16.gmra.mrb[36].mxu0 %v25612_v40  ;;  %v25712_v40 = vld [vmem:[#allocation2] sm:$0xff]  }
 0x13b   :  { %22844 = vmatprep.mubr.bf16.mxu0 %v25613_v28  ;;  %23241 = vmatpush3.bf16.msra.mxu1 %v25699_v15  ;;  %v25713_v28 = vld [vmem:[#allocation2 + $0x8] sm:$0xff]   ;;  %v25701_v15 = vld [vmem:[#allocation2 + $0x178] sm:$0xff]  }
 0x13c   :  { %23242 = vmatprep.subr.bf16.mxu1 %v25700_v12  ;;  %23252 = vmatprep.mubr.bf16.mxu1 %v25712_v40  ;;  %v25714_v40 = vld [vmem:[#allocation2 + $0x28] sm:$0xff]  }
 0x13f   :  { %23243 = vmatpush3.bf16.msra.mxu1 %v25700_v12  ;;  %v25768_v12 = vld [vmem:[#allocation2 + $0xe8] sm:$0xff]  }
 0x140   :  { %23244 = vmatprep.subr.bf16.mxu1 %v25703_v49 }
 0x142   :  { %22845 = vmatmul.mubr.bf16.gmra.mrb[40].mxu0 %v25614_v57  ;;  %v25668_v57 = vld [vmem:[#allocation2 + $0x98] sm:$0xff]  }
 0x143   :  { %22848 = vmatprep.mubr.bf16.mxu0 %v25615_v43  ;;  %23245 = vmatpush3.bf16.msra.mxu1 %v25703_v49  ;;  %v25669_v43 = vld [vmem:[#allocation2 + $0xa0] sm:$0xff]   ;;  %v25705_v49 = vld [vmem:[#allocation2 + $0x188] sm:$0xff]  }
 0x144   :  { %23246 = vmatprep.subr.bf16.mxu1 %v25704_v23 }
 0x147   :  { %23247 = vmatpush3.bf16.msra.mxu1 %v25704_v23  ;;  %v25772_v23 = vld [vmem:[#allocation2 + $0xf8] sm:$0xff]  }
 0x148   :  { %23248 = vmatprep.subr.bf16.mxu1 %v25707_v6 }
 0x14a   :  { %22849 = vmatmul.mubr.bf16.gmra.mrb[44].mxu0 %v25616_v50  ;;  %v25716_v50 = vld [vmem:[#allocation2 + $0x10] sm:$0xff]  }
 0x14b   :  { %22852 = vmatprep.mubr.bf16.mxu0 %v25617_v44  ;;  %23249 = vmatpush3.bf16.msra.mxu1 %v25707_v6  ;;  %v25717_v44 = vld [vmem:[#allocation2 + $0x18] sm:$0xff]  }
 0x14c   :  { %23250 = vmatprep.subr.bf16.mxu1 %v25708_v55  ;;  %v25709_v6 = vld [vmem:[#allocation2 + $0x18] sm:$0xff]  }
 0x14f   :  { %23251 = vmatpush3.bf16.msra.mxu1 %v25708_v55  ;;  %v25777_v55 = vld [vmem:[#allocation2 + $0x108] sm:$0xff]  }
 0x152   :  { %22853 = vmatmul.mubr.bf16.gmra.mrb[48].mxu0 %v25619_v2  ;;  %23253 = vmatmul.mubr.bf16.vlgmr.msra.gmra.mrb[0].mxu1 %v25713_v28  ;;  %v25670_v2 = vld [vmem:[#allocation2 + $0xa8] sm:$0xff]   ;;  %v25723_v28 = vld [vmem:[#allocation7 + $0x108] sm:$0xff]  }
 0x153   :  { %22856 = vmatprep.mubr.bf16.mxu0 %v25620_v17  ;;  %23256 = vmatprep.mubr.bf16.mxu1 %v25716_v50  ;;  %v25671_v17 = vld [vmem:[#allocation2 + $0xb0] sm:$0xff]   ;;  %v25736_v50 = vld [vmem:[#allocation7 + $0x110] sm:$0xff]  }
 0x15a   :  { %22857 = vmatmul.mubr.bf16.gmra.mrb[52].mxu0 %v25621_v0  ;;  %23257 = vmatmul.mubr.bf16.gmra.mrb[4].mxu1 %v25717_v44  ;;  %v25720_v0 = vld [vmem:[#allocation2 + $0x20] sm:$0xff]   ;;  %v25715_v44 = vld [vmem:[#allocation2 + $0x30] sm:$0xff]  }
 0x15b   :  { %22860 = vmatprep.mubr.bf16.mxu0 %v25622_v41  ;;  %v25721_v41 = vld [vmem:[#allocation2 + $0x28] sm:$0xff]   ;;  %23260 = vmatprep.mubr.bf16.mxu1 %v25720_v0 }
 0x15c   :  { %v25785_v0 = vld [vmem:[#allocation2 + $0x128] sm:$0xff]  }
 0x162   :  { %22861 = vmatmul.mubr.bf16.gmra.mrb[56].mxu0 %v25623_v53  ;;  %v25672_v53 = vld [vmem:[#allocation2 + $0xb8] sm:$0xff]   ;;  %23261 = vmatmul.mubr.bf16.gmra.mrb[8].mxu1 %v25721_v41  ;;  %v25786_v41 = vld [vmem:[#allocation2 + $0x130] sm:$0xff]  }
 0x163   :  { %22864 = vmatprep.mubr.bf16.mxu0 %v25624_v52  ;;  %v25673_v52 = vld [vmem:[#allocation2 + $0xd8] sm:$0xff]  }
 0x16a   :  { %22865 = vmatmul.mubr.bf16.gmra.mrb[60].mxu0 %v25626_v32  ;;  %v25725_v32 = vld [vmem:[#allocation2 + $0x30] sm:$0xff]  }
 0x16b   :  { %22868 = vmatprep.mubr.bf16.mxu0 %v25627_v60  ;;  %v25726_v60 = vld [vmem:[#allocation2 + $0x38] sm:$0xff]   ;;  %23264 = vmatprep.mubr.bf16.mxu1 %v25725_v32 }
 0x16c   :  { %23265 = vmatmul.mubr.bf16.gmra.mrb[12].mxu1 %v25726_v60  ;;  %v25775_v32 = vld [vmem:[#allocation7 + $0x128] sm:$0xff]  }
 0x16d   :  { %v25790_v60 = vld [vmem:[#allocation2 + $0x138] sm:$0xff]  }
 0x172   :  { %22869 = vmatmul.mubr.bf16.gmra.mrb[64].mxu0 %v25628_v48  ;;  %v25675_v48 = vld [vmem:[#allocation2 + $0xe0] sm:$0xff]  }
 0x173   :  { %22872 = vmatprep.mubr.bf16.mxu0 %v25629_v10  ;;  %v25676_v10 = vld [vmem:[#allocation2 + $0xe8] sm:$0xff]  }
 0x17a   :  { %22873 = vmatmul.mubr.bf16.gmra.mrb[68].mxu0 %v25630_v33  ;;  %v25729_v33 = vld [vmem:[#allocation2 + $0x40] sm:$0xff]  }
 0x17b   :  { %22876 = vmatprep.mubr.bf16.mxu0 %v25631_v47  ;;  %v25730_v47 = vld [vmem:[#allocation2 + $0x48] sm:$0xff]   ;;  %23268 = vmatprep.mubr.bf16.mxu1 %v25729_v33  ;;  %v25724_v33 = vld [vmem:[#allocation2 + $0x50] sm:$0xff]  }
 0x17c   :  { %23269 = vmatmul.mubr.bf16.gmra.mrb[16].mxu1 %v25730_v47  ;;  %v25727_v47 = vld [vmem:[#allocation2 + $0x58] sm:$0xff]  }
 0x182   :  { %22877 = vmatmul.mubr.bf16.gmra.mrb[72].mxu0 %v25633_v39  ;;  %v25677_v39 = vld [vmem:[#allocation2 + $0xf0] sm:$0xff]  }
 0x183   :  { %22880 = vmatprep.mubr.bf16.mxu0 %v25634_v36  ;;  %v25678_v36 = vld [vmem:[#allocation2 + $0xf8] sm:$0xff]  }
 0x18a   :  { %22881 = vmatmul.mubr.bf16.gmra.mrb[76].mxu0 %v25635_v27  ;;  %v25733_v27 = vld [vmem:[#allocation2 + $0x50] sm:$0xff]  }
 0x18b   :  { %22884 = vmatprep.mubr.bf16.mxu0 %v25636_v56  ;;  %v25734_v56 = vld [vmem:[#allocation2 + $0x58] sm:$0xff]   ;;  %23272 = vmatprep.mubr.bf16.mxu1 %v25733_v27  ;;  %v25728_v27 = vld [vmem:[#allocation2 + $0x60] sm:$0xff]  }
 0x18c   :  { %23273 = vmatmul.mubr.bf16.gmra.mrb[20].mxu1 %v25734_v56  ;;  %v25731_v56 = vld [vmem:[#allocation2 + $0x68] sm:$0xff]  }
 0x192   :  { %22885 = vmatmul.mubr.bf16.gmra.mrb[80].mxu0 %v25637_v4  ;;  %v25679_v4 = vld [vmem:[#allocation2 + $0x100] sm:$0xff]  }
 0x193   :  { %22888 = vmatprep.mubr.bf16.mxu0 %v25638_v59  ;;  %v25680_v59 = vld [vmem:[#allocation2 + $0x108] sm:$0xff]  }
 0x19a   :  { %22889 = vmatmul.mubr.bf16.gmra.mrb[84].mxu0 %v25640_v24  ;;  %v25738_v24 = vld [vmem:[#allocation2 + $0x60] sm:$0xff]  }
 0x19b   :  { %22892 = vmatprep.mubr.bf16.mxu0 %v25641_v54  ;;  %v25739_v54 = vld [vmem:[#allocation2 + $0x68] sm:$0xff]   ;;  %23276 = vmatprep.mubr.bf16.mxu1 %v25738_v24  ;;  %v25800_v24 = vld [vmem:[#allocation7 + $0x1c0] sm:$0xff]  }
 0x19c   :  { %23277 = vmatmul.mubr.bf16.gmra.mrb[24].mxu1 %v25739_v54  ;;  %v25801_v54 = vld [vmem:[#allocation7 + $0x1c8] sm:$0xff]   ;;  %23348 = vmatprep.subr.bf16.mxu1 %v25800_v24 }
 0x19d   :  { %23349 = vmatpush3.bf16.msra.mxu1 %v25800_v24  ;;  %v25792_v24 = vld [vmem:[#allocation2 + $0x160] sm:$0xff]  }
 0x19e   :  { %23350 = vmatprep.subr.bf16.mxu1 %v25801_v54 }
 0x1a1   :  { %23351 = vmatpush3.bf16.msra.mxu1 %v25801_v54  ;;  %v25867_v54 = vld [vmem:[#allocation2 + $0xb8] sm:$0xff]  }
 0x1a2   :  { %22893 = vmatmul.mubr.bf16.gmra.mrb[88].mxu0 %v25642_v38  ;;  %v25682_v38 = vld [vmem:[#allocation2 + $0x110] sm:$0xff]  }
 0x1a3   :  { %22896 = vmatprep.mubr.bf16.mxu0 %v25643_v8  ;;  %v25683_v8 = vld [vmem:[#allocation2 + $0x118] sm:$0xff]  }
 0x1aa   :  { %22897 = vmatmul.mubr.bf16.gmra.mrb[92].mxu0 %v25644_v9  ;;  %v25742_v9 = vld [vmem:[#allocation2 + $0x70] sm:$0xff]  }
 0x1ab   :  { %22916 = vmatprep.mubr.bf16.mxu0 %v25645_v34  ;;  %v25743_v34 = vld [vmem:[#allocation2 + $0x78] sm:$0xff]   ;;  %23280 = vmatprep.mubr.bf16.mxu1 %v25742_v9 }
 0x1ac   :  { %23281 = vmatmul.mubr.bf16.gmra.mrb[28].mxu1 %v25743_v34  ;;  %v25735_v9 = vld [vmem:[#allocation2 + $0x78] sm:$0xff]   ;;  %v25805_v34 = vld [vmem:[#allocation2 + $0x168] sm:$0xff]  }
 0x1b2   :  { %22917 = vmatmul.mubr.bf16.vlgmr.msra.gmra.mrb[0].mxu0 %v25647_v29  ;;  %v25684_v29 = vld [vmem:[#allocation2 + $0x120] sm:$0xff]  }
 0x1b3   :  { %23013 = vmatpush3.bf16.msra.mxu0 %v27427_v63  ;;  %22920 = vmatprep.mubr.bf16.mxu0 %v25648_v21  ;;  %v27431_v63 = vld [vmem:[#allocation7 + $0x100] sm:$0xff]   ;;  %v25685_v21 = vld [vmem:[#allocation2 + $0x128] sm:$0xff]  }
 0x1b4   :  { %23014 = vmatprep.subr.bf16.mxu0 %v25653_v18 }
 0x1b7   :  { %23015 = vmatpush3.bf16.msra.mxu0 %v25653_v18  ;;  %v25746_v18 = vld [vmem:[#allocation2 + $0x80] sm:$0xff]  }
 0x1b8   :  { %23016 = vmatprep.subr.bf16.mxu0 %v25660_v5  ;;  %23284 = vmatprep.mubr.bf16.mxu1 %v25746_v18  ;;  %v25808_v18 = vld [vmem:[#allocation7 + $0x1d8] sm:$0xff]  }
 0x1ba   :  { %22921 = vmatmul.mubr.bf16.gmra.mrb[4].mxu0 %v25649_v11  ;;  %v25686_v11 = vld [vmem:[#allocation2 + $0x130] sm:$0xff]  }
 0x1bb   :  { %22924 = vmatprep.mubr.bf16.mxu0 %v25650_v13  ;;  %23017 = vmatpush3.bf16.msra.mxu0 %v25660_v5  ;;  %v25747_v5 = vld [vmem:[#allocation2 + $0x88] sm:$0xff]   ;;  %v25687_v13 = vld [vmem:[#allocation2 + $0x138] sm:$0xff]  }
 0x1bc   :  { %23018 = vmatprep.subr.bf16.mxu0 %v25667_v31  ;;  %23285 = vmatmul.mubr.bf16.gmra.mrb[32].mxu1 %v25747_v5  ;;  %v25737_v5 = vld [vmem:[#allocation2 + $0x80] sm:$0xff]  }
 0x1bf   :  { %23019 = vmatpush3.bf16.msra.mxu0 %v25667_v31  ;;  %v25751_v31 = vld [vmem:[#allocation2 + $0x90] sm:$0xff]  }
 0x1c0   :  { %23020 = vmatprep.subr.bf16.mxu0 %v25674_v51  ;;  %23288 = vmatprep.mubr.bf16.mxu1 %v25751_v31  ;;  %v25812_v31 = vld [vmem:[#allocation2 + $0x180] sm:$0xff]  }
 0x1c2   :  { %22925 = vmatmul.mubr.bf16.gmra.mrb[8].mxu0 %v25651_v61  ;;  %v25689_v61 = vld [vmem:[#allocation2 + $0x140] sm:$0xff]  }
 0x1c3   :  { %22928 = vmatprep.mubr.bf16.mxu0 %v25652_v46  ;;  %23021 = vmatpush3.bf16.msra.mxu0 %v25674_v51  ;;  %v25752_v51 = vld [vmem:[#allocation2 + $0x98] sm:$0xff]   ;;  %v25690_v46 = vld [vmem:[#allocation2 + $0x148] sm:$0xff]  }
 0x1c4   :  { %23022 = vmatprep.subr.bf16.mxu0 %v25681_v30  ;;  %23289 = vmatmul.mubr.bf16.gmra.mrb[36].mxu1 %v25752_v51  ;;  %v25813_v51 = vld [vmem:[#allocation7 + $0x1e0] sm:$0xff]  }
 0x1c7   :  { %23023 = vmatpush3.bf16.msra.mxu0 %v25681_v30  ;;  %v25755_v30 = vld [vmem:[#allocation2 + $0xa0] sm:$0xff]  }
 0x1c8   :  { %23024 = vmatprep.subr.bf16.mxu0 %v25688_v16  ;;  %23292 = vmatprep.mubr.bf16.mxu1 %v25755_v30  ;;  %v25744_v30 = vld [vmem:[#allocation2 + $0x98] sm:$0xff]  }
 0x1ca   :  { %22929 = vmatmul.mubr.bf16.gmra.mrb[12].mxu0 %v25654_v19  ;;  %v25691_v19 = vld [vmem:[#allocation2 + $0x150] sm:$0xff]  }
 0x1cb   :  { %22932 = vmatprep.mubr.bf16.mxu0 %v25655_v42  ;;  %23025 = vmatpush3.bf16.msra.mxu0 %v25688_v16  ;;  %v25756_v16 = vld [vmem:[#allocation2 + $0xa8] sm:$0xff]   ;;  %v25692_v42 = vld [vmem:[#allocation2 + $0x158] sm:$0xff]  }
 0x1cc   :  { %23026 = vmatprep.subr.bf16.mxu0 %v25697_v45  ;;  %23293 = vmatmul.mubr.bf16.gmra.mrb[40].mxu1 %v25756_v16  ;;  %v25817_v16 = vld [vmem:[#allocation2 + $0x188] sm:$0xff]  }
 0x1cf   :  { %23027 = vmatpush3.bf16.msra.mxu0 %v25697_v45  ;;  %v25764_v45 = vld [vmem:[#allocation2 + $0xd8] sm:$0xff]  }
 0x1d0   :  { %23124 = vmatprep.subr.bf16.mxu0 %v27431_v63 }
 0x1d2   :  { %22933 = vmatmul.mubr.bf16.gmra.mrb[16].mxu0 %v25656_v58  ;;  %v25759_v58 = vld [vmem:[#allocation2 + $0xb0] sm:$0xff]  }
 0x1d3   :  { %22936 = vmatprep.mubr.bf16.mxu0 %v25657_v14  ;;  %v25760_v14 = vld [vmem:[#allocation2 + $0xb8] sm:$0xff]   ;;  %23296 = vmatprep.mubr.bf16.mxu1 %v25759_v58  ;;  %v25820_v58 = vld [vmem:[#allocation7 + $0x1f8] sm:$0xff]  }
 0x1d4   :  { %23297 = vmatmul.mubr.bf16.gmra.mrb[44].mxu1 %v25760_v14  ;;  %v27435_v14 = vld [vmem:[#allocation7 + $0x140] sm:$0xff]  }
 0x1d5   :  { %23300 = vmatprep.mubr.bf16.mxu1 %v25764_v45  ;;  %v25824_v45 = vld [vmem:[#allocation2 + $0x18] sm:$0xff]  }
 0x1da   :  { %22937 = vmatmul.mubr.bf16.gmra.mrb[20].mxu0 %v25658_v62  ;;  %v25765_v62 = vld [vmem:[#allocation2 + $0xe0] sm:$0xff]  }
 0x1db   :  { %22940 = vmatprep.mubr.bf16.mxu0 %v25659_v3  ;;  %v25698_v3 = vld [vmem:[#allocation2 + $0x170] sm:$0xff]  }
 0x1dc   :  { %23301 = vmatmul.mubr.bf16.gmra.mrb[48].mxu1 %v25765_v62  ;;  %v25825_v62 = vld [vmem:[#allocation2 + $0x20] sm:$0xff]  }
 0x1dd   :  { %23304 = vmatprep.mubr.bf16.mxu1 %v25768_v12  ;;  %v25828_v12 = vld [vmem:[#allocation2 + $0x28] sm:$0xff]  }
 0x1e2   :  { %22941 = vmatmul.mubr.bf16.gmra.mrb[24].mxu0 %v25661_v20  ;;  %v25769_v20 = vld [vmem:[#allocation2 + $0xf0] sm:$0xff]  }
 0x1e3   :  { %22944 = vmatprep.mubr.bf16.mxu0 %v25662_v7  ;;  %v25702_v7 = vld [vmem:[#allocation2 + $0x180] sm:$0xff]  }
 0x1e4   :  { %23305 = vmatmul.mubr.bf16.gmra.mrb[52].mxu1 %v25769_v20  ;;  %v25829_v20 = vld [vmem:[#allocation2 + $0x30] sm:$0xff]  }
 0x1e5   :  { %23308 = vmatprep.mubr.bf16.mxu1 %v25772_v23  ;;  %v25832_v23 = vld [vmem:[#allocation2 + $0x38] sm:$0xff]  }
 0x1ea   :  { %22945 = vmatmul.mubr.bf16.gmra.mrb[28].mxu0 %v25663_v1  ;;  %v25773_v1 = vld [vmem:[#allocation2 + $0x100] sm:$0xff]  }
 0x1eb   :  { %22948 = vmatprep.mubr.bf16.mxu0 %v25664_v26  ;;  %v25706_v26 = vld [vmem:[#allocation2 + $0x190] sm:$0xff]  }
 0x1ec   :  { %23309 = vmatmul.mubr.bf16.gmra.mrb[56].mxu1 %v25773_v1  ;;  %v25833_v1 = vld [vmem:[#allocation2 + $0x40] sm:$0xff]  }
 0x1ed   :  { %23312 = vmatprep.mubr.bf16.mxu1 %v25777_v55 }
 0x1f2   :  { %22949 = vmatmul.mubr.bf16.gmra.mrb[32].mxu0 %v25665_v25  ;;  %v25778_v25 = vld [vmem:[#allocation2 + $0x110] sm:$0xff]  }
 0x1f3   :  { %22952 = vmatprep.mubr.bf16.mxu0 %v25666_v35  ;;  %v25711_v35 = vld [vmem:[#allocation2 + $0x20] sm:$0xff]  }
 0x1f4   :  { %23313 = vmatmul.mubr.bf16.gmra.mrb[60].mxu1 %v25778_v25  ;;  %v25837_v25 = vld [vmem:[#allocation2 + $0x48] sm:$0xff]  }
 0x1fa   :  { %22953 = vmatmul.mubr.bf16.gmra.mrb[36].mxu0 %v25668_v57  ;;  %v25781_v57 = vld [vmem:[#allocation2 + $0x118] sm:$0xff]  }
 0x1fb   :  { %22956 = vmatprep.mubr.bf16.mxu0 %v25669_v43  ;;  %v25782_v43 = vld [vmem:[#allocation2 + $0x120] sm:$0xff]   ;;  %23316 = vmatprep.mubr.bf16.mxu1 %v25781_v57  ;;  %v25841_v57 = vld [vmem:[#allocation2 + $0x58] sm:$0xff]  }
 0x1fc   :  { %23317 = vmatmul.mubr.bf16.gmra.mrb[64].mxu1 %v25782_v43  ;;  %v25842_v43 = vld [vmem:[#allocation2 + $0x60] sm:$0xff]  }
 0x1fd   :  { %23320 = vmatprep.mubr.bf16.mxu1 %v25785_v0  ;;  %v25771_v0 = vld [vmem:[#allocation2 + $0x118] sm:$0xff]  }
 0x202   :  { %22957 = vmatmul.mubr.bf16.gmra.mrb[40].mxu0 %v25670_v2  ;;  %v25718_v2 = vld [vmem:[#allocation2 + $0x38] sm:$0xff]  }
 0x203   :  { %22960 = vmatprep.mubr.bf16.mxu0 %v25671_v17  ;;  %v25749_v17 = vld [vmem:[#allocation7 + $0x118] sm:$0xff]  }
 0x204   :  { %23321 = vmatmul.mubr.bf16.gmra.mrb[68].mxu1 %v25786_v41  ;;  %v25774_v41 = vld [vmem:[#allocation2 + $0x120] sm:$0xff]  }
 0x205   :  { %23324 = vmatprep.mubr.bf16.mxu1 %v25790_v60  ;;  %v25854_v60 = vld [vmem:[#allocation2 + $0x88] sm:$0xff]  }
 0x20a   :  { %22961 = vmatmul.mubr.bf16.gmra.mrb[44].mxu0 %v25672_v53  ;;  %v25762_v53 = vld [vmem:[#allocation7 + $0x120] sm:$0xff]  }
 0x20b   :  { %22964 = vmatprep.mubr.bf16.mxu0 %v25673_v52  ;;  %v25722_v52 = vld [vmem:[#allocation2 + $0x48] sm:$0xff]  }
 0x212   :  { %22965 = vmatmul.mubr.bf16.gmra.mrb[48].mxu0 %v25675_v48  ;;  %v25791_v48 = vld [vmem:[#allocation2 + $0x140] sm:$0xff]  }
 0x213   :  { %22968 = vmatprep.mubr.bf16.mxu0 %v25676_v10  ;;  %v25788_v10 = vld [vmem:[#allocation7 + $0x130] sm:$0xff]   ;;  %23325 = vmatmul.mubr.bf16.gmra.mrb[72].mxu1 %v25791_v48  ;;  %v25855_v48 = vld [vmem:[#allocation2 + $0x90] sm:$0xff]  }
 0x21a   :  { %22969 = vmatmul.mubr.bf16.gmra.mrb[52].mxu0 %v25677_v39  ;;  %v25794_v39 = vld [vmem:[#allocation2 + $0x148] sm:$0xff]  }
 0x21b   :  { %22972 = vmatprep.mubr.bf16.mxu0 %v25678_v36  ;;  %v25795_v36 = vld [vmem:[#allocation2 + $0x150] sm:$0xff]   ;;  %23328 = vmatprep.mubr.bf16.mxu1 %v25794_v39  ;;  %v25859_v39 = vld [vmem:[#allocation2 + $0xa0] sm:$0xff]  }
 0x21c   :  { %23329 = vmatmul.mubr.bf16.gmra.mrb[76].mxu1 %v25795_v36  ;;  %v25784_v36 = vld [vmem:[#allocation2 + $0x148] sm:$0xff]  }
 0x222   :  { %22973 = vmatmul.mubr.bf16.gmra.mrb[56].mxu0 %v25679_v4  ;;  %v25798_v4 = vld [vmem:[#allocation2 + $0x158] sm:$0xff]  }
 0x223   :  { %22976 = vmatprep.mubr.bf16.mxu0 %v25680_v59  ;;  %v25799_v59 = vld [vmem:[#allocation2 + $0x160] sm:$0xff]   ;;  %23332 = vmatprep.mubr.bf16.mxu1 %v25798_v4  ;;  %v25864_v4 = vld [vmem:[#allocation2 + $0xb0] sm:$0xff]  }
 0x224   :  { %23333 = vmatmul.mubr.bf16.gmra.mrb[80].mxu1 %v25799_v59  ;;  %v25789_v59 = vld [vmem:[#allocation2 + $0x158] sm:$0xff]  }
 0x225   :  { %23336 = vmatprep.mubr.bf16.mxu1 %v25805_v34  ;;  %v23254_v55 = vpop.f32.mrb[0].mxu1  ;;  %v25871_v34 = vld [vmem:[#allocation2 + $0xc8] sm:$0xff]  }
 0x22a   :  { %22977 = vmatmul.mubr.bf16.gmra.mrb[60].mxu0 %v25682_v38  ;;  %v25803_v38 = vld [vmem:[#allocation7 + $0x138] sm:$0xff]  }
 0x22b   :  { %22980 = vmatprep.mubr.bf16.mxu0 %v25683_v8  ;;  %v25732_v8 = vld [vmem:[#allocation2 + $0x70] sm:$0xff]  }
 0x232   :  { %22981 = vmatmul.mubr.bf16.gmra.mrb[64].mxu0 %v25684_v29  ;;  %v25806_v29 = vld [vmem:[#allocation2 + $0x170] sm:$0xff]  }
 0x233   :  { %22984 = vmatprep.mubr.bf16.mxu0 %v25685_v21  ;;  %v25807_v21 = vld [vmem:[#allocation7 + $0x1d0] sm:$0xff]   ;;  %23337 = vmatmul.mubr.bf16.gmra.mrb[84].mxu1 %v25806_v29  ;;  %v25872_v29 = vld [vmem:[#allocation2 + $0xd0] sm:$0xff]  }
 0x234   :  { %23352 = vmatprep.subr.bf16.mxu1 %v25807_v21 }
 0x235   :  { %23353 = vmatpush3.bf16.msra.mxu1 %v25807_v21  ;;  %v25797_v21 = vld [vmem:[#allocation2 + $0x178] sm:$0xff]  }
 0x236   :  { %23354 = vmatprep.subr.bf16.mxu1 %v25808_v18 }
 0x239   :  { %23355 = vmatpush3.bf16.msra.mxu1 %v25808_v18  ;;  %v25802_v18 = vld [vmem:[#allocation2 + $0x180] sm:$0xff]  }
 0x23a   :  { %22985 = vmatmul.mubr.bf16.gmra.mrb[68].mxu0 %v25686_v11  ;;  %v25740_v11 = vld [vmem:[#allocation2 + $0x88] sm:$0xff]   ;;  %23356 = vmatprep.subr.bf16.mxu1 %v25813_v51 }
 0x23b   :  { %22988 = vmatprep.mubr.bf16.mxu0 %v25687_v13  ;;  %v25811_v13 = vld [vmem:[#allocation2 + $0x178] sm:$0xff]  }
 0x23c   :  { %23340 = vmatprep.mubr.bf16.mxu1 %v25811_v13  ;;  %v25804_v13 = vld [vmem:[#allocation2 + $0x188] sm:$0xff]  }
 0x23d   :  { %23341 = vmatmul.mubr.bf16.gmra.mrb[88].mxu1 %v25812_v31  ;;  %v25809_v31 = vld [vmem:[#allocation2 + $0x190] sm:$0xff]  }
 0x23e   :  { %23357 = vmatpush3.bf16.msra.mxu1 %v25813_v51  ;;  %23344 = vmatprep.mubr.bf16.mxu1 %v25817_v16  ;;  %v25880_v51 = vld [vmem:[#allocation2 + $0x100] sm:$0xff]   ;;  %v25884_v16 = vld [vmem:[#allocation2 + $0x110] sm:$0xff]  }
 0x242   :  { %22989 = vmatmul.mubr.bf16.gmra.mrb[72].mxu0 %v25689_v61  ;;  %v25814_v61 = vld [vmem:[#allocation7 + $0x1e8] sm:$0xff]  }
 0x243   :  { %22992 = vmatprep.mubr.bf16.mxu0 %v25690_v46  ;;  %v25741_v46 = vld [vmem:[#allocation2 + $0x90] sm:$0xff]   ;;  %23358 = vmatprep.subr.bf16.mxu1 %v25814_v61 }
 0x244   :  { %23359 = vmatpush3.bf16.msra.mxu1 %v25814_v61  ;;  %v25881_v61 = vld [vmem:[#allocation2 + $0x108] sm:$0xff]  }
 0x24a   :  { %22993 = vmatmul.mubr.bf16.gmra.mrb[76].mxu0 %v25691_v19  ;;  %v25818_v19 = vld [vmem:[#allocation2 + $0x190] sm:$0xff]  }
 0x24b   :  { %22996 = vmatprep.mubr.bf16.mxu0 %v25692_v42  ;;  %v25819_v42 = vld [vmem:[#allocation7 + $0x1f0] sm:$0xff]   ;;  %23345 = vmatmul.mubr.bf16.gmra.mrb[92].mxu1 %v25818_v19  ;;  %v25885_v19 = vld [vmem:[#allocation2 + $0x118] sm:$0xff]  }
 0x24c   :  { %23360 = vmatprep.subr.bf16.mxu1 %v25819_v42  ;;  %23364 = vmatprep.mubr.bf16.mxu1 %v25824_v45  ;;  %v25889_v45 = vld [vmem:[#allocation2 + $0x120] sm:$0xff]  }
 0x24d   :  { %23361 = vmatpush3.bf16.msra.mxu1 %v25819_v42  ;;  %v25816_v42 = vld [vmem:[#allocation2 + $0x1a8] sm:$0xff]  }
 0x24e   :  { %23362 = vmatprep.subr.bf16.mxu1 %v25820_v58 }
 0x251   :  { %23363 = vmatpush3.bf16.msra.mxu1 %v25820_v58  ;;  %v25821_v58 = vld [vmem:[#allocation2 + $0xc] sm:$0xff]  }
 0x252   :  { %22997 = vmatmul.mubr.bf16.gmra.mrb[80].mxu0 %v25693_v22  ;;  %v25745_v22 = vld [vmem:[#allocation2 + $0xa0] sm:$0xff]  }
 0x253   :  { %23000 = vmatprep.mubr.bf16.mxu0 %v25696_v37  ;;  %v25748_v37 = vld [vmem:[#allocation2 + $0xa8] sm:$0xff]  }
 0x254   :  { %23365 = vmatmul.mubr.bf16.vlgmr.msra.gmra.mrb[96].mxu1 %v25825_v62 }
 0x255   :  { %23368 = vmatprep.mubr.bf16.mxu1 %v25828_v12 }
 0x25a   :  { %23001 = vmatmul.mubr.bf16.gmra.mrb[84].mxu0 %v25698_v3  ;;  %v25750_v3 = vld [vmem:[#allocation2 + $0xb0] sm:$0xff]  }
 0x25b   :  { %23004 = vmatprep.mubr.bf16.mxu0 %v25701_v15  ;;  %v25753_v15 = vld [vmem:[#allocation2 + $0xb8] sm:$0xff]  }
 0x25c   :  { %23369 = vmatmul.mubr.bf16.gmra.mrb[100].mxu1 %v25829_v20 }
 0x25d   :  { %23372 = vmatprep.mubr.bf16.mxu1 %v25832_v23  ;;  %v25826_v23 = vld [vmem:[#allocation2 + $0x1c] sm:$0xff]  }
 0x262   :  { %23005 = vmatmul.mubr.bf16.gmra.mrb[88].mxu0 %v25702_v7  ;;  %v25754_v7 = vld [vmem:[#allocation2 + $0xc0] sm:$0xff]  }
 0x263   :  { %23008 = vmatprep.mubr.bf16.mxu0 %v25705_v49  ;;  %v25757_v49 = vld [vmem:[#allocation2 + $0xc8] sm:$0xff]  }
 0x264   :  { %23373 = vmatmul.mubr.bf16.gmra.mrb[104].mxu1 %v25833_v1 }
 0x265   :  { %23376 = vmatprep.mubr.bf16.mxu1 %v25837_v25  ;;  %v25893_v25 = vld [vmem:[#allocation2 + $0x130] sm:$0xff]  }
 0x26a   :  { %23009 = vmatmul.mubr.bf16.gmra.mrb[92].mxu0 %v25706_v26  ;;  %v25758_v26 = vld [vmem:[#allocation2 + $0xd0] sm:$0xff]  }
 0x26b   :  { %23028 = vmatprep.mubr.bf16.mxu0 %v25709_v6  ;;  %v25761_v6 = vld [vmem:[#allocation2 + $0xf0] sm:$0xff]  }
 0x272   :  { %23029 = vmatmul.mubr.bf16.vlgmr.msra.gmra.mrb[0].mxu0 %v25711_v35  ;;  %v25838_v35 = vld [vmem:[#allocation2 + $0x50] sm:$0xff]  }
 0x273   :  { %23125 = vmatpush3.bf16.msra.mxu0 %v27431_v63  ;;  %23032 = vmatprep.mubr.bf16.mxu0 %v25714_v40  ;;  %v25719_v63 = vld [vmem:[#allocation2 + $0x40] sm:$0xff]   ;;  %v25763_v40 = vld [vmem:[#allocation2 + $0xf8] sm:$0xff]  }
 0x274   :  { %23126 = vmatprep.subr.bf16.mxu0 %v25723_v28  ;;  %23377 = vmatmul.mubr.bf16.gmra.mrb[108].mxu1 %v25838_v35 }
 0x275   :  { %23380 = vmatprep.mubr.bf16.mxu1 %v25841_v57  ;;  %v25848_v57 = vld [vmem:[#allocation7 + $0x150] sm:$0xff]  }
 0x277   :  { %23127 = vmatpush3.bf16.msra.mxu0 %v25723_v28  ;;  %v25766_v28 = vld [vmem:[#allocation2 + $0x100] sm:$0xff]  }
 0x278   :  { %23128 = vmatprep.subr.bf16.mxu0 %v25736_v50 }
 0x27a   :  { %23033 = vmatmul.mubr.bf16.gmra.mrb[4].mxu0 %v25715_v44  ;;  %v25770_v44 = vld [vmem:[#allocation2 + $0x110] sm:$0xff]  }
 0x27b   :  { %23036 = vmatprep.mubr.bf16.mxu0 %v25718_v2  ;;  %23129 = vmatpush3.bf16.msra.mxu0 %v25736_v50  ;;  %v25767_v50 = vld [vmem:[#allocation2 + $0x108] sm:$0xff]  }
 0x27c   :  { %23130 = vmatprep.subr.bf16.mxu0 %v25749_v17  ;;  %23381 = vmatmul.mubr.bf16.gmra.mrb[112].mxu1 %v25842_v43  ;;  %v25845_v2 = vld [vmem:[#allocation2 + $0x68] sm:$0xff]  }
 0x27d   :  { %23384 = vmatprep.mubr.bf16.mxu1 %v25845_v2 }
 0x27f   :  { %23131 = vmatpush3.bf16.msra.mxu0 %v25749_v17  ;;  %v25846_v17 = vld [vmem:[#allocation2 + $0x70] sm:$0xff]  }
 0x280   :  { %23132 = vmatprep.subr.bf16.mxu0 %v25762_v53 }
 0x282   :  { %23037 = vmatmul.mubr.bf16.gmra.mrb[8].mxu0 %v25719_v63  ;;  %v25851_v63 = vld [vmem:[#allocation2 + $0x80] sm:$0xff]  }
 0x283   :  { %23040 = vmatprep.mubr.bf16.mxu0 %v25722_v52  ;;  %23133 = vmatpush3.bf16.msra.mxu0 %v25762_v53  ;;  %v25850_v53 = vld [vmem:[#allocation2 + $0x78] sm:$0xff]   ;;  %v25776_v52 = vld [vmem:[#allocation2 + $0x128] sm:$0xff]  }
 0x284   :  { %23134 = vmatprep.subr.bf16.mxu0 %v25775_v32  ;;  %23385 = vmatmul.mubr.bf16.gmra.mrb[116].mxu1 %v25846_v17  ;;  %v25830_v17 = vld [vmem:[#allocation2 + $0x2c] sm:$0xff]  }
 0x285   :  { %23388 = vmatprep.mubr.bf16.mxu1 %v25850_v53 }
 0x287   :  { %23135 = vmatpush3.bf16.msra.mxu0 %v25775_v32  ;;  %v25779_v32 = vld [vmem:[#allocation2 + $0x130] sm:$0xff]  }
 0x288   :  { %23136 = vmatprep.subr.bf16.mxu0 %v25788_v10 }
 0x28a   :  { %23041 = vmatmul.mubr.bf16.gmra.mrb[12].mxu0 %v25724_v33  ;;  %v25783_v33 = vld [vmem:[#allocation2 + $0x140] sm:$0xff]  }
 0x28b   :  { %23044 = vmatprep.mubr.bf16.mxu0 %v25727_v47  ;;  %23137 = vmatpush3.bf16.msra.mxu0 %v25788_v10  ;;  %v25780_v10 = vld [vmem:[#allocation2 + $0x138] sm:$0xff]  }
 0x28c   :  { %23138 = vmatprep.subr.bf16.mxu0 %v25803_v38  ;;  %23389 = vmatmul.mubr.bf16.gmra.mrb[120].mxu1 %v25851_v63  ;;  %v25858_v47 = vld [vmem:[#allocation2 + $0x98] sm:$0xff]   ;;  %v25897_v63 = vld [vmem:[#allocation2 + $0x140] sm:$0xff]  }
 0x28d   :  { %23392 = vmatprep.mubr.bf16.mxu1 %v25854_v60 }
 0x28f   :  { %23139 = vmatpush3.bf16.msra.mxu0 %v25803_v38  ;;  %v25868_v38 = vld [vmem:[#allocation2 + $0xc0] sm:$0xff]  }
 0x290   :  { %23460 = vmatprep.subr.bf16.mxu0 %v27435_v14 }
 0x292   :  { %23045 = vmatmul.mubr.bf16.gmra.mrb[16].mxu0 %v25728_v27  ;;  %v25787_v27 = vld [vmem:[#allocation2 + $0x150] sm:$0xff]  }
 0x293   :  { %23048 = vmatprep.mubr.bf16.mxu0 %v25731_v56  ;;  %v25863_v56 = vld [vmem:[#allocation2 + $0xa8] sm:$0xff]  }
 0x294   :  { %23393 = vmatmul.mubr.bf16.gmra.mrb[124].mxu1 %v25855_v48  ;;  %v25874_v48 = vld [vmem:[#allocation7 + $0x160] sm:$0xff]  }
 0x295   :  { %23396 = vmatprep.mubr.bf16.mxu1 %v25858_v47  ;;  %v25831_v47 = vld [vmem:[#allocation2 + $0x34] sm:$0xff]  }
 0x29a   :  { %23049 = vmatmul.mubr.bf16.gmra.mrb[20].mxu0 %v25732_v8  ;;  %v25793_v8 = vld [vmem:[#allocation2 + $0x168] sm:$0xff]  }
 0x29b   :  { %23052 = vmatprep.mubr.bf16.mxu0 %v25735_v9  ;;  %v25796_v9 = vld [vmem:[#allocation2 + $0x170] sm:$0xff]  }
 0x29c   :  { %23397 = vmatmul.mubr.bf16.gmra.mrb[128].mxu1 %v25859_v39 }
 0x29d   :  { %23400 = vmatprep.mubr.bf16.mxu1 %v25863_v56 }
 0x2a2   :  { %23053 = vmatmul.mubr.bf16.gmra.mrb[24].mxu0 %v25737_v5  ;;  %v25876_v5 = vld [vmem:[#allocation2 + $0xf0] sm:$0xff]  }
 0x2a3   :  { %23056 = vmatprep.mubr.bf16.mxu0 %v25740_v11  ;;  %v25877_v11 = vld [vmem:[#allocation2 + $0xf8] sm:$0xff]  }
 0x2a4   :  { %23401 = vmatmul.mubr.bf16.gmra.mrb[132].mxu1 %v25864_v4  ;;  %v25887_v4 = vld [vmem:[#allocation7 + $0x168] sm:$0xff]  }
 0x2a5   :  { %23404 = vmatprep.mubr.bf16.mxu1 %v25867_v54  ;;  %v25902_v54 = vld [vmem:[#allocation2 + $0x150] sm:$0xff]  }
 0x2aa   :  { %23057 = vmatmul.mubr.bf16.gmra.mrb[28].mxu0 %v25741_v46  ;;  %v25810_v46 = vld [vmem:[#allocation2 + $0x198] sm:$0xff]  }
 0x2ab   :  { %23060 = vmatprep.mubr.bf16.mxu0 %v25744_v30  ;;  %v25815_v30 = vld [vmem:[#allocation2 + $0x1a0] sm:$0xff]  }
 0x2ac   :  { %23405 = vmatmul.mubr.bf16.gmra.mrb[136].mxu1 %v25868_v38 }
 0x2ad   :  { %23408 = vmatprep.mubr.bf16.mxu1 %v25871_v34 }
 0x2b2   :  { %23061 = vmatmul.mubr.bf16.gmra.mrb[32].mxu0 %v25745_v22  ;;  %v27438_v22 = vpop.f32.mrb[1].mxu1 }
 0x2b3   :  { %23064 = vmatprep.mubr.bf16.mxu0 %v25748_v37  ;;  %v27440_v37 = vpop.f32.mrb[2].mxu1 }
 0x2b4   :  { %23409 = vmatmul.mubr.bf16.gmra.mrb[140].mxu1 %v25872_v29  ;;  %v27442_v62 = vpop.f32.mrb[3].mxu1  ;;  %v25900_v29 = vld [vmem:[#allocation7 + $0x170] sm:$0xff]  }
 0x2b5   :  { %23412 = vmatprep.mubr.bf16.mxu1 %v25876_v5 }
 0x2ba   :  { %23065 = vmatmul.mubr.bf16.gmra.mrb[36].mxu0 %v25750_v3  ;;  %v25890_v3 = vld [vmem:[#allocation2 + $0x128] sm:$0xff]  }
 0x2bb   :  { %23068 = vmatprep.mubr.bf16.mxu0 %v25753_v15  ;;  %v27444_v15 = vpop.f32.mrb[4].mxu1 }
 0x2bc   :  { %23413 = vmatmul.mubr.bf16.gmra.mrb[144].mxu1 %v25877_v11  ;;  %v27446_v12 = vpop.f32.mrb[5].mxu1 }
 0x2bd   :  { %23416 = vmatprep.mubr.bf16.mxu1 %v25880_v51  ;;  %v27448_v20 = vpop.f32.mrb[6].mxu1 }
 0x2c2   :  { %23069 = vmatmul.mubr.bf16.gmra.mrb[40].mxu0 %v25754_v7  ;;  %v25823_v7 = vld [vmem:[#allocation2 + $0x14] sm:$0xff]  }
 0x2c3   :  { %23072 = vmatprep.mubr.bf16.mxu0 %v25757_v49  ;;  %v5256_v49 = vpop.f32.mrb[7].mxu1 }
 0x2c4   :  { %23417 = vmatmul.mubr.bf16.gmra.mrb[148].mxu1 %v25881_v61  ;;  %v27450_v1 = vpop.f32.mrb[8].mxu1  ;;  %v25839_v61 = vld [vmem:[#allocation2 + $0x4c] sm:$0xff]  }
 0x2c5   :  { %23420 = vmatprep.mubr.bf16.mxu1 %v25884_v16 }
 0x2ca   :  { %23073 = vmatmul.mubr.bf16.gmra.mrb[44].mxu0 %v25758_v26  ;;  %v25835_v26 = vld [vmem:[#allocation7 + $0x148] sm:$0xff]  }
 0x2cb   :  { %23076 = vmatprep.mubr.bf16.mxu0 %v25761_v6  ;;  %v5269_v6 = vpop.f32.mrb[9].mxu1 }
 0x2cc   :  { %23421 = vmatmul.mubr.bf16.gmra.mrb[152].mxu1 %v25885_v19  ;;  %v23263_v55 = vpop.f32.mrb[10].mxu1 }
 0x2cd   :  { %23424 = vmatprep.mubr.bf16.mxu1 %v25889_v45  ;;  %v27452_v35 = vpop.f32.mrb[11].mxu1 }
 0x2d2   :  { %23077 = vmatmul.mubr.bf16.gmra.mrb[48].mxu0 %v25763_v40  ;;  %v25894_v40 = vld [vmem:[#allocation2 + $0x138] sm:$0xff]  }
 0x2d3   :  { %23080 = vmatprep.mubr.bf16.mxu0 %v25766_v28  ;;  %v23266_v28 = vpop.f32.mrb[12].mxu1 }
 0x2d4   :  { %23425 = vmatmul.mubr.bf16.gmra.mrb[156].mxu1 %v25890_v3  ;;  %v27455_v43 = vpop.f32.mrb[13].mxu1 }
 0x2d5   :  { %23428 = vmatprep.mubr.bf16.mxu1 %v25893_v25 }
 0x2da   :  { %23081 = vmatmul.mubr.bf16.gmra.mrb[52].mxu0 %v25767_v50  ;;  %v27457_v50 = vpop.f32.mrb[14].mxu1 }
 0x2db   :  { %23084 = vmatprep.mubr.bf16.mxu0 %v25770_v44  ;;  %v25827_v44 = vld [vmem:[#allocation2 + $0x24] sm:$0xff]   ;;  %v27459_v2 = vpop.f32.mrb[15].mxu1 }
 0x2dc   :  { %23429 = vmatmul.mubr.bf16.gmra.mrb[160].mxu1 %v25894_v40 }
 0x2dd   :  { %23432 = vmatprep.mubr.bf16.mxu1 %v25897_v63 }
 0x2e2   :  { %23085 = vmatmul.mubr.bf16.gmra.mrb[56].mxu0 %v25771_v0  ;;  %v27461_v0 = vpop.f32.mrb[16].mxu1 }
 0x2e3   :  { %23088 = vmatprep.mubr.bf16.mxu0 %v25774_v41  ;;  %v25861_v41 = vld [vmem:[#allocation7 + $0x158] sm:$0xff]  }
 0x2ea   :  { %23089 = vmatmul.mubr.bf16.gmra.mrb[60].mxu0 %v25776_v52 }
 0x2eb   :  { %23092 = vmatprep.mubr.bf16.mxu0 %v25779_v32  ;;  %v25898_v32 = vld [vmem:[#allocation2 + $0x148] sm:$0xff]  }
 0x2ec   :  { %23433 = vmatmul.mubr.bf16.gmra.mrb[164].mxu1 %v25898_v32 }
 0x2ed   :  { %23436 = vmatprep.mubr.bf16.mxu1 %v25902_v54 }
 0x2f2   :  { %23093 = vmatmul.mubr.bf16.gmra.mrb[64].mxu0 %v25780_v10 }
 0x2f3   :  { %23096 = vmatprep.mubr.bf16.mxu0 %v25783_v33 }
 0x2fa   :  { %23097 = vmatmul.mubr.bf16.gmra.mrb[68].mxu0 %v25784_v36  ;;  %v25834_v36 = vld [vmem:[#allocation2 + $0x3c] sm:$0xff]  }
 0x2fb   :  { %23100 = vmatprep.mubr.bf16.mxu0 %v25787_v27  ;;  %v3693_v27 = vlaneseq }
 0x302   :  { %23101 = vmatmul.mubr.bf16.gmra.mrb[72].mxu0 %v25789_v59 }
 0x303   :  { %23104 = vmatprep.mubr.bf16.mxu0 %v25792_v24 }
 0x30a   :  { %23105 = vmatmul.mubr.bf16.gmra.mrb[76].mxu0 %v25793_v8  ;;  %v25903_v8 = vld [vmem:[#allocation2 + $0x158] sm:$0xff]  }
 0x30b   :  { %23108 = vmatprep.mubr.bf16.mxu0 %v25796_v9  ;;  %v27477_v9 = vshrl.u32 %v3693_v27, 7  ;;  %23437 = vmatmul.mubr.bf16.gmra.mrb[168].mxu1 %v25903_v8  ;;  %v25911_v8 = vld [vmem:[#allocation2 + $0x178] sm:$0xff]  }
 0x30d   :  { %30583 = vst [vmem:[#allocation18_spill] sm:$0xff] %v27477_v9  ;;  %vm3695_vm0 = vcmp.lt.s32.totalorder %v27477_v9, 1 }
 0x312   :  { %23109 = vmatmul.mubr.bf16.gmra.mrb[80].mxu0 %v25797_v21 }
 0x313   :  { %23112 = vmatprep.mubr.bf16.mxu0 %v25802_v18 }
 0x31a   :  { %23113 = vmatmul.mubr.bf16.gmra.mrb[84].mxu0 %v25804_v13  ;;  %v25836_v13 = vld [vmem:[#allocation2 + $0x44] sm:$0xff]  }
 0x31b   :  { %23116 = vmatprep.mubr.bf16.mxu0 %v25809_v31 }
 0x322   :  { %23117 = vmatmul.mubr.bf16.gmra.mrb[88].mxu0 %v25810_v46 }
 0x323   :  { %23120 = vmatprep.mubr.bf16.mxu0 %v25815_v30 }
 0x32a   :  { %23121 = vmatmul.mubr.bf16.gmra.mrb[92].mxu0 %v25816_v42 }
 0x32b   :  { %23140 = vmatprep.mubr.bf16.mxu0 %v25821_v58 }
 0x332   :  { %23141 = vmatmul.mubr.bf16.vlgmr.msra.gmra.mrb[96].mxu0 %v25823_v7  ;;  %v25906_v7 = vld [vmem:[#allocation2 + $0x160] sm:$0xff]  }
 0x333   :  { %23461 = vmatpush3.bf16.msra.mxu0 %v27435_v14  ;;  %23144 = vmatprep.mubr.bf16.mxu0 %v25826_v23  ;;  %v27463_v14 = vpop.f32.mrb[17].mxu1  ;;  %v25907_v23 = vld [vmem:[#allocation2 + $0x168] sm:$0xff]  }
 0x334   :  { %23462 = vmatprep.subr.bf16.mxu0 %v25835_v26  ;;  %v27465_v53 = vpop.f32.mrb[18].mxu1  ;;  %23440 = vmatprep.mubr.bf16.mxu1 %v25906_v7 }
 0x335   :  { %v5304_v52 = vpop.f32.mrb[19].mxu1  ;;  %23441 = vmatmul.mubr.bf16.gmra.mrb[172].mxu1 %v25907_v23 }
 0x336   :  { %v27467_v60 = vpop.f32.mrb[20].mxu1  ;;  %v25843_v52 = vld [vmem:[#allocation2 + $0x5c] sm:$0xff]  }
 0x337   :  { %23463 = vmatpush3.bf16.msra.mxu0 %v25835_v26  ;;  %v5317_v10 = vpop.f32.mrb[21].mxu1 }
 0x338   :  { %23464 = vmatprep.subr.bf16.mxu0 %v25848_v57  ;;  %v23275_v33 = vpop.f32.mrb[22].mxu1 }
 0x339   :  { %v27469_v39 = vpop.f32.mrb[23].mxu1 }
 0x33a   :  { %23145 = vmatmul.mubr.bf16.gmra.mrb[100].mxu0 %v25827_v44  ;;  %30579 = vst [vmem:[#allocation14_spill] sm:$0xff] %v27469_v39  ;;  %v23278_v56 = vpop.f32.mrb[24].mxu1  ;;  %v25840_v44 = vld [vmem:[#allocation2 + $0x54] sm:$0xff]  }
 0x33b   :  { %23148 = vmatprep.mubr.bf16.mxu0 %v25830_v17  ;;  %23465 = vmatpush3.bf16.msra.mxu0 %v25848_v57  ;;  %v27471_v59 = vpop.f32.mrb[25].mxu1  ;;  %v25910_v56 = vld [vmem:[#allocation2 + $0x170] sm:$0xff]  }
 0x33c   :  { %23466 = vmatprep.subr.bf16.mxu0 %v25861_v41  ;;  %30580 = vst [vmem:[#allocation15_spill] sm:$0xff] %v27471_v59  ;;  %v27473_v24 = vpop.f32.mrb[26].mxu1  ;;  %23444 = vmatprep.mubr.bf16.mxu1 %v25910_v56 }
 0x33d   :  { %30581 = vst [vmem:[#allocation16_spill] sm:$0xff] %v27473_v24  ;;  %v27475_v38 = vpop.f32.mrb[27].mxu1  ;;  %23445 = vmatmul.mubr.bf16.gmra.mrb[176].mxu1 %v25911_v8 }
 0x33e   :  { %30582 = vst [vmem:[#allocation17_spill] sm:$0xff] %v27475_v38  ;;  %v27479_v34 = vpop.f32.mrb[28].mxu1 }
 0x33f   :  { %23467 = vmatpush3.bf16.msra.mxu0 %v25861_v41  ;;  %30584 = vst [vmem:[#allocation19_spill] sm:$0xff] %v27479_v34  ;;  %v27481_v21 = vpop.f32.mrb[29].mxu1 }
 0x340   :  { %23468 = vmatprep.subr.bf16.mxu0 %v25874_v48  ;;  %30585 = vst [vmem:[#allocation20_spill] sm:$0xff] %v27481_v21  ;;  %v27483_v5 = vpop.f32.mrb[30].mxu1 }
 0x341   :  { %30586 = vst [vmem:[#allocation21_spill] sm:$0xff] %v27483_v5  ;;  %v5352_v31 = vpop.f32.mrb[31].mxu1 }
 0x342   :  { %23149 = vmatmul.mubr.bf16.gmra.mrb[104].mxu0 %v25831_v47  ;;  %v27488_v46 = vpop.f32.mrb[32].mxu1 }
 0x343   :  { %23152 = vmatprep.mubr.bf16.mxu0 %v25834_v36  ;;  %23469 = vmatpush3.bf16.msra.mxu0 %v25874_v48  ;;  %30587 = vst [vmem:[#allocation22_spill] sm:$0xff] %v27488_v46  ;;  %v5365_v42 = vpop.f32.mrb[33].mxu1 }
 0x344   :  { %23470 = vmatprep.subr.bf16.mxu0 %v25887_v4  ;;  %v23287_v3 = vpop.f32.mrb[34].mxu1 }
 0x345   :  { %v23030_v18 = vpop.f32.mrb[0].mxu0  ;;  %v27491_v49 = vpop.f32.mrb[35].mxu1 }
 0x346   :  { %v27485_v11 = vpop.f32.mrb[1].mxu0  ;;  %v3599_v30 = vrot.slane %v23030_v18, 7  ;;  %30588 = vst [vmem:[#allocation23_spill] sm:$0xff] %v27491_v49  ;;  %v23290_v6 = vpop.f32.mrb[36].mxu1 }
 0x347   :  { %v23031_v51 = vpop.f32.mrb[2].mxu0  ;;  %23471 = vmatpush3.bf16.msra.mxu0 %v25887_v4  ;;  %v30502_v58 = vrot.slane %v27485_v11, 7  ;;  %v27503_v25 = vpop.f32.mrb[37].mxu1 }
 0x348   :  { %v3600_v16 = vrot.slane %v23031_v51, 7  ;;  %v3121_v19 = vpop.f32.mrb[3].mxu0  ;;  %23472 = vmatprep.subr.bf16.mxu0 %v25900_v29  ;;  %30589 = vst [vmem:[#allocation24_spill] sm:$0xff] %v27503_v25  ;;  %v27505_v28 = vpop.f32.mrb[38].mxu1 }
 0x349   :  { %v3598_v45 = vrot.slane %v3121_v19, 7  ;;  %30590 = vst [vmem:[#allocation25_spill] sm:$0xff] %v27505_v28  ;;  %v27507_v17 = vpop.f32.mrb[39].mxu1 }
 0x34a   :  { %23153 = vmatmul.mubr.bf16.gmra.mrb[108].mxu0 %v25836_v13  ;;  %v27495_v26 = vsel %vm3695_vm0, %v3599_v30, %v3600_v16  ;;  %30591 = vst [vmem:[#allocation26_spill] sm:$0xff] %v27507_v17  ;;  %v27509_v32 = vpop.f32.mrb[40].mxu1 }
 0x34b   :  { %23156 = vmatprep.mubr.bf16.mxu0 %v25839_v61  ;;  %23473 = vmatpush3.bf16.msra.mxu0 %v25900_v29  ;;  %v27501_v55 = vsel %vm3695_vm0, %v30502_v58, %v3598_v45  ;;  %30592 = vst [vmem:[#allocation27_spill] sm:$0xff] %v27509_v32  ;;  %v27511_v47 = vpop.f32.mrb[41].mxu1  ;;  %v25847_v45 = vld [vmem:[#allocation2 + $0x6c] sm:$0xff]  }
 0x34c   :  { %30593 = vst [vmem:[#allocation28_spill] sm:$0xff] %v27511_v47  ;;  %v27513_v27 = vpop.f32.mrb[42].mxu1 }
 0x34d   :  { %v23034_v40 = vpop.f32.mrb[4].mxu0  ;;  %30594 = vst [vmem:[#allocation29_spill] sm:$0xff] %v27513_v27  ;;  %v5400_v54 = vpop.f32.mrb[43].mxu1 }
 0x34e   :  { %v3134_v57 = vpop.f32.mrb[5].mxu0  ;;  %v3603_v48 = vrot.slane %v23034_v40, 7  ;;  %v27523_v18 = vpop.f32.mrb[44].mxu1 }
 0x34f   :  { %v3601_v41 = vrot.slane %v3134_v57, 7  ;;  %v23035_v63 = vpop.f32.mrb[6].mxu0  ;;  %30595 = vst [vmem:[#allocation30_spill] sm:$0xff] %v27523_v18  ;;  %v5413_v31 = vpop.f32.mrb[45].mxu1 }
 0x350   :  { %v3604_v10 = vrot.slane %v23035_v63, 7  ;;  %v3137_v33 = vpop.f32.mrb[7].mxu0  ;;  %v23299_v61 = vpop.f32.mrb[46].mxu1 }
 0x351   :  { %v3602_v36 = vrot.slane %v3137_v33, 7  ;;  %v27517_v4 = vsel %vm3695_vm0, %v3600_v16, %v3601_v41  ;;  %v25844_v16 = vld [vmem:[#allocation2 + $0x64] sm:$0xff]   ;;  %v27529_v19 = vpop.f32.mrb[47].mxu1 }
 0x352   :  { %23157 = vmatmul.mubr.bf16.gmra.mrb[112].mxu0 %v25840_v44  ;;  %v27521_v29 = vsel %vm3695_vm0, %v3603_v48, %v3604_v10  ;;  %30596 = vst [vmem:[#allocation31_spill] sm:$0xff] %v27529_v19  ;;  %v23302_v3 = vpop.f32.mrb[48].mxu1  ;;  %v25915_v41 = vld [vmem:[#allocation2 + $0x180] sm:$0xff]  }
 0x353   :  { %23160 = vmatprep.mubr.bf16.mxu0 %v25843_v52  ;;  %v27527_v13 = vsel %vm3695_vm0, %v3602_v36, %v3603_v48  ;;  %v27531_v23 = vpop.f32.mrb[49].mxu1  ;;  %v25916_v52 = vld [vmem:[#allocation2 + $0x188] sm:$0xff]   ;;  %23448 = vmatprep.mubr.bf16.mxu1 %v25915_v41  ;;  %v25852_v3 = vld [vmem:[#allocation2 + $0x7c] sm:$0xff]  }
 0x354   :  { %30597 = vst [vmem:[#allocation32_spill] sm:$0xff] %v27531_v23  ;;  %v27533_v44 = vpop.f32.mrb[50].mxu1  ;;  %v25913_v48 = vld [vmem:[#allocation7 + $0x178] sm:$0xff]   ;;  %23449 = vmatmul.mubr.bf16.gmra.mrb[180].mxu1 %v25916_v52 }
 0x355   :  { %v23038_v51 = vpop.f32.mrb[8].mxu0  ;;  %30598 = vst [vmem:[#allocation33_spill] sm:$0xff] %v27533_v44  ;;  %v27535_v63 = vpop.f32.mrb[51].mxu1  ;;  %23474 = vmatprep.subr.bf16.mxu0 %v25913_v48 }
 0x356   :  { %v3150_v30 = vpop.f32.mrb[9].mxu0  ;;  %v3607_v6 = vrot.slane %v23038_v51, 7  ;;  %30599 = vst [vmem:[#allocation34_spill] sm:$0xff] %v27535_v63  ;;  %v27537_v10 = vpop.f32.mrb[52].mxu1  ;;  %v25849_v51 = vld [vmem:[#allocation2 + $0x74] sm:$0xff]   ;;  %23475 = vmatpush3.bf16.msra.mxu0 %v25913_v48 }
 0x357   :  { %v23039_v42 = vpop.f32.mrb[10].mxu0  ;;  %v3605_v40 = vrot.slane %v3150_v30, 7  ;;  %30600 = vst [vmem:[#allocation35_spill] sm:$0xff] %v27537_v10  ;;  %v27547_v56 = vpop.f32.mrb[53].mxu1  ;;  %v25919_v10 = vld [vmem:[#allocation2 + $0x190] sm:$0xff]  }
 0x358   :  { %v3153_v7 = vpop.f32.mrb[11].mxu0  ;;  %30601 = vst [vmem:[#allocation36_spill] sm:$0xff] %v27547_v56  ;;  %v27549_v8 = vpop.f32.mrb[54].mxu1  ;;  %v3608_v30 = vrot.slane %v23039_v42, 7  ;;  %v25920_v42 = vld [vmem:[#allocation2 + $0x198] sm:$0xff]   ;;  %23452 = vmatprep.mubr.bf16.mxu1 %v25919_v10 }
 0x359   :  { %v3606_v57 = vrot.slane %v3153_v7, 7  ;;  %30602 = vst [vmem:[#allocation37_spill] sm:$0xff] %v27549_v8  ;;  %v5448_v61 = vpop.f32.mrb[55].mxu1 }
 0x35a   :  { %23161 = vmatmul.mubr.bf16.gmra.mrb[116].mxu0 %v25844_v16  ;;  %v27551_v7 = vpop.f32.mrb[56].mxu1 }
 0x35b   :  { %23164 = vmatprep.mubr.bf16.mxu0 %v25847_v45  ;;  %v27541_v33 = vsel %vm3695_vm0, %v3606_v57, %v3607_v6  ;;  %v27545_v36 = vsel %vm3695_vm0, %v3605_v40, %v3606_v57  ;;  %30603 = vst [vmem:[#allocation38_spill] sm:$0xff] %v27551_v7  ;;  %v5461_v41 = vpop.f32.mrb[57].mxu1  ;;  %v25856_v7 = vld [vmem:[#allocation2 + $0x8c] sm:$0xff]  }
 0x35c   :  { %v23311_v56 = vpop.f32.mrb[58].mxu1  ;;  %23453 = vmatmul.mubr.bf16.gmra.mrb[184].mxu1 %v25920_v42  ;;  %v25923_v42 = vld [vmem:[#allocation2 + $0x1a0] sm:$0xff]  }
 0x35d   :  { %v23042_v54 = vpop.f32.mrb[12].mxu0  ;;  %v27557_v48 = vpop.f32.mrb[59].mxu1  ;;  %23456 = vmatprep.mubr.bf16.mxu1 %v25923_v42 }
 0x35e   :  { %v3166_v31 = vpop.f32.mrb[13].mxu0  ;;  %v3611_v6 = vrot.slane %v23042_v54, 7  ;;  %30604 = vst [vmem:[#allocation39_spill] sm:$0xff] %v27557_v48  ;;  %v23314_v54 = vpop.f32.mrb[60].mxu1 }
 0x35f   :  { %v3609_v16 = vrot.slane %v3166_v31, 7  ;;  %v23043_v45 = vpop.f32.mrb[14].mxu0  ;;  %v27567_v56 = vpop.f32.mrb[61].mxu1 }
 0x360   :  { %v3612_v40 = vrot.slane %v23043_v45, 7  ;;  %v3169_v57 = vpop.f32.mrb[15].mxu0  ;;  %30605 = vst [vmem:[#allocation40_spill] sm:$0xff] %v27567_v56 }
 0x361   :  { %v3610_v58 = vrot.slane %v3169_v57, 7  ;;  %v27555_v52 = vsel %vm3695_vm0, %v3608_v30, %v3609_v16  ;;  %v27569_v30 = vpop.f32.mrb[62].mxu1  ;;  %v25853_v57 = vld [vmem:[#allocation2 + $0x84] sm:$0xff]  }
 0x362   :  { %23165 = vmatmul.mubr.bf16.gmra.mrb[120].mxu0 %v25849_v51  ;;  %v27561_v31 = vsel %vm3695_vm0, %v3611_v6, %v3612_v40  ;;  %30606 = vst [vmem:[#allocation41_spill] sm:$0xff] %v27569_v30  ;;  %v27571_v41 = vpop.f32.mrb[63].mxu1 }
 0x363   :  { %23168 = vmatprep.mubr.bf16.mxu0 %v25852_v3  ;;  %v27565_v61 = vsel %vm3695_vm0, %v3609_v16, %v3610_v58  ;;  %30607 = vst [vmem:[#allocation42_spill] sm:$0xff] %v27571_v41  ;;  %v27573_v3 = vpop.f32.mrb[64].mxu1 }
 0x364   :  { %30608 = vst [vmem:[#allocation43_spill] sm:$0xff] %v27573_v3  ;;  %v27575_v58 = vpop.f32.mrb[65].mxu1  ;;  %v25860_v3 = vld [vmem:[#allocation2 + $0x9c] sm:$0xff]  }
 0x365   :  { %v23046_v45 = vpop.f32.mrb[16].mxu0  ;;  %30609 = vst [vmem:[#allocation44_spill] sm:$0xff] %v27575_v58  ;;  %v27577_v56 = vpop.f32.mrb[66].mxu1 }
 0x366   :  { %v3182_v51 = vpop.f32.mrb[17].mxu0  ;;  %v3615_v10 = vrot.slane %v23046_v45, 7  ;;  %30610 = vst [vmem:[#allocation45_spill] sm:$0xff] %v27577_v56  ;;  %v5496_v41 = vpop.f32.mrb[67].mxu1 }
 0x367   :  { %v3613_v48 = vrot.slane %v3182_v51, 7  ;;  %v23047_v6 = vpop.f32.mrb[18].mxu0  ;;  %v25924_v51 = vld [vmem:[#allocation2 + $0x1a8] sm:$0xff]   ;;  %v27587_v45 = vpop.f32.mrb[68].mxu1 }
 0x368   :  { %v3616_v54 = vrot.slane %v23047_v6, 7  ;;  %v3185_v8 = vpop.f32.mrb[19].mxu0  ;;  %30611 = vst [vmem:[#allocation46_spill] sm:$0xff] %v27587_v45  ;;  %v5509_v6 = vpop.f32.mrb[69].mxu1  ;;  %23457 = vmatmul.mubr.bf16.gmra.mrb[188].mxu1 %v25924_v51 }
 0x369   :  { %v3614_v16 = vrot.slane %v3185_v8, 7  ;;  %v27581_v30 = vsel %vm3695_vm0, %v3612_v40, %v3613_v48  ;;  %v23323_v40 = vpop.f32.mrb[70].mxu1 }
 0x36a   :  { %23169 = vmatmul.mubr.bf16.gmra.mrb[124].mxu0 %v25853_v57  ;;  %v27585_v63 = vsel %vm3695_vm0, %v3615_v10, %v3616_v54  ;;  %v25857_v57 = vld [vmem:[#allocation2 + $0x94] sm:$0xff]   ;;  %v27593_v41 = vpop.f32.mrb[71].mxu1 }
 0x36b   :  { %23172 = vmatprep.mubr.bf16.mxu0 %v25856_v7  ;;  %v27591_v8 = vsel %vm3695_vm0, %v3614_v16, %v3615_v10  ;;  %30612 = vst [vmem:[#allocation47_spill] sm:$0xff] %v27593_v41  ;;  %v23326_v54 = vpop.f32.mrb[72].mxu1  ;;  %v27601_v16 = vld [vmem:[#allocation7 + $0x80] sm:$0xff]  }
 0x36c   :  { %v27595_v7 = vpop.f32.mrb[73].mxu1  ;;  %23572 = vmatprep.subr.bf16.mxu0 %v27601_v16 }
 0x36d   :  { %v23050_v56 = vpop.f32.mrb[20].mxu0  ;;  %30613 = vst [vmem:[#allocation48_spill] sm:$0xff] %v27595_v7  ;;  %v27597_v19 = vpop.f32.mrb[74].mxu1  ;;  %v25865_v7 = vld [vmem:[#allocation2 + $0xac] sm:$0xff]  }
 0x36e   :  { %v3198_v48 = vpop.f32.mrb[21].mxu0  ;;  %v3619_v45 = vrot.slane %v23050_v56, 7  ;;  %30614 = vst [vmem:[#allocation49_spill] sm:$0xff] %v27597_v19  ;;  %v27599_v10 = vpop.f32.mrb[75].mxu1 }
 0x36f   :  { %v23051_v58 = vpop.f32.mrb[22].mxu0  ;;  %v3617_v42 = vrot.slane %v3198_v48, 7  ;;  %30615 = vst [vmem:[#allocation50_spill] sm:$0xff] %v27599_v10  ;;  %v27603_v51 = vpop.f32.mrb[76].mxu1 }
 0x370   :  { %v3201_v44 = vpop.f32.mrb[23].mxu0  ;;  %30616 = vst [vmem:[#allocation51_spill] sm:$0xff] %v27603_v51  ;;  %v27613_v56 = vpop.f32.mrb[77].mxu1  ;;  %v3620_v10 = vrot.slane %v23051_v58, 7 }
 0x371   :  { %v3618_v23 = vrot.slane %v3201_v44, 7  ;;  %30619 = vst [vmem:[#allocation54_spill] sm:$0xff] %v27613_v56  ;;  %v27616_v48 = vpop.f32.mrb[78].mxu1 }
 0x372   :  { %23173 = vmatmul.mubr.bf16.gmra.mrb[128].mxu0 %v25857_v57  ;;  %30620 = vst [vmem:[#allocation55_spill] sm:$0xff] %v27616_v48  ;;  %v25862_v57 = vld [vmem:[#allocation2 + $0xa4] sm:$0xff]   ;;  %v5544_v54 = vpop.f32.mrb[79].mxu1 }
 0x373   :  { %23176 = vmatprep.mubr.bf16.mxu0 %v25860_v3  ;;  %v27607_v6 = vsel %vm3695_vm0, %v3618_v23, %v3619_v45  ;;  %v27611_v40 = vsel %vm3695_vm0, %v3617_v42, %v3618_v23  ;;  %v27618_v45 = vpop.f32.mrb[80].mxu1 }
 0x374   :  { %30617 = vst [vmem:[#allocation52_spill] sm:$0xff] %v27607_v6  ;;  %30618 = vst [vmem:[#allocation53_spill] sm:$0xff] %v27611_v40  ;;  %v5557_v42 = vpop.f32.mrb[81].mxu1 }
 0x375   :  { %v23054_v44 = vpop.f32.mrb[24].mxu0  ;;  %30621 = vst [vmem:[#allocation56_spill] sm:$0xff] %v27618_v45  ;;  %v23335_v56 = vpop.f32.mrb[82].mxu1  ;;  %v25869_v45 = vld [vmem:[#allocation2 + $0xbc] sm:$0xff]  }
 0x376   :  { %v3214_v3 = vpop.f32.mrb[25].mxu0  ;;  %v3623_v41 = vrot.slane %v23054_v44, 7  ;;  %v27624_v48 = vpop.f32.mrb[83].mxu1 }
 0x377   :  { %v3621_v51 = vrot.slane %v3214_v3, 7  ;;  %v23055_v19 = vpop.f32.mrb[26].mxu0  ;;  %30623 = vst [vmem:[#allocation58_spill] sm:$0xff] %v27624_v48  ;;  %v23338_v3 = vpop.f32.mrb[84].mxu1 }
 0x378   :  { %v3624_v18 = vrot.slane %v23055_v19, 7  ;;  %v3217_v23 = vpop.f32.mrb[27].mxu0  ;;  %v27634_v44 = vpop.f32.mrb[85].mxu1 }
 0x379   :  { %v3622_v27 = vrot.slane %v3217_v23, 7  ;;  %v27622_v47 = vsel %vm3695_vm0, %v3620_v10, %v3621_v51  ;;  %30626 = vst [vmem:[#allocation61_spill] sm:$0xff] %v27634_v44  ;;  %v27636_v54 = vpop.f32.mrb[86].mxu1  ;;  %v25866_v23 = vld [vmem:[#allocation2 + $0xb4] sm:$0xff]  }
 0x37a   :  { %30622 = vst [vmem:[#allocation57_spill] sm:$0xff] %v27622_v47  ;;  %23177 = vmatmul.mubr.bf16.gmra.mrb[132].mxu0 %v25862_v57  ;;  %v27628_v58 = vsel %vm3695_vm0, %v3623_v41, %v3624_v18  ;;  %30627 = vst [vmem:[#allocation62_spill] sm:$0xff] %v27636_v54  ;;  %v27638_v57 = vpop.f32.mrb[87].mxu1 }
 0x37b   :  { %30624 = vst [vmem:[#allocation59_spill] sm:$0xff] %v27628_v58  ;;  %23180 = vmatprep.mubr.bf16.mxu0 %v25865_v7  ;;  %v27632_v19 = vsel %vm3695_vm0, %v3621_v51, %v3622_v27  ;;  %30628 = vst [vmem:[#allocation63_spill] sm:$0xff] %v27638_v57  ;;  %v27640_v41 = vpop.f32.mrb[88].mxu1  ;;  %v25870_v57 = vld [vmem:[#allocation2 + $0xc4] sm:$0xff]  }
 0x37c   :  { %30625 = vst [vmem:[#allocation60_spill] sm:$0xff] %v27632_v19  ;;  %30629 = vst [vmem:[#allocation64_spill] sm:$0xff] %v27640_v41  ;;  %v27642_v17 = vpop.f32.mrb[89].mxu1 }
 0x37d   :  { %v23058_v56 = vpop.f32.mrb[28].mxu0  ;;  %30630 = vst [vmem:[#allocation65_spill] sm:$0xff] %v27642_v17  ;;  %v27644_v51 = vpop.f32.mrb[90].mxu1 }
 0x37e   :  { %v3230_v10 = vpop.f32.mrb[29].mxu0  ;;  %v3627_v7 = vrot.slane %v23058_v56, 7  ;;  %30631 = vst [vmem:[#allocation66_spill] sm:$0xff] %v27644_v51  ;;  %v5592_v44 = vpop.f32.mrb[91].mxu1 }
 0x37f   :  { %v3625_v42 = vrot.slane %v3230_v10, 7  ;;  %v23059_v48 = vpop.f32.mrb[30].mxu0  ;;  %v27654_v41 = vpop.f32.mrb[92].mxu1  ;;  %v25873_v44 = vld [vmem:[#allocation2 + $0xe4] sm:$0xff]  }
 0x380   :  { %v3628_v3 = vrot.slane %v23059_v48, 7  ;;  %v3233_v32 = vpop.f32.mrb[31].mxu0  ;;  %30634 = vst [vmem:[#allocation69_spill] sm:$0xff] %v27654_v41 }
 0x381   :  { %v3626_v27 = vrot.slane %v3233_v32, 7  ;;  %v27648_v54 = vsel %vm3695_vm0, %v3624_v18, %v3625_v42  ;;  %v5605_v32 = vpop.f32.mrb[93].mxu1 }
 0x382   :  { %30632 = vst [vmem:[#allocation67_spill] sm:$0xff] %v27648_v54  ;;  %23181 = vmatmul.mubr.bf16.gmra.mrb[136].mxu0 %v25866_v23  ;;  %v27652_v10 = vsel %vm3695_vm0, %v3627_v7, %v3628_v3  ;;  %v23347_v51 = vpop.f32.mrb[94].mxu1 }
 0x383   :  { %30633 = vst [vmem:[#allocation68_spill] sm:$0xff] %v27652_v10  ;;  %23184 = vmatprep.mubr.bf16.mxu0 %v25869_v45  ;;  %v27658_v48 = vsel %vm3695_vm0, %v3626_v27, %v3627_v7  ;;  %v27660_v18 = vpop.f32.mrb[95].mxu1 }
 0x384   :  { %30635 = vst [vmem:[#allocation70_spill] sm:$0xff] %v27658_v48  ;;  %30636 = vst [vmem:[#allocation71_spill] sm:$0xff] %v27660_v18  ;;  %v23366_v28 = vpop.f32.mrb[96].mxu1 }
 0x385   :  { %v23062_v56 = vpop.f32.mrb[32].mxu0  ;;  %v27662_v49 = vpop.f32.mrb[97].mxu1 }
 0x386   :  { %v3246_v17 = vpop.f32.mrb[33].mxu0  ;;  %v3631_v3 = vrot.slane %v23062_v56, 7  ;;  %v27664_v41 = vpop.f32.mrb[98].mxu1 }
 0x387   :  { %v23063_v23 = vpop.f32.mrb[34].mxu0  ;;  %v3629_v25 = vrot.slane %v3246_v17, 7  ;;  %v27674_v51 = vpop.f32.mrb[99].mxu1  ;;  %v25875_v17 = vld [vmem:[#allocation2 + $0xec] sm:$0xff]  }
 0x388   :  { %v3249_v42 = vpop.f32.mrb[35].mxu0  ;;  %v3632_v56 = vrot.slane %v23063_v23, 7  ;;  %v27676_v48 = vpop.f32.mrb[100].mxu1 }
 0x389   :  { %v3630_v45 = vrot.slane %v3249_v42, 7 }
 0x38a   :  { %23185 = vmatmul.mubr.bf16.gmra.mrb[140].mxu0 %v25870_v57  ;;  %v25878_v57 = vld [vmem:[#allocation2 + $0xf4] sm:$0xff]  }
 0x38b   :  { %v27668_v7 = vsel %vm3695_vm0, %v3630_v45, %v3631_v3  ;;  %v27672_v27 = vsel %vm3695_vm0, %v3629_v25, %v3630_v45  ;;  %23188 = vmatprep.mubr.bf16.mxu0 %v25873_v44  ;;  %v27682_v44 = vpop.f32.mrb[101].mxu1 }
 0x38c   :  { %30637 = vst [vmem:[#allocation72_spill] sm:$0xff] %v27668_v7  ;;  %30638 = vst [vmem:[#allocation73_spill] sm:$0xff] %v27672_v27  ;;  %v27688_v23 = vpop.f32.mrb[102].mxu1  ;;  %v25882_v7 = vld [vmem:[#allocation2 + $0x104] sm:$0xff]  }
 0x38d   :  { %v23066_v28 = vpop.f32.mrb[36].mxu0 }
 0x38e   :  { %v3262_v32 = vpop.f32.mrb[37].mxu0  ;;  %v3635_v46 = vrot.slane %v23066_v28, 7  ;;  %v6122_v28 = vpop.f32.mrb[103].mxu1 }
 0x38f   :  { %v3633_v42 = vrot.slane %v3262_v32, 7  ;;  %v23067_v18 = vpop.f32.mrb[38].mxu0 }
 0x390   :  { %v3636_v10 = vrot.slane %v23067_v18, 7  ;;  %v3265_v54 = vpop.f32.mrb[39].mxu0 }
 0x391   :  { %v27680_v3 = vsel %vm3695_vm0, %v3632_v56, %v3633_v42  ;;  %v3634_v25 = vrot.slane %v3265_v54, 7  ;;  %v25879_v56 = vld [vmem:[#allocation2 + $0xfc] sm:$0xff]  }
 0x392   :  { %30639 = vst [vmem:[#allocation74_spill] sm:$0xff] %v27680_v3  ;;  %v27686_v45 = vsel %vm3695_vm0, %v3635_v46, %v3636_v10  ;;  %23189 = vmatmul.mubr.bf16.gmra.mrb[144].mxu0 %v25875_v17  ;;  %v27694_v46 = vpop.f32.mrb[104].mxu1 }
 0x393   :  { %30640 = vst [vmem:[#allocation75_spill] sm:$0xff] %v27686_v45  ;;  %v27692_v18 = vsel %vm3695_vm0, %v3633_v42, %v3634_v25  ;;  %23192 = vmatprep.mubr.bf16.mxu0 %v25878_v57  ;;  %v6135_v42 = vpop.f32.mrb[105].mxu1 }
 0x394   :  { %30641 = vst [vmem:[#allocation76_spill] sm:$0xff] %v27692_v18  ;;  %v23375_v25 = vpop.f32.mrb[106].mxu1  ;;  %v25883_v18 = vld [vmem:[#allocation2 + $0x10c] sm:$0xff]  }
 0x395   :  { %v23070_v32 = vpop.f32.mrb[40].mxu0  ;;  %v27708_v28 = vpop.f32.mrb[107].mxu1 }
 0x396   :  { %v3278_v27 = vpop.f32.mrb[41].mxu0  ;;  %v3639_v5 = vrot.slane %v23070_v32, 7  ;;  %v23378_v42 = vpop.f32.mrb[108].mxu1 }
 0x397   :  { %v3637_v3 = vrot.slane %v3278_v27, 7  ;;  %v23071_v54 = vpop.f32.mrb[42].mxu0 }
 0x398   :  { %v3640_v21 = vrot.slane %v23071_v54, 7  ;;  %v3281_v34 = vpop.f32.mrb[43].mxu0 }
 0x399   :  { %v27698_v17 = vsel %vm3695_vm0, %v3636_v10, %v3637_v3  ;;  %v3638_v45 = vrot.slane %v3281_v34, 7  ;;  %v25886_v3 = vld [vmem:[#allocation2 + $0x114] sm:$0xff]  }
 0x39a   :  { %30642 = vst [vmem:[#allocation77_spill] sm:$0xff] %v27698_v17  ;;  %v27702_v57 = vsel %vm3695_vm0, %v3639_v5, %v3640_v21  ;;  %23193 = vmatmul.mubr.bf16.gmra.mrb[148].mxu0 %v25879_v56 }
 0x39b   :  { %30643 = vst [vmem:[#allocation78_spill] sm:$0xff] %v27702_v57  ;;  %v27706_v27 = vsel %vm3695_vm0, %v3638_v45, %v3639_v5  ;;  %23196 = vmatprep.mubr.bf16.mxu0 %v25882_v7  ;;  %v27710_v57 = vpop.f32.mrb[109].mxu1 }
 0x39c   :  { %30644 = vst [vmem:[#allocation79_spill] sm:$0xff] %v27706_v27  ;;  %v27712_v56 = vpop.f32.mrb[110].mxu1 }
 0x39d   :  { %v23074_v32 = vpop.f32.mrb[44].mxu0  ;;  %v27722_v45 = vpop.f32.mrb[111].mxu1 }
 0x39e   :  { %v3294_v54 = vpop.f32.mrb[45].mxu0  ;;  %v3643_v17 = vrot.slane %v23074_v32, 7  ;;  %v27724_v24 = vpop.f32.mrb[112].mxu1 }
 0x39f   :  { %v23075_v10 = vpop.f32.mrb[46].mxu0  ;;  %v3641_v19 = vrot.slane %v3294_v54, 7  ;;  %v25888_v54 = vld [vmem:[#allocation2 + $0x11c] sm:$0xff]  }
 0x3a0   :  { %v3297_v34 = vpop.f32.mrb[47].mxu0 }
 0x3a1   :  { %v3642_v21 = vrot.slane %v3297_v34, 7  ;;  %v3644_v34 = vrot.slane %v23075_v10, 7 }
 0x3a2   :  { %23197 = vmatmul.mubr.bf16.gmra.mrb[152].mxu0 %v25883_v18  ;;  %v25891_v18 = vld [vmem:[#allocation2 + $0x124] sm:$0xff]  }
 0x3a3   :  { %v27716_v5 = vsel %vm3695_vm0, %v3642_v21, %v3643_v17  ;;  %v27720_v7 = vsel %vm3695_vm0, %v3641_v19, %v3642_v21  ;;  %23200 = vmatprep.mubr.bf16.mxu0 %v25886_v3  ;;  %v27730_v3 = vpop.f32.mrb[113].mxu1 }
 0x3a4   :  { %30645 = vst [vmem:[#allocation80_spill] sm:$0xff] %v27716_v5  ;;  %30646 = vst [vmem:[#allocation81_spill] sm:$0xff] %v27720_v7  ;;  %v27736_v10 = vpop.f32.mrb[114].mxu1  ;;  %v25895_v5 = vld [vmem:[#allocation2 + $0x134] sm:$0xff]  }
 0x3a5   :  { %v23078_v25 = vpop.f32.mrb[48].mxu0 }
 0x3a6   :  { %v3310_v32 = vpop.f32.mrb[49].mxu0  ;;  %v3647_v58 = vrot.slane %v23078_v25, 7  ;;  %v6170_v25 = vpop.f32.mrb[115].mxu1 }
 0x3a7   :  { %v3645_v42 = vrot.slane %v3310_v32, 7  ;;  %v23079_v27 = vpop.f32.mrb[50].mxu0 }
 0x3a8   :  { %v3648_v47 = vrot.slane %v23079_v27, 7  ;;  %v3313_v38 = vpop.f32.mrb[51].mxu0 }
 0x3a9   :  { %v27728_v17 = vsel %vm3695_vm0, %v3644_v34, %v3645_v42  ;;  %v3646_v19 = vrot.slane %v3313_v38, 7  ;;  %v25892_v34 = vld [vmem:[#allocation2 + $0x12c] sm:$0xff]  }
 0x3aa   :  { %30647 = vst [vmem:[#allocation82_spill] sm:$0xff] %v27728_v17  ;;  %v27734_v21 = vsel %vm3695_vm0, %v3647_v58, %v3648_v47  ;;  %23201 = vmatmul.mubr.bf16.gmra.mrb[156].mxu0 %v25888_v54  ;;  %v27742_v58 = vpop.f32.mrb[116].mxu1 }
 0x3ab   :  { %30648 = vst [vmem:[#allocation83_spill] sm:$0xff] %v27734_v21  ;;  %v27740_v27 = vsel %vm3695_vm0, %v3645_v42, %v3646_v19  ;;  %23204 = vmatprep.mubr.bf16.mxu0 %v25891_v18  ;;  %30650 = vst [vmem:[#allocation85_spill] sm:$0xff] %v27742_v58  ;;  %v6183_v42 = vpop.f32.mrb[117].mxu1 }
 0x3ac   :  { %30649 = vst [vmem:[#allocation84_spill] sm:$0xff] %v27740_v27  ;;  %v23387_v19 = vpop.f32.mrb[118].mxu1  ;;  %v25896_v27 = vld [vmem:[#allocation2 + $0x13c] sm:$0xff]  }
 0x3ad   :  { %v23082_v32 = vpop.f32.mrb[52].mxu0  ;;  %v27756_v25 = vpop.f32.mrb[119].mxu1 }
 0x3ae   :  { %v3326_v7 = vpop.f32.mrb[53].mxu0  ;;  %v3651_v59 = vrot.slane %v23082_v32, 7  ;;  %30654 = vst [vmem:[#allocation89_spill] sm:$0xff] %v27756_v25  ;;  %v23390_v42 = vpop.f32.mrb[120].mxu1 }
 0x3af   :  { %v3649_v17 = vrot.slane %v3326_v7, 7  ;;  %v23083_v38 = vpop.f32.mrb[54].mxu0 }
 0x3b0   :  { %v3652_v40 = vrot.slane %v23083_v38, 7  ;;  %v3329_v6 = vpop.f32.mrb[55].mxu0 }
 0x3b1   :  { %v27746_v54 = vsel %vm3695_vm0, %v3648_v47, %v3649_v17  ;;  %v3650_v21 = vrot.slane %v3329_v6, 7  ;;  %v25899_v17 = vld [vmem:[#allocation2 + $0x144] sm:$0xff]  }
 0x3b2   :  { %30651 = vst [vmem:[#allocation86_spill] sm:$0xff] %v27746_v54  ;;  %v27750_v18 = vsel %vm3695_vm0, %v3651_v59, %v3652_v40  ;;  %23205 = vmatmul.mubr.bf16.gmra.mrb[160].mxu0 %v25892_v34 }
 0x3b3   :  { %30652 = vst [vmem:[#allocation87_spill] sm:$0xff] %v27750_v18  ;;  %v27754_v7 = vsel %vm3695_vm0, %v3650_v21, %v3651_v59  ;;  %23208 = vmatprep.mubr.bf16.mxu0 %v25895_v5  ;;  %v27758_v18 = vpop.f32.mrb[121].mxu1 }
 0x3b4   :  { %30653 = vst [vmem:[#allocation88_spill] sm:$0xff] %v27754_v7  ;;  %30655 = vst [vmem:[#allocation90_spill] sm:$0xff] %v27758_v18  ;;  %v27760_v34 = vpop.f32.mrb[122].mxu1 }
 0x3b5   :  { %v23086_v32 = vpop.f32.mrb[56].mxu0  ;;  %30656 = vst [vmem:[#allocation91_spill] sm:$0xff] %v27760_v34  ;;  %v27770_v21 = vpop.f32.mrb[123].mxu1 }
 0x3b6   :  { %v3342_v38 = vpop.f32.mrb[57].mxu0  ;;  %v3655_v54 = vrot.slane %v23086_v32, 7  ;;  %30659 = vst [vmem:[#allocation94_spill] sm:$0xff] %v27770_v21  ;;  %v27772_v58 = vpop.f32.mrb[124].mxu1 }
 0x3b7   :  { %v23087_v47 = vpop.f32.mrb[58].mxu0  ;;  %v3653_v39 = vrot.slane %v3342_v38, 7  ;;  %v25901_v38 = vld [vmem:[#allocation2 + $0x14c] sm:$0xff]   ;;  %30660 = vst [vmem:[#allocation95_spill] sm:$0xff] %v27772_v58 }
 0x3b8   :  { %v3345_v6 = vpop.f32.mrb[59].mxu0 }
 0x3b9   :  { %v3654_v40 = vrot.slane %v3345_v6, 7  ;;  %v3656_v6 = vrot.slane %v23087_v47, 7 }
 0x3ba   :  { %23209 = vmatmul.mubr.bf16.gmra.mrb[164].mxu0 %v25896_v27  ;;  %v25904_v27 = vld [vmem:[#allocation2 + $0x154] sm:$0xff]  }
 0x3bb   :  { %v27764_v59 = vsel %vm3695_vm0, %v3654_v40, %v3655_v54  ;;  %v27768_v5 = vsel %vm3695_vm0, %v3653_v39, %v3654_v40  ;;  %23212 = vmatprep.mubr.bf16.mxu0 %v25899_v17  ;;  %v27778_v17 = vpop.f32.mrb[125].mxu1 }
 0x3bc   :  { %30657 = vst [vmem:[#allocation92_spill] sm:$0xff] %v27764_v59  ;;  %30658 = vst [vmem:[#allocation93_spill] sm:$0xff] %v27768_v5  ;;  %v27784_v47 = vpop.f32.mrb[126].mxu1  ;;  %v25908_v59 = vld [vmem:[#allocation2 + $0x164] sm:$0xff]  }
 0x3bd   :  { %v23090_v19 = vpop.f32.mrb[60].mxu0  ;;  %30662 = vst [vmem:[#allocation97_spill] sm:$0xff] %v27778_v17  ;;  %30664 = vst [vmem:[#allocation99_spill] sm:$0xff] %v27784_v47 }
 0x3be   :  { %v3358_v32 = vpop.f32.mrb[61].mxu0  ;;  %v3659_v18 = vrot.slane %v23090_v19, 7  ;;  %v6218_v19 = vpop.f32.mrb[127].mxu1 }
 0x3bf   :  { %v3657_v42 = vrot.slane %v3358_v32, 7  ;;  %v23091_v7 = vpop.f32.mrb[62].mxu0 }
 0x3c0   :  { %v3660_v34 = vrot.slane %v23091_v7, 7  ;;  %v3361_v25 = vpop.f32.mrb[63].mxu0 }
 0x3c1   :  { %v27776_v54 = vsel %vm3695_vm0, %v3656_v6, %v3657_v42  ;;  %v3658_v39 = vrot.slane %v3361_v25, 7  ;;  %v25905_v6 = vld [vmem:[#allocation2 + $0x15c] sm:$0xff]  }
 0x3c2   :  { %30661 = vst [vmem:[#allocation96_spill] sm:$0xff] %v27776_v54  ;;  %v27782_v40 = vsel %vm3695_vm0, %v3659_v18, %v3660_v34  ;;  %23213 = vmatmul.mubr.bf16.gmra.mrb[168].mxu0 %v25901_v38  ;;  %v27790_v18 = vpop.f32.mrb[128].mxu1 }
 0x3c3   :  { %30663 = vst [vmem:[#allocation98_spill] sm:$0xff] %v27782_v40  ;;  %v27788_v7 = vsel %vm3695_vm0, %v3657_v42, %v3658_v39  ;;  %23216 = vmatprep.mubr.bf16.mxu0 %v25904_v27  ;;  %30666 = vst [vmem:[#allocation101_spill] sm:$0xff] %v27790_v18  ;;  %v6231_v42 = vpop.f32.mrb[129].mxu1 }
 0x3c4   :  { %30665 = vst [vmem:[#allocation100_spill] sm:$0xff] %v27788_v7  ;;  %v23399_v39 = vpop.f32.mrb[130].mxu1  ;;  %v25909_v7 = vld [vmem:[#allocation2 + $0x16c] sm:$0xff]  }
 0x3c5   :  { %v23094_v32 = vpop.f32.mrb[64].mxu0  ;;  %v27804_v19 = vpop.f32.mrb[131].mxu1 }
 0x3c6   :  { %v3374_v5 = vpop.f32.mrb[65].mxu0  ;;  %v3663_v17 = vrot.slane %v23094_v32, 7  ;;  %30670 = vst [vmem:[#allocation105_spill] sm:$0xff] %v27804_v19  ;;  %v23402_v42 = vpop.f32.mrb[132].mxu1 }
 0x3c7   :  { %v3661_v54 = vrot.slane %v3374_v5, 7  ;;  %v23095_v25 = vpop.f32.mrb[66].mxu0 }
 0x3c8   :  { %v3664_v58 = vrot.slane %v23095_v25, 7  ;;  %v3377_v21 = vpop.f32.mrb[67].mxu0 }
 0x3c9   :  { %v27794_v38 = vsel %vm3695_vm0, %v3660_v34, %v3661_v54  ;;  %v3662_v40 = vrot.slane %v3377_v21, 7  ;;  %v25912_v54 = vld [vmem:[#allocation2 + $0x174] sm:$0xff]  }
 0x3ca   :  { %30667 = vst [vmem:[#allocation102_spill] sm:$0xff] %v27794_v38  ;;  %v27798_v27 = vsel %vm3695_vm0, %v3663_v17, %v3664_v58  ;;  %23217 = vmatmul.mubr.bf16.gmra.mrb[172].mxu0 %v25905_v6 }
 0x3cb   :  { %30668 = vst [vmem:[#allocation103_spill] sm:$0xff] %v27798_v27  ;;  %v27802_v5 = vsel %vm3695_vm0, %v3662_v40, %v3663_v17  ;;  %23220 = vmatprep.mubr.bf16.mxu0 %v25908_v59  ;;  %v27806_v27 = vpop.f32.mrb[133].mxu1 }
 0x3cc   :  { %30669 = vst [vmem:[#allocation104_spill] sm:$0xff] %v27802_v5  ;;  %30671 = vst [vmem:[#allocation106_spill] sm:$0xff] %v27806_v27  ;;  %v27808_v6 = vpop.f32.mrb[134].mxu1 }
 0x3cd   :  { %v23098_v32 = vpop.f32.mrb[68].mxu0  ;;  %30672 = vst [vmem:[#allocation107_spill] sm:$0xff] %v27808_v6  ;;  %v27818_v40 = vpop.f32.mrb[135].mxu1 }
 0x3ce   :  { %v3390_v25 = vpop.f32.mrb[69].mxu0  ;;  %v3667_v38 = vrot.slane %v23098_v32, 7  ;;  %30675 = vst [vmem:[#allocation110_spill] sm:$0xff] %v27818_v40  ;;  %v27820_v47 = vpop.f32.mrb[136].mxu1 }
 0x3cf   :  { %v23099_v34 = vpop.f32.mrb[70].mxu0  ;;  %v3665_v18 = vrot.slane %v3390_v25, 7  ;;  %v25914_v25 = vld [vmem:[#allocation2 + $0x17c] sm:$0xff]   ;;  %30676 = vst [vmem:[#allocation111_spill] sm:$0xff] %v27820_v47 }
 0x3d0   :  { %v3393_v21 = vpop.f32.mrb[71].mxu0 }
 0x3d1   :  { %v3666_v58 = vrot.slane %v3393_v21, 7  ;;  %v3668_v21 = vrot.slane %v23099_v34, 7 }
 0x3d2   :  { %23221 = vmatmul.mubr.bf16.gmra.mrb[176].mxu0 %v25909_v7  ;;  %v25917_v7 = vld [vmem:[#allocation2 + $0x184] sm:$0xff]  }
 0x3d3   :  { %v27812_v59 = vsel %vm3695_vm0, %v3666_v58, %v3667_v38  ;;  %v27816_v17 = vsel %vm3695_vm0, %v3665_v18, %v3666_v58  ;;  %23224 = vmatprep.mubr.bf16.mxu0 %v25912_v54  ;;  %v27826_v54 = vpop.f32.mrb[137].mxu1 }
 0x3d4   :  { %30673 = vst [vmem:[#allocation108_spill] sm:$0xff] %v27812_v59  ;;  %30674 = vst [vmem:[#allocation109_spill] sm:$0xff] %v27816_v17  ;;  %v27832_v34 = vpop.f32.mrb[138].mxu1  ;;  %v25921_v59 = vld [vmem:[#allocation2 + $0x194] sm:$0xff]  }
 0x3d5   :  { %v23102_v39 = vpop.f32.mrb[72].mxu0  ;;  %30678 = vst [vmem:[#allocation113_spill] sm:$0xff] %v27826_v54  ;;  %30680 = vst [vmem:[#allocation115_spill] sm:$0xff] %v27832_v34  ;;  %v25933_v34 = vld [vmem:[#allocation7 + $0x88] sm:$0xff]  }
 0x3d6   :  { %v3406_v32 = vpop.f32.mrb[73].mxu0  ;;  %v3671_v27 = vrot.slane %v23102_v39, 7  ;;  %v6266_v39 = vpop.f32.mrb[139].mxu1 }
 0x3d7   :  { %v3669_v42 = vrot.slane %v3406_v32, 7  ;;  %v23103_v5 = vpop.f32.mrb[74].mxu0 }
 0x3d8   :  { %v3672_v6 = vrot.slane %v23103_v5, 7  ;;  %v3409_v19 = vpop.f32.mrb[75].mxu0 }
 0x3d9   :  { %v27824_v38 = vsel %vm3695_vm0, %v3668_v21, %v3669_v42  ;;  %v3670_v18 = vrot.slane %v3409_v19, 7  ;;  %v25918_v21 = vld [vmem:[#allocation2 + $0x18c] sm:$0xff]  }
 0x3da   :  { %30677 = vst [vmem:[#allocation112_spill] sm:$0xff] %v27824_v38  ;;  %v27830_v58 = vsel %vm3695_vm0, %v3671_v27, %v3672_v6  ;;  %23225 = vmatmul.mubr.bf16.gmra.mrb[180].mxu0 %v25914_v25  ;;  %v27838_v27 = vpop.f32.mrb[140].mxu1 }
 0x3db   :  { %30679 = vst [vmem:[#allocation114_spill] sm:$0xff] %v27830_v58  ;;  %v27836_v5 = vsel %vm3695_vm0, %v3669_v42, %v3670_v18  ;;  %23228 = vmatprep.mubr.bf16.mxu0 %v25917_v7  ;;  %30682 = vst [vmem:[#allocation117_spill] sm:$0xff] %v27838_v27  ;;  %v6279_v42 = vpop.f32.mrb[141].mxu1 }
 0x3dc   :  { %30681 = vst [vmem:[#allocation116_spill] sm:$0xff] %v27836_v5  ;;  %v23411_v18 = vpop.f32.mrb[142].mxu1  ;;  %v25922_v5 = vld [vmem:[#allocation2 + $0x19c] sm:$0xff]  }
 0x3dd   :  { %v23106_v32 = vpop.f32.mrb[76].mxu0  ;;  %v27852_v39 = vpop.f32.mrb[143].mxu1 }
 0x3de   :  { %v3422_v17 = vpop.f32.mrb[77].mxu0  ;;  %v3675_v54 = vrot.slane %v23106_v32, 7  ;;  %30686 = vst [vmem:[#allocation121_spill] sm:$0xff] %v27852_v39  ;;  %v23414_v42 = vpop.f32.mrb[144].mxu1 }
 0x3df   :  { %v3673_v38 = vrot.slane %v3422_v17, 7  ;;  %v23107_v19 = vpop.f32.mrb[78].mxu0 }
 0x3e0   :  { %v3676_v47 = vrot.slane %v23107_v19, 7  ;;  %v3425_v40 = vpop.f32.mrb[79].mxu0 }
 0x3e1   :  { %v27842_v25 = vsel %vm3695_vm0, %v3672_v6, %v3673_v38  ;;  %v3674_v58 = vrot.slane %v3425_v40, 7  ;;  %v25925_v38 = vld [vmem:[#allocation2 + $0xc] sm:$0xff]  }
 0x3e2   :  { %30683 = vst [vmem:[#allocation118_spill] sm:$0xff] %v27842_v25  ;;  %v27846_v7 = vsel %vm3695_vm0, %v3675_v54, %v3676_v47  ;;  %23229 = vmatmul.mubr.bf16.gmra.mrb[184].mxu0 %v25918_v21 }
 0x3e3   :  { %30684 = vst [vmem:[#allocation119_spill] sm:$0xff] %v27846_v7  ;;  %v27850_v17 = vsel %vm3695_vm0, %v3674_v58, %v3675_v54  ;;  %23232 = vmatprep.mubr.bf16.mxu0 %v25921_v59  ;;  %v27854_v7 = vpop.f32.mrb[145].mxu1 }
 0x3e4   :  { %30685 = vst [vmem:[#allocation120_spill] sm:$0xff] %v27850_v17  ;;  %30687 = vst [vmem:[#allocation122_spill] sm:$0xff] %v27854_v7  ;;  %v27856_v21 = vpop.f32.mrb[146].mxu1 }
 0x3e5   :  { %v23110_v32 = vpop.f32.mrb[80].mxu0  ;;  %30688 = vst [vmem:[#allocation123_spill] sm:$0xff] %v27856_v21  ;;  %v27866_v58 = vpop.f32.mrb[147].mxu1 }
 0x3e6   :  { %v3438_v19 = vpop.f32.mrb[81].mxu0  ;;  %v3679_v25 = vrot.slane %v23110_v32, 7 }
 0x3e7   :  { %v23111_v6 = vpop.f32.mrb[82].mxu0  ;;  %v3677_v27 = vrot.slane %v3438_v19, 7  ;;  %v25927_v19 = vld [vmem:[#allocation2 + $0x14] sm:$0xff]  }
 0x3e8   :  { %v3441_v40 = vpop.f32.mrb[83].mxu0 }
 0x3e9   :  { %v3678_v47 = vrot.slane %v3441_v40, 7  ;;  %v3680_v40 = vrot.slane %v23111_v6, 7 }
 0x3ea   :  { %23233 = vmatmul.mubr.bf16.gmra.mrb[188].mxu0 %v25922_v5  ;;  %v25928_v5 = vld [vmem:[#allocation2 + $0x1c] sm:$0xff]  }
 0x3eb   :  { %v27860_v59 = vsel %vm3695_vm0, %v3678_v47, %v3679_v25  ;;  %v27864_v54 = vsel %vm3695_vm0, %v3677_v27, %v3678_v47  ;;  %23476 = vmatprep.mubr.bf16.mxu0 %v25925_v38  ;;  %v27868_v25 = vpop.f32.mrb[148].mxu1 }
 0x3ec   :  { %30689 = vst [vmem:[#allocation124_spill] sm:$0xff] %v27860_v59  ;;  %30690 = vst [vmem:[#allocation125_spill] sm:$0xff] %v27864_v54  ;;  %v27874_v47 = vpop.f32.mrb[149].mxu1 }
 0x3ed   :  { %v23114_v18 = vpop.f32.mrb[84].mxu0  ;;  %30691 = vst [vmem:[#allocation126_spill] sm:$0xff] %v27868_v25  ;;  %30693 = vst [vmem:[#allocation128_spill] sm:$0xff] %v27874_v47  ;;  %v27880_v6 = vpop.f32.mrb[150].mxu1  ;;  %v25947_v25 = vld [vmem:[#allocation7 + $0x98] sm:$0xff]  }
 0x3ee   :  { %v3454_v32 = vpop.f32.mrb[85].mxu0  ;;  %v3683_v7 = vrot.slane %v23114_v18, 7  ;;  %30695 = vst [vmem:[#allocation130_spill] sm:$0xff] %v27880_v6  ;;  %v6314_v18 = vpop.f32.mrb[151].mxu1 }
 0x3ef   :  { %v3681_v42 = vrot.slane %v3454_v32, 7  ;;  %v23115_v17 = vpop.f32.mrb[86].mxu0  ;;  %v25940_v32 = vld [vmem:[#allocation7 + $0x90] sm:$0xff]  }
 0x3f0   :  { %v3684_v21 = vrot.slane %v23115_v17, 7  ;;  %v3457_v39 = vpop.f32.mrb[87].mxu0 }
 0x3f1   :  { %v27872_v27 = vsel %vm3695_vm0, %v3680_v40, %v3681_v42  ;;  %v3682_v38 = vrot.slane %v3457_v39, 7 }
 0x3f2   :  { %30692 = vst [vmem:[#allocation127_spill] sm:$0xff] %v27872_v27  ;;  %v27878_v54 = vsel %vm3695_vm0, %v3683_v7, %v3684_v21  ;;  %23477 = vmatmul.mubr.bf16.vlgmr.msra.gmra.mrb[192].mxu0 %v25927_v19  ;;  %v25929_v27 = vld [vmem:[#allocation2 + $0x24] sm:$0xff]   ;;  %v25930_v7 = vld [vmem:[#allocation2 + $0x2c] sm:$0xff]  }
 0x3f3   :  { %30694 = vst [vmem:[#allocation129_spill] sm:$0xff] %v27878_v54  ;;  %v27884_v17 = vsel %vm3695_vm0, %v3681_v42, %v3682_v38  ;;  %23573 = vmatpush3.bf16.msra.mxu0 %v27601_v16  ;;  %23480 = vmatprep.mubr.bf16.mxu0 %v25928_v5  ;;  %v27887_v42 = vpop.f32.mrb[152].mxu1 }
 0x3f4   :  { %30696 = vst [vmem:[#allocation131_spill] sm:$0xff] %v27884_v17  ;;  %23574 = vmatprep.subr.bf16.mxu0 %v25933_v34  ;;  %v6327_v38 = vpop.f32.mrb[153].mxu1 }
 0x3f5   :  { %v23118_v39 = vpop.f32.mrb[88].mxu0 }
 0x3f6   :  { %v3470_v40 = vpop.f32.mrb[89].mxu0  ;;  %v3687_v19 = vrot.slane %v23118_v39, 7  ;;  %v25954_v39 = vld [vmem:[#allocation7 + $0xa0] sm:$0xff]  }
 0x3f7   :  { %v3685_v59 = vrot.slane %v3470_v40, 7  ;;  %v23119_v47 = vpop.f32.mrb[90].mxu0  ;;  %23575 = vmatpush3.bf16.msra.mxu0 %v25933_v34  ;;  %v23423_v40 = vpop.f32.mrb[154].mxu1 }
 0x3f8   :  { %v3688_v54 = vrot.slane %v23119_v47, 7  ;;  %v3473_v6 = vpop.f32.mrb[91].mxu0  ;;  %23576 = vmatprep.subr.bf16.mxu0 %v25940_v32  ;;  %v27901_v47 = vpop.f32.mrb[155].mxu1 }
 0x3f9   :  { %v27891_v16 = vsel %vm3695_vm0, %v3684_v21, %v3685_v59  ;;  %v3686_v5 = vrot.slane %v3473_v6, 7  ;;  %30700 = vst [vmem:[#allocation135_spill] sm:$0xff] %v27901_v47  ;;  %v25931_v6 = vld [vmem:[#allocation2 + $0x34] sm:$0xff]   ;;  %v23426_v40 = vpop.f32.mrb[156].mxu1 }
 0x3fa   :  { %30697 = vst [vmem:[#allocation132_spill] sm:$0xff] %v27891_v16  ;;  %v27895_v18 = vsel %vm3695_vm0, %v3687_v19, %v3688_v54  ;;  %23481 = vmatmul.mubr.bf16.gmra.mrb[196].mxu0 %v25929_v27  ;;  %v25932_v16 = vld [vmem:[#allocation2 + $0x3c] sm:$0xff]  }
 0x3fb   :  { %30698 = vst [vmem:[#allocation133_spill] sm:$0xff] %v27895_v18  ;;  %v27899_v34 = vsel %vm3695_vm0, %v3686_v5, %v3687_v19  ;;  %23484 = vmatprep.mubr.bf16.mxu0 %v25930_v7  ;;  %23577 = vmatpush3.bf16.msra.mxu0 %v25940_v32  ;;  %v25961_v27 = vld [vmem:[#allocation7 + $0xa8] sm:$0xff]   ;;  %v27903_v7 = vpop.f32.mrb[157].mxu1  ;;  %v30701_v32 = vrot.slane %v27485_v11, 7 }
 0x3fc   :  { %30699 = vst [vmem:[#allocation134_spill] sm:$0xff] %v27899_v34  ;;  %23578 = vmatprep.subr.bf16.mxu0 %v25947_v25  ;;  %v27909_v47 = vpop.f32.mrb[158].mxu1 }
 0x3fd   :  { %v23122_v21 = vpop.f32.mrb[92].mxu0 }
 0x3fe   :  { %v3486_v59 = vpop.f32.mrb[93].mxu0  ;;  %v3691_v17 = vrot.slane %v23122_v21, 7  ;;  %v25968_v21 = vld [vmem:[#allocation7 + $0xb0] sm:$0xff]  }
 0x3ff   :  { %v23123_v38 = vpop.f32.mrb[94].mxu0  ;;  %23579 = vmatpush3.bf16.msra.mxu0 %v25947_v25  ;;  %v3689_v19 = vrot.slane %v3486_v59, 7 }
 0x400   :  { %v3692_v54 = vrot.slane %v23123_v38, 7  ;;  %v3489_v18 = vpop.f32.mrb[95].mxu0  ;;  %23580 = vmatprep.subr.bf16.mxu0 %v25954_v39 }
 0x401   :  { %v3690_v5 = vrot.slane %v3489_v18, 7  ;;  %v27919_v18 = vpop.f32.mrb[159].mxu1 }
 0x402   :  { %23485 = vmatmul.mubr.bf16.gmra.mrb[200].mxu0 %v25931_v6  ;;  %v3791_v34 = vsel %vm3695_vm0, %v3692_v54, %v30701_v32  ;;  %v25934_v6 = vld [vmem:[#allocation2 + $0x44] sm:$0xff]   ;;  %v25935_v32 = vld [vmem:[#allocation2 + $0x4c] sm:$0xff]  }
 0x403   :  { %v27913_v25 = vsel %vm3695_vm0, %v3690_v5, %v3691_v17  ;;  %v27917_v38 = vsel %vm3695_vm0, %v3689_v19, %v3690_v5  ;;  %23488 = vmatprep.mubr.bf16.mxu0 %v25932_v16  ;;  %23581 = vmatpush3.bf16.msra.mxu0 %v25954_v39  ;;  %v27923_v19 = vpop.f32.mrb[160].mxu1 }
 0x404   :  { %30702 = vst [vmem:[#allocation136_spill] sm:$0xff] %v27913_v25  ;;  %23582 = vmatprep.subr.bf16.mxu0 %v25961_v27  ;;  %v27927_v5 = vpop.f32.mrb[161].mxu1 }
 0x405   :  { %v23142_v11 = vpop.f32.mrb[96].mxu0  ;;  %v27930_v9 = vpop.f32.mrb[162].mxu1 }
 0x406   :  { %v4484_v59 = vpop.f32.mrb[97].mxu0 }
 0x407   :  { %v5238_v54 = vadd.f32 %v27438_v22, %v4484_v59  ;;  %v23143_v40 = vpop.f32.mrb[98].mxu0  ;;  %23583 = vmatpush3.bf16.msra.mxu0 %v25961_v27 }
 0x408   :  { %v5249_v17 = vadd.f32 %v27440_v37, %v23143_v40  ;;  %v4487_v25 = vpop.f32.mrb[99].mxu0  ;;  %23584 = vmatprep.subr.bf16.mxu0 %v25968_v21  ;;  %v6362_v37 = vpop.f32.mrb[163].mxu1  ;;  %v25937_v40 = vld [vmem:[#allocation2 + $0x5c] sm:$0xff]  }
 0x409   :  { %v5241_v16 = vadd.f32 %v27442_v62, %v4487_v25  ;;  %v6486_v39 = vadd.f32 %v27662_v49, %v5238_v54  ;;  %v25938_v37 = vld [vmem:[#allocation2 + $0x64] sm:$0xff]  }
 0x40a   :  { %v6489_v11 = vadd.f32 %v27664_v41, %v5249_v17  ;;  %23489 = vmatmul.mubr.bf16.gmra.mrb[204].mxu0 %v25934_v6  ;;  %v25936_v6 = vld [vmem:[#allocation2 + $0x54] sm:$0xff]   ;;  %v27945_v17 = vpop.f32.mrb[164].mxu1 }
 0x40b   :  { %v27932_v22 = vadd.f32 %v6486_v39, %v3791_v34  ;;  %v6487_v27 = vadd.f32 %v27674_v51, %v5241_v16  ;;  %23492 = vmatprep.mubr.bf16.mxu0 %v25935_v32  ;;  %23585 = vmatpush3.bf16.msra.mxu0 %v25968_v21 }
 0x40c   :  { %v27936_v59 = vadd.f32 %v6489_v11, %v27495_v26 }
 0x40d   :  { %v27939_v62 = vadd.f32 %v6487_v27, %v27501_v55  ;;  %v23146_v49 = vpop.f32.mrb[100].mxu0  ;;  %v6375_v55 = vpop.f32.mrb[165].mxu1 }
 0x40e   :  { %v5262_v25 = vadd.f32 %v27444_v15, %v23146_v49  ;;  %v4500_v41 = vpop.f32.mrb[101].mxu0  ;;  %v23435_v39 = vpop.f32.mrb[166].mxu1  ;;  %v25939_v49 = vld [vmem:[#allocation2 + $0x6c] sm:$0xff]  }
 0x40f   :  { %v5254_v54 = vadd.f32 %v27446_v12, %v4500_v41  ;;  %v23147_v34 = vpop.f32.mrb[102].mxu0 }
 0x410   :  { %v5265_v51 = vadd.f32 %v27448_v20, %v23147_v34  ;;  %v6492_v21 = vadd.f32 %v27676_v48, %v5262_v25  ;;  %v4503_v32 = vpop.f32.mrb[103].mxu0  ;;  %v27955_v20 = vpop.f32.mrb[167].mxu1  ;;  %v25975_v34 = vld [vmem:[#allocation7 + $0xb8] sm:$0xff]  }
 0x411   :  { %v6490_v26 = vadd.f32 %v27682_v44, %v5254_v54  ;;  %v23438_v41 = vpop.f32.mrb[168].mxu1  ;;  %23586 = vmatprep.subr.bf16.mxu0 %v25975_v34 }
 0x412   :  { %v27949_v16 = vadd.f32 %v6492_v21, %v27527_v13  ;;  %v6493_v15 = vadd.f32 %v27688_v23, %v5265_v51  ;;  %23493 = vmatmul.mubr.bf16.gmra.mrb[208].mxu0 %v25936_v6  ;;  %v27963_v6 = vpop.f32.mrb[169].mxu1  ;;  %v25941_v21 = vld [vmem:[#allocation2 + $0x74] sm:$0xff]  }
 0x413   :  { %v27953_v12 = vadd.f32 %v6490_v26, %v27517_v4  ;;  %23496 = vmatprep.mubr.bf16.mxu0 %v25937_v40  ;;  %23587 = vmatpush3.bf16.msra.mxu0 %v25975_v34  ;;  %v25942_v26 = vld [vmem:[#allocation2 + $0x7c] sm:$0xff]  }
 0x414   :  { %v27958_v48 = vadd.f32 %v6493_v15, %v27521_v29  ;;  %v27968_v29 = vpop.f32.mrb[170].mxu1 }
 0x415   :  { %v23150_v11 = vpop.f32.mrb[104].mxu0  ;;  %v27971_v40 = vpop.f32.mrb[171].mxu1 }
 0x416   :  { %v5278_v44 = vadd.f32 %v27450_v1, %v23150_v11  ;;  %v4516_v27 = vpop.f32.mrb[105].mxu0  ;;  %v27978_v39 = vpop.f32.mrb[172].mxu1 }
 0x417   :  { %v23151_v13 = vpop.f32.mrb[106].mxu0 }
 0x418   :  { %v6496_v23 = vadd.f32 %v27694_v46, %v5278_v44  ;;  %v4519_v25 = vpop.f32.mrb[107].mxu0  ;;  %v27982_v44 = vpop.f32.mrb[173].mxu1 }
 0x419   :  { %v5273_v4 = vadd.f32 %v27452_v35, %v4519_v25  ;;  %v27985_v27 = vpop.f32.mrb[174].mxu1 }
 0x41a   :  { %v27966_v54 = vadd.f32 %v6496_v23, %v27541_v33  ;;  %23497 = vmatmul.mubr.bf16.gmra.mrb[212].mxu0 %v25938_v37  ;;  %v25943_v23 = vld [vmem:[#allocation2 + $0x84] sm:$0xff]  }
 0x41b   :  { %v6495_v1 = vadd.f32 %v27708_v28, %v5273_v4  ;;  %23500 = vmatprep.mubr.bf16.mxu0 %v25939_v49 }
 0x41d   :  { %v27974_v46 = vadd.f32 %v6495_v1, %v27545_v36  ;;  %v23154_v51 = vpop.f32.mrb[108].mxu0 }
 0x41e   :  { %v4532_v35 = vpop.f32.mrb[109].mxu0 }
 0x41f   :  { %v5286_v33 = vadd.f32 %v27455_v43, %v4532_v35  ;;  %v23155_v32 = vpop.f32.mrb[110].mxu0 }
 0x420   :  { %v5297_v55 = vadd.f32 %v27457_v50, %v23155_v32  ;;  %v4535_v15 = vpop.f32.mrb[111].mxu0  ;;  %v6410_v50 = vpop.f32.mrb[175].mxu1  ;;  %v25945_v32 = vld [vmem:[#allocation2 + $0x94] sm:$0xff]  }
 0x421   :  { %v5289_v28 = vadd.f32 %v27459_v2, %v4535_v15  ;;  %v6498_v11 = vadd.f32 %v27710_v57, %v5286_v33  ;;  %v28001_v1 = vpop.f32.mrb[176].mxu1 }
 0x422   :  { %v6501_v36 = vadd.f32 %v27712_v56, %v5297_v55  ;;  %23501 = vmatmul.mubr.bf16.gmra.mrb[216].mxu0 %v25941_v21  ;;  %v30703_v55 = vld [vmem:[#allocation85_spill] sm:$0xff] }
 0x423   :  { %v27988_v43 = vadd.f32 %v6498_v11, %v27555_v52  ;;  %v6499_v37 = vadd.f32 %v27722_v45, %v5289_v28  ;;  %23504 = vmatprep.mubr.bf16.mxu0 %v25942_v26  ;;  %v25944_v52 = vld [vmem:[#allocation2 + $0x8c] sm:$0xff]   ;;  %v25946_v26 = vld [vmem:[#allocation2 + $0x9c] sm:$0xff]  }
 0x424   :  { %v27992_v13 = vadd.f32 %v6501_v36, %v27561_v31  ;;  %v30704_v11 = vld [vmem:[#allocation14_spill] sm:$0xff] }
 0x425   :  { %v27995_v2 = vadd.f32 %v6499_v37, %v27565_v61  ;;  %v23158_v57 = vpop.f32.mrb[112].mxu0  ;;  %v6423_v61 = vpop.f32.mrb[177].mxu1  ;;  %v30705_v37 = vld [vmem:[#allocation52_spill] sm:$0xff] }
 0x426   :  { %v5310_v49 = vadd.f32 %v27461_v0, %v23158_v57  ;;  %v4548_v56 = vpop.f32.mrb[113].mxu0  ;;  %v23447_v35 = vpop.f32.mrb[178].mxu1  ;;  %v28026_v57 = vld [vmem:[#allocation7 + $0x200] sm:$0xff]  }
 0x427   :  { %v5302_v25 = vadd.f32 %v27463_v14, %v4548_v56  ;;  %v23159_v41 = vpop.f32.mrb[114].mxu0  ;;  %23684 = vmatprep.subr.bf16.mxu0 %v28026_v57  ;;  %v25949_v61 = vld [vmem:[#allocation2 + $0xac] sm:$0xff]  }
 0x428   :  { %v5313_v4 = vadd.f32 %v27465_v53, %v23159_v41  ;;  %v6504_v45 = vadd.f32 %v27724_v24, %v5310_v49  ;;  %v4551_v34 = vpop.f32.mrb[115].mxu0  ;;  %v28011_v53 = vpop.f32.mrb[179].mxu1 }
 0x429   :  { %v6502_v31 = vadd.f32 %v27730_v3, %v5302_v25  ;;  %v23450_v28 = vpop.f32.mrb[180].mxu1 }
 0x42a   :  { %v28005_v51 = vadd.f32 %v6504_v45, %v27591_v8  ;;  %v6505_v0 = vadd.f32 %v27736_v10, %v5313_v4  ;;  %23505 = vmatmul.mubr.bf16.gmra.mrb[220].mxu0 %v25943_v23  ;;  %v28019_v36 = vpop.f32.mrb[181].mxu1  ;;  %v30707_v23 = vld [vmem:[#allocation53_spill] sm:$0xff]  ;;  %v30709_v45 = vld [vmem:[#allocation15_spill] sm:$0xff] }
 0x42b   :  { %v28009_v14 = vadd.f32 %v6502_v31, %v27581_v30  ;;  %23508 = vmatprep.mubr.bf16.mxu0 %v25944_v52  ;;  %v25948_v4 = vld [vmem:[#allocation2 + $0xa4] sm:$0xff]  }
 0x42c   :  { %v28014_v24 = vadd.f32 %v6505_v0, %v27585_v63  ;;  %v28024_v63 = vpop.f32.mrb[182].mxu1  ;;  %v30710_v0 = vld [vmem:[#allocation16_spill] sm:$0xff] }
 0x42d   :  { %v23162_v21 = vpop.f32.mrb[116].mxu0  ;;  %v28029_v56 = vpop.f32.mrb[183].mxu1 }
 0x42e   :  { %v5326_v3 = vadd.f32 %v27467_v60, %v23162_v21  ;;  %v4564_v33 = vpop.f32.mrb[117].mxu0  ;;  %v30706_v60 = vld [vmem:[#allocation89_spill] sm:$0xff] }
 0x42f   :  { %v23163_v8 = vpop.f32.mrb[118].mxu0  ;;  %v30711_v33 = vld [vmem:[#allocation17_spill] sm:$0xff] }
 0x430   :  { %v6508_v10 = vadd.f32 %v30703_v55, %v5326_v3  ;;  %v4567_v15 = vpop.f32.mrb[119].mxu0  ;;  %v28037_v3 = vpop.f32.mrb[184].mxu1  ;;  %v30712_v8 = vld [vmem:[#allocation90_spill] sm:$0xff] }
 0x431   :  { %v5321_v30 = vadd.f32 %v30704_v11, %v4567_v15  ;;  %v28041_v55 = vpop.f32.mrb[185].mxu1  ;;  %v30714_v11 = vld [vmem:[#allocation57_spill] sm:$0xff] }
 0x432   :  { %v28022_v50 = vadd.f32 %v6508_v10, %v30705_v37  ;;  %23509 = vmatmul.mubr.bf16.gmra.mrb[224].mxu0 %v25945_v32  ;;  %v30713_v10 = vld [vmem:[#allocation91_spill] sm:$0xff]  ;;  %v28044_v28 = vpop.f32.mrb[186].mxu1  ;;  %v30716_v37 = vld [vmem:[#allocation94_spill] sm:$0xff] }
 0x433   :  { %v6507_v49 = vadd.f32 %v30706_v60, %v5321_v30  ;;  %23512 = vmatprep.mubr.bf16.mxu0 %v25946_v26 }
 0x435   :  { %v28033_v25 = vadd.f32 %v6507_v49, %v30707_v23  ;;  %v23166_v41 = vpop.f32.mrb[120].mxu0  ;;  %v6458_v49 = vpop.f32.mrb[187].mxu1  ;;  %v30717_v23 = vld [vmem:[#allocation59_spill] sm:$0xff] }
 0x436   :  { %v4580_v52 = vpop.f32.mrb[121].mxu0 }
 0x437   :  { %30708 = vst [vmem:[#allocation85_spill] sm:$0xff] %v28033_v25  ;;  %v5334_v34 = vadd.f32 %v30709_v45, %v4580_v52  ;;  %v23167_v31 = vpop.f32.mrb[122].mxu0  ;;  %v30719_v52 = vld [vmem:[#allocation60_spill] sm:$0xff] }
 0x438   :  { %v5345_v35 = vadd.f32 %v30710_v0, %v23167_v31  ;;  %v4583_v21 = vpop.f32.mrb[123].mxu0  ;;  %v30721_v31 = vld [vmem:[#allocation19_spill] sm:$0xff] }
 0x439   :  { %v5337_v32 = vadd.f32 %v30711_v33, %v4583_v21  ;;  %v6510_v26 = vadd.f32 %v30712_v8, %v5334_v34  ;;  %v30722_v21 = vld [vmem:[#allocation20_spill] sm:$0xff] }
 0x43a   :  { %v6513_v15 = vadd.f32 %v30713_v10, %v5345_v35  ;;  %23513 = vmatmul.mubr.bf16.gmra.mrb[228].mxu0 %v25948_v4  ;;  %v25950_v4 = vld [vmem:[#allocation2 + $0xb4] sm:$0xff]   ;;  %v30723_v10 = vld [vmem:[#allocation21_spill] sm:$0xff] }
 0x43b   :  { %v28047_v30 = vadd.f32 %v6510_v26, %v30714_v11  ;;  %v6511_v60 = vadd.f32 %v30716_v37, %v5337_v32  ;;  %23516 = vmatprep.mubr.bf16.mxu0 %v25949_v61  ;;  %v25951_v26 = vld [vmem:[#allocation2 + $0xbc] sm:$0xff]   ;;  %v28060_v49 = vpop.f32.mrb[188].mxu1 }
 0x43c   :  { %v28051_v41 = vadd.f32 %v6513_v15, %v30717_v23  ;;  %v30724_v32 = vld [vmem:[#allocation95_spill] sm:$0xff]  ;;  %v30725_v15 = vld [vmem:[#allocation97_spill] sm:$0xff] }
 0x43d   :  { %30715 = vst [vmem:[#allocation14_spill] sm:$0xff] %v28047_v30  ;;  %v28054_v45 = vadd.f32 %v6511_v60, %v30719_v52  ;;  %v23170_v34 = vpop.f32.mrb[124].mxu0  ;;  %v6471_v60 = vpop.f32.mrb[189].mxu1  ;;  %v30726_v52 = vld [vmem:[#allocation70_spill] sm:$0xff] }
 0x43e   :  { %30718 = vst [vmem:[#allocation52_spill] sm:$0xff] %v28051_v41  ;;  %v5358_v0 = vadd.f32 %v30721_v31, %v23170_v34  ;;  %v4596_v35 = vpop.f32.mrb[125].mxu0  ;;  %v30728_v34 = vld [vmem:[#allocation99_spill] sm:$0xff]  ;;  %v25952_v60 = vld [vmem:[#allocation2 + $0xc4] sm:$0xff]  }
 0x43f   :  { %30720 = vst [vmem:[#allocation89_spill] sm:$0xff] %v28054_v45  ;;  %v5350_v33 = vadd.f32 %v30722_v21, %v4596_v35  ;;  %v23171_v8 = vpop.f32.mrb[126].mxu0  ;;  %v23459_v45 = vpop.f32.mrb[190].mxu1  ;;  %v30729_v35 = vld [vmem:[#allocation67_spill] sm:$0xff] }
 0x440   :  { %v5361_v11 = vadd.f32 %v30723_v10, %v23171_v8  ;;  %v6516_v61 = vadd.f32 %v30724_v32, %v5358_v0  ;;  %v4599_v37 = vpop.f32.mrb[127].mxu0  ;;  %v28070_v8 = vpop.f32.mrb[191].mxu1  ;;  %v30731_v0 = vld [vmem:[#allocation68_spill] sm:$0xff]  ;;  %v30735_v45 = vld [vmem:[#allocation23_spill] sm:$0xff] }
 0x441   :  { %v6514_v23 = vadd.f32 %v30725_v15, %v5350_v33  ;;  %v30733_v37 = vld [vmem:[#allocation22_spill] sm:$0xff] }
 0x442   :  { %v28064_v41 = vadd.f32 %v6516_v61, %v30726_v52  ;;  %v6517_v31 = vadd.f32 %v30728_v34, %v5361_v11  ;;  %23517 = vmatmul.mubr.bf16.gmra.mrb[232].mxu0 %v25950_v4  ;;  %v25953_v52 = vld [vmem:[#allocation2 + $0xe4] sm:$0xff]  }
 0x443   :  { %v28068_v21 = vadd.f32 %v6514_v23, %v30729_v35  ;;  %23520 = vmatprep.mubr.bf16.mxu0 %v25951_v26  ;;  %v30736_v23 = vld [vmem:[#allocation72_spill] sm:$0xff]  ;;  %v30738_v35 = vld [vmem:[#allocation105_spill] sm:$0xff] }
 0x444   :  { %30727 = vst [vmem:[#allocation53_spill] sm:$0xff] %v28064_v41  ;;  %v28073_v10 = vadd.f32 %v6517_v31, %v30731_v0  ;;  %v30734_v41 = vld [vmem:[#allocation101_spill] sm:$0xff] }
 0x445   :  { %30730 = vst [vmem:[#allocation15_spill] sm:$0xff] %v28068_v21  ;;  %v23174_v32 = vpop.f32.mrb[128].mxu0  ;;  %v30739_v0 = vld [vmem:[#allocation73_spill] sm:$0xff] }
 0x446   :  { %30732 = vst [vmem:[#allocation16_spill] sm:$0xff] %v28073_v10  ;;  %v5374_v33 = vadd.f32 %v30733_v37, %v23174_v32  ;;  %v4612_v15 = vpop.f32.mrb[129].mxu0  ;;  %v25955_v37 = vld [vmem:[#allocation2 + $0xec] sm:$0xff]  }
 0x447   :  { %v23175_v61 = vpop.f32.mrb[130].mxu0  ;;  %v30741_v15 = vld [vmem:[#allocation24_spill] sm:$0xff] }
 0x448   :  { %v6520_v11 = vadd.f32 %v30734_v41, %v5374_v33  ;;  %v4615_v4 = vpop.f32.mrb[131].mxu0  ;;  %v25956_v41 = vld [vmem:[#allocation2 + $0xf4] sm:$0xff]   ;;  %v30742_v33 = vld [vmem:[#allocation25_spill] sm:$0xff] }
 0x449   :  { %v5369_v34 = vadd.f32 %v30735_v45, %v4615_v4 }
 0x44a   :  { %23521 = vmatmul.mubr.bf16.gmra.mrb[236].mxu0 %v25952_v60  ;;  %v28079_v26 = vadd.f32 %v6520_v11, %v30736_v23  ;;  %v30743_v60 = vld [vmem:[#allocation26_spill] sm:$0xff] }
 0x44b   :  { %v6519_v21 = vadd.f32 %v30738_v35, %v5369_v34  ;;  %23524 = vmatprep.mubr.bf16.mxu0 %v25953_v52  ;;  %v30744_v11 = vld [vmem:[#allocation106_spill] sm:$0xff] }
 0x44c   :  { %30737 = vst [vmem:[#allocation17_spill] sm:$0xff] %v28079_v26  ;;  %v30745_v26 = vld [vmem:[#allocation107_spill] sm:$0xff]  ;;  %v30746_v52 = vld [vmem:[#allocation110_spill] sm:$0xff] }
 0x44d   :  { %v23178_v31 = vpop.f32.mrb[132].mxu0  ;;  %v28083_v10 = vadd.f32 %v6519_v21, %v30739_v0  ;;  %v30747_v21 = vld [vmem:[#allocation74_spill] sm:$0xff]  ;;  %v30749_v0 = vld [vmem:[#allocation75_spill] sm:$0xff] }
 0x44e   :  { %v4628_v32 = vpop.f32.mrb[133].mxu0 }
 0x44f   :  { %30740 = vst [vmem:[#allocation90_spill] sm:$0xff] %v28083_v10  ;;  %v5382_v61 = vadd.f32 %v30741_v15, %v4628_v32  ;;  %v23179_v30 = vpop.f32.mrb[134].mxu0  ;;  %v30751_v10 = vld [vmem:[#allocation76_spill] sm:$0xff] }
 0x450   :  { %v5393_v25 = vadd.f32 %v30742_v33, %v23179_v30  ;;  %v4631_v4 = vpop.f32.mrb[135].mxu0  ;;  %v30753_v33 = vld [vmem:[#allocation27_spill] sm:$0xff] }
 0x451   :  { %v5385_v45 = vadd.f32 %v30743_v60, %v4631_v4  ;;  %v6522_v23 = vadd.f32 %v30744_v11, %v5382_v61  ;;  %v25957_v61 = vld [vmem:[#allocation2 + $0xfc] sm:$0xff]  }
 0x452   :  { %v6525_v34 = vadd.f32 %v30745_v26, %v5393_v25  ;;  %23525 = vmatmul.mubr.bf16.gmra.mrb[240].mxu0 %v25955_v37  ;;  %v30754_v11 = vld [vmem:[#allocation28_spill] sm:$0xff] }
 0x453   :  { %v6523_v35 = vadd.f32 %v30746_v52, %v5385_v45  ;;  %23528 = vmatprep.mubr.bf16.mxu0 %v25956_v41  ;;  %v28092_v31 = vadd.f32 %v6522_v23, %v30747_v21  ;;  %v25958_v37 = vld [vmem:[#allocation2 + $0x104] sm:$0xff]   ;;  %v30756_v52 = vld [vmem:[#allocation111_spill] sm:$0xff] }
 0x454   :  { %v28095_v32 = vadd.f32 %v6525_v34, %v30749_v0  ;;  %v30755_v45 = vld [vmem:[#allocation29_spill] sm:$0xff]  ;;  %v30758_v0 = vld [vmem:[#allocation115_spill] sm:$0xff] }
 0x455   :  { %30748 = vst [vmem:[#allocation91_spill] sm:$0xff] %v28092_v31  ;;  %v23182_v15 = vpop.f32.mrb[136].mxu0  ;;  %v28098_v30 = vadd.f32 %v6523_v35, %v30751_v10  ;;  %v30757_v31 = vld [vmem:[#allocation113_spill] sm:$0xff]  ;;  %v30759_v10 = vld [vmem:[#allocation79_spill] sm:$0xff] }
 0x456   :  { %30750 = vst [vmem:[#allocation57_spill] sm:$0xff] %v28095_v32  ;;  %v5406_v4 = vadd.f32 %v30753_v33, %v23182_v15  ;;  %v4644_v60 = vpop.f32.mrb[137].mxu0  ;;  %v30761_v15 = vld [vmem:[#allocation77_spill] sm:$0xff] }
 0x457   :  { %30752 = vst [vmem:[#allocation94_spill] sm:$0xff] %v28098_v30  ;;  %v5398_v25 = vadd.f32 %v30754_v11, %v4644_v60  ;;  %v23183_v26 = vpop.f32.mrb[138].mxu0  ;;  %v30763_v60 = vld [vmem:[#allocation78_spill] sm:$0xff] }
 0x458   :  { %v5409_v41 = vadd.f32 %v30755_v45, %v23183_v26  ;;  %v6528_v23 = vadd.f32 %v30756_v52, %v5406_v4  ;;  %v4647_v21 = vpop.f32.mrb[139].mxu0  ;;  %v30765_v26 = vld [vmem:[#allocation30_spill] sm:$0xff] }
 0x459   :  { %v6526_v34 = vadd.f32 %v30757_v31, %v5398_v25  ;;  %v25959_v52 = vld [vmem:[#allocation2 + $0x10c] sm:$0xff]   ;;  %v25960_v31 = vld [vmem:[#allocation2 + $0x114] sm:$0xff]  }
 0x45a   :  { %v6529_v32 = vadd.f32 %v30758_v0, %v5409_v41  ;;  %23529 = vmatmul.mubr.bf16.gmra.mrb[244].mxu0 %v25957_v61  ;;  %v28107_v35 = vadd.f32 %v6528_v23, %v30759_v10  ;;  %v30766_v25 = vld [vmem:[#allocation117_spill] sm:$0xff]  ;;  %v30767_v0 = vld [vmem:[#allocation31_spill] sm:$0xff] }
 0x45b   :  { %23532 = vmatprep.mubr.bf16.mxu0 %v25958_v37  ;;  %v28110_v33 = vadd.f32 %v6526_v34, %v30761_v15  ;;  %v30768_v37 = vld [vmem:[#allocation80_spill] sm:$0xff]  ;;  %v30770_v34 = vld [vmem:[#allocation121_spill] sm:$0xff] }
 0x45c   :  { %30760 = vst [vmem:[#allocation59_spill] sm:$0xff] %v28107_v35  ;;  %v28113_v11 = vadd.f32 %v6529_v32, %v30763_v60  ;;  %v30771_v60 = vld [vmem:[#allocation81_spill] sm:$0xff] }
 0x45d   :  { %30762 = vst [vmem:[#allocation60_spill] sm:$0xff] %v28110_v33  ;;  %v23186_v30 = vpop.f32.mrb[140].mxu0 }
 0x45e   :  { %30764 = vst [vmem:[#allocation19_spill] sm:$0xff] %v28113_v11  ;;  %v5422_v45 = vadd.f32 %v30765_v26, %v23186_v30  ;;  %v4660_v4 = vpop.f32.mrb[141].mxu0  ;;  %v25962_v26 = vld [vmem:[#allocation2 + $0x11c] sm:$0xff]  }
 0x45f   :  { %v23187_v21 = vpop.f32.mrb[142].mxu0  ;;  %v30772_v4 = vld [vmem:[#allocation32_spill] sm:$0xff] }
 0x460   :  { %v6532_v41 = vadd.f32 %v30766_v25, %v5422_v45  ;;  %v4663_v61 = vpop.f32.mrb[143].mxu0  ;;  %v25963_v45 = vld [vmem:[#allocation2 + $0x124] sm:$0xff]  }
 0x461   :  { %v5417_v23 = vadd.f32 %v30767_v0, %v4663_v61  ;;  %v30773_v25 = vld [vmem:[#allocation33_spill] sm:$0xff] }
 0x462   :  { %23533 = vmatmul.mubr.bf16.gmra.mrb[248].mxu0 %v25959_v52  ;;  %v28119_v10 = vadd.f32 %v6532_v41, %v30768_v37  ;;  %v30774_v52 = vld [vmem:[#allocation34_spill] sm:$0xff] }
 0x463   :  { %v6531_v15 = vadd.f32 %v30770_v34, %v5417_v23  ;;  %23536 = vmatprep.mubr.bf16.mxu0 %v25960_v31  ;;  %v30775_v41 = vld [vmem:[#allocation122_spill] sm:$0xff] }
 0x464   :  { %30769 = vst [vmem:[#allocation20_spill] sm:$0xff] %v28119_v10  ;;  %v30776_v10 = vld [vmem:[#allocation123_spill] sm:$0xff]  ;;  %v30777_v34 = vld [vmem:[#allocation82_spill] sm:$0xff] }
 0x465   :  { %v23190_v32 = vpop.f32.mrb[144].mxu0  ;;  %v28123_v11 = vadd.f32 %v6531_v15, %v30771_v60 }
 0x466   :  { %v4676_v30 = vpop.f32.mrb[145].mxu0  ;;  %v30779_v32 = vld [vmem:[#allocation83_spill] sm:$0xff] }
 0x467   :  { %v5430_v21 = vadd.f32 %v30772_v4, %v4676_v30  ;;  %v23191_v33 = vpop.f32.mrb[146].mxu0  ;;  %v30781_v4 = vld [vmem:[#allocation84_spill] sm:$0xff] }
 0x468   :  { %v5441_v35 = vadd.f32 %v30773_v25, %v23191_v33  ;;  %v4679_v61 = vpop.f32.mrb[147].mxu0  ;;  %v30783_v25 = vld [vmem:[#allocation35_spill] sm:$0xff] }
 0x469   :  { %v5433_v0 = vadd.f32 %v30774_v52, %v4679_v61  ;;  %v6534_v37 = vadd.f32 %v30775_v41, %v5430_v21  ;;  %v25964_v21 = vld [vmem:[#allocation2 + $0x12c] sm:$0xff]   ;;  %v30784_v41 = vld [vmem:[#allocation36_spill] sm:$0xff] }
 0x46a   :  { %v6537_v23 = vadd.f32 %v30776_v10, %v5441_v35  ;;  %23537 = vmatmul.mubr.bf16.gmra.mrb[252].mxu0 %v25962_v26  ;;  %v25965_v26 = vld [vmem:[#allocation2 + $0x134] sm:$0xff]  }
 0x46b   :  { %v6535_v31 = vadd.f32 %v27866_v58, %v5433_v0  ;;  %23540 = vmatprep.mubr.bf16.mxu0 %v25963_v45  ;;  %v28132_v15 = vadd.f32 %v6534_v37, %v30777_v34  ;;  %v30785_v58 = vld [vmem:[#allocation37_spill] sm:$0xff]  ;;  %v30786_v0 = vld [vmem:[#allocation126_spill] sm:$0xff] }
 0x46c   :  { %v28135_v60 = vadd.f32 %v6537_v23, %v30779_v32  ;;  %v30788_v32 = vld [vmem:[#allocation130_spill] sm:$0xff] }
 0x46d   :  { %30778 = vst [vmem:[#allocation21_spill] sm:$0xff] %v28132_v15  ;;  %v23194_v30 = vpop.f32.mrb[148].mxu0  ;;  %v28138_v33 = vadd.f32 %v6535_v31, %v30781_v4  ;;  %v30787_v15 = vld [vmem:[#allocation128_spill] sm:$0xff] }
 0x46e   :  { %30780 = vst [vmem:[#allocation95_spill] sm:$0xff] %v28135_v60  ;;  %v5454_v61 = vadd.f32 %v30783_v25, %v23194_v30  ;;  %v4692_v52 = vpop.f32.mrb[149].mxu0  ;;  %v30789_v31 = vld [vmem:[#allocation88_spill] sm:$0xff]  ;;  %v30790_v30 = vld [vmem:[#allocation86_spill] sm:$0xff] }
 0x46f   :  { %30782 = vst [vmem:[#allocation97_spill] sm:$0xff] %v28138_v33  ;;  %v5446_v35 = vadd.f32 %v30784_v41, %v4692_v52  ;;  %v23195_v10 = vpop.f32.mrb[150].mxu0  ;;  %v30792_v52 = vld [vmem:[#allocation87_spill] sm:$0xff] }
 0x470   :  { %v5457_v45 = vadd.f32 %v30785_v58, %v23195_v10  ;;  %v6540_v37 = vadd.f32 %v30786_v0, %v5454_v61  ;;  %v4695_v34 = vpop.f32.mrb[151].mxu0  ;;  %v30794_v10 = vld [vmem:[#allocation38_spill] sm:$0xff]  ;;  %v25966_v0 = vld [vmem:[#allocation2 + $0x13c] sm:$0xff]  }
 0x471   :  { %v6538_v23 = vadd.f32 %v30787_v15, %v5446_v35  ;;  %v25967_v15 = vld [vmem:[#allocation2 + $0x144] sm:$0xff]  }
 0x472   :  { %v6541_v60 = vadd.f32 %v30788_v32, %v5457_v45  ;;  %23541 = vmatmul.mubr.bf16.gmra.mrb[0].mxu0 %v25964_v21  ;;  %v28147_v4 = vadd.f32 %v6540_v37, %v30789_v31  ;;  %v30795_v45 = vld [vmem:[#allocation39_spill] sm:$0xff] }
 0x473   :  { %23544 = vmatprep.mubr.bf16.mxu0 %v25965_v26  ;;  %v28150_v25 = vadd.f32 %v6538_v23, %v30790_v30  ;;  %v30796_v26 = vld [vmem:[#allocation92_spill] sm:$0xff]  ;;  %v30797_v23 = vld [vmem:[#allocation135_spill] sm:$0xff]  ;;  %v30798_v30 = vld [vmem:[#allocation93_spill] sm:$0xff] }
 0x474   :  { %v28153_v41 = vadd.f32 %v6541_v60, %v30792_v52 }
 0x475   :  { %30791 = vst [vmem:[#allocation70_spill] sm:$0xff] %v28150_v25  ;;  %v23198_v33 = vpop.f32.mrb[152].mxu0 }
 0x476   :  { %30793 = vst [vmem:[#allocation99_spill] sm:$0xff] %v28153_v41  ;;  %v5470_v58 = vadd.f32 %v30794_v10, %v23198_v33  ;;  %v4708_v61 = vpop.f32.mrb[153].mxu0  ;;  %v25969_v10 = vld [vmem:[#allocation2 + $0x14c] sm:$0xff]  }
 0x477   :  { %v23199_v34 = vpop.f32.mrb[154].mxu0  ;;  %v30799_v61 = vld [vmem:[#allocation40_spill] sm:$0xff] }
 0x478   :  { %v6544_v35 = vadd.f32 %v27887_v42, %v5470_v58  ;;  %v4711_v21 = vpop.f32.mrb[155].mxu0  ;;  %v25970_v42 = vld [vmem:[#allocation2 + $0x154] sm:$0xff]   ;;  %v30800_v58 = vld [vmem:[#allocation41_spill] sm:$0xff] }
 0x479   :  { %v5465_v37 = vadd.f32 %v30795_v45, %v4711_v21 }
 0x47a   :  { %23545 = vmatmul.mubr.bf16.gmra.mrb[4].mxu0 %v25966_v0  ;;  %v28159_v32 = vadd.f32 %v6544_v35, %v30796_v26  ;;  %v30801_v0 = vld [vmem:[#allocation42_spill] sm:$0xff]  ;;  %v30802_v26 = vld [vmem:[#allocation96_spill] sm:$0xff] }
 0x47b   :  { %v6543_v31 = vadd.f32 %v30797_v23, %v5465_v37  ;;  %23548 = vmatprep.mubr.bf16.mxu0 %v25967_v15 }
 0x47d   :  { %v23202_v60 = vpop.f32.mrb[156].mxu0  ;;  %v28163_v52 = vadd.f32 %v6543_v31, %v30798_v30  ;;  %v30803_v31 = vld [vmem:[#allocation98_spill] sm:$0xff] }
 0x47e   :  { %v4724_v33 = vpop.f32.mrb[157].mxu0 }
 0x47f   :  { %v5478_v34 = vadd.f32 %v30799_v61, %v4724_v33  ;;  %v23203_v41 = vpop.f32.mrb[158].mxu0  ;;  %v30804_v33 = vld [vmem:[#allocation100_spill] sm:$0xff]  ;;  %v30805_v61 = vld [vmem:[#allocation43_spill] sm:$0xff] }
 0x480   :  { %v5489_v25 = vadd.f32 %v30800_v58, %v23203_v41  ;;  %v4727_v21 = vpop.f32.mrb[159].mxu0 }
 0x481   :  { %v5481_v45 = vadd.f32 %v30801_v0, %v4727_v21  ;;  %v6546_v35 = vadd.f32 %v27903_v7, %v5478_v34  ;;  %v25971_v7 = vld [vmem:[#allocation2 + $0x15c] sm:$0xff]  }
 0x482   :  { %v6549_v37 = vadd.f32 %v27909_v47, %v5489_v25  ;;  %23549 = vmatmul.mubr.bf16.gmra.mrb[8].mxu0 %v25969_v10  ;;  %v30806_v34 = vld [vmem:[#allocation44_spill] sm:$0xff] }
 0x483   :  { %v6547_v15 = vadd.f32 %v27919_v18, %v5481_v45  ;;  %23552 = vmatprep.mubr.bf16.mxu0 %v25970_v42  ;;  %v28172_v23 = vadd.f32 %v6546_v35, %v30802_v26  ;;  %v25972_v10 = vld [vmem:[#allocation2 + $0x164] sm:$0xff]  }
 0x484   :  { %v28175_v60 = vadd.f32 %v6549_v37, %v30803_v31  ;;  %v30807_v18 = vld [vmem:[#allocation45_spill] sm:$0xff]  ;;  %v30809_v31 = vld [vmem:[#allocation102_spill] sm:$0xff] }
 0x485   :  { %v23206_v30 = vpop.f32.mrb[160].mxu0  ;;  %v28178_v41 = vadd.f32 %v6547_v15, %v30804_v33  ;;  %v30808_v15 = vld [vmem:[#allocation104_spill] sm:$0xff]  ;;  %v30810_v33 = vld [vmem:[#allocation103_spill] sm:$0xff] }
 0x486   :  { %v5502_v58 = vadd.f32 %v30805_v61, %v23206_v30  ;;  %v4740_v21 = vpop.f32.mrb[161].mxu0 }
 0x487   :  { %v5494_v47 = vadd.f32 %v30806_v34, %v4740_v21  ;;  %v23207_v25 = vpop.f32.mrb[162].mxu0  ;;  %v30811_v34 = vld [vmem:[#allocation46_spill] sm:$0xff] }
 0x488   :  { %v5505_v42 = vadd.f32 %v30807_v18, %v23207_v25  ;;  %v6552_v0 = vadd.f32 %v27923_v19, %v5502_v58  ;;  %v4743_v45 = vpop.f32.mrb[163].mxu0  ;;  %v25973_v58 = vld [vmem:[#allocation2 + $0x16c] sm:$0xff]  }
 0x489   :  { %v6550_v35 = vadd.f32 %v27927_v5, %v5494_v47  ;;  %v25974_v5 = vld [vmem:[#allocation2 + $0x174] sm:$0xff]  }
 0x48a   :  { %v6553_v37 = vadd.f32 %v27930_v9, %v5505_v42  ;;  %23553 = vmatmul.mubr.bf16.gmra.mrb[12].mxu0 %v25971_v7  ;;  %v28187_v26 = vadd.f32 %v6552_v0, %v30808_v15  ;;  %v30812_v47 = vld [vmem:[#allocation47_spill] sm:$0xff] }
 0x48b   :  { %23556 = vmatprep.mubr.bf16.mxu0 %v25972_v10  ;;  %v28190_v30 = vadd.f32 %v6550_v35, %v30809_v31  ;;  %v30813_v10 = vld [vmem:[#allocation108_spill] sm:$0xff] }
 0x48c   :  { %v28193_v61 = vadd.f32 %v6553_v37, %v30810_v33  ;;  %v30814_v37 = vld [vmem:[#allocation109_spill] sm:$0xff]  ;;  %v25976_v33 = vld [vmem:[#allocation2 + $0x17c] sm:$0xff]  }
 0x48d   :  { %v23210_v21 = vpop.f32.mrb[164].mxu0 }
 0x48e   :  { %v5518_v25 = vadd.f32 %v30811_v34, %v23210_v21  ;;  %v4756_v19 = vpop.f32.mrb[165].mxu0  ;;  %v30815_v21 = vld [vmem:[#allocation48_spill] sm:$0xff] }
 0x48f   :  { %v23211_v18 = vpop.f32.mrb[166].mxu0 }
 0x490   :  { %v6556_v9 = vadd.f32 %v27945_v17, %v5518_v25  ;;  %v4759_v7 = vpop.f32.mrb[167].mxu0  ;;  %v25977_v17 = vld [vmem:[#allocation2 + $0x184] sm:$0xff]  }
 0x491   :  { %v5513_v42 = vadd.f32 %v30812_v47, %v4759_v7  ;;  %v30816_v25 = vld [vmem:[#allocation49_spill] sm:$0xff] }
 0x492   :  { %23557 = vmatmul.mubr.bf16.gmra.mrb[16].mxu0 %v25973_v58  ;;  %v28199_v0 = vadd.f32 %v6556_v9, %v30813_v10  ;;  %v30817_v58 = vld [vmem:[#allocation50_spill] sm:$0xff] }
 0x493   :  { %v6555_v45 = vadd.f32 %v27955_v20, %v5513_v42  ;;  %23560 = vmatprep.mubr.bf16.mxu0 %v25974_v5  ;;  %v30818_v42 = vld [vmem:[#allocation112_spill] sm:$0xff] }
 0x495   :  { %v23214_v35 = vpop.f32.mrb[168].mxu0  ;;  %v28203_v15 = vadd.f32 %v6555_v45, %v30814_v37  ;;  %v30820_v45 = vld [vmem:[#allocation114_spill] sm:$0xff] }
 0x496   :  { %v4772_v31 = vpop.f32.mrb[169].mxu0 }
 0x497   :  { %v5526_v34 = vadd.f32 %v30815_v21, %v4772_v31  ;;  %v23215_v19 = vpop.f32.mrb[170].mxu0  ;;  %v30822_v31 = vld [vmem:[#allocation116_spill] sm:$0xff] }
 0x498   :  { %v5537_v18 = vadd.f32 %v30816_v25, %v23215_v19  ;;  %v4775_v7 = vpop.f32.mrb[171].mxu0  ;;  %v30824_v19 = vld [vmem:[#allocation51_spill] sm:$0xff] }
 0x499   :  { %v5529_v47 = vadd.f32 %v30817_v58, %v4775_v7  ;;  %v6558_v9 = vadd.f32 %v27963_v6, %v5526_v34  ;;  %v25978_v6 = vld [vmem:[#allocation2 + $0x18c] sm:$0xff]  }
 0x49a   :  { %v6561_v20 = vadd.f32 %v27968_v29, %v5537_v18  ;;  %23561 = vmatmul.mubr.bf16.gmra.mrb[20].mxu0 %v25976_v33  ;;  %v30825_v34 = vld [vmem:[#allocation54_spill] sm:$0xff] }
 0x49b   :  { %v6559_v5 = vadd.f32 %v27971_v40, %v5529_v47  ;;  %23564 = vmatprep.mubr.bf16.mxu0 %v25977_v17  ;;  %v28212_v10 = vadd.f32 %v6558_v9, %v30818_v42  ;;  %v25979_v18 = vld [vmem:[#allocation2 + $0x194] sm:$0xff]  }
 0x49c   :  { %v28215_v35 = vadd.f32 %v6561_v20, %v30820_v45  ;;  %v30826_v40 = vld [vmem:[#allocation55_spill] sm:$0xff]  ;;  %v30829_v45 = vld [vmem:[#allocation118_spill] sm:$0xff] }
 0x49d   :  { %30819 = vst [vmem:[#allocation67_spill] sm:$0xff] %v28212_v10  ;;  %v23218_v37 = vpop.f32.mrb[172].mxu0  ;;  %v28218_v21 = vadd.f32 %v6559_v5, %v30822_v31  ;;  %v30827_v5 = vld [vmem:[#allocation120_spill] sm:$0xff]  ;;  %v30831_v31 = vld [vmem:[#allocation119_spill] sm:$0xff] }
 0x49e   :  { %30821 = vst [vmem:[#allocation68_spill] sm:$0xff] %v28215_v35  ;;  %v5550_v25 = vadd.f32 %v30824_v19, %v23218_v37  ;;  %v4788_v7 = vpop.f32.mrb[173].mxu0  ;;  %v26088_v35 = vld [vmem:[#allocation9 + $0xd8] sm:$0xff]   ;;  %v30885_v10 = vld [vmem:[#allocation95_spill] sm:$0xff] }
 0x49f   :  { %30823 = vst [vmem:[#allocation22_spill] sm:$0xff] %v28218_v21  ;;  %v5542_v29 = vadd.f32 %v30825_v34, %v4788_v7  ;;  %v23219_v33 = vpop.f32.mrb[174].mxu0  ;;  %v30833_v34 = vld [vmem:[#allocation56_spill] sm:$0xff] }
 0x4a0   :  { %v5553_v17 = vadd.f32 %v30826_v40, %v23219_v33  ;;  %v6564_v58 = vadd.f32 %v27978_v39, %v5550_v25  ;;  %v4791_v47 = vpop.f32.mrb[175].mxu0  ;;  %v25980_v25 = vld [vmem:[#allocation2 + $0x19c] sm:$0xff]  }
 0x4a1   :  { %v6562_v9 = vadd.f32 %v27982_v44, %v5542_v29  ;;  %v25981_v44 = vld [vmem:[#allocation2] sm:$0xff]   ;;  %v30834_v29 = vld [vmem:[#allocation58_spill] sm:$0xff] }
 0x4a2   :  { %v6565_v20 = vadd.f32 %v27985_v27, %v5553_v17  ;;  %23565 = vmatmul.mubr.bf16.gmra.mrb[24].mxu0 %v25978_v6  ;;  %v28227_v42 = vadd.f32 %v6564_v58, %v30827_v5 }
 0x4a3   :  { %23568 = vmatprep.mubr.bf16.mxu0 %v25979_v18  ;;  %v28230_v37 = vadd.f32 %v6562_v9, %v30829_v45  ;;  %v30835_v18 = vld [vmem:[#allocation124_spill] sm:$0xff] }
 0x4a4   :  { %30828 = vst [vmem:[#allocation101_spill] sm:$0xff] %v28227_v42  ;;  %v28233_v19 = vadd.f32 %v6565_v20, %v30831_v31  ;;  %v30837_v20 = vld [vmem:[#allocation125_spill] sm:$0xff] }
 0x4a5   :  { %30830 = vst [vmem:[#allocation23_spill] sm:$0xff] %v28230_v37  ;;  %v23222_v7 = vpop.f32.mrb[176].mxu0  ;;  %v25983_v31 = vld [vmem:[#allocation2 + $0x8] sm:$0xff]  }
 0x4a6   :  { %30832 = vst [vmem:[#allocation72_spill] sm:$0xff] %v28233_v19  ;;  %v5566_v33 = vadd.f32 %v30833_v34, %v23222_v7  ;;  %v4804_v39 = vpop.f32.mrb[177].mxu0  ;;  %v30839_v7 = vld [vmem:[#allocation61_spill] sm:$0xff] }
 0x4a7   :  { %v23223_v40 = vpop.f32.mrb[178].mxu0 }
 0x4a8   :  { %v6568_v27 = vadd.f32 %v28001_v1, %v5566_v33  ;;  %v4807_v6 = vpop.f32.mrb[179].mxu0  ;;  %v25984_v1 = vld [vmem:[#allocation2 + $0x10] sm:$0xff]  }
 0x4a9   :  { %v5561_v17 = vadd.f32 %v30834_v29, %v4807_v6  ;;  %v30840_v33 = vld [vmem:[#allocation62_spill] sm:$0xff]  ;;  %v30841_v29 = vld [vmem:[#allocation63_spill] sm:$0xff] }
 0x4aa   :  { %23569 = vmatmul.mubr.bf16.gmra.mrb[28].mxu0 %v25980_v25  ;;  %v28239_v58 = vadd.f32 %v6568_v27, %v30835_v18  ;;  %v25989_v25 = vld [vmem:[#allocation7 + $0x208] sm:$0xff]  }
 0x4ab   :  { %v6567_v47 = vadd.f32 %v28011_v53, %v5561_v17  ;;  %23588 = vmatprep.mubr.bf16.mxu0 %v25981_v44  ;;  %v30842_v17 = vld [vmem:[#allocation127_spill] sm:$0xff] }
 0x4ac   :  { %30836 = vst [vmem:[#allocation105_spill] sm:$0xff] %v28239_v58 }
 0x4ad   :  { %v23226_v9 = vpop.f32.mrb[180].mxu0  ;;  %v28243_v5 = vadd.f32 %v6567_v47, %v30837_v20  ;;  %v30844_v20 = vld [vmem:[#allocation129_spill] sm:$0xff] }
 0x4ae   :  { %v4820_v45 = vpop.f32.mrb[181].mxu0  ;;  %v25996_v9 = vld [vmem:[#allocation7 + $0x210] sm:$0xff]  }
 0x4af   :  { %30838 = vst [vmem:[#allocation73_spill] sm:$0xff] %v28243_v5  ;;  %v5574_v34 = vadd.f32 %v30839_v7, %v4820_v45  ;;  %v23227_v39 = vpop.f32.mrb[182].mxu0 }
 0x4b0   :  { %v5585_v40 = vadd.f32 %v30840_v33, %v23227_v39  ;;  %v4823_v6 = vpop.f32.mrb[183].mxu0  ;;  %v30846_v39 = vld [vmem:[#allocation131_spill] sm:$0xff] }
 0x4b1   :  { %v5577_v27 = vadd.f32 %v30841_v29, %v4823_v6  ;;  %v6570_v18 = vadd.f32 %v28019_v36, %v5574_v34  ;;  %v30848_v36 = vld [vmem:[#allocation64_spill] sm:$0xff]  ;;  %v25985_v34 = vld [vmem:[#allocation2 + $0x18] sm:$0xff]   ;;  %v30850_v6 = vld [vmem:[#allocation66_spill] sm:$0xff] }
 0x4b2   :  { %v6573_v53 = vadd.f32 %v28024_v63, %v5585_v40  ;;  %23589 = vmatmul.mubr.bf16.vlgmr.msra.gmra.mrb[192].mxu0 %v25983_v31 }
 0x4b3   :  { %v6571_v44 = vadd.f32 %v28029_v56, %v5577_v27  ;;  %23685 = vmatpush3.bf16.msra.mxu0 %v28026_v57  ;;  %23592 = vmatprep.mubr.bf16.mxu0 %v25984_v1  ;;  %v28253_v47 = vadd.f32 %v6570_v18, %v30842_v17  ;;  %v30849_v56 = vld [vmem:[#allocation65_spill] sm:$0xff]  ;;  %v25986_v1 = vld [vmem:[#allocation2 + $0x20] sm:$0xff]  }
 0x4b4   :  { %23686 = vmatprep.subr.bf16.mxu0 %v25989_v25  ;;  %v28256_v45 = vadd.f32 %v6573_v53, %v30844_v20  ;;  %v26003_v53 = vld [vmem:[#allocation7 + $0x218] sm:$0xff]   ;;  %v30851_v20 = vld [vmem:[#allocation134_spill] sm:$0xff] }
 0x4b5   :  { %30843 = vst [vmem:[#allocation24_spill] sm:$0xff] %v28253_v47  ;;  %v23230_v7 = vpop.f32.mrb[184].mxu0  ;;  %v28259_v33 = vadd.f32 %v6571_v44, %v30846_v39  ;;  %v30853_v39 = vld [vmem:[#allocation132_spill] sm:$0xff] }
 0x4b6   :  { %30845 = vst [vmem:[#allocation25_spill] sm:$0xff] %v28256_v45  ;;  %v5598_v63 = vadd.f32 %v30848_v36, %v23230_v7  ;;  %v4836_v31 = vpop.f32.mrb[185].mxu0 }
 0x4b7   :  { %30847 = vst [vmem:[#allocation26_spill] sm:$0xff] %v28259_v33  ;;  %v5590_v40 = vadd.f32 %v30849_v56, %v4836_v31  ;;  %v23231_v57 = vpop.f32.mrb[186].mxu0  ;;  %23687 = vmatpush3.bf16.msra.mxu0 %v25989_v25  ;;  %v26010_v25 = vld [vmem:[#allocation7 + $0x220] sm:$0xff]   ;;  %v30855_v31 = vld [vmem:[#allocation133_spill] sm:$0xff] }
 0x4b8   :  { %v5601_v29 = vadd.f32 %v30850_v6, %v23231_v57  ;;  %v6576_v27 = vadd.f32 %v28037_v3, %v5598_v63  ;;  %v4839_v18 = vpop.f32.mrb[187].mxu0  ;;  %23688 = vmatprep.subr.bf16.mxu0 %v25996_v9  ;;  %v30857_v56 = vld [vmem:[#allocation69_spill] sm:$0xff] }
 0x4b9   :  { %v6574_v17 = vadd.f32 %v28041_v55, %v5590_v40  ;;  %v25987_v40 = vld [vmem:[#allocation2 + $0x28] sm:$0xff]   ;;  %v30859_v18 = vld [vmem:[#allocation136_spill] sm:$0xff] }
 0x4ba   :  { %v6577_v44 = vadd.f32 %v28044_v28, %v5601_v29  ;;  %23593 = vmatmul.mubr.bf16.gmra.mrb[196].mxu0 %v25985_v34  ;;  %v28268_v7 = vadd.f32 %v6576_v27, %v30851_v20  ;;  %v25988_v34 = vld [vmem:[#allocation2 + $0x30] sm:$0xff]   ;;  %v30858_v29 = vld [vmem:[#allocation71_spill] sm:$0xff]  ;;  %v26024_v20 = vld [vmem:[#allocation7 + $0x230] sm:$0xff]  }
 0x4bb   :  { %23596 = vmatprep.mubr.bf16.mxu0 %v25986_v1  ;;  %23689 = vmatpush3.bf16.msra.mxu0 %v25996_v9  ;;  %v28271_v36 = vadd.f32 %v6574_v17, %v30853_v39  ;;  %v26017_v9 = vld [vmem:[#allocation7 + $0x228] sm:$0xff]  }
 0x4bc   :  { %30852 = vst [vmem:[#allocation106_spill] sm:$0xff] %v28268_v7  ;;  %23690 = vmatprep.subr.bf16.mxu0 %v26003_v53  ;;  %v28274_v3 = vadd.f32 %v6577_v44, %v30855_v31  ;;  %v25992_v31 = vld [vmem:[#allocation2 + $0x48] sm:$0xff]  }
 0x4bd   :  { %30854 = vst [vmem:[#allocation107_spill] sm:$0xff] %v28271_v36  ;;  %v23234_v63 = vpop.f32.mrb[188].mxu0 }
 0x4be   :  { %30856 = vst [vmem:[#allocation110_spill] sm:$0xff] %v28274_v3  ;;  %v5614_v57 = vadd.f32 %v30857_v56, %v23234_v63  ;;  %v4852_v55 = vpop.f32.mrb[189].mxu0  ;;  %v25993_v63 = vld [vmem:[#allocation2 + $0x50] sm:$0xff]   ;;  %v26031_v56 = vld [vmem:[#allocation7 + $0x238] sm:$0xff]  }
 0x4bf   :  { %v23235_v28 = vpop.f32.mrb[190].mxu0  ;;  %23691 = vmatpush3.bf16.msra.mxu0 %v26003_v53  ;;  %v25990_v53 = vld [vmem:[#allocation2 + $0x38] sm:$0xff]  }
 0x4c0   :  { %v6580_v6 = vadd.f32 %v28060_v49, %v5614_v57  ;;  %v4855_v1 = vpop.f32.mrb[191].mxu0  ;;  %23692 = vmatprep.subr.bf16.mxu0 %v26010_v25  ;;  %v25991_v49 = vld [vmem:[#allocation2 + $0x40] sm:$0xff]   ;;  %v25998_v57 = vld [vmem:[#allocation2 + $0x70] sm:$0xff]   ;;  %v25999_v55 = vld [vmem:[#allocation2 + $0x78] sm:$0xff]  }
 0x4c1   :  { %v5609_v27 = vadd.f32 %v30858_v29, %v4855_v1  ;;  %v26001_v28 = vld [vmem:[#allocation2 + $0x88] sm:$0xff]   ;;  %v26005_v1 = vld [vmem:[#allocation2 + $0xa0] sm:$0xff]   ;;  %v26007_v29 = vld [vmem:[#allocation2 + $0xb0] sm:$0xff]  }
 0x4c2   :  { %23597 = vmatmul.mubr.bf16.gmra.mrb[200].mxu0 %v25987_v40  ;;  %v28280_v17 = vadd.f32 %v6580_v6, %v30859_v18  ;;  %v26000_v40 = vld [vmem:[#allocation2 + $0x80] sm:$0xff]   ;;  %v26004_v6 = vld [vmem:[#allocation2 + $0x98] sm:$0xff]  }
 0x4c3   :  { %v6579_v44 = vadd.f32 %v28070_v8, %v5609_v27  ;;  %23600 = vmatprep.mubr.bf16.mxu0 %v25988_v34  ;;  %23693 = vmatpush3.bf16.msra.mxu0 %v26010_v25  ;;  %v25994_v8 = vld [vmem:[#allocation2 + $0x58] sm:$0xff]   ;;  %v25995_v25 = vld [vmem:[#allocation2 + $0x60] sm:$0xff]   ;;  %v26002_v34 = vld [vmem:[#allocation2 + $0x90] sm:$0xff]  }
 0x4c4   :  { %30860 = vst [vmem:[#allocation74_spill] sm:$0xff] %v28280_v17  ;;  %23694 = vmatprep.subr.bf16.mxu0 %v26017_v9  ;;  %v26008_v27 = vld [vmem:[#allocation2 + $0xb8] sm:$0xff]  }
 0x4c5   :  { %v28284_v39 = vadd.f32 %v6579_v44, %v27917_v38  ;;  %v25997_v38 = vld [vmem:[#allocation2 + $0x68] sm:$0xff]   ;;  %v26009_v18 = vld [vmem:[#allocation2 + $0xd8] sm:$0xff]   ;;  %v26011_v44 = vld [vmem:[#allocation2 + $0xe0] sm:$0xff]  }
 0x4c7   :  { %30861 = vst [vmem:[#allocation75_spill] sm:$0xff] %v28284_v39  ;;  %23695 = vmatpush3.bf16.msra.mxu0 %v26017_v9  ;;  %v26006_v9 = vld [vmem:[#allocation2 + $0xa8] sm:$0xff]  }
 0x4c8   :  { %23696 = vmatprep.subr.bf16.mxu0 %v26024_v20 }
 0x4ca   :  { %23601 = vmatmul.mubr.bf16.gmra.mrb[204].mxu0 %v25990_v53  ;;  %v26013_v53 = vld [vmem:[#allocation2 + $0xf0] sm:$0xff]  }
 0x4cb   :  { %23604 = vmatprep.mubr.bf16.mxu0 %v25991_v49  ;;  %23697 = vmatpush3.bf16.msra.mxu0 %v26024_v20  ;;  %v26012_v20 = vld [vmem:[#allocation2 + $0xe8] sm:$0xff]   ;;  %v26014_v49 = vld [vmem:[#allocation2 + $0xf8] sm:$0xff]  }
 0x4cc   :  { %23698 = vmatprep.subr.bf16.mxu0 %v26031_v56 }
 0x4cf   :  { %23699 = vmatpush3.bf16.msra.mxu0 %v26031_v56  ;;  %v26018_v56 = vld [vmem:[#allocation2 + $0x110] sm:$0xff]  }
 0x4d2   :  { %23605 = vmatmul.mubr.bf16.gmra.mrb[208].mxu0 %v25992_v31  ;;  %v26015_v31 = vld [vmem:[#allocation2 + $0x100] sm:$0xff]  }
 0x4d3   :  { %23608 = vmatprep.mubr.bf16.mxu0 %v25993_v63  ;;  %v26016_v63 = vld [vmem:[#allocation2 + $0x108] sm:$0xff]  }
 0x4da   :  { %23609 = vmatmul.mubr.bf16.gmra.mrb[212].mxu0 %v25994_v8  ;;  %v26019_v8 = vld [vmem:[#allocation2 + $0x118] sm:$0xff]  }
 0x4db   :  { %23612 = vmatprep.mubr.bf16.mxu0 %v25995_v25  ;;  %v26020_v25 = vld [vmem:[#allocation2 + $0x120] sm:$0xff]  }
 0x4e2   :  { %23613 = vmatmul.mubr.bf16.gmra.mrb[216].mxu0 %v25997_v38  ;;  %v26021_v38 = vld [vmem:[#allocation2 + $0x128] sm:$0xff]  }
 0x4e3   :  { %23616 = vmatprep.mubr.bf16.mxu0 %v25998_v57  ;;  %v26022_v57 = vld [vmem:[#allocation2 + $0x130] sm:$0xff]  }
 0x4ea   :  { %23617 = vmatmul.mubr.bf16.gmra.mrb[220].mxu0 %v25999_v55  ;;  %v26023_v55 = vld [vmem:[#allocation2 + $0x138] sm:$0xff]  }
 0x4eb   :  { %23620 = vmatprep.mubr.bf16.mxu0 %v26000_v40  ;;  %v26025_v40 = vld [vmem:[#allocation2 + $0x140] sm:$0xff]  }
 0x4f2   :  { %23621 = vmatmul.mubr.bf16.gmra.mrb[224].mxu0 %v26001_v28  ;;  %v26026_v28 = vld [vmem:[#allocation2 + $0x148] sm:$0xff]  }
 0x4f3   :  { %23624 = vmatprep.mubr.bf16.mxu0 %v26002_v34  ;;  %v26027_v34 = vld [vmem:[#allocation2 + $0x150] sm:$0xff]  }
 0x4fa   :  { %23625 = vmatmul.mubr.bf16.gmra.mrb[228].mxu0 %v26004_v6  ;;  %v26028_v6 = vld [vmem:[#allocation2 + $0x158] sm:$0xff]  }
 0x4fb   :  { %23628 = vmatprep.mubr.bf16.mxu0 %v26005_v1  ;;  %v26029_v1 = vld [vmem:[#allocation2 + $0x160] sm:$0xff]  }
 0x502   :  { %23629 = vmatmul.mubr.bf16.gmra.mrb[232].mxu0 %v26006_v9  ;;  %v26030_v9 = vld [vmem:[#allocation2 + $0x168] sm:$0xff]  }
 0x503   :  { %23632 = vmatprep.mubr.bf16.mxu0 %v26007_v29  ;;  %v26032_v29 = vld [vmem:[#allocation2 + $0x170] sm:$0xff]  }
 0x50a   :  { %23633 = vmatmul.mubr.bf16.gmra.mrb[236].mxu0 %v26008_v27  ;;  %v26033_v27 = vld [vmem:[#allocation2 + $0x178] sm:$0xff]  }
 0x50b   :  { %23636 = vmatprep.mubr.bf16.mxu0 %v26009_v18  ;;  %v26034_v18 = vld [vmem:[#allocation2 + $0x180] sm:$0xff]  }
 0x512   :  { %23637 = vmatmul.mubr.bf16.gmra.mrb[240].mxu0 %v26011_v44  ;;  %v26035_v44 = vld [vmem:[#allocation2 + $0x188] sm:$0xff]  }
 0x513   :  { %23640 = vmatprep.mubr.bf16.mxu0 %v26012_v20  ;;  %v26036_v20 = vld [vmem:[#allocation2 + $0x190] sm:$0xff]  }
 0x51a   :  { %23641 = vmatmul.mubr.bf16.gmra.mrb[244].mxu0 %v26013_v53  ;;  %v26037_v53 = vld [vmem:[#allocation2 + $0x18] sm:$0xff]  }
 0x51b   :  { %23644 = vmatprep.mubr.bf16.mxu0 %v26014_v49  ;;  %v26038_v49 = vld [vmem:[#allocation2 + $0x20] sm:$0xff]  }
 0x522   :  { %23645 = vmatmul.mubr.bf16.gmra.mrb[248].mxu0 %v26015_v31  ;;  %v26039_v31 = vld [vmem:[#allocation2 + $0x28] sm:$0xff]  }
 0x523   :  { %23648 = vmatprep.mubr.bf16.mxu0 %v26016_v63  ;;  %v26040_v63 = vld [vmem:[#allocation2 + $0x30] sm:$0xff]  }
 0x52a   :  { %23649 = vmatmul.mubr.bf16.gmra.mrb[252].mxu0 %v26018_v56  ;;  %v26041_v56 = vld [vmem:[#allocation2 + $0x38] sm:$0xff]  }
 0x52b   :  { %23652 = vmatprep.mubr.bf16.mxu0 %v26019_v8  ;;  %v26042_v8 = vld [vmem:[#allocation2 + $0x40] sm:$0xff]  }
 0x532   :  { %23653 = vmatmul.mubr.bf16.gmra.mrb[0].mxu0 %v26020_v25  ;;  %v26043_v25 = vld [vmem:[#allocation2 + $0x48] sm:$0xff]  }
 0x533   :  { %23656 = vmatprep.mubr.bf16.mxu0 %v26021_v38  ;;  %v26044_v38 = vld [vmem:[#allocation2 + $0x50] sm:$0xff]  }
 0x53a   :  { %23657 = vmatmul.mubr.bf16.gmra.mrb[4].mxu0 %v26022_v57  ;;  %v26045_v57 = vld [vmem:[#allocation2 + $0x58] sm:$0xff]  }
 0x53b   :  { %23660 = vmatprep.mubr.bf16.mxu0 %v26023_v55  ;;  %v26046_v55 = vld [vmem:[#allocation2 + $0x60] sm:$0xff]  }
 0x542   :  { %23661 = vmatmul.mubr.bf16.gmra.mrb[8].mxu0 %v26025_v40  ;;  %v26047_v40 = vld [vmem:[#allocation2 + $0x68] sm:$0xff]  }
 0x543   :  { %23664 = vmatprep.mubr.bf16.mxu0 %v26026_v28  ;;  %v26048_v28 = vld [vmem:[#allocation2 + $0x70] sm:$0xff]  }
 0x54a   :  { %23665 = vmatmul.mubr.bf16.gmra.mrb[12].mxu0 %v26027_v34  ;;  %v26049_v34 = vld [vmem:[#allocation2 + $0x78] sm:$0xff]  }
 0x54b   :  { %23668 = vmatprep.mubr.bf16.mxu0 %v26028_v6  ;;  %v26050_v6 = vld [vmem:[#allocation2 + $0x80] sm:$0xff]  }
 0x552   :  { %23669 = vmatmul.mubr.bf16.gmra.mrb[16].mxu0 %v26029_v1  ;;  %v26051_v1 = vld [vmem:[#allocation2 + $0x88] sm:$0xff]  }
 0x553   :  { %23672 = vmatprep.mubr.bf16.mxu0 %v26030_v9  ;;  %v26052_v9 = vld [vmem:[#allocation2 + $0x90] sm:$0xff]  }
 0x55a   :  { %23673 = vmatmul.mubr.bf16.gmra.mrb[20].mxu0 %v26032_v29  ;;  %v26053_v29 = vld [vmem:[#allocation2 + $0x98] sm:$0xff]  }
 0x55b   :  { %23676 = vmatprep.mubr.bf16.mxu0 %v26033_v27  ;;  %v26054_v27 = vld [vmem:[#allocation2 + $0xa0] sm:$0xff]  }
 0x562   :  { %23677 = vmatmul.mubr.bf16.gmra.mrb[24].mxu0 %v26034_v18  ;;  %v26055_v18 = vld [vmem:[#allocation2 + $0xa8] sm:$0xff]  }
 0x563   :  { %23680 = vmatprep.mubr.bf16.mxu0 %v26035_v44  ;;  %v26056_v44 = vld [vmem:[#allocation2 + $0xb0] sm:$0xff]  }
 0x56a   :  { %23681 = vmatmul.mubr.bf16.gmra.mrb[28].mxu0 %v26036_v20  ;;  %v26057_v20 = vld [vmem:[#allocation2 + $0xb8] sm:$0xff]  }
 0x56b   :  { %23700 = vmatprep.mubr.bf16.mxu0 %v26037_v53  ;;  %v26058_v53 = vld [vmem:[#allocation2 + $0xc0] sm:$0xff]  }
 0x572   :  { %23701 = vmatmul.mubr.bf16.vlgmr.msra.gmra.mrb[192].mxu0 %v26038_v49  ;;  %v26059_v49 = vld [vmem:[#allocation2 + $0xc8] sm:$0xff]  }
 0x573   :  { %23704 = vmatprep.mubr.bf16.mxu0 %v26039_v31  ;;  %v26060_v31 = vld [vmem:[#allocation2 + $0xd0] sm:$0xff]  }
 0x57a   :  { %23705 = vmatmul.mubr.bf16.gmra.mrb[196].mxu0 %v26040_v63  ;;  %v26061_v63 = vld [vmem:[#allocation2 + $0xf0] sm:$0xff]  }
 0x57b   :  { %23708 = vmatprep.mubr.bf16.mxu0 %v26041_v56  ;;  %v26062_v56 = vld [vmem:[#allocation2 + $0xf8] sm:$0xff]  }
 0x582   :  { %23709 = vmatmul.mubr.bf16.gmra.mrb[200].mxu0 %v26042_v8  ;;  %v26063_v8 = vld [vmem:[#allocation2 + $0x100] sm:$0xff]  }
 0x583   :  { %23712 = vmatprep.mubr.bf16.mxu0 %v26043_v25  ;;  %v26064_v25 = vld [vmem:[#allocation2 + $0x108] sm:$0xff]  }
 0x58a   :  { %23713 = vmatmul.mubr.bf16.gmra.mrb[204].mxu0 %v26044_v38  ;;  %v26065_v38 = vld [vmem:[#allocation2 + $0x110] sm:$0xff]  }
 0x58b   :  { %23716 = vmatprep.mubr.bf16.mxu0 %v26045_v57  ;;  %v26066_v57 = vld [vmem:[#allocation2 + $0x118] sm:$0xff]  }
 0x592   :  { %23717 = vmatmul.mubr.bf16.gmra.mrb[208].mxu0 %v26046_v55  ;;  %v26067_v55 = vld [vmem:[#allocation2 + $0x120] sm:$0xff]  }
 0x593   :  { %23720 = vmatprep.mubr.bf16.mxu0 %v26047_v40  ;;  %v26068_v40 = vld [vmem:[#allocation2 + $0x128] sm:$0xff]  }
 0x59a   :  { %23721 = vmatmul.mubr.bf16.gmra.mrb[212].mxu0 %v26048_v28  ;;  %v26069_v28 = vld [vmem:[#allocation2 + $0x130] sm:$0xff]  }
 0x59b   :  { %23724 = vmatprep.mubr.bf16.mxu0 %v26049_v34  ;;  %v26085_v34 = vld [vmem:[#allocation9 + $0xc0] sm:$0xff]  }
 0x59c   :  { %23796 = vmatprep.subr.bf16.mxu1 %v26085_v34 }
 0x59d   :  { %23797 = vmatpush3.bf16.msra.mxu1 %v26085_v34 }
 0x5a2   :  { %23725 = vmatmul.mubr.bf16.gmra.mrb[216].mxu0 %v26050_v6  ;;  %v26070_v6 = vld [vmem:[#allocation2 + $0x138] sm:$0xff]  }
 0x5a3   :  { %23728 = vmatprep.mubr.bf16.mxu0 %v26051_v1  ;;  %v26071_v1 = vld [vmem:[#allocation2 + $0x140] sm:$0xff]  }
 0x5aa   :  { %23729 = vmatmul.mubr.bf16.gmra.mrb[220].mxu0 %v26052_v9  ;;  %v26072_v9 = vld [vmem:[#allocation2 + $0x148] sm:$0xff]  }
 0x5ab   :  { %23732 = vmatprep.mubr.bf16.mxu0 %v26053_v29  ;;  %v26073_v29 = vld [vmem:[#allocation2 + $0x150] sm:$0xff]  }
 0x5b2   :  { %23733 = vmatmul.mubr.bf16.gmra.mrb[224].mxu0 %v26054_v27  ;;  %v26074_v27 = vld [vmem:[#allocation2 + $0x158] sm:$0xff]  }
 0x5b3   :  { %23736 = vmatprep.mubr.bf16.mxu0 %v26055_v18  ;;  %v26075_v18 = vld [vmem:[#allocation2 + $0x160] sm:$0xff]  }
 0x5ba   :  { %23737 = vmatmul.mubr.bf16.gmra.mrb[228].mxu0 %v26056_v44  ;;  %v26086_v44 = vld [vmem:[#allocation9 + $0xc8] sm:$0xff]  }
 0x5bb   :  { %23740 = vmatprep.mubr.bf16.mxu0 %v26057_v20  ;;  %23798 = vmatprep.subr.bf16.mxu1 %v26086_v44  ;;  %v26076_v20 = vld [vmem:[#allocation2 + $0x168] sm:$0xff]  }
 0x5bc   :  { %23799 = vmatpush3.bf16.msra.mxu1 %v26086_v44 }
 0x5c2   :  { %23741 = vmatmul.mubr.bf16.gmra.mrb[232].mxu0 %v26058_v53  ;;  %v26077_v53 = vld [vmem:[#allocation2 + $0x170] sm:$0xff]  }
 0x5c3   :  { %23744 = vmatprep.mubr.bf16.mxu0 %v26059_v49  ;;  %v26078_v49 = vld [vmem:[#allocation2 + $0x178] sm:$0xff]  }
 0x5ca   :  { %23745 = vmatmul.mubr.bf16.gmra.mrb[236].mxu0 %v26060_v31  ;;  %v26079_v31 = vld [vmem:[#allocation2 + $0x180] sm:$0xff]  }
 0x5cb   :  { %23748 = vmatprep.mubr.bf16.mxu0 %v26061_v63  ;;  %v26080_v63 = vld [vmem:[#allocation2 + $0x188] sm:$0xff]  }
 0x5d2   :  { %23749 = vmatmul.mubr.bf16.gmra.mrb[240].mxu0 %v26062_v56  ;;  %v26081_v56 = vld [vmem:[#allocation2 + $0x190] sm:$0xff]  }
 0x5d3   :  { %23752 = vmatprep.mubr.bf16.mxu0 %v26063_v8  ;;  %v26087_v8 = vld [vmem:[#allocation9 + $0xd0] sm:$0xff]  }
 0x5d4   :  { %23800 = vmatprep.subr.bf16.mxu1 %v26087_v8 }
 0x5d5   :  { %23801 = vmatpush3.bf16.msra.mxu1 %v26087_v8 }
 0x5d6   :  { %23802 = vmatprep.subr.bf16.mxu1 %v26088_v35 }
 0x5d9   :  { %23803 = vmatpush3.bf16.msra.mxu1 %v26088_v35 }
 0x5da   :  { %23753 = vmatmul.mubr.bf16.gmra.mrb[244].mxu0 %v26064_v25  ;;  %v26082_v25 = vld [vmem:[#allocation2 + $0x198] sm:$0xff]  }
 0x5db   :  { %23756 = vmatprep.mubr.bf16.mxu0 %v26065_v38  ;;  %v26083_v38 = vld [vmem:[#allocation2 + $0x1a0] sm:$0xff]  }
 0x5e2   :  { %23757 = vmatmul.mubr.bf16.gmra.mrb[248].mxu0 %v26066_v57  ;;  %v26084_v57 = vld [vmem:[#allocation2 + $0x1a8] sm:$0xff]  }
 0x5e3   :  { %23760 = vmatprep.mubr.bf16.mxu0 %v26067_v55 }
 0x5ea   :  { %23761 = vmatmul.mubr.bf16.gmra.mrb[252].mxu0 %v26068_v40 }
 0x5eb   :  { %23764 = vmatprep.mubr.bf16.mxu0 %v26069_v28 }
 0x5f2   :  { %23765 = vmatmul.mubr.bf16.gmra.mrb[0].mxu0 %v26070_v6  ;;  %v30862_v6 = vld [vmem:[#allocation18_spill] sm:$0xff] }
 0x5f3   :  { %23768 = vmatprep.mubr.bf16.mxu0 %v26071_v1  ;;  %vm9660_vm1 = vcmp.lt.s32.totalorder %v30862_v6, 7 }
 0x5fa   :  { %23769 = vmatmul.mubr.bf16.gmra.mrb[4].mxu0 %v26072_v9 }
 0x5fb   :  { %23772 = vmatprep.mubr.bf16.mxu0 %v26073_v29 }
 0x602   :  { %23773 = vmatmul.mubr.bf16.gmra.mrb[8].mxu0 %v26074_v27 }
 0x603   :  { %23776 = vmatprep.mubr.bf16.mxu0 %v26075_v18 }
 0x60a   :  { %23777 = vmatmul.mubr.bf16.gmra.mrb[12].mxu0 %v26076_v20 }
 0x60b   :  { %23780 = vmatprep.mubr.bf16.mxu0 %v26077_v53 }
 0x612   :  { %23781 = vmatmul.mubr.bf16.gmra.mrb[16].mxu0 %v26078_v49 }
 0x613   :  { %23784 = vmatprep.mubr.bf16.mxu0 %v26079_v31 }
 0x61a   :  { %23785 = vmatmul.mubr.bf16.gmra.mrb[20].mxu0 %v26080_v63 }
 0x61b   :  { %23788 = vmatprep.mubr.bf16.mxu0 %v26081_v56 }
 0x622   :  { %23789 = vmatmul.mubr.bf16.gmra.mrb[24].mxu0 %v26082_v25 }
 0x623   :  { %23792 = vmatprep.mubr.bf16.mxu0 %v26083_v38 }
 0x62a   :  { %23793 = vmatmul.mubr.bf16.gmra.mrb[28].mxu0 %v26084_v57 }
 0x645   :  { %v23702_v55 = vpop.f32.mrb[192].mxu0 }
 0x646   :  { %v9085_v40 = vpop.f32.mrb[193].mxu0  ;;  %v9566_v1 = vrot.slane %v23702_v55, 1 }
 0x647   :  { %v23703_v28 = vpop.f32.mrb[194].mxu0  ;;  %v9564_v9 = vrot.slane %v9085_v40, 1 }
 0x648   :  { %v9088_v34 = vpop.f32.mrb[195].mxu0  ;;  %v9567_v31 = vrot.slane %v23703_v28, 1 }
 0x649   :  { %v9565_v29 = vrot.slane %v9088_v34, 1 }
 0x64b   :  { %v9754_v27 = vsel %vm9660_vm1, %v9565_v29, %v9566_v1  ;;  %v9755_v18 = vsel %vm9660_vm1, %v9564_v9, %v9565_v29 }
 0x64c   :  { %v28292_v44 = vadd.f32 %v9755_v18, %v27932_v22  ;;  %v28295_v20 = vadd.f32 %v9754_v27, %v27939_v62 }
 0x64d   :  { %v23706_v53 = vpop.f32.mrb[196].mxu0 }
 0x64e   :  { %v9101_v49 = vpop.f32.mrb[197].mxu0  ;;  %v9570_v8 = vrot.slane %v23706_v53, 1  ;;  %v10109_v40 = vadd.f32 %v28295_v20, %v28292_v44 }
 0x64f   :  { %v9568_v63 = vrot.slane %v9101_v49, 1  ;;  %v23707_v56 = vpop.f32.mrb[198].mxu0 }
 0x650   :  { %v9571_v25 = vrot.slane %v23707_v56, 1  ;;  %v9104_v38 = vpop.f32.mrb[199].mxu0 }
 0x651   :  { %v9752_v57 = vsel %vm9660_vm1, %v9567_v31, %v9568_v63  ;;  %v9569_v55 = vrot.slane %v9104_v38, 1 }
 0x652   :  { %v28302_v22 = vadd.f32 %v9752_v57, %v27936_v59  ;;  %v9749_v62 = vsel %vm9660_vm1, %v9570_v8, %v9571_v25 }
 0x653   :  { %v28307_v28 = vadd.f32 %v9749_v62, %v27949_v16  ;;  %v9751_v34 = vsel %vm9660_vm1, %v9568_v63, %v9569_v55 }
 0x654   :  { %v10110_v1 = vadd.f32 %v10109_v40, %v28302_v22  ;;  %v28313_v9 = vadd.f32 %v9751_v34, %v27953_v12 }
 0x655   :  { %v23710_v29 = vpop.f32.mrb[200].mxu0 }
 0x656   :  { %v10111_v27 = vadd.f32 %v10110_v1, %v28313_v9  ;;  %v9117_v18 = vpop.f32.mrb[201].mxu0  ;;  %v9574_v49 = vrot.slane %v23710_v29, 1 }
 0x657   :  { %v9572_v59 = vrot.slane %v9117_v18, 1  ;;  %v23711_v53 = vpop.f32.mrb[202].mxu0 }
 0x658   :  { %v9575_v31 = vrot.slane %v23711_v53, 1  ;;  %v9120_v56 = vpop.f32.mrb[203].mxu0  ;;  %v10112_v38 = vadd.f32 %v10111_v27, %v28307_v28 }
 0x659   :  { %v9748_v16 = vsel %vm9660_vm1, %v9571_v25, %v9572_v59  ;;  %v9573_v8 = vrot.slane %v9120_v56, 1 }
 0x65a   :  { %v28319_v63 = vadd.f32 %v9748_v16, %v27958_v48  ;;  %v9745_v12 = vsel %vm9660_vm1, %v9574_v49, %v9575_v31 }
 0x65b   :  { %v28325_v57 = vadd.f32 %v9745_v12, %v27966_v54  ;;  %v9746_v55 = vsel %vm9660_vm1, %v9573_v8, %v9574_v49 }
 0x65c   :  { %v10113_v40 = vadd.f32 %v10112_v38, %v28319_v63  ;;  %v28331_v62 = vadd.f32 %v9746_v55, %v27974_v46 }
 0x65d   :  { %v23714_v25 = vpop.f32.mrb[204].mxu0 }
 0x65e   :  { %v9133_v34 = vpop.f32.mrb[205].mxu0  ;;  %v10114_v1 = vadd.f32 %v10113_v40, %v28331_v62  ;;  %v9578_v27 = vrot.slane %v23714_v25, 1 }
 0x65f   :  { %v23715_v48 = vpop.f32.mrb[206].mxu0  ;;  %v9576_v18 = vrot.slane %v9133_v34, 1 }
 0x660   :  { %v9136_v29 = vpop.f32.mrb[207].mxu0  ;;  %v10115_v31 = vadd.f32 %v10114_v1, %v28325_v57  ;;  %v9579_v38 = vrot.slane %v23715_v48, 1 }
 0x661   :  { %v9577_v59 = vrot.slane %v9136_v29, 1 }
 0x663   :  { %v9742_v54 = vsel %vm9660_vm1, %v9577_v59, %v9578_v27  ;;  %v9743_v53 = vsel %vm9660_vm1, %v9576_v18, %v9577_v59 }
 0x664   :  { %v28339_v49 = vadd.f32 %v9743_v53, %v27988_v43  ;;  %v28342_v46 = vadd.f32 %v9742_v54, %v27995_v2 }
 0x665   :  { %v23718_v56 = vpop.f32.mrb[208].mxu0 }
 0x666   :  { %v10116_v16 = vadd.f32 %v10115_v31, %v28339_v49  ;;  %v9149_v8 = vpop.f32.mrb[209].mxu0  ;;  %v9582_v40 = vrot.slane %v23718_v56, 1 }
 0x667   :  { %v9580_v12 = vrot.slane %v9149_v8, 1  ;;  %v23719_v55 = vpop.f32.mrb[210].mxu0 }
 0x668   :  { %v9583_v25 = vrot.slane %v23719_v55, 1  ;;  %v9152_v34 = vpop.f32.mrb[211].mxu0  ;;  %v10117_v27 = vadd.f32 %v10116_v16, %v28342_v46 }
 0x669   :  { %v9740_v29 = vsel %vm9660_vm1, %v9579_v38, %v9580_v12  ;;  %v9581_v43 = vrot.slane %v9152_v34, 1 }
 0x66a   :  { %v28350_v2 = vadd.f32 %v9740_v29, %v27992_v13  ;;  %v9737_v1 = vsel %vm9660_vm1, %v9582_v40, %v9583_v25 }
 0x66b   :  { %v28355_v18 = vadd.f32 %v9737_v1, %v28005_v51  ;;  %v9739_v48 = vsel %vm9660_vm1, %v9580_v12, %v9581_v43  ;;  %v30864_v1 = vld [vmem:[#allocation85_spill] sm:$0xff] }
 0x66c   :  { %v10118_v59 = vadd.f32 %v10117_v27, %v28350_v2  ;;  %v28361_v54 = vadd.f32 %v9739_v48, %v28009_v14 }
 0x66d   :  { %v23722_v53 = vpop.f32.mrb[212].mxu0 }
 0x66e   :  { %v10119_v31 = vadd.f32 %v10118_v59, %v28361_v54  ;;  %v9165_v56 = vpop.f32.mrb[213].mxu0  ;;  %v9586_v8 = vrot.slane %v23722_v53, 1 }
 0x66f   :  { %v9584_v13 = vrot.slane %v9165_v56, 1  ;;  %v23723_v16 = vpop.f32.mrb[214].mxu0 }
 0x670   :  { %v9587_v38 = vrot.slane %v23723_v16, 1  ;;  %v9168_v55 = vpop.f32.mrb[215].mxu0  ;;  %v10120_v34 = vadd.f32 %v10119_v31, %v28355_v18 }
 0x671   :  { %v9736_v51 = vsel %vm9660_vm1, %v9583_v25, %v9584_v13  ;;  %v9585_v40 = vrot.slane %v9168_v55, 1 }
 0x672   :  { %v28367_v12 = vadd.f32 %v9736_v51, %v28014_v24  ;;  %v9733_v14 = vsel %vm9660_vm1, %v9586_v8, %v9587_v38  ;;  %v30866_v38 = vld [vmem:[#allocation14_spill] sm:$0xff]  ;;  %v30867_v51 = vld [vmem:[#allocation89_spill] sm:$0xff] }
 0x673   :  { %v28373_v29 = vadd.f32 %v9733_v14, %v28022_v50  ;;  %v9734_v43 = vsel %vm9660_vm1, %v9585_v40, %v9586_v8 }
 0x674   :  { %v10121_v27 = vadd.f32 %v10120_v34, %v28367_v12  ;;  %v28379_v48 = vadd.f32 %v9734_v43, %v30864_v1 }
 0x675   :  { %30863 = vst [vmem:[#allocation76_spill] sm:$0xff] %v28373_v29  ;;  %v23726_v25 = vpop.f32.mrb[216].mxu0 }
 0x676   :  { %30865 = vst [vmem:[#allocation27_spill] sm:$0xff] %v28379_v48  ;;  %v9181_v59 = vpop.f32.mrb[217].mxu0  ;;  %v10122_v53 = vadd.f32 %v10121_v27, %v28379_v48  ;;  %v9590_v56 = vrot.slane %v23726_v25, 1 }
 0x677   :  { %v23727_v24 = vpop.f32.mrb[218].mxu0  ;;  %v9588_v13 = vrot.slane %v9181_v59, 1 }
 0x678   :  { %v9184_v31 = vpop.f32.mrb[219].mxu0  ;;  %v10123_v34 = vadd.f32 %v10122_v53, %v28373_v29  ;;  %v9591_v1 = vrot.slane %v23727_v24, 1  ;;  %v26092_v29 = vld [vmem:[#allocation9 + $0x100] sm:$0xff]  }
 0x679   :  { %v9589_v16 = vrot.slane %v9184_v31, 1  ;;  %24132 = vmatprep.subr.bf16.mxu0 %v26092_v29 }
 0x67a   :  { %24133 = vmatpush3.bf16.msra.mxu0 %v26092_v29 }
 0x67b   :  { %v9730_v50 = vsel %vm9660_vm1, %v9589_v16, %v9590_v56  ;;  %v9731_v8 = vsel %vm9660_vm1, %v9588_v13, %v9589_v16 }
 0x67c   :  { %v28387_v55 = vadd.f32 %v9731_v8, %v30866_v38  ;;  %v28390_v40 = vadd.f32 %v9730_v50, %v30867_v51  ;;  %v30868_v50 = vld [vmem:[#allocation52_spill] sm:$0xff]  ;;  %v30869_v51 = vld [vmem:[#allocation53_spill] sm:$0xff] }
 0x67d   :  { %v23730_v14 = vpop.f32.mrb[220].mxu0 }
 0x67e   :  { %v10124_v43 = vadd.f32 %v10123_v34, %v28387_v55  ;;  %v9197_v27 = vpop.f32.mrb[221].mxu0  ;;  %v9594_v56 = vrot.slane %v23730_v14, 1 }
 0x67f   :  { %v9592_v25 = vrot.slane %v9197_v27, 1  ;;  %v23731_v59 = vpop.f32.mrb[222].mxu0 }
 0x680   :  { %v10125_v31 = vadd.f32 %v10124_v43, %v28390_v40  ;;  %v9595_v39 = vrot.slane %v23731_v59, 1  ;;  %v9200_v13 = vpop.f32.mrb[223].mxu0  ;;  %v30870_v43 = vld [vmem:[#allocation15_spill] sm:$0xff] }
 0x681   :  { %v9728_v16 = vsel %vm9660_vm1, %v9591_v1, %v9592_v25  ;;  %v9593_v8 = vrot.slane %v9200_v13, 1 }
 0x682   :  { %v28398_v38 = vadd.f32 %v9728_v16, %v30868_v50  ;;  %v9725_v53 = vsel %vm9660_vm1, %v9594_v56, %v9595_v39 }
 0x683   :  { %v28403_v34 = vadd.f32 %v9725_v53, %v30869_v51  ;;  %v9727_v24 = vsel %vm9660_vm1, %v9592_v25, %v9593_v8  ;;  %v30871_v8 = vld [vmem:[#allocation16_spill] sm:$0xff] }
 0x684   :  { %v10126_v14 = vadd.f32 %v10125_v31, %v28398_v38  ;;  %v28409_v27 = vadd.f32 %v9727_v24, %v30870_v43  ;;  %v30872_v43 = vld [vmem:[#allocation17_spill] sm:$0xff] }
 0x685   :  { %v23734_v59 = vpop.f32.mrb[224].mxu0 }
 0x686   :  { %v10127_v1 = vadd.f32 %v10126_v14, %v28409_v27  ;;  %v9213_v13 = vpop.f32.mrb[225].mxu0  ;;  %v9598_v17 = vrot.slane %v23734_v59, 1 }
 0x687   :  { %v9596_v16 = vrot.slane %v9213_v13, 1  ;;  %v23735_v50 = vpop.f32.mrb[226].mxu0  ;;  %v30873_v13 = vld [vmem:[#allocation90_spill] sm:$0xff] }
 0x688   :  { %v10128_v56 = vadd.f32 %v10127_v1, %v28403_v34  ;;  %v9599_v3 = vrot.slane %v23735_v50, 1  ;;  %v9216_v53 = vpop.f32.mrb[227].mxu0 }
 0x689   :  { %v9724_v51 = vsel %vm9660_vm1, %v9595_v39, %v9596_v16  ;;  %v9597_v25 = vrot.slane %v9216_v53, 1 }
 0x68a   :  { %v28416_v31 = vadd.f32 %v9724_v51, %v30871_v8  ;;  %v9721_v24 = vsel %vm9660_vm1, %v9598_v17, %v9599_v3 }
 0x68b   :  { %v28421_v14 = vadd.f32 %v9721_v24, %v30872_v43  ;;  %v9722_v59 = vsel %vm9660_vm1, %v9597_v25, %v9598_v17 }
 0x68c   :  { %v10129_v1 = vadd.f32 %v10128_v56, %v28416_v31  ;;  %v28427_v50 = vadd.f32 %v9722_v59, %v30873_v13  ;;  %v30874_v56 = vld [vmem:[#allocation91_spill] sm:$0xff]  ;;  %v30875_v59 = vld [vmem:[#allocation94_spill] sm:$0xff] }
 0x68d   :  { %v23738_v36 = vpop.f32.mrb[228].mxu0 }
 0x68e   :  { %v10130_v39 = vadd.f32 %v10129_v1, %v28427_v50  ;;  %v9229_v16 = vpop.f32.mrb[229].mxu0  ;;  %v9602_v3 = vrot.slane %v23738_v36, 1 }
 0x68f   :  { %v23739_v53 = vpop.f32.mrb[230].mxu0  ;;  %v9600_v7 = vrot.slane %v9229_v16, 1 }
 0x690   :  { %v9232_v51 = vpop.f32.mrb[231].mxu0  ;;  %v10131_v8 = vadd.f32 %v10130_v39, %v28421_v14  ;;  %v9603_v39 = vrot.slane %v23739_v53, 1  ;;  %v30878_v53 = vld [vmem:[#allocation60_spill] sm:$0xff] }
 0x691   :  { %v9601_v24 = vrot.slane %v9232_v51, 1 }
 0x693   :  { %v9718_v43 = vsel %vm9660_vm1, %v9601_v24, %v9602_v3  ;;  %v9719_v17 = vsel %vm9660_vm1, %v9600_v7, %v9601_v24 }
 0x694   :  { %v28436_v25 = vadd.f32 %v9719_v17, %v30874_v56  ;;  %v28439_v13 = vadd.f32 %v9718_v43, %v30875_v59  ;;  %v30876_v17 = vld [vmem:[#allocation57_spill] sm:$0xff] }
 0x695   :  { %v23742_v1 = vpop.f32.mrb[232].mxu0 }
 0x696   :  { %v10132_v45 = vadd.f32 %v10131_v8, %v28436_v25  ;;  %v9245_v33 = vpop.f32.mrb[233].mxu0  ;;  %v9606_v47 = vrot.slane %v23742_v1, 1  ;;  %v30877_v8 = vld [vmem:[#allocation59_spill] sm:$0xff] }
 0x697   :  { %v9604_v36 = vrot.slane %v9245_v33, 1  ;;  %v23743_v16 = vpop.f32.mrb[234].mxu0 }
 0x698   :  { %v10133_v51 = vadd.f32 %v10132_v45, %v28439_v13  ;;  %v9607_v3 = vrot.slane %v23743_v16, 1  ;;  %v9248_v5 = vpop.f32.mrb[235].mxu0 }
 0x699   :  { %v9716_v7 = vsel %vm9660_vm1, %v9603_v39, %v9604_v36  ;;  %v9605_v24 = vrot.slane %v9248_v5, 1 }
 0x69a   :  { %v28446_v56 = vadd.f32 %v9716_v7, %v30876_v17  ;;  %v9713_v43 = vsel %vm9660_vm1, %v9606_v47, %v9607_v3 }
 0x69b   :  { %v28451_v59 = vadd.f32 %v9713_v43, %v30877_v8  ;;  %v9715_v33 = vsel %vm9660_vm1, %v9604_v36, %v9605_v24  ;;  %v30879_v24 = vld [vmem:[#allocation19_spill] sm:$0xff] }
 0x69c   :  { %v10134_v45 = vadd.f32 %v10133_v51, %v28446_v56  ;;  %v28457_v1 = vadd.f32 %v9715_v33, %v30878_v53  ;;  %v30880_v53 = vld [vmem:[#allocation20_spill] sm:$0xff] }
 0x69d   :  { %v23746_v16 = vpop.f32.mrb[236].mxu0 }
 0x69e   :  { %v10135_v5 = vadd.f32 %v10134_v45, %v28457_v1  ;;  %v9261_v39 = vpop.f32.mrb[237].mxu0  ;;  %v9610_v58 = vrot.slane %v23746_v16, 1 }
 0x69f   :  { %v9608_v7 = vrot.slane %v9261_v39, 1  ;;  %v23747_v17 = vpop.f32.mrb[238].mxu0 }
 0x6a0   :  { %v10136_v47 = vadd.f32 %v10135_v5, %v28451_v59  ;;  %v9611_v19 = vrot.slane %v23747_v17, 1  ;;  %v9264_v43 = vpop.f32.mrb[239].mxu0 }
 0x6a1   :  { %v9712_v8 = vsel %vm9660_vm1, %v9607_v3, %v9608_v7  ;;  %v9609_v36 = vrot.slane %v9264_v43, 1 }
 0x6a2   :  { %v28464_v51 = vadd.f32 %v9712_v8, %v30879_v24  ;;  %v9709_v33 = vsel %vm9660_vm1, %v9610_v58, %v9611_v19 }
 0x6a3   :  { %v28469_v45 = vadd.f32 %v9709_v33, %v30880_v53  ;;  %v9710_v16 = vsel %vm9660_vm1, %v9609_v36, %v9610_v58  ;;  %v30881_v36 = vld [vmem:[#allocation21_spill] sm:$0xff] }
 0x6a4   :  { %v10137_v5 = vadd.f32 %v10136_v47, %v28464_v51  ;;  %v28475_v39 = vadd.f32 %v9710_v16, %v28123_v11 }
 0x6a5   :  { %v23750_v17 = vpop.f32.mrb[240].mxu0 }
 0x6a6   :  { %v10138_v3 = vadd.f32 %v10137_v5, %v28475_v39  ;;  %v9277_v7 = vpop.f32.mrb[241].mxu0  ;;  %v9614_v19 = vrot.slane %v23750_v17, 1  ;;  %v30883_v5 = vld [vmem:[#allocation97_spill] sm:$0xff] }
 0x6a7   :  { %v23751_v43 = vpop.f32.mrb[242].mxu0  ;;  %v9612_v37 = vrot.slane %v9277_v7, 1 }
 0x6a8   :  { %v10139_v8 = vadd.f32 %v10138_v3, %v28469_v45  ;;  %v9280_v24 = vpop.f32.mrb[243].mxu0 }
 0x6a9   :  { %v9613_v33 = vrot.slane %v9280_v24, 1  ;;  %v9615_v24 = vrot.slane %v23751_v43, 1 }
 0x6aa   :  { %v10140_v53 = vrot.slane %v10139_v8, 4 }
 0x6ab   :  { %v9706_v58 = vsel %vm9660_vm1, %v9613_v33, %v9614_v19  ;;  %v9707_v47 = vsel %vm9660_vm1, %v9612_v37, %v9613_v33 }
 0x6ac   :  { %v10141_v11 = vadd.f32 %v10140_v53, %v10139_v8  ;;  %v28484_v16 = vadd.f32 %v9707_v47, %v30881_v36  ;;  %v28487_v42 = vadd.f32 %v9706_v58, %v30883_v5  ;;  %v26089_v47 = vld [vmem:[#allocation9 + $0xe0] sm:$0xff]  }
 0x6ad   :  { %v23754_v3 = vpop.f32.mrb[244].mxu0  ;;  %23804 = vmatprep.subr.bf16.mxu1 %v26089_v47 }
 0x6ae   :  { %30882 = vst [vmem:[#allocation28_spill] sm:$0xff] %v28484_v16  ;;  %30884 = vst [vmem:[#allocation29_spill] sm:$0xff] %v28487_v42  ;;  %v10142_v17 = vrot.slane %v10141_v11, 2  ;;  %v9293_v7 = vpop.f32.mrb[245].mxu0  ;;  %v9618_v8 = vrot.slane %v23754_v3, 1  ;;  %23805 = vmatpush3.bf16.msra.mxu1 %v26089_v47  ;;  %v30888_v3 = vld [vmem:[#allocation70_spill] sm:$0xff] }
 0x6af   :  { %v9616_v21 = vrot.slane %v9293_v7, 1  ;;  %v28489_v19 = vpop.f32.mrb[246].mxu0  ;;  %v26090_v7 = vld [vmem:[#allocation9 + $0xe8] sm:$0xff]  }
 0x6b0   :  { %v10143_v37 = vadd.f32 %v10142_v17, %v10141_v11  ;;  %v30507_v33 = vrot.slane %v28489_v19, 1  ;;  %v9296_v53 = vpop.f32.mrb[247].mxu0  ;;  %23806 = vmatprep.subr.bf16.mxu1 %v26090_v7 }
 0x6b1   :  { %v9704_v58 = vsel %vm9660_vm1, %v9615_v24, %v9616_v21  ;;  %v9617_v36 = vrot.slane %v9296_v53, 1 }
 0x6b2   :  { %v10144_v5 = vrot.slane %v10143_v37, 1  ;;  %v28495_v48 = vadd.f32 %v9704_v58, %v30885_v10  ;;  %v9701_v35 = vsel %vm9660_vm1, %v9618_v8, %v30507_v33  ;;  %23807 = vmatpush3.bf16.msra.mxu1 %v26090_v7  ;;  %v26091_v58 = vld [vmem:[#allocation9 + $0xf0] sm:$0xff]  }
 0x6b3   :  { %v28502_v43 = vadd.f32 %v9701_v35, %v28147_v4  ;;  %v9703_v29 = vsel %vm9660_vm1, %v9616_v21, %v9617_v36  ;;  %23808 = vmatprep.subr.bf16.mxu1 %v26091_v58  ;;  %v26093_v21 = vld [vmem:[#allocation9 + $0x108] sm:$0xff]  }
 0x6b4   :  { %30886 = vst [vmem:[#allocation111_spill] sm:$0xff] %v28495_v48  ;;  %v10145_v11 = vadd.f32 %v10144_v5, %v10143_v37  ;;  %v28507_v17 = vadd.f32 %v9703_v29, %v30888_v3  ;;  %v10146_v37 = vadd.f32 %v28487_v42, %v28484_v16  ;;  %24134 = vmatprep.subr.bf16.mxu0 %v26093_v21  ;;  %v26095_v3 = vld [vmem:[#allocation9 + $0x110] sm:$0xff]   ;;  %v30903_v16 = vrot.slane %v28489_v19, 1 }
 0x6b5   :  { %30887 = vst [vmem:[#allocation113_spill] sm:$0xff] %v28502_v43  ;;  %v28509_v10 = vpop.f32.mrb[248].mxu0  ;;  %24135 = vmatpush3.bf16.msra.mxu0 %v26093_v21 }
 0x6b6   :  { %30889 = vst [vmem:[#allocation115_spill] sm:$0xff] %v28507_v17  ;;  %v28511_v24 = vpop.f32.mrb[249].mxu0  ;;  %v28515_v8 = vmul.f32 0.00390625, %v10145_v11  ;;  %23809 = vmatpush3.bf16.msra.mxu1 %v26091_v58  ;;  %24136 = vmatprep.subr.bf16.mxu0 %v26095_v3 }
 0x6b7   :  { %v28513_v53 = vpop.f32.mrb[250].mxu0 }
 0x6b8   :  { %v28517_v4 = vpop.f32.mrb[251].mxu0  ;;  %v28523_v47 = vsub.f32 %v28387_v55, %v28515_v8  ;;  %v28527_v36 = vsub.f32 %v28390_v40, %v28515_v8  ;;  %v28531_v5 = vsub.f32 %v28398_v38, %v28515_v8  ;;  %v28535_v35 = vsub.f32 %v28409_v27, %v28515_v8 }
 0x6b9   :  { %v28539_v29 = vsub.f32 %v28403_v34, %v28515_v8  ;;  %v28543_v55 = vsub.f32 %v28416_v31, %v28515_v8  ;;  %v28547_v40 = vsub.f32 %v28427_v50, %v28515_v8  ;;  %v28551_v38 = vsub.f32 %v28421_v14, %v28515_v8  ;;  %24137 = vmatpush3.bf16.msra.mxu0 %v26095_v3 }
 0x6ba   :  { %v28557_v27 = vsub.f32 %v28436_v25, %v28515_v8  ;;  %v28561_v34 = vsub.f32 %v28439_v13, %v28515_v8  ;;  %v28565_v31 = vsub.f32 %v28446_v56, %v28515_v8  ;;  %v28569_v50 = vsub.f32 %v28457_v1, %v28515_v8 }
 0x6bb   :  { %v28575_v7 = vsub.f32 %v28451_v59, %v28515_v8  ;;  %v28579_v25 = vsub.f32 %v28464_v51, %v28515_v8  ;;  %v28583_v13 = vsub.f32 %v28475_v39, %v28515_v8  ;;  %v28587_v56 = vsub.f32 %v28469_v45, %v28515_v8  ;;  %v26096_v45 = vld [vmem:[#allocation9 + $0x118] sm:$0xff]  }
 0x6bc   :  { %30890 = vst [vmem:[#allocation79_spill] sm:$0xff] %v28565_v31  ;;  %30891 = vst [vmem:[#allocation77_spill] sm:$0xff] %v28569_v50  ;;  %v28593_v58 = vsub.f32 %v28292_v44, %v28515_v8  ;;  %v28597_v59 = vsub.f32 %v28295_v20, %v28515_v8  ;;  %v10147_v51 = vadd.f32 %v10146_v37, %v28495_v48  ;;  %v9620_v48 = vrot.slane %v28511_v24, 1 }
 0x6bd   :  { %v28553_v11 = vpop.f32.mrb[252].mxu0  ;;  %30892 = vst [vmem:[#allocation78_spill] sm:$0xff] %v28575_v7  ;;  %30893 = vst [vmem:[#allocation30_spill] sm:$0xff] %v28579_v25  ;;  %v28602_v39 = vsub.f32 %v28302_v22, %v28515_v8  ;;  %v28606_v33 = vsub.f32 %v28313_v9, %v28515_v8  ;;  %v28610_v44 = vsub.f32 %v28307_v28, %v28515_v8  ;;  %24138 = vmatprep.subr.bf16.mxu0 %v26096_v45 }
 0x6be   :  { %v28571_v14 = vpop.f32.mrb[253].mxu0  ;;  %30894 = vst [vmem:[#allocation117_spill] sm:$0xff] %v28583_v13  ;;  %30895 = vst [vmem:[#allocation31_spill] sm:$0xff] %v28587_v56  ;;  %v28614_v20 = vsub.f32 %v28319_v63, %v28515_v8  ;;  %v28618_v37 = vsub.f32 %v28331_v62, %v28515_v8  ;;  %v10249_v22 = vmul.f32 %v28593_v58, %v28593_v58  ;;  %v9622_v28 = vrot.slane %v28509_v10, 1 }
 0x6bf   :  { %v28589_v1 = vpop.f32.mrb[254].mxu0  ;;  %30896 = vst [vmem:[#allocation80_spill] sm:$0xff] %v28593_v58  ;;  %30897 = vst [vmem:[#allocation121_spill] sm:$0xff] %v28597_v59  ;;  %v10250_v3 = vmul.f32 %v28597_v59, %v28597_v59  ;;  %v10148_v9 = vadd.f32 %v10147_v51, %v28507_v17  ;;  %24139 = vmatpush3.bf16.msra.mxu0 %v26096_v45  ;;  %v28629_v63 = vsub.f32 %v28325_v57, %v28515_v8  ;;  %v26097_v17 = vld [vmem:[#allocation9 + $0x120] sm:$0xff]  }
 0x6c0   :  { %v9328_v21 = vpop.f32.mrb[255].mxu0  ;;  %30898 = vst [vmem:[#allocation81_spill] sm:$0xff] %v28602_v39  ;;  %30899 = vst [vmem:[#allocation32_spill] sm:$0xff] %v28606_v33  ;;  %v28633_v62 = vsub.f32 %v28339_v49, %v28515_v8  ;;  %v28637_v59 = vsub.f32 %v28342_v46, %v28515_v8  ;;  %v10251_v24 = vmul.f32 %v28602_v39, %v28602_v39  ;;  %24140 = vmatprep.subr.bf16.mxu0 %v26097_v17 }
 0x6c1   :  { %30900 = vst [vmem:[#allocation33_spill] sm:$0xff] %v28610_v44  ;;  %30901 = vst [vmem:[#allocation34_spill] sm:$0xff] %v28614_v20  ;;  %v10252_v10 = vmul.f32 %v28606_v33, %v28606_v33  ;;  %v10253_v57 = vmul.f32 %v28610_v44, %v28610_v44  ;;  %v10254_v45 = vmul.f32 %v28614_v20, %v28614_v20  ;;  %v9623_v33 = vrot.slane %v28513_v53, 1  ;;  %v30904_v44 = vld [vmem:[#allocation99_spill] sm:$0xff] }
 0x6c2   :  { %30902 = vst [vmem:[#allocation122_spill] sm:$0xff] %v28618_v37  ;;  %v10255_v49 = vmul.f32 %v28618_v37, %v28618_v37  ;;  %v10313_v46 = vadd.f32 %v10250_v3, %v10249_v22  ;;  %v9700_v39 = vsel %vm9660_vm1, %v30903_v16, %v9620_v48  ;;  %v10149_v56 = vadd.f32 %v10148_v9, %v28502_v43  ;;  %v26098_v53 = vld [vmem:[#allocation9 + $0x128] sm:$0xff]  }
 0x6c3   :  { %v28656_v25 = vadd.f32 %v9700_v39, %v30904_v44  ;;  %v9621_v20 = vrot.slane %v28517_v4, 1  ;;  %v9626_v37 = vrot.slane %v28553_v11, 1  ;;  %v9624_v22 = vrot.slane %v28571_v14, 1  ;;  %24141 = vmatpush3.bf16.msra.mxu0 %v26097_v17 }
 0x6c4   :  { %v10314_v19 = vadd.f32 %v10313_v46, %v10251_v24  ;;  %v9697_v48 = vsel %vm9660_vm1, %v9622_v28, %v9623_v33  ;;  %v9627_v16 = vrot.slane %v28589_v1, 1  ;;  %v9625_v3 = vrot.slane %v9328_v21, 1  ;;  %24142 = vmatprep.subr.bf16.mxu0 %v26098_v53 }
 0x6c5   :  { %v23766_v42 = vpop.f32.mrb[0].mxu0  ;;  %30905 = vst [vmem:[#allocation123_spill] sm:$0xff] %v28656_v25  ;;  %v10150_v9 = vadd.f32 %v10149_v56, %v28656_v25  ;;  %v28666_v39 = vadd.f32 %v9697_v48, %v28159_v32  ;;  %v9698_v4 = vsel %vm9660_vm1, %v9621_v20, %v9622_v28  ;;  %v30932_v25 = vld [vmem:[#allocation74_spill] sm:$0xff] }
 0x6c6   :  { %v9341_v51 = vpop.f32.mrb[1].mxu0  ;;  %v9630_v11 = vrot.slane %v23766_v42, 1  ;;  %v10315_v44 = vadd.f32 %v10314_v19, %v10252_v10  ;;  %v28671_v17 = vadd.f32 %v9698_v4, %v28163_v52  ;;  %v9694_v33 = vsel %vm9660_vm1, %v9625_v3, %v9626_v37  ;;  %v26099_v10 = vld [vmem:[#allocation9 + $0x130] sm:$0xff]  }
 0x6c7   :  { %v23767_v58 = vpop.f32.mrb[2].mxu0  ;;  %30906 = vst [vmem:[#allocation82_spill] sm:$0xff] %v28666_v39  ;;  %v9695_v14 = vsel %vm9660_vm1, %v9624_v22, %v9625_v3  ;;  %v28681_v32 = vadd.f32 %v9694_v33, %v28178_v41  ;;  %v9628_v1 = vrot.slane %v9341_v51, 1  ;;  %24143 = vmatpush3.bf16.msra.mxu0 %v26098_v53  ;;  %v10256_v52 = vmul.f32 %v28629_v63, %v28629_v63 }
 0x6c8   :  { %v9344_v13 = vpop.f32.mrb[3].mxu0  ;;  %30907 = vst [vmem:[#allocation83_spill] sm:$0xff] %v28671_v17  ;;  %v28678_v56 = vadd.f32 %v9695_v14, %v28172_v23  ;;  %v9631_v21 = vrot.slane %v23767_v58, 1  ;;  %v10316_v20 = vadd.f32 %v10315_v44, %v10253_v57  ;;  %v10151_v37 = vadd.f32 %v10150_v9, %v28671_v17  ;;  %24144 = vmatprep.subr.bf16.mxu0 %v26099_v10  ;;  %v26100_v44 = vld [vmem:[#allocation9 + $0x138] sm:$0xff]  }
 0x6c9   :  { %30909 = vst [vmem:[#allocation35_spill] sm:$0xff] %v28681_v32  ;;  %v9629_v28 = vrot.slane %v9344_v13, 1  ;;  %v9692_v23 = vsel %vm9660_vm1, %v9627_v16, %v9628_v1  ;;  %v28710_v33 = vsub.f32 %v28350_v2, %v28515_v8  ;;  %v10257_v14 = vmul.f32 %v28633_v62, %v28633_v62 }
 0x6ca   :  { %30908 = vst [vmem:[#allocation84_spill] sm:$0xff] %v28678_v56  ;;  %v9689_v41 = vsel %vm9660_vm1, %v9630_v11, %v9631_v21  ;;  %v10317_v22 = vadd.f32 %v10316_v20, %v10254_v45  ;;  %v10152_v19 = vadd.f32 %v10151_v37, %v28666_v39  ;;  %v28692_v48 = vadd.f32 %v9692_v23, %v28175_v60  ;;  %v26094_v11 = vld [vmem:[#allocation9 + $0xf8] sm:$0xff]   ;;  %v30930_v39 = vld [vmem:[#allocation31_spill] sm:$0xff] }
 0x6cb   :  { %v28695_v57 = vadd.f32 %v9689_v41, %v28187_v26  ;;  %v9691_v16 = vsel %vm9660_vm1, %v9628_v1, %v9629_v28  ;;  %24145 = vmatpush3.bf16.msra.mxu0 %v26099_v10  ;;  %23810 = vmatprep.subr.bf16.mxu1 %v26094_v11  ;;  %v28727_v20 = vsub.f32 %v28361_v54, %v28515_v8 }
 0x6cc   :  { %30910 = vst [vmem:[#allocation36_spill] sm:$0xff] %v28692_v48  ;;  %v10318_v45 = vadd.f32 %v10317_v22, %v10255_v49  ;;  %v10153_v4 = vadd.f32 %v10152_v19, %v28678_v56  ;;  %v28703_v60 = vadd.f32 %v9691_v16, %v28190_v30  ;;  %23811 = vmatpush3.bf16.msra.mxu1 %v26094_v11  ;;  %v30913_v16 = vld [vmem:[#allocation27_spill] sm:$0xff] }
 0x6cd   :  { %v23770_v42 = vpop.f32.mrb[4].mxu0  ;;  %30911 = vst [vmem:[#allocation37_spill] sm:$0xff] %v28695_v57  ;;  %24146 = vmatprep.subr.bf16.mxu0 %v26100_v44  ;;  %v10258_v37 = vmul.f32 %v28637_v59, %v28637_v59  ;;  %v10259_v10 = vmul.f32 %v28710_v33, %v28710_v33  ;;  %v28741_v22 = vsub.f32 %v28367_v12, %v28515_v8  ;;  %v30914_v11 = vld [vmem:[#allocation67_spill] sm:$0xff] }
 0x6ce   :  { %v9357_v24 = vpop.f32.mrb[5].mxu0  ;;  %v9634_v46 = vrot.slane %v23770_v42, 1  ;;  %30912 = vst [vmem:[#allocation126_spill] sm:$0xff] %v28703_v60  ;;  %v10319_v30 = vadd.f32 %v10318_v45, %v10256_v52  ;;  %v10260_v19 = vmul.f32 %v28727_v20, %v28727_v20 }
 0x6cf   :  { %v9632_v51 = vrot.slane %v9357_v24, 1  ;;  %v23771_v58 = vpop.f32.mrb[6].mxu0  ;;  %24147 = vmatpush3.bf16.msra.mxu0 %v26100_v44 }
 0x6d0   :  { %v9360_v13 = vpop.f32.mrb[7].mxu0  ;;  %v9635_v53 = vrot.slane %v23771_v58, 1  ;;  %v10320_v52 = vadd.f32 %v10319_v30, %v10257_v14  ;;  %v30915_v14 = vld [vmem:[#allocation22_spill] sm:$0xff] }
 0x6d1   :  { %v9688_v3 = vsel %vm9660_vm1, %v9631_v21, %v9632_v51  ;;  %v9633_v9 = vrot.slane %v9360_v13, 1  ;;  %v10154_v21 = vadd.f32 %v10153_v4, %v28681_v32 }
 0x6d2   :  { %v28706_v26 = vadd.f32 %v9688_v3, %v28193_v61  ;;  %v9685_v49 = vsel %vm9660_vm1, %v9634_v46, %v9635_v53  ;;  %v10321_v23 = vadd.f32 %v10320_v52, %v10258_v37  ;;  %v28748_v3 = vsub.f32 %v30913_v16, %v28515_v8 }
 0x6d3   :  { %v9686_v1 = vsel %vm9660_vm1, %v9633_v9, %v9634_v46  ;;  %v28720_v61 = vadd.f32 %v9685_v49, %v28199_v0  ;;  %v10155_v28 = vadd.f32 %v10154_v21, %v28692_v48  ;;  %v28734_v0 = vsub.f32 %v28355_v18, %v28515_v8 }
 0x6d4   :  { %v28723_v42 = vadd.f32 %v9686_v1, %v28203_v15  ;;  %v10322_v18 = vadd.f32 %v10321_v23, %v10259_v10  ;;  %v30916_v1 = vld [vmem:[#allocation76_spill] sm:$0xff] }
 0x6d5   :  { %v23774_v2 = vpop.f32.mrb[8].mxu0  ;;  %v10156_v54 = vadd.f32 %v10155_v28, %v28703_v60  ;;  %v10261_v53 = vmul.f32 %v28734_v0, %v28734_v0  ;;  %v28765_v30 = vsub.f32 %v30916_v1, %v28515_v8 }
 0x6d6   :  { %v9373_v24 = vpop.f32.mrb[9].mxu0  ;;  %v9638_v46 = vrot.slane %v23774_v2, 1  ;;  %v10323_v45 = vadd.f32 %v10322_v18, %v10260_v19  ;;  %v10262_v2 = vmul.f32 %v28741_v22, %v28741_v22 }
 0x6d7   :  { %v23775_v15 = vpop.f32.mrb[10].mxu0  ;;  %v9636_v51 = vrot.slane %v9373_v24, 1  ;;  %v10157_v13 = vadd.f32 %v10156_v54, %v28695_v57  ;;  %v10263_v24 = vmul.f32 %v28748_v3, %v28748_v3  ;;  %v10264_v19 = vmul.f32 %v28765_v30, %v28765_v30 }
 0x6d8   :  { %v9376_v41 = vpop.f32.mrb[11].mxu0  ;;  %v10324_v37 = vadd.f32 %v10323_v45, %v10261_v53  ;;  %v9639_v10 = vrot.slane %v23775_v15, 1  ;;  %v30918_v45 = vld [vmem:[#allocation101_spill] sm:$0xff] }
 0x6d9   :  { %v9637_v58 = vrot.slane %v9376_v41, 1  ;;  %v10158_v4 = vadd.f32 %v10157_v13, %v28706_v26 }
 0x6da   :  { %v10325_v41 = vadd.f32 %v10324_v37, %v10262_v2  ;;  %v30919_v2 = vld [vmem:[#allocation23_spill] sm:$0xff] }
 0x6db   :  { %v9682_v9 = vsel %vm9660_vm1, %v9637_v58, %v9638_v46  ;;  %v9683_v12 = vsel %vm9660_vm1, %v9636_v51, %v9637_v58  ;;  %v10159_v52 = vadd.f32 %v10158_v4, %v28723_v42 }
 0x6dc   :  { %v28758_v44 = vadd.f32 %v9683_v12, %v30914_v11  ;;  %v28761_v49 = vadd.f32 %v9682_v9, %v30915_v14  ;;  %v10326_v16 = vadd.f32 %v10325_v41, %v10263_v24  ;;  %v30917_v9 = vld [vmem:[#allocation68_spill] sm:$0xff]  ;;  %v10265_v14 = vmul.f32 %v28523_v47, %v28523_v47 }
 0x6dd   :  { %v23778_v21 = vpop.f32.mrb[12].mxu0  ;;  %v10160_v46 = vadd.f32 %v10159_v52, %v28720_v61 }
 0x6de   :  { %v9389_v28 = vpop.f32.mrb[13].mxu0  ;;  %v9642_v51 = vrot.slane %v23778_v21, 1  ;;  %v10327_v1 = vadd.f32 %v10326_v16, %v10264_v19  ;;  %v10268_v16 = vmul.f32 %v28535_v35, %v28535_v35 }
 0x6df   :  { %v9640_v23 = vrot.slane %v9389_v28, 1  ;;  %v23779_v54 = vpop.f32.mrb[14].mxu0  ;;  %v10161_v53 = vadd.f32 %v10160_v46, %v28758_v44  ;;  %v10266_v28 = vmul.f32 %v28527_v36, %v28527_v36 }
 0x6e0   :  { %v9643_v8 = vrot.slane %v23779_v54, 1  ;;  %v9392_v58 = vpop.f32.mrb[15].mxu0  ;;  %v10328_v24 = vadd.f32 %v10327_v1, %v10265_v14 }
 0x6e1   :  { %v9680_v18 = vsel %vm9660_vm1, %v9639_v10, %v9640_v23  ;;  %v9641_v13 = vrot.slane %v9392_v58, 1  ;;  %v10162_v21 = vadd.f32 %v10161_v53, %v28761_v49 }
 0x6e2   :  { %v28779_v15 = vadd.f32 %v9680_v18, %v30917_v9  ;;  %v9677_v12 = vsel %vm9660_vm1, %v9642_v51, %v9643_v8  ;;  %v10329_v51 = vadd.f32 %v10328_v24, %v10266_v28  ;;  %v10269_v28 = vmul.f32 %v28539_v29, %v28539_v29 }
 0x6e3   :  { %v28784_v4 = vadd.f32 %v9677_v12, %v30918_v45  ;;  %v9679_v11 = vsel %vm9660_vm1, %v9640_v23, %v9641_v13  ;;  %v10267_v23 = vmul.f32 %v28531_v5, %v28531_v5  ;;  %v30920_v45 = vld [vmem:[#allocation72_spill] sm:$0xff] }
 0x6e4   :  { %v28792_v37 = vadd.f32 %v9679_v11, %v30919_v2  ;;  %v10163_v10 = vadd.f32 %v10162_v21, %v28779_v15  ;;  %v30921_v21 = vld [vmem:[#allocation105_spill] sm:$0xff] }
 0x6e5   :  { %v23782_v52 = vpop.f32.mrb[16].mxu0  ;;  %v10330_v12 = vadd.f32 %v10329_v51, %v10267_v23 }
 0x6e6   :  { %v9405_v54 = vpop.f32.mrb[17].mxu0  ;;  %v10164_v58 = vadd.f32 %v10163_v10, %v28792_v37  ;;  %v9646_v19 = vrot.slane %v23782_v52, 1  ;;  %v30922_v10 = vld [vmem:[#allocation73_spill] sm:$0xff] }
 0x6e7   :  { %v9644_v41 = vrot.slane %v9405_v54, 1  ;;  %v23783_v46 = vpop.f32.mrb[18].mxu0 }
 0x6e8   :  { %v9647_v18 = vrot.slane %v23783_v46, 1  ;;  %v9408_v13 = vpop.f32.mrb[19].mxu0  ;;  %v10165_v14 = vadd.f32 %v10164_v58, %v28784_v4 }
 0x6e9   :  { %v9676_v53 = vsel %vm9660_vm1, %v9643_v8, %v9644_v41  ;;  %v9645_v9 = vrot.slane %v9408_v13, 1  ;;  %v10331_v8 = vadd.f32 %v10330_v12, %v10268_v16  ;;  %v10270_v41 = vmul.f32 %v28543_v55, %v28543_v55 }
 0x6ea   :  { %v28805_v11 = vadd.f32 %v9676_v53, %v30920_v45  ;;  %v9673_v1 = vsel %vm9660_vm1, %v9646_v19, %v9647_v18 }
 0x6eb   :  { %v28811_v2 = vadd.f32 %v9673_v1, %v30921_v21  ;;  %v9674_v52 = vsel %vm9660_vm1, %v9645_v9, %v9646_v19  ;;  %v10332_v46 = vadd.f32 %v10331_v8, %v10269_v28  ;;  %v10271_v19 = vmul.f32 %v28547_v40, %v28547_v40 }
 0x6ec   :  { %v10166_v24 = vadd.f32 %v10165_v14, %v28805_v11  ;;  %v28819_v54 = vadd.f32 %v9674_v52, %v30922_v10  ;;  %v10272_v14 = vmul.f32 %v28551_v38, %v28551_v38  ;;  %v10273_v28 = vmul.f32 %v28557_v27, %v28557_v27 }
 0x6ed   :  { %v23786_v23 = vpop.f32.mrb[20].mxu0  ;;  %v10333_v13 = vadd.f32 %v10332_v46, %v10270_v41 }
 0x6ee   :  { %v10167_v51 = vadd.f32 %v10166_v24, %v28819_v54  ;;  %v9421_v58 = vpop.f32.mrb[21].mxu0  ;;  %v9650_v9 = vrot.slane %v23786_v23, 1  ;;  %v30923_v24 = vld [vmem:[#allocation24_spill] sm:$0xff]  ;;  %v30924_v23 = vld [vmem:[#allocation26_spill] sm:$0xff] }
 0x6ef   :  { %v23787_v18 = vpop.f32.mrb[22].mxu0  ;;  %v9648_v12 = vrot.slane %v9421_v58, 1  ;;  %v10334_v1 = vadd.f32 %v10333_v13, %v10271_v19 }
 0x6f0   :  { %v9424_v53 = vpop.f32.mrb[23].mxu0  ;;  %v10168_v16 = vadd.f32 %v10167_v51, %v28811_v2  ;;  %v10274_v51 = vmul.f32 %v28561_v34, %v28561_v34 }
 0x6f1   :  { %v9649_v45 = vrot.slane %v9424_v53, 1  ;;  %v10335_v8 = vadd.f32 %v10334_v1, %v10272_v14  ;;  %v10275_v53 = vmul.f32 %v28565_v31, %v28565_v31 }
 0x6f3   :  { %v9670_v21 = vsel %vm9660_vm1, %v9649_v45, %v9650_v9  ;;  %v9671_v52 = vsel %vm9660_vm1, %v9648_v12, %v9649_v45  ;;  %v10336_v58 = vadd.f32 %v10335_v8, %v10273_v28  ;;  %v9651_v9 = vrot.slane %v23787_v18, 1  ;;  %v30925_v8 = vld [vmem:[#allocation25_spill] sm:$0xff] }
 0x6f4   :  { %v28836_v10 = vadd.f32 %v9671_v52, %v30923_v24  ;;  %v28839_v41 = vadd.f32 %v9670_v21, %v30924_v23 }
 0x6f5   :  { %v23790_v46 = vpop.f32.mrb[24].mxu0  ;;  %v10337_v14 = vadd.f32 %v10336_v58, %v10274_v51  ;;  %v30926_v51 = vld [vmem:[#allocation106_spill] sm:$0xff] }
 0x6f6   :  { %v10169_v19 = vadd.f32 %v10168_v16, %v28836_v10  ;;  %v9437_v13 = vpop.f32.mrb[25].mxu0  ;;  %v9654_v52 = vrot.slane %v23790_v46, 1  ;;  %v10276_v16 = vmul.f32 %v28569_v50, %v28569_v50 }
 0x6f7   :  { %v9652_v12 = vrot.slane %v9437_v13, 1  ;;  %v23791_v45 = vpop.f32.mrb[26].mxu0  ;;  %v10338_v28 = vadd.f32 %v10337_v14, %v10275_v53 }
 0x6f8   :  { %v10170_v1 = vadd.f32 %v10169_v19, %v28839_v41  ;;  %v9655_v21 = vrot.slane %v23791_v45, 1  ;;  %v9440_v24 = vpop.f32.mrb[27].mxu0  ;;  %v10277_v19 = vmul.f32 %v28575_v7, %v28575_v7  ;;  %v30927_v45 = vld [vmem:[#allocation107_spill] sm:$0xff] }
 0x6f9   :  { %v9668_v23 = vsel %vm9660_vm1, %v9651_v9, %v9652_v12  ;;  %v9653_v57 = vrot.slane %v9440_v24, 1  ;;  %v10339_v13 = vadd.f32 %v10338_v28, %v10276_v16  ;;  %v30928_v24 = vld [vmem:[#allocation30_spill] sm:$0xff] }
 0x6fa   :  { %v28852_v60 = vadd.f32 %v9668_v23, %v30925_v8  ;;  %v9665_v18 = vsel %vm9660_vm1, %v9654_v52, %v9655_v21  ;;  %v10278_v23 = vmul.f32 %v30928_v24, %v30928_v24 }
 0x6fb   :  { %v28857_v58 = vadd.f32 %v9665_v18, %v30926_v51  ;;  %v9667_v46 = vsel %vm9660_vm1, %v9652_v12, %v9653_v57  ;;  %v10340_v8 = vadd.f32 %v10339_v13, %v10277_v19  ;;  %v30929_v18 = vld [vmem:[#allocation117_spill] sm:$0xff]  ;;  %v10280_v19 = vmul.f32 %v30930_v39, %v30930_v39 }
 0x6fc   :  { %v10171_v9 = vadd.f32 %v10170_v1, %v28852_v60  ;;  %v9941_v53 = vadd.f32 %v9667_v46, %v30927_v45  ;;  %v10279_v51 = vmul.f32 %v30929_v18, %v30929_v18 }
 0x6fd   :  { %v23794_v14 = vpop.f32.mrb[28].mxu0  ;;  %v10341_v12 = vadd.f32 %v10340_v8, %v10278_v23 }
 0x6fe   :  { %v10172_v52 = vadd.f32 %v10171_v9, %v9941_v53  ;;  %v9453_v48 = vpop.f32.mrb[29].mxu0  ;;  %v9658_v56 = vrot.slane %v23794_v14, 1  ;;  %v30931_v9 = vld [vmem:[#allocation110_spill] sm:$0xff] }
 0x6ff   :  { %v9656_v32 = vrot.slane %v9453_v48, 1  ;;  %v23795_v57 = vpop.f32.mrb[30].mxu0  ;;  %v10342_v13 = vadd.f32 %v10341_v12, %v10279_v51 }
 0x700   :  { %v10173_v16 = vadd.f32 %v10172_v52, %v28857_v58  ;;  %v9659_v28 = vrot.slane %v23795_v57, 1  ;;  %v9456_v1 = vpop.f32.mrb[31].mxu0  ;;  %v30933_v57 = vld [vmem:[#allocation75_spill] sm:$0xff] }
 0x701   :  { %v9664_v46 = vsel %vm9660_vm1, %v9655_v21, %v9656_v32  ;;  %v9657_v45 = vrot.slane %v9456_v1, 1  ;;  %v10343_v8 = vadd.f32 %v10342_v13, %v10280_v19 }
 0x702   :  { %v9944_v17 = vadd.f32 %v9664_v46, %v30931_v9  ;;  %v9661_v48 = vsel %vm9660_vm1, %v9658_v56, %v9659_v28 }
 0x703   :  { %v9947_v23 = vadd.f32 %v9661_v48, %v30932_v25  ;;  %v9662_v14 = vsel %vm9660_vm1, %v9657_v45, %v9658_v56  ;;  %v10344_v32 = vrot.slane %v10343_v8, 4 }
 0x704   :  { %v10174_v52 = vadd.f32 %v10173_v16, %v9944_v17  ;;  %v9946_v43 = vadd.f32 %v9662_v14, %v30933_v57 }
 0x705   :  { %v10345_v1 = vadd.f32 %v10344_v32, %v10343_v8  ;;  %v30941_v8 = vld [vmem:[#allocation80_spill] sm:$0xff] }
 0x706   :  { %v10175_v21 = vadd.f32 %v10174_v52, %v9946_v43 }
 0x707   :  { %v10346_v7 = vrot.slane %v10345_v1, 2 }
 0x708   :  { %v10176_v24 = vadd.f32 %v10175_v21, %v9947_v23  ;;  %v30944_v21 = vld [vmem:[#allocation32_spill] sm:$0xff] }
 0x709   :  { %v10347_v12 = vadd.f32 %v10346_v7, %v10345_v1 }
 0x70a   :  { %v10177_v51 = vrot.slane %v10176_v24, 4 }
 0x70b   :  { %v10348_v9 = vrot.slane %v10347_v12, 1 }
 0x70c   :  { %v10178_v46 = vadd.f32 %v10177_v51, %v10176_v24  ;;  %v30945_v51 = vld [vmem:[#allocation33_spill] sm:$0xff] }
 0x70d   :  { %v10349_v28 = vadd.f32 %v10348_v9, %v10347_v12 }
 0x70e   :  { %v10179_v50 = vrot.slane %v10178_v46, 2 }
 0x70f   :  { %v10387_v25 = vmul.f32 0.00390625, %v10349_v28  ;;  %v30947_v28 = vld [vmem:[#allocation122_spill] sm:$0xff] }
 0x710   :  { %v10180_v31 = vadd.f32 %v10179_v50, %v10178_v46  ;;  %v30946_v46 = vld [vmem:[#allocation34_spill] sm:$0xff] }
 0x711   :  { %v10389_v6 = vadd.f32 1e-05, %v10387_v25 }
 0x712   :  { %v10181_v48 = vrot.slane %v10180_v31, 1 }
 0x713   :  { %26593 = vrsqrt.f32 %v10389_v6 }
 0x714   :  { %v10182_v56 = vadd.f32 %v10181_v48, %v10180_v31 }
 0x716   :  { %v28881_v16 = vmul.f32 0.00390625, %v10182_v56 }
 0x718   :  { %v28885_v45 = vsub.f32 %v28706_v26, %v28881_v16  ;;  %v28889_v19 = vsub.f32 %v28723_v42, %v28881_v16  ;;  %v28893_v7 = vsub.f32 %v28720_v61, %v28881_v16  ;;  %v28897_v50 = vsub.f32 %v28758_v44, %v28881_v16 }
 0x719   :  { %v28901_v6 = vsub.f32 %v28761_v49, %v28881_v16  ;;  %v28905_v31 = vsub.f32 %v28779_v15, %v28881_v16  ;;  %v28909_v26 = vsub.f32 %v28792_v37, %v28881_v16  ;;  %v28913_v61 = vsub.f32 %v28784_v4, %v28881_v16 }
 0x71a   :  { %v28917_v42 = vsub.f32 %v28805_v11, %v28881_v16  ;;  %v28921_v44 = vsub.f32 %v28819_v54, %v28881_v16  ;;  %v28925_v49 = vsub.f32 %v28811_v2, %v28881_v16  ;;  %v28929_v15 = vsub.f32 %v28836_v10, %v28881_v16 }
 0x71b   :  { %v28933_v4 = vsub.f32 %v28839_v41, %v28881_v16  ;;  %v28937_v37 = vsub.f32 %v28852_v60, %v28881_v16  ;;  %v28940_v11 = vsub.f32 %v9941_v53, %v28881_v16  ;;  %v28944_v54 = vsub.f32 %v28857_v58, %v28881_v16  ;;  %v30939_v60 = vld [vmem:[#allocation28_spill] sm:$0xff]  ;;  %v30940_v53 = vld [vmem:[#allocation29_spill] sm:$0xff] }
 0x71c   :  { %v28947_v2 = vsub.f32 %v9944_v17, %v28881_v16  ;;  %v28950_v10 = vsub.f32 %v9946_v43, %v28881_v16  ;;  %v28953_v41 = vsub.f32 %v9947_v23, %v28881_v16  ;;  %v28957_v13 = vsub.f32 %v30939_v60, %v28881_v16  ;;  %v30942_v43 = vld [vmem:[#allocation121_spill] sm:$0xff] }
 0x71d   :  { %30934 = vst [vmem:[#allocation128_spill] sm:$0xff] %v28940_v11  ;;  %30935 = vst [vmem:[#allocation130_spill] sm:$0xff] %v28944_v54  ;;  %v26594_v24 = vpop.eup %26593  ;;  %v28961_v14 = vsub.f32 %v30940_v53, %v28881_v16  ;;  %v30943_v23 = vld [vmem:[#allocation81_spill] sm:$0xff] }
 0x71e   :  { %30936 = vst [vmem:[#allocation88_spill] sm:$0xff] %v28947_v2  ;;  %30937 = vst [vmem:[#allocation86_spill] sm:$0xff] %v28950_v10  ;;  %v10423_v58 = vmul.f32 %v26594_v24, %v30929_v18  ;;  %v10424_v17 = vmul.f32 %v26594_v24, %v30930_v39  ;;  %v28966_v52 = vmul.f32 %v26594_v24, %v30941_v8 }
 0x71f   :  { %30938 = vst [vmem:[#allocation87_spill] sm:$0xff] %v28953_v41  ;;  %v28969_v57 = vmul.f32 %v26594_v24, %v30942_v43  ;;  %v28972_v32 = vmul.f32 %v26594_v24, %v30943_v23  ;;  %v28975_v1 = vmul.f32 %v26594_v24, %v30944_v21  ;;  %v28978_v12 = vmul.f32 %v26594_v24, %v30945_v51 }
 0x720   :  { %v28981_v9 = vmul.f32 %v26594_v24, %v30946_v46  ;;  %v10487_v18 = vmax.f32 %v10423_v58, 0.0  ;;  %v10488_v39 = vmax.f32 %v10424_v17, 0.0  ;;  %v28984_v25 = vmul.f32 %v26594_v24, %v30947_v28 }
 0x721   :  { %v28987_v48 = vmul.f32 %v26594_v24, %v28629_v63  ;;  %v10401_v56 = vmul.f32 %v26594_v24, %v28633_v62  ;;  %v10402_v60 = vmul.f32 %v26594_v24, %v28637_v59  ;;  %v28992_v53 = vmul.f32 %v26594_v24, %v28710_v33 }
 0x722   :  { %v28995_v8 = vmul.f32 %v26594_v24, %v28727_v20  ;;  %v21706_v43 = vpack.c.bf16 %v10488_v39, %v10487_v18  ;;  %v10405_v58 = vmul.f32 %v26594_v24, %v28734_v0  ;;  %v10406_v17 = vmul.f32 %v26594_v24, %v28741_v22 }
 0x723   :  { %v29000_v23 = vmul.f32 %v26594_v24, %v28748_v3  ;;  %v29003_v63 = vmul.f32 %v26594_v24, %v28765_v30  ;;  %v10409_v62 = vmul.f32 %v26594_v24, %v28523_v47  ;;  %v10410_v59 = vmul.f32 %v26594_v24, %v28527_v36 }
 0x724   :  { %v29008_v33 = vmul.f32 %v26594_v24, %v28531_v5  ;;  %v29011_v20 = vmul.f32 %v26594_v24, %v28535_v35  ;;  %v10413_v0 = vmul.f32 %v26594_v24, %v28539_v29  ;;  %v10414_v22 = vmul.f32 %v26594_v24, %v28543_v55  ;;  %21771 = vst [vmem:[#allocation2 + $0xc0] sm:$0xff] %v21706_v43   ;;  %v30948_v5 = vld [vmem:[#allocation79_spill] sm:$0xff]  ;;  %v30949_v35 = vld [vmem:[#allocation77_spill] sm:$0xff]  ;;  %v30950_v29 = vld [vmem:[#allocation78_spill] sm:$0xff] }
 0x725   :  { %v29016_v3 = vmul.f32 %v26594_v24, %v28547_v40  ;;  %v29019_v30 = vmul.f32 %v26594_v24, %v28551_v38  ;;  %v10417_v47 = vmul.f32 %v26594_v24, %v28557_v27  ;;  %v10418_v36 = vmul.f32 %v26594_v24, %v28561_v34  ;;  %v30951_v55 = vld [vmem:[#allocation30_spill] sm:$0xff] }
 0x726   :  { %v29024_v21 = vmul.f32 %v26594_v24, %v30948_v5  ;;  %v29027_v51 = vmul.f32 %v26594_v24, %v30949_v35  ;;  %v10421_v46 = vmul.f32 %v26594_v24, %v30950_v29  ;;  %v10422_v18 = vmul.f32 %v26594_v24, %v30951_v55 }
 0x727   :  { %v10457_v40 = vmax.f32 %v28966_v52, 0.0  ;;  %v10458_v39 = vmax.f32 %v28969_v57, 0.0  ;;  %v10459_v38 = vmax.f32 %v28972_v32, 0.0  ;;  %v10460_v27 = vmax.f32 %v28975_v1, 0.0 }
 0x728   :  { %v10461_v34 = vmax.f32 %v28978_v12, 0.0  ;;  %v10462_v28 = vmax.f32 %v28981_v9, 0.0  ;;  %v10463_v43 = vmax.f32 %v28984_v25, 0.0  ;;  %v10464_v5 = vmax.f32 %v28987_v48, 0.0  ;;  %v29045_v48 = vld [vmem:[#allocation9] sm:$0xff]  }
 0x729   :  { %v10465_v35 = vmax.f32 %v10401_v56, 0.0  ;;  %v10466_v29 = vmax.f32 %v10402_v60, 0.0  ;;  %v10467_v24 = vmax.f32 %v28992_v53, 0.0  ;;  %v10468_v52 = vmax.f32 %v28995_v8, 0.0  ;;  %23908 = vmatprep.subr.bf16.mxu1 %v29045_v48 }
 0x72a   :  { %v10469_v55 = vmax.f32 %v10405_v58, 0.0  ;;  %v10470_v57 = vmax.f32 %v10406_v17, 0.0  ;;  %v10471_v32 = vmax.f32 %v29000_v23, 0.0  ;;  %v10472_v1 = vmax.f32 %v29003_v63, 0.0 }
 0x72b   :  { %v10473_v41 = vmax.f32 %v10409_v62, 0.0  ;;  %v10474_v12 = vmax.f32 %v10410_v59, 0.0  ;;  %v10475_v9 = vmax.f32 %v29008_v33, 0.0  ;;  %v10476_v25 = vmax.f32 %v29011_v20, 0.0 }
 0x72c   :  { %v10477_v10 = vmax.f32 %v10413_v0, 0.0  ;;  %v10478_v56 = vmax.f32 %v10414_v22, 0.0  ;;  %v10479_v60 = vmax.f32 %v29016_v3, 0.0  ;;  %v10480_v53 = vmax.f32 %v29019_v30, 0.0 }
 0x72d   :  { %v10481_v8 = vmax.f32 %v10417_v47, 0.0  ;;  %v10482_v58 = vmax.f32 %v10418_v36, 0.0  ;;  %v10483_v17 = vmax.f32 %v29024_v21, 0.0  ;;  %v10484_v23 = vmax.f32 %v29027_v51, 0.0 }
 0x72e   :  { %v10485_v63 = vmax.f32 %v10421_v46, 0.0  ;;  %v10486_v62 = vmax.f32 %v10422_v18, 0.0  ;;  %v21524_v59 = vpack.c.bf16 %v10457_v40, %v10457_v40  ;;  %v21525_v33 = vpack.c.bf16 %v10458_v39, %v10458_v39 }
 0x72f   :  { %v21528_v20 = vpack.c.bf16 %v10461_v34, %v10461_v34  ;;  %v21529_v0 = vpack.c.bf16 %v10462_v28, %v10462_v28  ;;  %v21532_v2 = vpack.c.bf16 %v10465_v35, %v10465_v35  ;;  %v21533_v22 = vpack.c.bf16 %v10466_v29, %v10466_v29 }
 0x730   :  { %v21536_v54 = vpack.c.bf16 %v10469_v55, %v10469_v55  ;;  %v21537_v3 = vpack.c.bf16 %v10470_v57, %v10470_v57  ;;  %v21540_v11 = vpack.c.bf16 %v10473_v41, %v10473_v41  ;;  %v21541_v30 = vpack.c.bf16 %v10474_v12, %v10474_v12  ;;  %10777 = vst [vmem:[#allocation2 + $0xc] sm:$0xf] %v21524_v59  ;;  %v30957_v59 = vld [vmem:[#allocation82_spill] sm:$0xff] }
 0x731   :  { %v21544_v47 = vpack.c.bf16 %v10477_v10, %v10477_v10  ;;  %10778 = vst [vmem:[#allocation2 + $0x10] sm:$0xf] %v21525_v33  ;;  %10781 = vst [vmem:[#allocation2 + $0x24] sm:$0xf] %v21528_v20  ;;  %v21545_v36 = vpack.c.bf16 %v10478_v56, %v10478_v56  ;;  %v21548_v21 = vpack.c.bf16 %v10481_v8, %v10481_v8 }
 0x732   :  { %v21549_v51 = vpack.c.bf16 %v10482_v58, %v10482_v58  ;;  %v21552_v46 = vpack.c.bf16 %v10485_v63, %v10485_v63  ;;  %10782 = vst [vmem:[#allocation2 + $0x28] sm:$0xf] %v21529_v0  ;;  %10785 = vst [vmem:[#allocation2 + $0x3c] sm:$0xf] %v21532_v2  ;;  %v21553_v18 = vpack.c.bf16 %v10486_v62, %v10486_v62  ;;  %v30956_v58 = vld [vmem:[#allocation83_spill] sm:$0xff]  ;;  %v26129_v62 = vld [vmem:[#allocation9 + $0x10] sm:$0xff]  }
 0x733   :  { %10786 = vst [vmem:[#allocation2 + $0x40] sm:$0xf] %v21533_v22  ;;  %10789 = vst [vmem:[#allocation2 + $0x54] sm:$0xf] %v21536_v54  ;;  %v21671_v40 = vpack.c.bf16 %v10460_v27, %v10459_v38  ;;  %v21676_v39 = vpack.c.bf16 %v10464_v5, %v10463_v43  ;;  %v21681_v34 = vpack.c.bf16 %v10468_v52, %v10467_v24  ;;  %v30953_v5 = vld [vmem:[#allocation115_spill] sm:$0xff]  ;;  %v30954_v52 = vld [vmem:[#allocation113_spill] sm:$0xff] }
 0x734   :  { %10790 = vst [vmem:[#allocation2 + $0x58] sm:$0xf] %v21537_v3  ;;  %10793 = vst [vmem:[#allocation2 + $0x6c] sm:$0xf] %v21540_v11  ;;  %v21686_v10 = vpack.c.bf16 %v10472_v1, %v10471_v32  ;;  %v21691_v41 = vpack.c.bf16 %v10476_v25, %v10475_v9  ;;  %v21696_v28 = vpack.c.bf16 %v10480_v53, %v10479_v60  ;;  %v30952_v11 = vld [vmem:[#allocation111_spill] sm:$0xff]  ;;  %v26142_v0 = vld [vmem:[#allocation9 + $0x18] sm:$0xff]  }
 0x735   :  { %10794 = vst [vmem:[#allocation2 + $0x70] sm:$0xf] %v21541_v30  ;;  %10797 = vst [vmem:[#allocation2 + $0x84] sm:$0xf] %v21544_v47  ;;  %v21701_v35 = vpack.c.bf16 %v10484_v23, %v10483_v17  ;;  %v29054_v54 = vsub.f32 %v30952_v11, %v28881_v16  ;;  %v10281_v2 = vmul.f32 %v28957_v13, %v28957_v13  ;;  %v26116_v24 = vld [vmem:[#allocation9 + $0x8] sm:$0xff]   ;;  %v30958_v22 = vld [vmem:[#allocation84_spill] sm:$0xff] }
 0x736   :  { %10798 = vst [vmem:[#allocation2 + $0x88] sm:$0xf] %v21545_v36  ;;  %10801 = vst [vmem:[#allocation2 + $0x9c] sm:$0xf] %v21548_v21  ;;  %v10282_v38 = vmul.f32 %v28961_v14, %v28961_v14  ;;  %v29062_v29 = vsub.f32 %v30953_v5, %v28881_v16  ;;  %v29066_v55 = vsub.f32 %v30954_v52, %v28881_v16  ;;  %v30955_v25 = vld [vmem:[#allocation123_spill] sm:$0xff]  ;;  %v26154_v11 = vld [vmem:[#allocation9 + $0x20] sm:$0xff]  }
 0x737   :  { %10802 = vst [vmem:[#allocation2 + $0xa0] sm:$0xf] %v21549_v51  ;;  %10805 = vst [vmem:[#allocation2 + $0xb4] sm:$0xf] %v21552_v46  ;;  %v10283_v57 = vmul.f32 %v29054_v54, %v29054_v54  ;;  %v29072_v56 = vsub.f32 %v30955_v25, %v28881_v16  ;;  %v29079_v17 = vsub.f32 %v30956_v58, %v28881_v16  ;;  %v30959_v46 = vld [vmem:[#allocation35_spill] sm:$0xff]  ;;  %v30962_v5 = vld [vmem:[#allocation37_spill] sm:$0xff] }
 0x738   :  { %21764 = vst [vmem:[#allocation2 + $0x18] sm:$0xff] %v21671_v40   ;;  %21765 = vst [vmem:[#allocation2 + $0x30] sm:$0xff] %v21676_v39   ;;  %v26101_v27 = vld [vmem:[#allocation2 + $0xc] sm:$0xff]   ;;  %v10350_v32 = vadd.f32 %v10282_v38, %v10281_v2  ;;  %v10284_v60 = vmul.f32 %v29062_v29, %v29062_v29  ;;  %v10285_v23 = vmul.f32 %v29066_v55, %v29066_v55 }
 0x739   :  { %21766 = vst [vmem:[#allocation2 + $0x48] sm:$0xff] %v21681_v34   ;;  %10806 = vst [vmem:[#allocation2 + $0xb8] sm:$0xf] %v21553_v18  ;;  %v26103_v43 = vld [vmem:[#allocation2 + $0xc] sm:$0xff]   ;;  %23812 = vmatprep.mubr.bf16.mxu1 %v26101_v27  ;;  %v29085_v33 = vsub.f32 %v30957_v59, %v28881_v16  ;;  %v29091_v3 = vsub.f32 %v30958_v22, %v28881_v16  ;;  %v10287_v30 = vmul.f32 %v29079_v17, %v29079_v17  ;;  %v26108_v36 = vld [vmem:[#allocation2 + $0x24] sm:$0xff]  }
 0x73a   :  { %21767 = vst [vmem:[#allocation2 + $0x60] sm:$0xff] %v21686_v10   ;;  %21768 = vst [vmem:[#allocation2 + $0x78] sm:$0xff] %v21691_v41   ;;  %24148 = vmatprep.mubr.bf16.mxu0 %v26103_v43  ;;  %v10351_v53 = vadd.f32 %v10350_v32, %v10283_v57  ;;  %v26109_v21 = vld [vmem:[#allocation2 + $0x24] sm:$0xff]   ;;  %v29097_v18 = vsub.f32 %v30959_v46, %v28881_v16  ;;  %v30961_v2 = vld [vmem:[#allocation126_spill] sm:$0xff]  ;;  %v10299_v46 = vmul.f32 %v28905_v31, %v28905_v31 }
 0x73b   :  { %21769 = vst [vmem:[#allocation2 + $0x90] sm:$0xff] %v21696_v28   ;;  %21770 = vst [vmem:[#allocation2 + $0xa8] sm:$0xff] %v21701_v35   ;;  %v10288_v40 = vmul.f32 %v29085_v33, %v29085_v33  ;;  %v30960_v10 = vld [vmem:[#allocation36_spill] sm:$0xff]  ;;  %v10289_v28 = vmul.f32 %v29091_v3, %v29091_v3  ;;  %v29109_v38 = vsub.f32 %v30961_v2, %v28881_v16 }
 0x73c   :  { %v10352_v63 = vadd.f32 %v10351_v53, %v10284_v60  ;;  %v29103_v41 = vsub.f32 %v30960_v10, %v28881_v16  ;;  %v10290_v27 = vmul.f32 %v29097_v18, %v29097_v18  ;;  %v26115_v60 = vld [vmem:[#allocation2 + $0x3c] sm:$0xff]  }
 0x73d   :  { %v26181_v2 = vld [vmem:[#allocation9 + $0x30] sm:$0xff]  }
 0x73e   :  { %v10353_v20 = vadd.f32 %v10352_v63, %v10285_v23  ;;  %v10291_v52 = vmul.f32 %v29103_v41, %v29103_v41  ;;  %v10295_v63 = vmul.f32 %v28889_v19, %v28889_v19 }
 0x73f   :  { %v26104_v1 = vld [vmem:[#allocation2 + $0x14] sm:$0xff]   ;;  %v26106_v9 = vld [vmem:[#allocation2 + $0x1c] sm:$0xff]   ;;  %v26110_v51 = vld [vmem:[#allocation2 + $0x2c] sm:$0xff]  }
 0x740   :  { %v26105_v12 = vld [vmem:[#allocation2 + $0x14] sm:$0xff]   ;;  %23813 = vmatmul.mubr.bf16.vlgmr.msra.gmra.mrb[192].mxu1 %v26104_v1  ;;  %v26107_v8 = vld [vmem:[#allocation2 + $0x1c] sm:$0xff]   ;;  %v26111_v34 = vld [vmem:[#allocation2 + $0x2c] sm:$0xff]  }
 0x741   :  { %23909 = vmatpush3.bf16.msra.mxu1 %v29045_v48  ;;  %24149 = vmatmul.mubr.bf16.vlgmr.msra.gmra.mrb[32].mxu0 %v26105_v12  ;;  %v10286_v48 = vmul.f32 %v29072_v56, %v29072_v56  ;;  %v26112_v32 = vld [vmem:[#allocation2 + $0x34] sm:$0xff]   ;;  %v26114_v12 = vld [vmem:[#allocation2 + $0x3c] sm:$0xff]   ;;  %v26117_v23 = vld [vmem:[#allocation2 + $0x44] sm:$0xff]  }
 0x742   :  { %23816 = vmatprep.mubr.bf16.mxu1 %v26106_v9  ;;  %24152 = vmatprep.mubr.bf16.mxu0 %v26107_v8  ;;  %v26113_v1 = vld [vmem:[#allocation2 + $0x34] sm:$0xff]   ;;  %v10292_v9 = vmul.f32 %v29109_v38, %v29109_v38  ;;  %v10294_v8 = vmul.f32 %v28885_v45, %v28885_v45  ;;  %v26118_v59 = vld [vmem:[#allocation2 + $0x44] sm:$0xff]   ;;  %v26120_v22 = vld [vmem:[#allocation2 + $0x4c] sm:$0xff]  }
 0x743   :  { %23910 = vmatprep.subr.bf16.mxu1 %v26116_v24  ;;  %v10354_v47 = vadd.f32 %v10353_v20, %v10286_v48  ;;  %v26119_v48 = vld [vmem:[#allocation2 + $0x4c] sm:$0xff]   ;;  %v10296_v20 = vmul.f32 %v28893_v7, %v28893_v7  ;;  %v26123_v10 = vld [vmem:[#allocation2 + $0x5c] sm:$0xff]  }
 0x745   :  { %23911 = vmatpush3.bf16.msra.mxu1 %v26116_v24  ;;  %v10355_v39 = vadd.f32 %v10354_v47, %v10287_v30  ;;  %v29115_v24 = vsub.f32 %v30962_v5, %v28881_v16  ;;  %v10297_v30 = vmul.f32 %v28897_v50, %v28897_v50  ;;  %v10302_v5 = vmul.f32 %v28917_v42, %v28917_v42 }
 0x746   :  { %23912 = vmatprep.subr.bf16.mxu1 %v26129_v62 }
 0x747   :  { %v10356_v35 = vadd.f32 %v10355_v39, %v10288_v40  ;;  %v10293_v16 = vmul.f32 %v29115_v24, %v29115_v24  ;;  %v26121_v39 = vld [vmem:[#allocation2 + $0x54] sm:$0xff]  }
 0x748   :  { %23817 = vmatmul.mubr.bf16.gmra.mrb[196].mxu1 %v26108_v36  ;;  %v10298_v36 = vmul.f32 %v28901_v6, %v28901_v6 }
 0x749   :  { %24153 = vmatmul.mubr.bf16.gmra.mrb[36].mxu0 %v26109_v21  ;;  %23820 = vmatprep.mubr.bf16.mxu1 %v26110_v51  ;;  %v10357_v43 = vadd.f32 %v10356_v35, %v10289_v28  ;;  %v26168_v51 = vld [vmem:[#allocation9 + $0x28] sm:$0xff]   ;;  %v10300_v28 = vmul.f32 %v28909_v26, %v28909_v26 }
 0x74a   :  { %24156 = vmatprep.mubr.bf16.mxu0 %v26111_v34  ;;  %23913 = vmatpush3.bf16.msra.mxu1 %v26129_v62  ;;  %v26122_v34 = vld [vmem:[#allocation2 + $0x54] sm:$0xff]  }
 0x74b   :  { %23914 = vmatprep.subr.bf16.mxu1 %v26142_v0  ;;  %v10358_v57 = vadd.f32 %v10357_v43, %v10290_v27  ;;  %v10301_v27 = vmul.f32 %v28913_v61, %v28913_v61 }
 0x74d   :  { %v10359_v25 = vadd.f32 %v10358_v57, %v10291_v52  ;;  %v26125_v57 = vld [vmem:[#allocation2 + $0x64] sm:$0xff]  }
 0x74e   :  { %23915 = vmatpush3.bf16.msra.mxu1 %v26142_v0 }
 0x74f   :  { %23916 = vmatprep.subr.bf16.mxu1 %v26154_v11  ;;  %v10360_v53 = vadd.f32 %v10359_v25, %v10292_v9  ;;  %v26127_v9 = vld [vmem:[#allocation2 + $0x6c] sm:$0xff]   ;;  %v10304_v25 = vmul.f32 %v28925_v49, %v28925_v49 }
 0x750   :  { %23821 = vmatmul.mubr.bf16.gmra.mrb[200].mxu1 %v26112_v32  ;;  %v10303_v32 = vmul.f32 %v28921_v44, %v28921_v44 }
 0x751   :  { %24157 = vmatmul.mubr.bf16.gmra.mrb[40].mxu0 %v26113_v1  ;;  %23824 = vmatprep.mubr.bf16.mxu1 %v26114_v12  ;;  %v10361_v58 = vadd.f32 %v10360_v53, %v10293_v16  ;;  %v26126_v12 = vld [vmem:[#allocation2 + $0x64] sm:$0xff]   ;;  %v26128_v16 = vld [vmem:[#allocation2 + $0x6c] sm:$0xff]   ;;  %v10305_v53 = vmul.f32 %v28929_v15, %v28929_v15 }
 0x752   :  { %24160 = vmatprep.mubr.bf16.mxu0 %v26115_v60  ;;  %23917 = vmatpush3.bf16.msra.mxu1 %v26154_v11  ;;  %v26124_v11 = vld [vmem:[#allocation2 + $0x5c] sm:$0xff]  }
 0x753   :  { %v10362_v62 = vadd.f32 %v10361_v58, %v10294_v8  ;;  %23918 = vmatprep.subr.bf16.mxu1 %v26168_v51  ;;  %v10306_v58 = vmul.f32 %v28933_v4, %v28933_v4 }
 0x755   :  { %v10363_v0 = vadd.f32 %v10362_v62, %v10295_v63  ;;  %v10307_v63 = vmul.f32 %v28937_v37, %v28937_v37 }
 0x756   :  { %23919 = vmatpush3.bf16.msra.mxu1 %v26168_v51 }
 0x757   :  { %v10364_v47 = vadd.f32 %v10363_v0, %v10296_v20  ;;  %23920 = vmatprep.subr.bf16.mxu1 %v26181_v2  ;;  %v26132_v20 = vld [vmem:[#allocation2 + $0x7c] sm:$0xff]  }
 0x758   :  { %23825 = vmatmul.mubr.bf16.gmra.mrb[204].mxu1 %v26117_v23  ;;  %v30963_v0 = vld [vmem:[#allocation128_spill] sm:$0xff] }
 0x759   :  { %24161 = vmatmul.mubr.bf16.gmra.mrb[44].mxu0 %v26118_v59  ;;  %23828 = vmatprep.mubr.bf16.mxu1 %v26119_v48  ;;  %v10365_v21 = vadd.f32 %v10364_v47, %v10297_v30  ;;  %v26130_v59 = vld [vmem:[#allocation2 + $0x74] sm:$0xff]   ;;  %v26133_v47 = vld [vmem:[#allocation2 + $0x7c] sm:$0xff]  }
 0x75a   :  { %24164 = vmatprep.mubr.bf16.mxu0 %v26120_v22  ;;  %23921 = vmatpush3.bf16.msra.mxu1 %v26181_v2  ;;  %v26131_v48 = vld [vmem:[#allocation2 + $0x74] sm:$0xff]   ;;  %v10308_v22 = vmul.f32 %v30963_v0, %v30963_v0  ;;  %v26136_v2 = vld [vmem:[#allocation2 + $0x8c] sm:$0xff]  }
 0x75b   :  { %v10366_v40 = vadd.f32 %v10365_v21, %v10298_v36  ;;  %v30964_v36 = vld [vmem:[#allocation130_spill] sm:$0xff] }
 0x75c   :  { %v10309_v21 = vmul.f32 %v30964_v36, %v30964_v36 }
 0x75d   :  { %v10367_v35 = vadd.f32 %v10366_v40, %v10299_v46  ;;  %v30965_v46 = vld [vmem:[#allocation88_spill] sm:$0xff] }
 0x75e   :  { %v10310_v40 = vmul.f32 %v30965_v46, %v30965_v46 }
 0x75f   :  { %v10368_v43 = vadd.f32 %v10367_v35, %v10300_v28 }
 0x760   :  { %23829 = vmatmul.mubr.bf16.gmra.mrb[208].mxu1 %v26121_v39 }
 0x761   :  { %24165 = vmatmul.mubr.bf16.gmra.mrb[48].mxu0 %v26122_v34  ;;  %23832 = vmatprep.mubr.bf16.mxu1 %v26123_v10  ;;  %v10369_v52 = vadd.f32 %v10368_v43, %v10301_v27  ;;  %v26134_v34 = vld [vmem:[#allocation2 + $0x84] sm:$0xff]   ;;  %v30966_v10 = vld [vmem:[#allocation86_spill] sm:$0xff] }
 0x762   :  { %24168 = vmatprep.mubr.bf16.mxu0 %v26124_v11  ;;  %v10311_v28 = vmul.f32 %v30966_v10, %v30966_v10  ;;  %v26135_v11 = vld [vmem:[#allocation2 + $0x84] sm:$0xff]   ;;  %v26137_v27 = vld [vmem:[#allocation2 + $0x8c] sm:$0xff]  }
 0x763   :  { %v10370_v1 = vadd.f32 %v10369_v52, %v10302_v5  ;;  %v26192_v43 = vld [vmem:[#allocation9 + $0x1c0] sm:$0xff]   ;;  %v30967_v5 = vld [vmem:[#allocation87_spill] sm:$0xff] }
 0x764   :  { %v10312_v52 = vmul.f32 %v30967_v5, %v30967_v5  ;;  %24356 = vmatprep.subr.bf16.mxu0 %v26192_v43 }
 0x765   :  { %v10371_v60 = vadd.f32 %v10370_v1, %v10303_v32  ;;  %v26195_v32 = vld [vmem:[#allocation9 + $0x1c8] sm:$0xff]   ;;  %v26196_v1 = vld [vmem:[#allocation9 + $0x38] sm:$0xff]   ;;  %24357 = vmatpush3.bf16.msra.mxu0 %v26192_v43  ;;  %v29161_v43 = vld [vmem:[#allocation9 + $0x180] sm:$0xff]  }
 0x766   :  { %23922 = vmatprep.subr.bf16.mxu1 %v26196_v1  ;;  %24358 = vmatprep.subr.bf16.mxu0 %v26195_v32 }
 0x767   :  { %v10372_v8 = vadd.f32 %v10371_v60, %v10304_v25  ;;  %23923 = vmatpush3.bf16.msra.mxu1 %v26196_v1  ;;  %v26138_v25 = vld [vmem:[#allocation2 + $0x94] sm:$0xff]  }
 0x768   :  { %23833 = vmatmul.mubr.bf16.gmra.mrb[212].mxu1 %v26125_v57  ;;  %24020 = vmatprep.subr.bf16.mxu1 %v29161_v43 }
 0x769   :  { %24169 = vmatmul.mubr.bf16.gmra.mrb[52].mxu0 %v26126_v12  ;;  %23836 = vmatprep.mubr.bf16.mxu1 %v26127_v9  ;;  %v10373_v23 = vadd.f32 %v10372_v8, %v10305_v53  ;;  %v26140_v53 = vld [vmem:[#allocation2 + $0x9c] sm:$0xff]  }
 0x76a   :  { %24172 = vmatprep.mubr.bf16.mxu0 %v26128_v16  ;;  %v26139_v16 = vld [vmem:[#allocation2 + $0x94] sm:$0xff]   ;;  %24359 = vmatpush3.bf16.msra.mxu0 %v26195_v32  ;;  %v26199_v8 = vld [vmem:[#allocation9 + $0x1d0] sm:$0xff]  }
 0x76b   :  { %v10374_v62 = vadd.f32 %v10373_v23, %v10306_v58  ;;  %v26141_v23 = vld [vmem:[#allocation2 + $0x9c] sm:$0xff]   ;;  %24360 = vmatprep.subr.bf16.mxu0 %v26199_v8 }
 0x76d   :  { %v10375_v30 = vadd.f32 %v10374_v62, %v10307_v63  ;;  %v26202_v63 = vld [vmem:[#allocation9 + $0x1d8] sm:$0xff]  }
 0x76e   :  { %24361 = vmatpush3.bf16.msra.mxu0 %v26199_v8 }
 0x76f   :  { %v10376_v51 = vadd.f32 %v10375_v30, %v10308_v22  ;;  %24362 = vmatprep.subr.bf16.mxu0 %v26202_v63  ;;  %v26144_v22 = vld [vmem:[#allocation2 + $0xa4] sm:$0xff]   ;;  %v26145_v30 = vld [vmem:[#allocation2 + $0xac] sm:$0xff]  }
 0x770   :  { %23837 = vmatmul.mubr.bf16.gmra.mrb[216].mxu1 %v26130_v59 }
 0x771   :  { %24173 = vmatmul.mubr.bf16.gmra.mrb[56].mxu0 %v26131_v48  ;;  %23840 = vmatprep.mubr.bf16.mxu1 %v26132_v20  ;;  %v10377_v39 = vadd.f32 %v10376_v51, %v10309_v21  ;;  %v26143_v48 = vld [vmem:[#allocation2 + $0xa4] sm:$0xff]   ;;  %v26146_v51 = vld [vmem:[#allocation2 + $0xac] sm:$0xff]  }
 0x772   :  { %24176 = vmatprep.mubr.bf16.mxu0 %v26133_v47  ;;  %24363 = vmatpush3.bf16.msra.mxu0 %v26202_v63  ;;  %v26205_v47 = vld [vmem:[#allocation9 + $0x1e0] sm:$0xff]  }
 0x773   :  { %v10378_v35 = vadd.f32 %v10377_v39, %v10310_v40  ;;  %v26208_v40 = vld [vmem:[#allocation9 + $0x1e8] sm:$0xff]   ;;  %24364 = vmatprep.subr.bf16.mxu0 %v26205_v47 }
 0x775   :  { %v10379_v57 = vadd.f32 %v10378_v35, %v10311_v28  ;;  %v26149_v28 = vld [vmem:[#allocation2 + $0xbc] sm:$0xff]   ;;  %v26148_v35 = vld [vmem:[#allocation2 + $0xb4] sm:$0xff]  }
 0x776   :  { %24365 = vmatpush3.bf16.msra.mxu0 %v26205_v47 }
 0x777   :  { %v10380_v12 = vadd.f32 %v10379_v57, %v10312_v52  ;;  %24366 = vmatprep.subr.bf16.mxu0 %v26208_v40  ;;  %v26151_v57 = vld [vmem:[#allocation2 + $0xc4] sm:$0xff]  }
 0x778   :  { %23841 = vmatmul.mubr.bf16.gmra.mrb[220].mxu1 %v26134_v34  ;;  %v26147_v34 = vld [vmem:[#allocation2 + $0xb4] sm:$0xff]  }
 0x779   :  { %24177 = vmatmul.mubr.bf16.gmra.mrb[60].mxu0 %v26135_v11  ;;  %23844 = vmatprep.mubr.bf16.mxu1 %v26136_v2  ;;  %v10381_v9 = vrot.slane %v10380_v12, 4  ;;  %v26211_v11 = vld [vmem:[#allocation9 + $0x1f0] sm:$0xff]  }
 0x77a   :  { %24180 = vmatprep.mubr.bf16.mxu0 %v26137_v27  ;;  %24367 = vmatpush3.bf16.msra.mxu0 %v26208_v40  ;;  %v26150_v2 = vld [vmem:[#allocation2 + $0xbc] sm:$0xff]   ;;  %v26213_v27 = vld [vmem:[#allocation9 + $0x1f8] sm:$0xff]  }
 0x77b   :  { %v10382_v60 = vadd.f32 %v10381_v9, %v10380_v12  ;;  %24368 = vmatprep.subr.bf16.mxu0 %v26211_v11 }
 0x77d   :  { %v10383_v58 = vrot.slane %v10382_v60, 2 }
 0x77e   :  { %24369 = vmatpush3.bf16.msra.mxu0 %v26211_v11 }
 0x77f   :  { %v10384_v62 = vadd.f32 %v10383_v58, %v10382_v60  ;;  %24370 = vmatprep.subr.bf16.mxu0 %v26213_v27 }
 0x780   :  { %23845 = vmatmul.mubr.bf16.gmra.mrb[224].mxu1 %v26138_v25  ;;  %v26152_v25 = vld [vmem:[#allocation2 + $0xc4] sm:$0xff]  }
 0x781   :  { %24181 = vmatmul.mubr.bf16.gmra.mrb[64].mxu0 %v26139_v16  ;;  %23848 = vmatprep.mubr.bf16.mxu1 %v26140_v53  ;;  %v10385_v59 = vrot.slane %v10384_v62, 1 }
 0x782   :  { %24184 = vmatprep.mubr.bf16.mxu0 %v26141_v23  ;;  %24371 = vmatpush3.bf16.msra.mxu0 %v26213_v27 }
 0x783   :  { %v10386_v20 = vadd.f32 %v10385_v59, %v10384_v62 }
 0x785   :  { %v10388_v21 = vmul.f32 0.00390625, %v10386_v20 }
 0x787   :  { %v10390_v39 = vadd.f32 1e-05, %v10388_v21 }
 0x788   :  { %23849 = vmatmul.mubr.bf16.gmra.mrb[228].mxu1 %v26143_v48 }
 0x789   :  { %24185 = vmatmul.mubr.bf16.gmra.mrb[68].mxu0 %v26144_v22  ;;  %23852 = vmatprep.mubr.bf16.mxu1 %v26145_v30  ;;  %26595 = vrsqrt.f32 %v10390_v39 }
 0x78a   :  { %24188 = vmatprep.mubr.bf16.mxu0 %v26146_v51 }
 0x790   :  { %23853 = vmatmul.mubr.bf16.gmra.mrb[232].mxu1 %v26147_v34 }
 0x791   :  { %24189 = vmatmul.mubr.bf16.gmra.mrb[72].mxu0 %v26148_v35  ;;  %23856 = vmatprep.mubr.bf16.mxu1 %v26149_v28 }
 0x792   :  { %24192 = vmatprep.mubr.bf16.mxu0 %v26150_v2 }
 0x793   :  { %v26596_v52 = vpop.eup %26595 }
 0x794   :  { %v10455_v32 = vmul.f32 %v26596_v52, %v30966_v10  ;;  %v10456_v1 = vmul.f32 %v26596_v52, %v30967_v5  ;;  %v29167_v12 = vmul.f32 %v26596_v52, %v28957_v13  ;;  %v29170_v9 = vmul.f32 %v26596_v52, %v28961_v14 }
 0x795   :  { %v29173_v60 = vmul.f32 %v26596_v52, %v29054_v54  ;;  %v29176_v16 = vmul.f32 %v26596_v52, %v29062_v29  ;;  %v29179_v53 = vmul.f32 %v26596_v52, %v29066_v55  ;;  %v29182_v10 = vmul.f32 %v26596_v52, %v29072_v56 }
 0x796   :  { %v10519_v13 = vmax.f32 %v10455_v32, 0.0  ;;  %v10520_v5 = vmax.f32 %v10456_v1, 0.0  ;;  %v29185_v14 = vmul.f32 %v26596_v52, %v29079_v17  ;;  %v29188_v8 = vmul.f32 %v26596_v52, %v29085_v33 }
 0x797   :  { %v10433_v54 = vmul.f32 %v26596_v52, %v29091_v3  ;;  %v10434_v29 = vmul.f32 %v26596_v52, %v29097_v18  ;;  %v29193_v55 = vmul.f32 %v26596_v52, %v29103_v41  ;;  %v29196_v56 = vmul.f32 %v26596_v52, %v29109_v38 }
 0x798   :  { %23857 = vmatmul.mubr.bf16.gmra.mrb[236].mxu1 %v26151_v57  ;;  %v21746_v58 = vpack.c.bf16 %v10520_v5, %v10519_v13  ;;  %v10437_v23 = vmul.f32 %v26596_v52, %v29115_v24  ;;  %v10438_v17 = vmul.f32 %v26596_v52, %v28885_v45  ;;  %v29201_v63 = vmul.f32 %v26596_v52, %v28889_v19 }
 0x799   :  { %24193 = vmatmul.mubr.bf16.gmra.mrb[76].mxu0 %v26152_v25  ;;  %v29204_v33 = vmul.f32 %v26596_v52, %v28893_v7  ;;  %v10441_v3 = vmul.f32 %v26596_v52, %v28897_v50  ;;  %v10442_v18 = vmul.f32 %v26596_v52, %v28901_v6  ;;  %v29209_v41 = vmul.f32 %v26596_v52, %v28905_v31 }
 0x79a   :  { %v29212_v38 = vmul.f32 %v26596_v52, %v28909_v26  ;;  %v10445_v24 = vmul.f32 %v26596_v52, %v28913_v61  ;;  %v10446_v45 = vmul.f32 %v26596_v52, %v28917_v42  ;;  %v29217_v19 = vmul.f32 %v26596_v52, %v28921_v44  ;;  %21779 = vst [vmem:[#allocation2 + $0x198] sm:$0xff] %v21746_v58  }
 0x79b   :  { %v29220_v7 = vmul.f32 %v26596_v52, %v28925_v49  ;;  %v10449_v50 = vmul.f32 %v26596_v52, %v28929_v15  ;;  %v10450_v6 = vmul.f32 %v26596_v52, %v28933_v4  ;;  %v29225_v31 = vmul.f32 %v26596_v52, %v28937_v37 }
 0x79c   :  { %v29228_v26 = vmul.f32 %v26596_v52, %v30963_v0  ;;  %v10453_v61 = vmul.f32 %v26596_v52, %v30964_v36  ;;  %v10454_v42 = vmul.f32 %v26596_v52, %v30965_v46  ;;  %v10489_v44 = vmax.f32 %v29167_v12, 0.0 }
 0x79d   :  { %v10490_v62 = vmax.f32 %v29170_v9, 0.0  ;;  %v10491_v49 = vmax.f32 %v29173_v60, 0.0  ;;  %v10492_v15 = vmax.f32 %v29176_v16, 0.0  ;;  %v10493_v4 = vmax.f32 %v29179_v53, 0.0 }
 0x79e   :  { %v10494_v37 = vmax.f32 %v29182_v10, 0.0  ;;  %v10495_v59 = vmax.f32 %v29185_v14, 0.0  ;;  %v10496_v0 = vmax.f32 %v29188_v8, 0.0  ;;  %v10497_v48 = vmax.f32 %v10433_v54, 0.0 }
 0x79f   :  { %v10498_v36 = vmax.f32 %v10434_v29, 0.0  ;;  %v10499_v46 = vmax.f32 %v29193_v55, 0.0  ;;  %v10500_v20 = vmax.f32 %v29196_v56, 0.0  ;;  %v10501_v22 = vmax.f32 %v10437_v23, 0.0 }
 0x7a0   :  { %v10502_v30 = vmax.f32 %v10438_v17, 0.0  ;;  %v10503_v47 = vmax.f32 %v29201_v63, 0.0  ;;  %v10504_v21 = vmax.f32 %v29204_v33, 0.0  ;;  %v10505_v51 = vmax.f32 %v10441_v3, 0.0 }
 0x7a1   :  { %v10506_v40 = vmax.f32 %v10442_v18, 0.0  ;;  %v10507_v39 = vmax.f32 %v29209_v41, 0.0  ;;  %v10508_v34 = vmax.f32 %v29212_v38, 0.0  ;;  %v10509_v28 = vmax.f32 %v10445_v24, 0.0 }
 0x7a2   :  { %v10510_v35 = vmax.f32 %v10446_v45, 0.0  ;;  %v10511_v11 = vmax.f32 %v29217_v19, 0.0  ;;  %v10512_v2 = vmax.f32 %v29220_v7, 0.0  ;;  %v10513_v27 = vmax.f32 %v10449_v50, 0.0 }
 0x7a3   :  { %v10514_v52 = vmax.f32 %v10450_v6, 0.0  ;;  %v10515_v57 = vmax.f32 %v29225_v31, 0.0  ;;  %v10516_v32 = vmax.f32 %v29228_v26, 0.0  ;;  %v10517_v1 = vmax.f32 %v10453_v61, 0.0 }
 0x7a4   :  { %v10518_v12 = vmax.f32 %v10454_v42, 0.0  ;;  %v21556_v9 = vpack.c.bf16 %v10489_v44, %v10489_v44  ;;  %v21557_v25 = vpack.c.bf16 %v10490_v62, %v10490_v62  ;;  %v21560_v60 = vpack.c.bf16 %v10493_v4, %v10493_v4 }
 0x7a5   :  { %v21561_v16 = vpack.c.bf16 %v10494_v37, %v10494_v37  ;;  %v21564_v53 = vpack.c.bf16 %v10497_v48, %v10497_v48  ;;  %v21565_v10 = vpack.c.bf16 %v10498_v36, %v10498_v36  ;;  %v21568_v13 = vpack.c.bf16 %v10501_v22, %v10501_v22 }
 0x7a6   :  { %v21569_v5 = vpack.c.bf16 %v10502_v30, %v10502_v30  ;;  %v21572_v14 = vpack.c.bf16 %v10505_v51, %v10505_v51  ;;  %v21573_v8 = vpack.c.bf16 %v10506_v40, %v10506_v40  ;;  %v21576_v54 = vpack.c.bf16 %v10509_v28, %v10509_v28  ;;  %10809 = vst [vmem:[#allocation2 + $0xe4] sm:$0xf] %v21556_v9 }
 0x7a7   :  { %10810 = vst [vmem:[#allocation2 + $0xe8] sm:$0xf] %v21557_v25  ;;  %10813 = vst [vmem:[#allocation2 + $0xfc] sm:$0xf] %v21560_v60  ;;  %v21577_v29 = vpack.c.bf16 %v10510_v35, %v10510_v35  ;;  %v21580_v55 = vpack.c.bf16 %v10513_v27, %v10513_v27  ;;  %v21581_v56 = vpack.c.bf16 %v10514_v52, %v10514_v52  ;;  %v26206_v60 = vld [vmem:[#allocation2 + $0x194] sm:$0xff]  }
 0x7a8   :  { %v21584_v58 = vpack.c.bf16 %v10517_v1, %v10517_v1  ;;  %10814 = vst [vmem:[#allocation2 + $0x100] sm:$0xf] %v21561_v16  ;;  %10817 = vst [vmem:[#allocation2 + $0x114] sm:$0xf] %v21564_v53  ;;  %v21585_v23 = vpack.c.bf16 %v10518_v12, %v10518_v12  ;;  %v21711_v17 = vpack.c.bf16 %v10492_v15, %v10491_v49 }
 0x7a9   :  { %10818 = vst [vmem:[#allocation2 + $0x118] sm:$0xf] %v21565_v10  ;;  %10821 = vst [vmem:[#allocation2 + $0x12c] sm:$0xf] %v21568_v13  ;;  %v21716_v63 = vpack.c.bf16 %v10496_v0, %v10495_v59  ;;  %v21721_v33 = vpack.c.bf16 %v10500_v20, %v10499_v46  ;;  %v21726_v3 = vpack.c.bf16 %v10504_v21, %v10503_v47  ;;  %v26207_v10 = vld [vmem:[#allocation2 + $0x194] sm:$0xff]   ;;  %v26214_v13 = vld [vmem:[#allocation2] sm:$0xff]  }
 0x7aa   :  { %10822 = vst [vmem:[#allocation2 + $0x130] sm:$0xf] %v21569_v5  ;;  %10825 = vst [vmem:[#allocation2 + $0x144] sm:$0xf] %v21572_v14  ;;  %v21731_v18 = vpack.c.bf16 %v10508_v34, %v10507_v39  ;;  %v21736_v41 = vpack.c.bf16 %v10512_v2, %v10511_v11  ;;  %v21741_v38 = vpack.c.bf16 %v10516_v32, %v10515_v57  ;;  %v26209_v5 = vld [vmem:[#allocation2 + $0x19c] sm:$0xff]  }
 0x7ab   :  { %10826 = vst [vmem:[#allocation2 + $0x148] sm:$0xf] %v21573_v8  ;;  %10829 = vst [vmem:[#allocation2 + $0x15c] sm:$0xf] %v21576_v54  ;;  %v26210_v14 = vld [vmem:[#allocation2 + $0x19c] sm:$0xff]   ;;  %v26216_v54 = vld [vmem:[#allocation2 + $0x8] sm:$0xff]  }
 0x7ac   :  { %10830 = vst [vmem:[#allocation2 + $0x160] sm:$0xf] %v21577_v29  ;;  %10833 = vst [vmem:[#allocation2 + $0x174] sm:$0xf] %v21580_v55  ;;  %v26212_v8 = vld [vmem:[#allocation2 + $0x18] sm:$0xff]   ;;  %v26217_v29 = vld [vmem:[#allocation2 + $0x20] sm:$0xff]  }
 0x7ad   :  { %10834 = vst [vmem:[#allocation2 + $0x178] sm:$0xf] %v21581_v56  ;;  %10837 = vst [vmem:[#allocation2 + $0x18c] sm:$0xf] %v21584_v58  ;;  %v26218_v56 = vld [vmem:[#allocation2 + $0x10] sm:$0xff]  }
 0x7ae   :  { %21772 = vst [vmem:[#allocation2 + $0xf0] sm:$0xff] %v21711_v17   ;;  %21773 = vst [vmem:[#allocation2 + $0x108] sm:$0xff] %v21716_v63   ;;  %v26153_v24 = vld [vmem:[#allocation2 + $0xe4] sm:$0xff]  }
 0x7af   :  { %21774 = vst [vmem:[#allocation2 + $0x120] sm:$0xff] %v21721_v33   ;;  %10838 = vst [vmem:[#allocation2 + $0x190] sm:$0xf] %v21585_v23  ;;  %v26155_v45 = vld [vmem:[#allocation2 + $0xe4] sm:$0xff]   ;;  %23860 = vmatprep.mubr.bf16.mxu1 %v26153_v24  ;;  %v26160_v31 = vld [vmem:[#allocation2 + $0xfc] sm:$0xff]  }
 0x7b0   :  { %21775 = vst [vmem:[#allocation2 + $0x138] sm:$0xff] %v21726_v3   ;;  %21776 = vst [vmem:[#allocation2 + $0x150] sm:$0xff] %v21731_v18   ;;  %24196 = vmatprep.mubr.bf16.mxu0 %v26155_v45  ;;  %v26161_v26 = vld [vmem:[#allocation2 + $0xfc] sm:$0xff]   ;;  %v26166_v49 = vld [vmem:[#allocation2 + $0x114] sm:$0xff]  }
 0x7b1   :  { %21777 = vst [vmem:[#allocation2 + $0x168] sm:$0xff] %v21736_v41   ;;  %21778 = vst [vmem:[#allocation2 + $0x180] sm:$0xff] %v21741_v38   ;;  %v26167_v15 = vld [vmem:[#allocation2 + $0x114] sm:$0xff]   ;;  %v26173_v48 = vld [vmem:[#allocation2 + $0x12c] sm:$0xff]  }
 0x7b2   :  { %v26174_v36 = vld [vmem:[#allocation2 + $0x12c] sm:$0xff]   ;;  %v26179_v47 = vld [vmem:[#allocation2 + $0x144] sm:$0xff]   ;;  %v26228_v23 = vld [vmem:[#allocation9 + $0x188] sm:$0xff]  }
 0x7b3   :  { %v26180_v21 = vld [vmem:[#allocation2 + $0x144] sm:$0xff]   ;;  %v26186_v28 = vld [vmem:[#allocation2 + $0x15c] sm:$0xff]   ;;  %v26221_v41 = vld [vmem:[#allocation2 + $0x30] sm:$0xff]  }
 0x7b4   :  { %v26187_v35 = vld [vmem:[#allocation2 + $0x15c] sm:$0xff]   ;;  %v26193_v57 = vld [vmem:[#allocation2 + $0x174] sm:$0xff]   ;;  %v26219_v17 = vld [vmem:[#allocation2 + $0x28] sm:$0xff]  }
 0x7b5   :  { %v26156_v19 = vld [vmem:[#allocation2 + $0xec] sm:$0xff]   ;;  %v26158_v50 = vld [vmem:[#allocation2 + $0xf4] sm:$0xff]   ;;  %v26162_v61 = vld [vmem:[#allocation2 + $0x104] sm:$0xff]  }
 0x7b6   :  { %v26157_v7 = vld [vmem:[#allocation2 + $0xec] sm:$0xff]   ;;  %23861 = vmatmul.mubr.bf16.gmra.mrb[240].mxu1 %v26156_v19  ;;  %v26159_v6 = vld [vmem:[#allocation2 + $0xf4] sm:$0xff]   ;;  %v26163_v42 = vld [vmem:[#allocation2 + $0x104] sm:$0xff]  }
 0x7b7   :  { %24197 = vmatmul.mubr.bf16.gmra.mrb[80].mxu0 %v26157_v7  ;;  %23864 = vmatprep.mubr.bf16.mxu1 %v26158_v50  ;;  %v26164_v44 = vld [vmem:[#allocation2 + $0x10c] sm:$0xff]   ;;  %v26169_v4 = vld [vmem:[#allocation2 + $0x11c] sm:$0xff]   ;;  %v26171_v59 = vld [vmem:[#allocation2 + $0x124] sm:$0xff]  }
 0x7b8   :  { %24200 = vmatprep.mubr.bf16.mxu0 %v26159_v6  ;;  %v26165_v62 = vld [vmem:[#allocation2 + $0x10c] sm:$0xff]   ;;  %v26170_v37 = vld [vmem:[#allocation2 + $0x11c] sm:$0xff]   ;;  %v26172_v0 = vld [vmem:[#allocation2 + $0x124] sm:$0xff]  }
 0x7b9   :  { %v26175_v46 = vld [vmem:[#allocation2 + $0x134] sm:$0xff]   ;;  %v26177_v22 = vld [vmem:[#allocation2 + $0x13c] sm:$0xff]   ;;  %v26182_v51 = vld [vmem:[#allocation2 + $0x14c] sm:$0xff]  }
 0x7ba   :  { %v26176_v20 = vld [vmem:[#allocation2 + $0x134] sm:$0xff]   ;;  %v26178_v30 = vld [vmem:[#allocation2 + $0x13c] sm:$0xff]   ;;  %v26183_v40 = vld [vmem:[#allocation2 + $0x14c] sm:$0xff]  }
 0x7bb   :  { %v26184_v39 = vld [vmem:[#allocation2 + $0x154] sm:$0xff]   ;;  %v26188_v11 = vld [vmem:[#allocation2 + $0x164] sm:$0xff]   ;;  %v26190_v27 = vld [vmem:[#allocation2 + $0x16c] sm:$0xff]  }
 0x7bc   :  { %v26185_v34 = vld [vmem:[#allocation2 + $0x154] sm:$0xff]   ;;  %v26189_v2 = vld [vmem:[#allocation2 + $0x164] sm:$0xff]   ;;  %v26191_v52 = vld [vmem:[#allocation2 + $0x16c] sm:$0xff]  }
 0x7bd   :  { %v26194_v32 = vld [vmem:[#allocation2 + $0x174] sm:$0xff]   ;;  %v26197_v1 = vld [vmem:[#allocation2 + $0x17c] sm:$0xff]   ;;  %v26200_v9 = vld [vmem:[#allocation2 + $0x184] sm:$0xff]  }
 0x7be   :  { %23865 = vmatmul.mubr.bf16.gmra.mrb[244].mxu1 %v26160_v31  ;;  %v26198_v12 = vld [vmem:[#allocation2 + $0x17c] sm:$0xff]   ;;  %v26201_v25 = vld [vmem:[#allocation2 + $0x184] sm:$0xff]   ;;  %v26203_v16 = vld [vmem:[#allocation2 + $0x18c] sm:$0xff]  }
 0x7bf   :  { %24201 = vmatmul.mubr.bf16.gmra.mrb[84].mxu0 %v26161_v26  ;;  %23868 = vmatprep.mubr.bf16.mxu1 %v26162_v61  ;;  %v26204_v53 = vld [vmem:[#allocation2 + $0x18c] sm:$0xff]   ;;  %v26241_v3 = vld [vmem:[#allocation9 + $0x190] sm:$0xff]   ;;  %v26220_v18 = vld [vmem:[#allocation2 + $0x18] sm:$0xff]  }
 0x7c0   :  { %24204 = vmatprep.mubr.bf16.mxu0 %v26163_v42  ;;  %v26222_v24 = vld [vmem:[#allocation2 + $0x20] sm:$0xff]   ;;  %v26254_v19 = vld [vmem:[#allocation9 + $0x198] sm:$0xff]   ;;  %v26223_v7 = vld [vmem:[#allocation2 + $0x38] sm:$0xff]  }
 0x7c1   :  { %v26267_v6 = vld [vmem:[#allocation9 + $0x1a0] sm:$0xff]   ;;  %v26224_v31 = vld [vmem:[#allocation2 + $0x28] sm:$0xff]   ;;  %v26225_v26 = vld [vmem:[#allocation2 + $0x40] sm:$0xff]  }
 0x7c2   :  { %v26226_v61 = vld [vmem:[#allocation2 + $0x30] sm:$0xff]  }
 0x7c6   :  { %23869 = vmatmul.mubr.bf16.gmra.mrb[248].mxu1 %v26164_v44 }
 0x7c7   :  { %24205 = vmatmul.mubr.bf16.gmra.mrb[88].mxu0 %v26165_v62  ;;  %23872 = vmatprep.mubr.bf16.mxu1 %v26166_v49  ;;  %v26280_v62 = vld [vmem:[#allocation9 + $0x1a8] sm:$0xff]   ;;  %v26227_v49 = vld [vmem:[#allocation2 + $0x48] sm:$0xff]  }
 0x7c8   :  { %24208 = vmatprep.mubr.bf16.mxu0 %v26167_v15 }
 0x7ce   :  { %23873 = vmatmul.mubr.bf16.gmra.mrb[252].mxu1 %v26169_v4 }
 0x7cf   :  { %24209 = vmatmul.mubr.bf16.gmra.mrb[92].mxu0 %v26170_v37  ;;  %23876 = vmatprep.mubr.bf16.mxu1 %v26171_v59  ;;  %v26293_v37 = vld [vmem:[#allocation9 + $0x1b0] sm:$0xff]   ;;  %v26229_v59 = vld [vmem:[#allocation2 + $0x38] sm:$0xff]  }
 0x7d0   :  { %24212 = vmatprep.mubr.bf16.mxu0 %v26172_v0 }
 0x7d6   :  { %23877 = vmatmul.mubr.bf16.gmra.mrb[0].mxu1 %v26173_v48  ;;  %v26230_v48 = vld [vmem:[#allocation2 + $0x50] sm:$0xff]  }
 0x7d7   :  { %24213 = vmatmul.mubr.bf16.gmra.mrb[96].mxu0 %v26174_v36  ;;  %23880 = vmatprep.mubr.bf16.mxu1 %v26175_v46  ;;  %v26231_v36 = vld [vmem:[#allocation2 + $0x40] sm:$0xff]  }
 0x7d8   :  { %24216 = vmatprep.mubr.bf16.mxu0 %v26176_v20  ;;  %v26232_v20 = vld [vmem:[#allocation2 + $0x58] sm:$0xff]  }
 0x7de   :  { %23881 = vmatmul.mubr.bf16.gmra.mrb[4].mxu1 %v26177_v22 }
 0x7df   :  { %24217 = vmatmul.mubr.bf16.gmra.mrb[100].mxu0 %v26178_v30  ;;  %23884 = vmatprep.mubr.bf16.mxu1 %v26179_v47  ;;  %v26233_v47 = vld [vmem:[#allocation2 + $0x48] sm:$0xff]  }
 0x7e0   :  { %24220 = vmatprep.mubr.bf16.mxu0 %v26180_v21  ;;  %v26234_v21 = vld [vmem:[#allocation2 + $0x60] sm:$0xff]  }
 0x7e6   :  { %23885 = vmatmul.mubr.bf16.gmra.mrb[8].mxu1 %v26182_v51 }
 0x7e7   :  { %24221 = vmatmul.mubr.bf16.gmra.mrb[104].mxu0 %v26183_v40  ;;  %23888 = vmatprep.mubr.bf16.mxu1 %v26184_v39  ;;  %v26235_v40 = vld [vmem:[#allocation2 + $0x50] sm:$0xff]  }
 0x7e8   :  { %24224 = vmatprep.mubr.bf16.mxu0 %v26185_v34  ;;  %v26236_v34 = vld [vmem:[#allocation2 + $0x68] sm:$0xff]  }
 0x7ee   :  { %23889 = vmatmul.mubr.bf16.gmra.mrb[12].mxu1 %v26186_v28 }
 0x7ef   :  { %24225 = vmatmul.mubr.bf16.gmra.mrb[108].mxu0 %v26187_v35  ;;  %23892 = vmatprep.mubr.bf16.mxu1 %v26188_v11  ;;  %v26237_v11 = vld [vmem:[#allocation2 + $0x58] sm:$0xff]  }
 0x7f0   :  { %24228 = vmatprep.mubr.bf16.mxu0 %v26189_v2  ;;  %v26238_v2 = vld [vmem:[#allocation2 + $0x70] sm:$0xff]  }
 0x7f6   :  { %23893 = vmatmul.mubr.bf16.gmra.mrb[16].mxu1 %v26190_v27 }
 0x7f7   :  { %24229 = vmatmul.mubr.bf16.gmra.mrb[112].mxu0 %v26191_v52  ;;  %23896 = vmatprep.mubr.bf16.mxu1 %v26193_v57  ;;  %v26239_v52 = vld [vmem:[#allocation2 + $0x60] sm:$0xff]  }
 0x7f8   :  { %24232 = vmatprep.mubr.bf16.mxu0 %v26194_v32  ;;  %v26306_v32 = vld [vmem:[#allocation9 + $0x1b8] sm:$0xff]  }
 0x7fe   :  { %23897 = vmatmul.mubr.bf16.gmra.mrb[20].mxu1 %v26197_v1  ;;  %v26240_v1 = vld [vmem:[#allocation2 + $0x78] sm:$0xff]  }
 0x7ff   :  { %24233 = vmatmul.mubr.bf16.gmra.mrb[116].mxu0 %v26198_v12  ;;  %23900 = vmatprep.mubr.bf16.mxu1 %v26200_v9 }
 0x800   :  { %24236 = vmatprep.mubr.bf16.mxu0 %v26201_v25  ;;  %v26242_v25 = vld [vmem:[#allocation2 + $0x68] sm:$0xff]  }
 0x806   :  { %23901 = vmatmul.mubr.bf16.gmra.mrb[24].mxu1 %v26203_v16 }
 0x807   :  { %24237 = vmatmul.mubr.bf16.gmra.mrb[120].mxu0 %v26204_v53  ;;  %23904 = vmatprep.mubr.bf16.mxu1 %v26206_v60  ;;  %v26243_v60 = vld [vmem:[#allocation2 + $0x80] sm:$0xff]   ;;  %v26244_v53 = vld [vmem:[#allocation2 + $0x70] sm:$0xff]  }
 0x808   :  { %24240 = vmatprep.mubr.bf16.mxu0 %v26207_v10 }
 0x80e   :  { %23905 = vmatmul.mubr.bf16.gmra.mrb[28].mxu1 %v26209_v5 }
 0x80f   :  { %24241 = vmatmul.mubr.bf16.gmra.mrb[124].mxu0 %v26210_v14  ;;  %23924 = vmatprep.mubr.bf16.mxu1 %v26214_v13  ;;  %v26245_v13 = vld [vmem:[#allocation2 + $0x88] sm:$0xff]  }
 0x810   :  { %24372 = vmatprep.mubr.bf16.mxu0 %v26212_v8  ;;  %v26246_v8 = vld [vmem:[#allocation2 + $0x78] sm:$0xff]  }
 0x814   :  { %v24150_v55 = vpop.f32.mrb[32].mxu0 }
 0x815   :  { %v29250_v58 = vpop.f32.mrb[33].mxu0  ;;  %v26248_v55 = vld [vmem:[#allocation2 + $0x80] sm:$0xff]  }
 0x816   :  { %23925 = vmatmul.mubr.bf16.vlgmr.msra.gmra.mrb[192].mxu1 %v26216_v54  ;;  %v29252_v63 = vpop.f32.mrb[34].mxu0 }
 0x817   :  { %24021 = vmatpush3.bf16.msra.mxu1 %v29161_v43  ;;  %24373 = vmatmul.mubr.bf16.vlgmr.msra.gmra.mrb[128].mxu0 %v26217_v29  ;;  %v29255_v33 = vpop.f32.mrb[35].mxu0  ;;  %v26247_v29 = vld [vmem:[#allocation2 + $0x90] sm:$0xff]  }
 0x818   :  { %23928 = vmatprep.mubr.bf16.mxu1 %v26218_v56  ;;  %24376 = vmatprep.mubr.bf16.mxu0 %v26219_v17 }
 0x819   :  { %24022 = vmatprep.subr.bf16.mxu1 %v26228_v23 }
 0x81b   :  { %24023 = vmatpush3.bf16.msra.mxu1 %v26228_v23  ;;  %v26249_v23 = vld [vmem:[#allocation2 + $0x98] sm:$0xff]  }
 0x81c   :  { %v29257_v38 = vpop.f32.mrb[36].mxu0  ;;  %24024 = vmatprep.subr.bf16.mxu1 %v26241_v3 }
 0x81d   :  { %v29259_v45 = vpop.f32.mrb[37].mxu0 }
 0x81e   :  { %23929 = vmatmul.mubr.bf16.gmra.mrb[196].mxu1 %v26220_v18  ;;  %v29261_v43 = vpop.f32.mrb[38].mxu0  ;;  %v26250_v18 = vld [vmem:[#allocation2 + $0x88] sm:$0xff]  }
 0x81f   :  { %24377 = vmatmul.mubr.bf16.gmra.mrb[132].mxu0 %v26221_v41  ;;  %23932 = vmatprep.mubr.bf16.mxu1 %v26222_v24  ;;  %v14437_v50 = vpop.f32.mrb[39].mxu0  ;;  %v26251_v41 = vld [vmem:[#allocation2 + $0xa0] sm:$0xff]  }
 0x820   :  { %24380 = vmatprep.mubr.bf16.mxu0 %v26223_v7  ;;  %24025 = vmatpush3.bf16.msra.mxu1 %v26241_v3  ;;  %v29297_v50 = vld [vmem:[#allocation9 + $0x40] sm:$0xff]  }
 0x821   :  { %24026 = vmatprep.subr.bf16.mxu1 %v26254_v19 }
 0x824   :  { %v29263_v42 = vpop.f32.mrb[40].mxu0  ;;  %24027 = vmatpush3.bf16.msra.mxu1 %v26254_v19  ;;  %v26252_v19 = vld [vmem:[#allocation2 + $0x90] sm:$0xff]  }
 0x825   :  { %v14450_v44 = vpop.f32.mrb[41].mxu0  ;;  %24028 = vmatprep.subr.bf16.mxu1 %v26267_v6 }
 0x826   :  { %23933 = vmatmul.mubr.bf16.gmra.mrb[200].mxu1 %v26224_v31  ;;  %v24159_v15 = vpop.f32.mrb[42].mxu0  ;;  %v26256_v44 = vld [vmem:[#allocation2 + $0xb0] sm:$0xff]  }
 0x827   :  { %24381 = vmatmul.mubr.bf16.gmra.mrb[136].mxu0 %v26225_v26  ;;  %23936 = vmatprep.mubr.bf16.mxu1 %v26226_v61  ;;  %v29265_v4 = vpop.f32.mrb[43].mxu0  ;;  %v26255_v61 = vld [vmem:[#allocation2 + $0x98] sm:$0xff]  }
 0x828   :  { %30968 = vst [vmem:[#allocation38_spill] sm:$0xff] %v29265_v4  ;;  %24384 = vmatprep.mubr.bf16.mxu0 %v26227_v49  ;;  %24029 = vmatpush3.bf16.msra.mxu1 %v26267_v6  ;;  %v26253_v6 = vld [vmem:[#allocation2 + $0xa8] sm:$0xff]   ;;  %v26257_v49 = vld [vmem:[#allocation2 + $0xa0] sm:$0xff]  }
 0x829   :  { %24030 = vmatprep.subr.bf16.mxu1 %v26280_v62  ;;  %v26402_v4 = vld [vmem:[#allocation2 + $0xe8] sm:$0xff]  }
 0x82c   :  { %v24162_v0 = vpop.f32.mrb[44].mxu0  ;;  %24031 = vmatpush3.bf16.msra.mxu1 %v26280_v62 }
 0x82d   :  { %v29267_v46 = vpop.f32.mrb[45].mxu0  ;;  %24032 = vmatprep.subr.bf16.mxu1 %v26293_v37 }
 0x82e   :  { %30969 = vst [vmem:[#allocation39_spill] sm:$0xff] %v29267_v46  ;;  %23937 = vmatmul.mubr.bf16.gmra.mrb[204].mxu1 %v26229_v59  ;;  %v29269_v22 = vpop.f32.mrb[46].mxu0 }
 0x82f   :  { %30970 = vst [vmem:[#allocation92_spill] sm:$0xff] %v29269_v22  ;;  %24385 = vmatmul.mubr.bf16.gmra.mrb[140].mxu0 %v26230_v48  ;;  %23940 = vmatprep.mubr.bf16.mxu1 %v26231_v36  ;;  %v29271_v30 = vpop.f32.mrb[47].mxu0  ;;  %v26259_v48 = vld [vmem:[#allocation2 + $0xa8] sm:$0xff]   ;;  %v26260_v36 = vld [vmem:[#allocation2 + $0xc0] sm:$0xff]  }
 0x830   :  { %30971 = vst [vmem:[#allocation135_spill] sm:$0xff] %v29271_v30  ;;  %24388 = vmatprep.mubr.bf16.mxu0 %v26232_v20  ;;  %24033 = vmatpush3.bf16.msra.mxu1 %v26293_v37  ;;  %v26258_v37 = vld [vmem:[#allocation2 + $0xb8] sm:$0xff]   ;;  %v26262_v20 = vld [vmem:[#allocation2 + $0xc8] sm:$0xff]  }
 0x831   :  { %24034 = vmatprep.subr.bf16.mxu1 %v26306_v32 }
 0x834   :  { %v29273_v51 = vpop.f32.mrb[48].mxu0  ;;  %24035 = vmatpush3.bf16.msra.mxu1 %v26306_v32 }
 0x835   :  { %30972 = vst [vmem:[#allocation93_spill] sm:$0xff] %v29273_v51  ;;  %v29275_v39 = vpop.f32.mrb[49].mxu0  ;;  %24244 = vmatprep.subr.bf16.mxu1 %v29297_v50  ;;  %v26399_v51 = vld [vmem:[#allocation2 + $0xd8] sm:$0xff]  }
 0x836   :  { %30973 = vst [vmem:[#allocation40_spill] sm:$0xff] %v29275_v39  ;;  %23941 = vmatmul.mubr.bf16.gmra.mrb[208].mxu1 %v26233_v47  ;;  %v29277_v28 = vpop.f32.mrb[50].mxu0 }
 0x837   :  { %30974 = vst [vmem:[#allocation41_spill] sm:$0xff] %v29277_v28  ;;  %24389 = vmatmul.mubr.bf16.gmra.mrb[144].mxu0 %v26234_v21  ;;  %23944 = vmatprep.mubr.bf16.mxu1 %v26235_v40  ;;  %v14485_v35 = vpop.f32.mrb[51].mxu0  ;;  %v26261_v21 = vld [vmem:[#allocation2 + $0xb0] sm:$0xff]  }
 0x838   :  { %24392 = vmatprep.mubr.bf16.mxu0 %v26236_v34 }
 0x83c   :  { %v29279_v27 = vpop.f32.mrb[52].mxu0 }
 0x83d   :  { %30975 = vst [vmem:[#allocation42_spill] sm:$0xff] %v29279_v27  ;;  %v14498_v57 = vpop.f32.mrb[53].mxu0  ;;  %v26396_v27 = vld [vmem:[#allocation2 + $0xa8] sm:$0xff]  }
 0x83e   :  { %23945 = vmatmul.mubr.bf16.gmra.mrb[212].mxu1 %v26237_v11  ;;  %v24171_v12 = vpop.f32.mrb[54].mxu0  ;;  %v26264_v11 = vld [vmem:[#allocation2 + $0xd0] sm:$0xff]  }
 0x83f   :  { %24393 = vmatmul.mubr.bf16.gmra.mrb[148].mxu0 %v26238_v2  ;;  %23948 = vmatprep.mubr.bf16.mxu1 %v26239_v52  ;;  %v29281_v9 = vpop.f32.mrb[55].mxu0  ;;  %v26266_v2 = vld [vmem:[#allocation2 + $0xd8] sm:$0xff]  }
 0x840   :  { %30976 = vst [vmem:[#allocation96_spill] sm:$0xff] %v29281_v9  ;;  %24396 = vmatprep.mubr.bf16.mxu0 %v26240_v1  ;;  %v26263_v52 = vld [vmem:[#allocation2 + $0xb8] sm:$0xff]   ;;  %v26265_v1 = vld [vmem:[#allocation2 + $0xf0] sm:$0xff]  }
 0x844   :  { %v24174_v16 = vpop.f32.mrb[56].mxu0 }
 0x845   :  { %v29283_v10 = vpop.f32.mrb[57].mxu0  ;;  %v26269_v16 = vld [vmem:[#allocation2 + $0xf8] sm:$0xff]  }
 0x846   :  { %30977 = vst [vmem:[#allocation98_spill] sm:$0xff] %v29283_v10  ;;  %23949 = vmatmul.mubr.bf16.gmra.mrb[216].mxu1 %v26242_v25  ;;  %v29285_v5 = vpop.f32.mrb[58].mxu0 }
 0x847   :  { %30978 = vst [vmem:[#allocation100_spill] sm:$0xff] %v29285_v5  ;;  %24397 = vmatmul.mubr.bf16.gmra.mrb[152].mxu0 %v26243_v60  ;;  %23952 = vmatprep.mubr.bf16.mxu1 %v26244_v53  ;;  %v29287_v14 = vpop.f32.mrb[59].mxu0  ;;  %v26268_v60 = vld [vmem:[#allocation2 + $0xe0] sm:$0xff]   ;;  %v26270_v53 = vld [vmem:[#allocation2 + $0xe8] sm:$0xff]   ;;  %v29559_v5 = vld [vmem:[#allocation9 + $0x80] sm:$0xff]  }
 0x848   :  { %30979 = vst [vmem:[#allocation43_spill] sm:$0xff] %v29287_v14  ;;  %24400 = vmatprep.mubr.bf16.mxu0 %v26245_v13  ;;  %v26271_v13 = vld [vmem:[#allocation2 + $0x100] sm:$0xff]   ;;  %v26391_v14 = vld [vmem:[#allocation2 + $0x88] sm:$0xff]  }
 0x84c   :  { %v29289_v54 = vpop.f32.mrb[60].mxu0 }
 0x84d   :  { %30980 = vst [vmem:[#allocation44_spill] sm:$0xff] %v29289_v54  ;;  %v29291_v56 = vpop.f32.mrb[61].mxu0  ;;  %v26429_v54 = vld [vmem:[#allocation2 + $0x1a8] sm:$0xff]  }
 0x84e   :  { %30981 = vst [vmem:[#allocation45_spill] sm:$0xff] %v29291_v56  ;;  %23953 = vmatmul.mubr.bf16.gmra.mrb[220].mxu1 %v26246_v8  ;;  %v29293_v17 = vpop.f32.mrb[62].mxu0  ;;  %v26272_v8 = vld [vmem:[#allocation2 + $0xf0] sm:$0xff]   ;;  %v26390_v56 = vld [vmem:[#allocation2 + $0x80] sm:$0xff]  }
 0x84f   :  { %30982 = vst [vmem:[#allocation104_spill] sm:$0xff] %v29293_v17  ;;  %24401 = vmatmul.mubr.bf16.gmra.mrb[156].mxu0 %v26247_v29  ;;  %23956 = vmatprep.mubr.bf16.mxu1 %v26248_v55  ;;  %v14533_v3 = vpop.f32.mrb[63].mxu0  ;;  %v26273_v29 = vld [vmem:[#allocation2 + $0x108] sm:$0xff]   ;;  %v26274_v55 = vld [vmem:[#allocation2 + $0xf8] sm:$0xff]  }
 0x850   :  { %24404 = vmatprep.mubr.bf16.mxu0 %v26249_v23  ;;  %v26275_v23 = vld [vmem:[#allocation2 + $0x110] sm:$0xff]   ;;  %v26276_v3 = vld [vmem:[#allocation2 + $0x100] sm:$0xff]  }
 0x854   :  { %v29295_v24 = vpop.f32.mrb[64].mxu0 }
 0x855   :  { %30983 = vst [vmem:[#allocation102_spill] sm:$0xff] %v29295_v24  ;;  %v14546_v7 = vpop.f32.mrb[65].mxu0  ;;  %v26387_v24 = vld [vmem:[#allocation2 + $0x68] sm:$0xff]  }
 0x856   :  { %23957 = vmatmul.mubr.bf16.gmra.mrb[224].mxu1 %v26250_v18  ;;  %v24183_v31 = vpop.f32.mrb[66].mxu0  ;;  %v26277_v18 = vld [vmem:[#allocation2 + $0x118] sm:$0xff]  }
 0x857   :  { %24405 = vmatmul.mubr.bf16.gmra.mrb[160].mxu0 %v26251_v41  ;;  %23960 = vmatprep.mubr.bf16.mxu1 %v26252_v19  ;;  %v29299_v26 = vpop.f32.mrb[67].mxu0  ;;  %v26278_v41 = vld [vmem:[#allocation2 + $0x108] sm:$0xff]   ;;  %v26279_v19 = vld [vmem:[#allocation2 + $0x120] sm:$0xff]  }
 0x858   :  { %30984 = vst [vmem:[#allocation103_spill] sm:$0xff] %v29299_v26  ;;  %24408 = vmatprep.mubr.bf16.mxu0 %v26253_v6 }
 0x85c   :  { %v24186_v62 = vpop.f32.mrb[68].mxu0 }
 0x85d   :  { %v29302_v15 = vpop.f32.mrb[69].mxu0  ;;  %v26282_v62 = vld [vmem:[#allocation2 + $0x128] sm:$0xff]  }
 0x85e   :  { %30985 = vst [vmem:[#allocation46_spill] sm:$0xff] %v29302_v15  ;;  %23961 = vmatmul.mubr.bf16.gmra.mrb[228].mxu1 %v26255_v61  ;;  %v29304_v59 = vpop.f32.mrb[70].mxu0  ;;  %v26281_v61 = vld [vmem:[#allocation2 + $0x110] sm:$0xff]  }
 0x85f   :  { %30986 = vst [vmem:[#allocation47_spill] sm:$0xff] %v29304_v59  ;;  %24409 = vmatmul.mubr.bf16.gmra.mrb[164].mxu0 %v26256_v44  ;;  %23964 = vmatprep.mubr.bf16.mxu1 %v26257_v49  ;;  %v29306_v0 = vpop.f32.mrb[71].mxu0  ;;  %v26283_v49 = vld [vmem:[#allocation2 + $0x118] sm:$0xff]  }
 0x860   :  { %30987 = vst [vmem:[#allocation108_spill] sm:$0xff] %v29306_v0  ;;  %24412 = vmatprep.mubr.bf16.mxu0 %v26258_v37  ;;  %v26284_v37 = vld [vmem:[#allocation2 + $0x130] sm:$0xff]   ;;  %v26349_v0 = vld [vmem:[#allocation2 + $0x118] sm:$0xff]  }
 0x864   :  { %v29308_v47 = vpop.f32.mrb[72].mxu0 }
 0x865   :  { %30988 = vst [vmem:[#allocation109_spill] sm:$0xff] %v29308_v47  ;;  %v29310_v40 = vpop.f32.mrb[73].mxu0 }
 0x866   :  { %30989 = vst [vmem:[#allocation48_spill] sm:$0xff] %v29310_v40  ;;  %23965 = vmatmul.mubr.bf16.gmra.mrb[232].mxu1 %v26259_v48  ;;  %v29312_v34 = vpop.f32.mrb[74].mxu0  ;;  %v26345_v40 = vld [vmem:[#allocation2 + $0xf8] sm:$0xff]  }
 0x867   :  { %30990 = vst [vmem:[#allocation49_spill] sm:$0xff] %v29312_v34  ;;  %24413 = vmatmul.mubr.bf16.gmra.mrb[168].mxu0 %v26260_v36  ;;  %23968 = vmatprep.mubr.bf16.mxu1 %v26261_v21  ;;  %v14581_v35 = vpop.f32.mrb[75].mxu0  ;;  %v26285_v21 = vld [vmem:[#allocation2 + $0x120] sm:$0xff]  }
 0x868   :  { %24416 = vmatprep.mubr.bf16.mxu0 %v26262_v20 }
 0x86c   :  { %v29314_v57 = vpop.f32.mrb[76].mxu0 }
 0x86d   :  { %30991 = vst [vmem:[#allocation50_spill] sm:$0xff] %v29314_v57  ;;  %v14594_v32 = vpop.f32.mrb[77].mxu0 }
 0x86e   :  { %23969 = vmatmul.mubr.bf16.gmra.mrb[236].mxu1 %v26263_v52  ;;  %v24195_v12 = vpop.f32.mrb[78].mxu0  ;;  %v26288_v52 = vld [vmem:[#allocation2 + $0x140] sm:$0xff]  }
 0x86f   :  { %24417 = vmatmul.mubr.bf16.gmra.mrb[172].mxu0 %v26264_v11  ;;  %23972 = vmatprep.mubr.bf16.mxu1 %v26266_v2  ;;  %v29316_v25 = vpop.f32.mrb[79].mxu0  ;;  %v26286_v11 = vld [vmem:[#allocation2 + $0x138] sm:$0xff]   ;;  %v26287_v2 = vld [vmem:[#allocation2 + $0x128] sm:$0xff]  }
 0x870   :  { %30992 = vst [vmem:[#allocation112_spill] sm:$0xff] %v29316_v25  ;;  %24420 = vmatprep.mubr.bf16.mxu0 %v26265_v1 }
 0x876   :  { %23973 = vmatmul.mubr.bf16.gmra.mrb[240].mxu1 %v26268_v60  ;;  %v26289_v60 = vld [vmem:[#allocation2 + $0x130] sm:$0xff]  }
 0x877   :  { %24421 = vmatmul.mubr.bf16.gmra.mrb[176].mxu0 %v26269_v16  ;;  %23976 = vmatprep.mubr.bf16.mxu1 %v26270_v53  ;;  %v26290_v53 = vld [vmem:[#allocation2 + $0x148] sm:$0xff]  }
 0x878   :  { %24424 = vmatprep.mubr.bf16.mxu0 %v26271_v13  ;;  %v26291_v13 = vld [vmem:[#allocation2 + $0x138] sm:$0xff]  }
 0x87e   :  { %23977 = vmatmul.mubr.bf16.gmra.mrb[244].mxu1 %v26272_v8  ;;  %v26292_v8 = vld [vmem:[#allocation2 + $0x150] sm:$0xff]  }
 0x87f   :  { %24425 = vmatmul.mubr.bf16.gmra.mrb[180].mxu0 %v26273_v29  ;;  %23980 = vmatprep.mubr.bf16.mxu1 %v26274_v55 }
 0x880   :  { %24428 = vmatprep.mubr.bf16.mxu0 %v26275_v23 }
 0x886   :  { %23981 = vmatmul.mubr.bf16.gmra.mrb[248].mxu1 %v26276_v3  ;;  %v26294_v3 = vld [vmem:[#allocation2 + $0x140] sm:$0xff]  }
 0x887   :  { %24429 = vmatmul.mubr.bf16.gmra.mrb[184].mxu0 %v26277_v18  ;;  %23984 = vmatprep.mubr.bf16.mxu1 %v26278_v41  ;;  %v26295_v41 = vld [vmem:[#allocation2 + $0x158] sm:$0xff]  }
 0x888   :  { %24432 = vmatprep.mubr.bf16.mxu0 %v26279_v19  ;;  %v26296_v19 = vld [vmem:[#allocation2 + $0x148] sm:$0xff]  }
 0x88a   :  { %v24198_v7 = vpop.f32.mrb[80].mxu0 }
 0x88b   :  { %v29318_v6 = vpop.f32.mrb[81].mxu0  ;;  %v26297_v7 = vld [vmem:[#allocation2 + $0x160] sm:$0xff]  }
 0x88c   :  { %30993 = vst [vmem:[#allocation114_spill] sm:$0xff] %v29318_v6  ;;  %v29320_v31 = vpop.f32.mrb[82].mxu0 }
 0x88d   :  { %30994 = vst [vmem:[#allocation116_spill] sm:$0xff] %v29320_v31  ;;  %v29322_v44 = vpop.f32.mrb[83].mxu0 }
 0x88e   :  { %30995 = vst [vmem:[#allocation51_spill] sm:$0xff] %v29322_v44  ;;  %23985 = vmatmul.mubr.bf16.gmra.mrb[252].mxu1 %v26281_v61  ;;  %v26342_v44 = vld [vmem:[#allocation2 + $0xd0] sm:$0xff]  }
 0x88f   :  { %24433 = vmatmul.mubr.bf16.gmra.mrb[188].mxu0 %v26282_v62  ;;  %23988 = vmatprep.mubr.bf16.mxu1 %v26283_v49 }
 0x890   :  { %24436 = vmatprep.mubr.bf16.mxu0 %v26284_v37  ;;  %v26298_v37 = vld [vmem:[#allocation2 + $0x150] sm:$0xff]  }
 0x892   :  { %v29324_v48 = vpop.f32.mrb[84].mxu0 }
 0x893   :  { %30996 = vst [vmem:[#allocation54_spill] sm:$0xff] %v29324_v48  ;;  %v29326_v36 = vpop.f32.mrb[85].mxu0 }
 0x894   :  { %30997 = vst [vmem:[#allocation55_spill] sm:$0xff] %v29326_v36  ;;  %v29328_v20 = vpop.f32.mrb[86].mxu0  ;;  %v26341_v36 = vld [vmem:[#allocation2 + $0xc8] sm:$0xff]  }
 0x895   :  { %30998 = vst [vmem:[#allocation120_spill] sm:$0xff] %v29328_v20  ;;  %v14629_v35 = vpop.f32.mrb[87].mxu0 }
 0x896   :  { %23989 = vmatmul.mubr.bf16.gmra.mrb[0].mxu1 %v26285_v21  ;;  %v26299_v35 = vld [vmem:[#allocation2 + $0x168] sm:$0xff]  }
 0x897   :  { %24437 = vmatmul.mubr.bf16.gmra.mrb[192].mxu0 %v26286_v11  ;;  %23992 = vmatprep.mubr.bf16.mxu1 %v26287_v2  ;;  %v26300_v11 = vld [vmem:[#allocation2 + $0x158] sm:$0xff]   ;;  %v26301_v2 = vld [vmem:[#allocation2 + $0x170] sm:$0xff]  }
 0x898   :  { %24440 = vmatprep.mubr.bf16.mxu0 %v26288_v52 }
 0x89a   :  { %v29330_v32 = vpop.f32.mrb[88].mxu0 }
 0x89b   :  { %30999 = vst [vmem:[#allocation118_spill] sm:$0xff] %v29330_v32  ;;  %v14642_v1 = vpop.f32.mrb[89].mxu0 }
 0x89c   :  { %v24207_v12 = vpop.f32.mrb[90].mxu0 }
 0x89d   :  { %v29332_v16 = vpop.f32.mrb[91].mxu0 }
 0x89e   :  { %31000 = vst [vmem:[#allocation119_spill] sm:$0xff] %v29332_v16  ;;  %23993 = vmatmul.mubr.bf16.gmra.mrb[4].mxu1 %v26289_v60  ;;  %v26302_v60 = vld [vmem:[#allocation2 + $0x160] sm:$0xff]  }
 0x89f   :  { %24441 = vmatmul.mubr.bf16.gmra.mrb[196].mxu0 %v26290_v53  ;;  %23996 = vmatprep.mubr.bf16.mxu1 %v26291_v13  ;;  %v26303_v13 = vld [vmem:[#allocation2 + $0x178] sm:$0xff]  }
 0x8a0   :  { %24444 = vmatprep.mubr.bf16.mxu0 %v26292_v8  ;;  %v26304_v8 = vld [vmem:[#allocation2 + $0x168] sm:$0xff]  }
 0x8a2   :  { %v24210_v29 = vpop.f32.mrb[92].mxu0 }
 0x8a3   :  { %v29334_v55 = vpop.f32.mrb[93].mxu0  ;;  %v26305_v29 = vld [vmem:[#allocation2 + $0x180] sm:$0xff]  }
 0x8a4   :  { %31001 = vst [vmem:[#allocation56_spill] sm:$0xff] %v29334_v55  ;;  %v29336_v23 = vpop.f32.mrb[94].mxu0 }
 0x8a5   :  { %31002 = vst [vmem:[#allocation58_spill] sm:$0xff] %v29336_v23  ;;  %v29338_v18 = vpop.f32.mrb[95].mxu0  ;;  %v26335_v23 = vld [vmem:[#allocation2 + $0xa0] sm:$0xff]  }
 0x8a6   :  { %31003 = vst [vmem:[#allocation124_spill] sm:$0xff] %v29338_v18  ;;  %23997 = vmatmul.mubr.bf16.gmra.mrb[8].mxu1 %v26294_v3 }
 0x8a7   :  { %24445 = vmatmul.mubr.bf16.gmra.mrb[200].mxu0 %v26295_v41  ;;  %24000 = vmatprep.mubr.bf16.mxu1 %v26296_v19 }
 0x8a8   :  { %24448 = vmatprep.mubr.bf16.mxu0 %v26297_v7  ;;  %v26307_v7 = vld [vmem:[#allocation2 + $0x170] sm:$0xff]  }
 0x8aa   :  { %v29340_v61 = vpop.f32.mrb[96].mxu0 }
 0x8ab   :  { %31004 = vst [vmem:[#allocation125_spill] sm:$0xff] %v29340_v61  ;;  %v29342_v62 = vpop.f32.mrb[97].mxu0 }
 0x8ac   :  { %31005 = vst [vmem:[#allocation61_spill] sm:$0xff] %v29342_v62  ;;  %v29344_v49 = vpop.f32.mrb[98].mxu0 }
 0x8ad   :  { %31006 = vst [vmem:[#allocation62_spill] sm:$0xff] %v29344_v49  ;;  %v14677_v21 = vpop.f32.mrb[99].mxu0  ;;  %v26332_v49 = vld [vmem:[#allocation2 + $0x88] sm:$0xff]  }
 0x8ae   :  { %24001 = vmatmul.mubr.bf16.gmra.mrb[12].mxu1 %v26298_v37  ;;  %v26308_v21 = vld [vmem:[#allocation2 + $0x188] sm:$0xff]  }
 0x8af   :  { %24449 = vmatmul.mubr.bf16.gmra.mrb[204].mxu0 %v26299_v35  ;;  %24004 = vmatprep.mubr.bf16.mxu1 %v26300_v11  ;;  %v26309_v35 = vld [vmem:[#allocation2 + $0x178] sm:$0xff]   ;;  %v26310_v11 = vld [vmem:[#allocation2 + $0x190] sm:$0xff]  }
 0x8b0   :  { %24452 = vmatprep.mubr.bf16.mxu0 %v26301_v2 }
 0x8b2   :  { %v29346_v52 = vpop.f32.mrb[100].mxu0 }
 0x8b3   :  { %31007 = vst [vmem:[#allocation63_spill] sm:$0xff] %v29346_v52  ;;  %v14690_v1 = vpop.f32.mrb[101].mxu0 }
 0x8b4   :  { %v24219_v12 = vpop.f32.mrb[102].mxu0 }
 0x8b5   :  { %v29348_v53 = vpop.f32.mrb[103].mxu0 }
 0x8b6   :  { %31008 = vst [vmem:[#allocation127_spill] sm:$0xff] %v29348_v53  ;;  %24005 = vmatmul.mubr.bf16.gmra.mrb[16].mxu1 %v26302_v60  ;;  %v26311_v60 = vld [vmem:[#allocation2 + $0x180] sm:$0xff]  }
 0x8b7   :  { %24453 = vmatmul.mubr.bf16.gmra.mrb[208].mxu0 %v26303_v13  ;;  %24008 = vmatprep.mubr.bf16.mxu1 %v26304_v8  ;;  %v26312_v8 = vld [vmem:[#allocation2 + $0x198] sm:$0xff]  }
 0x8b8   :  { %24456 = vmatprep.mubr.bf16.mxu0 %v26305_v29  ;;  %v26313_v29 = vld [vmem:[#allocation2 + $0x188] sm:$0xff]  }
 0x8ba   :  { %v24222_v3 = vpop.f32.mrb[104].mxu0 }
 0x8bb   :  { %v29350_v41 = vpop.f32.mrb[105].mxu0 }
 0x8bc   :  { %31009 = vst [vmem:[#allocation129_spill] sm:$0xff] %v29350_v41  ;;  %v29352_v19 = vpop.f32.mrb[106].mxu0  ;;  %v26328_v41 = vld [vmem:[#allocation2 + $0x70] sm:$0xff]  }
 0x8bd   :  { %31010 = vst [vmem:[#allocation131_spill] sm:$0xff] %v29352_v19  ;;  %v29354_v37 = vpop.f32.mrb[107].mxu0  ;;  %v26323_v19 = vld [vmem:[#allocation9 + $0x48] sm:$0xff]  }
 0x8be   :  { %31011 = vst [vmem:[#allocation64_spill] sm:$0xff] %v29354_v37  ;;  %24009 = vmatmul.mubr.bf16.gmra.mrb[20].mxu1 %v26307_v7 }
 0x8bf   :  { %24457 = vmatmul.mubr.bf16.gmra.mrb[212].mxu0 %v26308_v21  ;;  %24012 = vmatprep.mubr.bf16.mxu1 %v26309_v35  ;;  %v26314_v21 = vld [vmem:[#allocation2 + $0x190] sm:$0xff]  }
 0x8c0   :  { %24460 = vmatprep.mubr.bf16.mxu0 %v26310_v11  ;;  %v26315_v11 = vld [vmem:[#allocation2 + $0x18] sm:$0xff]  }
 0x8c2   :  { %v29356_v2 = vpop.f32.mrb[108].mxu0 }
 0x8c3   :  { %31012 = vst [vmem:[#allocation65_spill] sm:$0xff] %v29356_v2  ;;  %v29358_v1 = vpop.f32.mrb[109].mxu0 }
 0x8c4   :  { %31013 = vst [vmem:[#allocation66_spill] sm:$0xff] %v29358_v1  ;;  %v29360_v12 = vpop.f32.mrb[110].mxu0 }
 0x8c5   :  { %31014 = vst [vmem:[#allocation134_spill] sm:$0xff] %v29360_v12  ;;  %v14725_v13 = vpop.f32.mrb[111].mxu0 }
 0x8c6   :  { %24013 = vmatmul.mubr.bf16.gmra.mrb[24].mxu1 %v26311_v60  ;;  %v26317_v13 = vld [vmem:[#allocation2 + $0x20] sm:$0xff]  }
 0x8c7   :  { %24461 = vmatmul.mubr.bf16.gmra.mrb[216].mxu0 %v26312_v8  ;;  %24016 = vmatprep.mubr.bf16.mxu1 %v26313_v29  ;;  %v26318_v8 = vld [vmem:[#allocation2 + $0x28] sm:$0xff]  }
 0x8ca   :  { %v29362_v3 = vpop.f32.mrb[112].mxu0 }
 0x8cb   :  { %31015 = vst [vmem:[#allocation132_spill] sm:$0xff] %v29362_v3  ;;  %v14738_v7 = vpop.f32.mrb[113].mxu0 }
 0x8cc   :  { %v24231_v37 = vpop.f32.mrb[114].mxu0 }
 0x8cd   :  { %v29364_v35 = vpop.f32.mrb[115].mxu0  ;;  %v26330_v37 = vld [vmem:[#allocation9 + $0x50] sm:$0xff]  }
 0x8ce   :  { %31016 = vst [vmem:[#allocation133_spill] sm:$0xff] %v29364_v35  ;;  %24017 = vmatmul.mubr.bf16.gmra.mrb[28].mxu1 %v26314_v21  ;;  %v26319_v21 = vld [vmem:[#allocation2 + $0x30] sm:$0xff]  }
 0x8cf   :  { %24036 = vmatprep.mubr.bf16.mxu1 %v26315_v11  ;;  %v26337_v11 = vld [vmem:[#allocation9 + $0x58] sm:$0xff]  }
 0x8d2   :  { %v24234_v1 = vpop.f32.mrb[116].mxu0 }
 0x8d3   :  { %v29366_v2 = vpop.f32.mrb[117].mxu0 }
 0x8d4   :  { %31017 = vst [vmem:[#allocation69_spill] sm:$0xff] %v29366_v2  ;;  %v29368_v12 = vpop.f32.mrb[118].mxu0  ;;  %v26320_v2 = vld [vmem:[#allocation2 + $0x38] sm:$0xff]  }
 0x8d5   :  { %31018 = vst [vmem:[#allocation71_spill] sm:$0xff] %v29368_v12  ;;  %v29370_v60 = vpop.f32.mrb[119].mxu0 }
 0x8d6   :  { %31019 = vst [vmem:[#allocation136_spill] sm:$0xff] %v29370_v60  ;;  %24037 = vmatmul.mubr.bf16.vlgmr.msra.gmra.mrb[192].mxu1 %v26317_v13  ;;  %v26321_v60 = vld [vmem:[#allocation2 + $0x40] sm:$0xff]  }
 0x8d7   :  { %24245 = vmatpush3.bf16.msra.mxu1 %v29297_v50  ;;  %24040 = vmatprep.mubr.bf16.mxu1 %v26318_v8  ;;  %v26344_v50 = vld [vmem:[#allocation9 + $0x60] sm:$0xff]  }
 0x8d8   :  { %24246 = vmatprep.subr.bf16.mxu1 %v26323_v19 }
 0x8da   :  { %v29373_v29 = vpop.f32.mrb[120].mxu0 }
 0x8db   :  { %31020 = vst [vmem:[#allocation85_spill] sm:$0xff] %v29373_v29  ;;  %v29375_v7 = vpop.f32.mrb[121].mxu0  ;;  %24247 = vmatpush3.bf16.msra.mxu1 %v26323_v19  ;;  %v26351_v19 = vld [vmem:[#allocation9 + $0x68] sm:$0xff]  }
 0x8dc   :  { %31021 = vst [vmem:[#allocation14_spill] sm:$0xff] %v29375_v7  ;;  %v29377_v1 = vpop.f32.mrb[122].mxu0  ;;  %24248 = vmatprep.subr.bf16.mxu1 %v26330_v37 }
 0x8dd   :  { %31022 = vst [vmem:[#allocation89_spill] sm:$0xff] %v29377_v1  ;;  %v14773_v12 = vpop.f32.mrb[123].mxu0  ;;  %v26322_v1 = vld [vmem:[#allocation2 + $0x48] sm:$0xff]  }
 0x8de   :  { %24041 = vmatmul.mubr.bf16.gmra.mrb[196].mxu1 %v26319_v21  ;;  %v26358_v12 = vld [vmem:[#allocation9 + $0x70] sm:$0xff]  }
 0x8df   :  { %24044 = vmatprep.mubr.bf16.mxu1 %v26320_v2  ;;  %24249 = vmatpush3.bf16.msra.mxu1 %v26330_v37 }
 0x8e0   :  { %24250 = vmatprep.subr.bf16.mxu1 %v26337_v11 }
 0x8e2   :  { %v29379_v13 = vpop.f32.mrb[124].mxu0 }
 0x8e3   :  { %31023 = vst [vmem:[#allocation52_spill] sm:$0xff] %v29379_v13  ;;  %v14786_v8 = vpop.f32.mrb[125].mxu0  ;;  %24251 = vmatpush3.bf16.msra.mxu1 %v26337_v11  ;;  %v26325_v11 = vld [vmem:[#allocation2 + $0x58] sm:$0xff]   ;;  %v26327_v13 = vld [vmem:[#allocation2 + $0x68] sm:$0xff]  }
 0x8e4   :  { %v24243_v29 = vpop.f32.mrb[126].mxu0  ;;  %24252 = vmatprep.subr.bf16.mxu1 %v26344_v50  ;;  %v26324_v8 = vld [vmem:[#allocation2 + $0x50] sm:$0xff]  }
 0x8e5   :  { %v29381_v7 = vpop.f32.mrb[127].mxu0 }
 0x8e6   :  { %31024 = vst [vmem:[#allocation53_spill] sm:$0xff] %v29381_v7  ;;  %24045 = vmatmul.mubr.bf16.gmra.mrb[200].mxu1 %v26321_v60 }
 0x8e7   :  { %24048 = vmatprep.mubr.bf16.mxu1 %v26322_v1  ;;  %24253 = vmatpush3.bf16.msra.mxu1 %v26344_v50  ;;  %v26326_v50 = vld [vmem:[#allocation2 + $0x60] sm:$0xff]  }
 0x8e8   :  { %24254 = vmatprep.subr.bf16.mxu1 %v26351_v19 }
 0x8ea   :  { %v24374_v2 = vpop.f32.mrb[128].mxu0 }
 0x8eb   :  { %v29383_v37 = vpop.f32.mrb[129].mxu0  ;;  %24255 = vmatpush3.bf16.msra.mxu1 %v26351_v19 }
 0x8ec   :  { %v29385_v21 = vpop.f32.mrb[130].mxu0  ;;  %24256 = vmatprep.subr.bf16.mxu1 %v26358_v12 }
 0x8ed   :  { %v29387_v29 = vpop.f32.mrb[131].mxu0 }
 0x8ee   :  { %24049 = vmatmul.mubr.bf16.gmra.mrb[204].mxu1 %v26324_v8  ;;  %v26329_v8 = vld [vmem:[#allocation2 + $0x78] sm:$0xff]  }
 0x8ef   :  { %24052 = vmatprep.mubr.bf16.mxu1 %v26325_v11  ;;  %24257 = vmatpush3.bf16.msra.mxu1 %v26358_v12  ;;  %v26365_v12 = vld [vmem:[#allocation9 + $0x78] sm:$0xff]  }
 0x8f0   :  { %24258 = vmatprep.subr.bf16.mxu1 %v26365_v12 }
 0x8f2   :  { %v29389_v7 = vpop.f32.mrb[132].mxu0 }
 0x8f3   :  { %v29391_v60 = vpop.f32.mrb[133].mxu0  ;;  %24259 = vmatpush3.bf16.msra.mxu1 %v26365_v12  ;;  %v26334_v12 = vld [vmem:[#allocation2 + $0x98] sm:$0xff]  }
 0x8f4   :  { %v29393_v1 = vpop.f32.mrb[134].mxu0 }
 0x8f5   :  { %v16056_v2 = vpop.f32.mrb[135].mxu0 }
 0x8f6   :  { %24053 = vmatmul.mubr.bf16.gmra.mrb[208].mxu1 %v26326_v50  ;;  %v26331_v50 = vld [vmem:[#allocation2 + $0x80] sm:$0xff]  }
 0x8f7   :  { %24056 = vmatprep.mubr.bf16.mxu1 %v26327_v13 }
 0x8fa   :  { %v29395_v19 = vpop.f32.mrb[136].mxu0 }
 0x8fb   :  { %v16069_v35 = vpop.f32.mrb[137].mxu0 }
 0x8fc   :  { %v24383_v3 = vpop.f32.mrb[138].mxu0 }
 0x8fd   :  { %v29397_v53 = vpop.f32.mrb[139].mxu0 }
 0x8fe   :  { %31025 = vst [vmem:[#allocation15_spill] sm:$0xff] %v29397_v53  ;;  %24057 = vmatmul.mubr.bf16.gmra.mrb[212].mxu1 %v26328_v41  ;;  %v26333_v41 = vld [vmem:[#allocation2 + $0x90] sm:$0xff]  }
 0x8ff   :  { %24060 = vmatprep.mubr.bf16.mxu1 %v26329_v8 }
 0x902   :  { %v24386_v11 = vpop.f32.mrb[140].mxu0 }
 0x903   :  { %v29399_v52 = vpop.f32.mrb[141].mxu0 }
 0x904   :  { %31026 = vst [vmem:[#allocation16_spill] sm:$0xff] %v29399_v52  ;;  %v29401_v2 = vpop.f32.mrb[142].mxu0 }
 0x905   :  { %31027 = vst [vmem:[#allocation17_spill] sm:$0xff] %v29401_v2  ;;  %v29403_v13 = vpop.f32.mrb[143].mxu0  ;;  %v26398_v2 = vld [vmem:[#allocation2 + $0xb8] sm:$0xff]  }
 0x906   :  { %31028 = vst [vmem:[#allocation90_spill] sm:$0xff] %v29403_v13  ;;  %24061 = vmatmul.mubr.bf16.gmra.mrb[216].mxu1 %v26331_v50  ;;  %v26336_v50 = vld [vmem:[#allocation2 + $0xa8] sm:$0xff]  }
 0x907   :  { %24064 = vmatprep.mubr.bf16.mxu1 %v26332_v49  ;;  %v29415_v49 = vld [vmem:[#allocation9 + $0x140] sm:$0xff]  }
 0x908   :  { %24468 = vmatprep.subr.bf16.mxu1 %v29415_v49 }
 0x90a   :  { %v29405_v3 = vpop.f32.mrb[144].mxu0 }
 0x90b   :  { %31029 = vst [vmem:[#allocation91_spill] sm:$0xff] %v29405_v3  ;;  %v29407_v35 = vpop.f32.mrb[145].mxu0 }
 0x90c   :  { %31030 = vst [vmem:[#allocation94_spill] sm:$0xff] %v29407_v35  ;;  %v29409_v62 = vpop.f32.mrb[146].mxu0 }
 0x90d   :  { %31031 = vst [vmem:[#allocation57_spill] sm:$0xff] %v29409_v62  ;;  %v16104_v8 = vpop.f32.mrb[147].mxu0  ;;  %v26397_v62 = vld [vmem:[#allocation2 + $0xb0] sm:$0xff]  }
 0x90e   :  { %24065 = vmatmul.mubr.bf16.gmra.mrb[220].mxu1 %v26333_v41  ;;  %v26338_v41 = vld [vmem:[#allocation2 + $0xb0] sm:$0xff]  }
 0x90f   :  { %24068 = vmatprep.mubr.bf16.mxu1 %v26334_v12 }
 0x912   :  { %v29411_v11 = vpop.f32.mrb[148].mxu0 }
 0x913   :  { %31032 = vst [vmem:[#allocation59_spill] sm:$0xff] %v29411_v11  ;;  %v16117_v61 = vpop.f32.mrb[149].mxu0 }
 0x914   :  { %v24395_v18 = vpop.f32.mrb[150].mxu0  ;;  %v26339_v61 = vld [vmem:[#allocation2 + $0xb8] sm:$0xff]  }
 0x915   :  { %v29413_v55 = vpop.f32.mrb[151].mxu0 }
 0x916   :  { %31033 = vst [vmem:[#allocation60_spill] sm:$0xff] %v29413_v55  ;;  %24069 = vmatmul.mubr.bf16.gmra.mrb[224].mxu1 %v26335_v23  ;;  %v26395_v55 = vld [vmem:[#allocation2 + $0xa0] sm:$0xff]  }
 0x917   :  { %24072 = vmatprep.mubr.bf16.mxu1 %v26336_v50  ;;  %v26340_v50 = vld [vmem:[#allocation2 + $0xc0] sm:$0xff]  }
 0x91a   :  { %v24398_v16 = vpop.f32.mrb[152].mxu0 }
 0x91b   :  { %v29418_v32 = vpop.f32.mrb[153].mxu0 }
 0x91c   :  { %31034 = vst [vmem:[#allocation19_spill] sm:$0xff] %v29418_v32  ;;  %v29420_v8 = vpop.f32.mrb[154].mxu0  ;;  %v26392_v32 = vld [vmem:[#allocation2 + $0x90] sm:$0xff]  }
 0x91d   :  { %31035 = vst [vmem:[#allocation20_spill] sm:$0xff] %v29420_v8  ;;  %v29422_v12 = vpop.f32.mrb[155].mxu0 }
 0x91e   :  { %31036 = vst [vmem:[#allocation21_spill] sm:$0xff] %v29422_v12  ;;  %24073 = vmatmul.mubr.bf16.gmra.mrb[228].mxu1 %v26338_v41  ;;  %v26343_v41 = vld [vmem:[#allocation2 + $0xf0] sm:$0xff]  }
 0x91f   :  { %24076 = vmatprep.mubr.bf16.mxu1 %v26339_v61 }
 0x922   :  { %v29424_v18 = vpop.f32.mrb[156].mxu0 }
 0x923   :  { %31037 = vst [vmem:[#allocation97_spill] sm:$0xff] %v29424_v18  ;;  %v29426_v20 = vpop.f32.mrb[157].mxu0  ;;  %v26389_v18 = vld [vmem:[#allocation2 + $0x78] sm:$0xff]  }
 0x924   :  { %31038 = vst [vmem:[#allocation95_spill] sm:$0xff] %v29426_v20  ;;  %v29428_v23 = vpop.f32.mrb[158].mxu0 }
 0x925   :  { %31039 = vst [vmem:[#allocation70_spill] sm:$0xff] %v29428_v23  ;;  %v16152_v48 = vpop.f32.mrb[159].mxu0  ;;  %v26388_v23 = vld [vmem:[#allocation2 + $0x70] sm:$0xff]  }
 0x926   :  { %24077 = vmatmul.mubr.bf16.gmra.mrb[232].mxu1 %v26340_v50  ;;  %v26346_v48 = vld [vmem:[#allocation2 + $0x100] sm:$0xff]   ;;  %v26347_v50 = vld [vmem:[#allocation2 + $0x108] sm:$0xff]  }
 0x927   :  { %24080 = vmatprep.mubr.bf16.mxu1 %v26341_v36 }
 0x92a   :  { %v29430_v16 = vpop.f32.mrb[160].mxu0 }
 0x92b   :  { %31040 = vst [vmem:[#allocation99_spill] sm:$0xff] %v29430_v16  ;;  %v16165_v31 = vpop.f32.mrb[161].mxu0 }
 0x92c   :  { %v24407_v6 = vpop.f32.mrb[162].mxu0 }
 0x92d   :  { %v29432_v25 = vpop.f32.mrb[163].mxu0 }
 0x92e   :  { %31041 = vst [vmem:[#allocation27_spill] sm:$0xff] %v29432_v25  ;;  %24081 = vmatmul.mubr.bf16.gmra.mrb[236].mxu1 %v26342_v44  ;;  %v26421_v25 = vld [vmem:[#allocation9 + $0x178] sm:$0xff]  }
 0x92f   :  { %24084 = vmatprep.mubr.bf16.mxu1 %v26343_v41  ;;  %v26348_v41 = vld [vmem:[#allocation2 + $0x110] sm:$0xff]  }
 0x932   :  { %v24410_v61 = vpop.f32.mrb[164].mxu0 }
 0x933   :  { %v29434_v57 = vpop.f32.mrb[165].mxu0 }
 0x934   :  { %31042 = vst [vmem:[#allocation67_spill] sm:$0xff] %v29434_v57  ;;  %v29436_v34 = vpop.f32.mrb[166].mxu0 }
 0x935   :  { %31043 = vst [vmem:[#allocation22_spill] sm:$0xff] %v29436_v34  ;;  %v29438_v47 = vpop.f32.mrb[167].mxu0 }
 0x936   :  { %31044 = vst [vmem:[#allocation76_spill] sm:$0xff] %v29438_v47  ;;  %24085 = vmatmul.mubr.bf16.gmra.mrb[240].mxu1 %v26345_v40  ;;  %v26350_v47 = vld [vmem:[#allocation2 + $0x120] sm:$0xff]  }
 0x937   :  { %24088 = vmatprep.mubr.bf16.mxu1 %v26346_v48 }
 0x93a   :  { %v29440_v36 = vpop.f32.mrb[168].mxu0 }
 0x93b   :  { %31045 = vst [vmem:[#allocation68_spill] sm:$0xff] %v29440_v36  ;;  %v29442_v31 = vpop.f32.mrb[169].mxu0 }
 0x93c   :  { %31046 = vst [vmem:[#allocation101_spill] sm:$0xff] %v29442_v31  ;;  %v29444_v6 = vpop.f32.mrb[170].mxu0 }
 0x93d   :  { %31047 = vst [vmem:[#allocation23_spill] sm:$0xff] %v29444_v6  ;;  %v16200_v44 = vpop.f32.mrb[171].mxu0  ;;  %v26352_v6 = vld [vmem:[#allocation2 + $0x128] sm:$0xff]  }
 0x93e   :  { %24089 = vmatmul.mubr.bf16.gmra.mrb[244].mxu1 %v26347_v50  ;;  %v26353_v50 = vld [vmem:[#allocation2 + $0x130] sm:$0xff]  }
 0x93f   :  { %24092 = vmatprep.mubr.bf16.mxu1 %v26348_v41 }
 0x942   :  { %v29446_v61 = vpop.f32.mrb[172].mxu0 }
 0x943   :  { %31048 = vst [vmem:[#allocation72_spill] sm:$0xff] %v29446_v61  ;;  %v16213_v34 = vpop.f32.mrb[173].mxu0  ;;  %v26356_v61 = vld [vmem:[#allocation2 + $0x148] sm:$0xff]  }
 0x944   :  { %v24419_v57 = vpop.f32.mrb[174].mxu0 }
 0x945   :  { %v29448_v59 = vpop.f32.mrb[175].mxu0 }
 0x946   :  { %31049 = vst [vmem:[#allocation105_spill] sm:$0xff] %v29448_v59  ;;  %24093 = vmatmul.mubr.bf16.gmra.mrb[248].mxu1 %v26349_v0  ;;  %v26354_v59 = vld [vmem:[#allocation2 + $0x138] sm:$0xff]  }
 0x947   :  { %24096 = vmatprep.mubr.bf16.mxu1 %v26350_v47  ;;  %v26355_v47 = vld [vmem:[#allocation2 + $0x140] sm:$0xff]  }
 0x94a   :  { %v24422_v40 = vpop.f32.mrb[176].mxu0 }
 0x94b   :  { %v29450_v48 = vpop.f32.mrb[177].mxu0 }
 0x94c   :  { %31050 = vst [vmem:[#allocation73_spill] sm:$0xff] %v29450_v48  ;;  %v29452_v31 = vpop.f32.mrb[178].mxu0 }
 0x94d   :  { %31051 = vst [vmem:[#allocation24_spill] sm:$0xff] %v29452_v31  ;;  %v29454_v44 = vpop.f32.mrb[179].mxu0 }
 0x94e   :  { %31052 = vst [vmem:[#allocation26_spill] sm:$0xff] %v29454_v44  ;;  %24097 = vmatmul.mubr.bf16.gmra.mrb[252].mxu1 %v26352_v6  ;;  %v26357_v6 = vld [vmem:[#allocation2 + $0x150] sm:$0xff]  }
 0x94f   :  { %24100 = vmatprep.mubr.bf16.mxu1 %v26353_v50 }
 0x952   :  { %v29456_v41 = vpop.f32.mrb[180].mxu0 }
 0x953   :  { %31053 = vst [vmem:[#allocation25_spill] sm:$0xff] %v29456_v41  ;;  %v29458_v34 = vpop.f32.mrb[181].mxu0 }
 0x954   :  { %31054 = vst [vmem:[#allocation106_spill] sm:$0xff] %v29458_v34  ;;  %v29460_v57 = vpop.f32.mrb[182].mxu0 }
 0x955   :  { %31055 = vst [vmem:[#allocation107_spill] sm:$0xff] %v29460_v57  ;;  %v16248_v0 = vpop.f32.mrb[183].mxu0  ;;  %v26359_v57 = vld [vmem:[#allocation2 + $0x158] sm:$0xff]  }
 0x956   :  { %24101 = vmatmul.mubr.bf16.gmra.mrb[0].mxu1 %v26354_v59  ;;  %v26360_v59 = vld [vmem:[#allocation2 + $0x160] sm:$0xff]  }
 0x957   :  { %24104 = vmatprep.mubr.bf16.mxu1 %v26355_v47 }
 0x95a   :  { %v29462_v40 = vpop.f32.mrb[184].mxu0 }
 0x95b   :  { %31056 = vst [vmem:[#allocation117_spill] sm:$0xff] %v29462_v40  ;;  %v16261_v31 = vpop.f32.mrb[185].mxu0  ;;  %v26363_v40 = vld [vmem:[#allocation2 + $0x178] sm:$0xff]  }
 0x95c   :  { %v24431_v48 = vpop.f32.mrb[186].mxu0 }
 0x95d   :  { %v29464_v44 = vpop.f32.mrb[187].mxu0 }
 0x95e   :  { %31057 = vst [vmem:[#allocation31_spill] sm:$0xff] %v29464_v44  ;;  %24105 = vmatmul.mubr.bf16.gmra.mrb[4].mxu1 %v26356_v61  ;;  %v26361_v44 = vld [vmem:[#allocation2 + $0x168] sm:$0xff]  }
 0x95f   :  { %24108 = vmatprep.mubr.bf16.mxu1 %v26357_v6  ;;  %v26362_v6 = vld [vmem:[#allocation2 + $0x170] sm:$0xff]  }
 0x962   :  { %v24434_v50 = vpop.f32.mrb[188].mxu0 }
 0x963   :  { %v29466_v41 = vpop.f32.mrb[189].mxu0 }
 0x964   :  { %31058 = vst [vmem:[#allocation110_spill] sm:$0xff] %v29466_v41  ;;  %v29468_v34 = vpop.f32.mrb[190].mxu0 }
 0x965   :  { %31059 = vst [vmem:[#allocation74_spill] sm:$0xff] %v29468_v34  ;;  %v29470_v0 = vpop.f32.mrb[191].mxu0 }
 0x966   :  { %31060 = vst [vmem:[#allocation75_spill] sm:$0xff] %v29470_v0  ;;  %24109 = vmatmul.mubr.bf16.gmra.mrb[8].mxu1 %v26359_v57  ;;  %v26364_v57 = vld [vmem:[#allocation2 + $0x180] sm:$0xff]  }
 0x967   :  { %24112 = vmatprep.mubr.bf16.mxu1 %v26360_v59 }
 0x96a   :  { %v29472_v47 = vpop.f32.mrb[192].mxu0 }
 0x96b   :  { %31061 = vst [vmem:[#allocation28_spill] sm:$0xff] %v29472_v47  ;;  %v29474_v31 = vpop.f32.mrb[193].mxu0 }
 0x96c   :  { %31062 = vst [vmem:[#allocation29_spill] sm:$0xff] %v29474_v31  ;;  %v29476_v48 = vpop.f32.mrb[194].mxu0 }
 0x96d   :  { %31063 = vst [vmem:[#allocation80_spill] sm:$0xff] %v29476_v48  ;;  %v16296_v61 = vpop.f32.mrb[195].mxu0  ;;  %v26366_v48 = vld [vmem:[#allocation2 + $0x188] sm:$0xff]  }
 0x96e   :  { %24113 = vmatmul.mubr.bf16.gmra.mrb[12].mxu1 %v26361_v44  ;;  %v26367_v44 = vld [vmem:[#allocation2 + $0x190] sm:$0xff]  }
 0x96f   :  { %24116 = vmatprep.mubr.bf16.mxu1 %v26362_v6 }
 0x972   :  { %v29478_v50 = vpop.f32.mrb[196].mxu0 }
 0x973   :  { %31064 = vst [vmem:[#allocation121_spill] sm:$0xff] %v29478_v50  ;;  %v16309_v34 = vpop.f32.mrb[197].mxu0  ;;  %v26371_v50 = vld [vmem:[#allocation2] sm:$0xff]  }
 0x974   :  { %v24443_v41 = vpop.f32.mrb[198].mxu0  ;;  %v26369_v34 = vld [vmem:[#allocation2 + $0x1a0] sm:$0xff]  }
 0x975   :  { %v29480_v0 = vpop.f32.mrb[199].mxu0 }
 0x976   :  { %31065 = vst [vmem:[#allocation81_spill] sm:$0xff] %v29480_v0  ;;  %24117 = vmatmul.mubr.bf16.gmra.mrb[16].mxu1 %v26363_v40  ;;  %v26368_v40 = vld [vmem:[#allocation2 + $0x198] sm:$0xff]  }
 0x977   :  { %24120 = vmatprep.mubr.bf16.mxu1 %v26364_v57 }
 0x97a   :  { %v24446_v59 = vpop.f32.mrb[200].mxu0 }
 0x97b   :  { %v29482_v47 = vpop.f32.mrb[201].mxu0 }
 0x97c   :  { %31066 = vst [vmem:[#allocation32_spill] sm:$0xff] %v29482_v47  ;;  %v29484_v31 = vpop.f32.mrb[202].mxu0 }
 0x97d   :  { %31067 = vst [vmem:[#allocation33_spill] sm:$0xff] %v29484_v31  ;;  %v29486_v61 = vpop.f32.mrb[203].mxu0  ;;  %v26370_v31 = vld [vmem:[#allocation2 + $0x1a8] sm:$0xff]  }
 0x97e   :  { %31068 = vst [vmem:[#allocation34_spill] sm:$0xff] %v29486_v61  ;;  %24121 = vmatmul.mubr.bf16.gmra.mrb[20].mxu1 %v26366_v48 }
 0x97f   :  { %24124 = vmatprep.mubr.bf16.mxu1 %v26367_v44 }
 0x982   :  { %v29488_v6 = vpop.f32.mrb[204].mxu0 }
 0x983   :  { %31069 = vst [vmem:[#allocation122_spill] sm:$0xff] %v29488_v6  ;;  %v29490_v41 = vpop.f32.mrb[205].mxu0  ;;  %v26379_v6 = vld [vmem:[#allocation9 + $0x148] sm:$0xff]  }
 0x984   :  { %31070 = vst [vmem:[#allocation79_spill] sm:$0xff] %v29490_v41  ;;  %v29492_v0 = vpop.f32.mrb[206].mxu0 }
 0x985   :  { %31071 = vst [vmem:[#allocation77_spill] sm:$0xff] %v29492_v0  ;;  %v16344_v57 = vpop.f32.mrb[207].mxu0  ;;  %v26373_v0 = vld [vmem:[#allocation2 + $0x8] sm:$0xff]  }
 0x986   :  { %24125 = vmatmul.mubr.bf16.gmra.mrb[24].mxu1 %v26368_v40  ;;  %v26375_v40 = vld [vmem:[#allocation2 + $0x18] sm:$0xff]  }
 0x987   :  { %24128 = vmatprep.mubr.bf16.mxu1 %v26369_v34  ;;  %v26374_v34 = vld [vmem:[#allocation2 + $0x10] sm:$0xff]  }
 0x98a   :  { %v29494_v59 = vpop.f32.mrb[208].mxu0 }
 0x98b   :  { %31072 = vst [vmem:[#allocation78_spill] sm:$0xff] %v29494_v59  ;;  %v16357_v47 = vpop.f32.mrb[209].mxu0 }
 0x98c   :  { %v24455_v61 = vpop.f32.mrb[210].mxu0  ;;  %v26386_v47 = vld [vmem:[#allocation9 + $0x150] sm:$0xff]  }
 0x98d   :  { %v29496_v36 = vpop.f32.mrb[211].mxu0 }
 0x98e   :  { %31073 = vst [vmem:[#allocation30_spill] sm:$0xff] %v29496_v36  ;;  %24129 = vmatmul.mubr.bf16.gmra.mrb[28].mxu1 %v26370_v31  ;;  %v26383_v36 = vld [vmem:[#allocation2 + $0x50] sm:$0xff]  }
 0x98f   :  { %24260 = vmatprep.mubr.bf16.mxu1 %v26371_v50 }
 0x992   :  { %v24458_v48 = vpop.f32.mrb[212].mxu0 }
 0x993   :  { %v29498_v44 = vpop.f32.mrb[213].mxu0  ;;  %v26393_v48 = vld [vmem:[#allocation9 + $0x158] sm:$0xff]  }
 0x994   :  { %31074 = vst [vmem:[#allocation111_spill] sm:$0xff] %v29498_v44  ;;  %v29500_v41 = vpop.f32.mrb[214].mxu0  ;;  %v26376_v44 = vld [vmem:[#allocation2 + $0x20] sm:$0xff]  }
 0x995   :  { %31075 = vst [vmem:[#allocation115_spill] sm:$0xff] %v29500_v41  ;;  %v29502_v57 = vpop.f32.mrb[215].mxu0 }
 0x996   :  { %31076 = vst [vmem:[#allocation113_spill] sm:$0xff] %v29502_v57  ;;  %24261 = vmatmul.mubr.bf16.vlgmr.msra.gmra.mrb[32].mxu1 %v26373_v0  ;;  %v26377_v0 = vld [vmem:[#allocation2 + $0x28] sm:$0xff]  }
 0x997   :  { %24469 = vmatpush3.bf16.msra.mxu1 %v29415_v49  ;;  %24264 = vmatprep.mubr.bf16.mxu1 %v26374_v34  ;;  %v26400_v49 = vld [vmem:[#allocation9 + $0x160] sm:$0xff]   ;;  %v26407_v34 = vld [vmem:[#allocation9 + $0x168] sm:$0xff]   ;;  %v26382_v57 = vld [vmem:[#allocation2 + $0x48] sm:$0xff]  }
 0x998   :  { %24470 = vmatprep.subr.bf16.mxu1 %v26379_v6 }
 0x99a   :  { %v29505_v61 = vpop.f32.mrb[216].mxu0 }
 0x99b   :  { %31077 = vst [vmem:[#allocation123_spill] sm:$0xff] %v29505_v61  ;;  %v29507_v31 = vpop.f32.mrb[217].mxu0  ;;  %24471 = vmatpush3.bf16.msra.mxu1 %v26379_v6  ;;  %v26378_v61 = vld [vmem:[#allocation2 + $0x30] sm:$0xff]   ;;  %v26414_v6 = vld [vmem:[#allocation9 + $0x170] sm:$0xff]  }
 0x99c   :  { %31078 = vst [vmem:[#allocation83_spill] sm:$0xff] %v29507_v31  ;;  %v29509_v50 = vpop.f32.mrb[218].mxu0  ;;  %24472 = vmatprep.subr.bf16.mxu1 %v26386_v47 }
 0x99d   :  { %31079 = vst [vmem:[#allocation82_spill] sm:$0xff] %v29509_v50  ;;  %v16392_v41 = vpop.f32.mrb[219].mxu0 }
 0x99e   :  { %24265 = vmatmul.mubr.bf16.gmra.mrb[36].mxu1 %v26375_v40  ;;  %v26381_v40 = vld [vmem:[#allocation2 + $0x40] sm:$0xff]  }
 0x99f   :  { %24268 = vmatprep.mubr.bf16.mxu1 %v26376_v44  ;;  %24473 = vmatpush3.bf16.msra.mxu1 %v26386_v47  ;;  %v26380_v47 = vld [vmem:[#allocation2 + $0x38] sm:$0xff]  }
 0x9a0   :  { %24474 = vmatprep.subr.bf16.mxu1 %v26393_v48 }
 0x9a3   :  { %24475 = vmatpush3.bf16.msra.mxu1 %v26393_v48 }
 0x9a4   :  { %24476 = vmatprep.subr.bf16.mxu1 %v26400_v49 }
 0x9a6   :  { %24269 = vmatmul.mubr.bf16.gmra.mrb[40].mxu1 %v26377_v0 }
 0x9a7   :  { %24272 = vmatprep.mubr.bf16.mxu1 %v26378_v61  ;;  %24477 = vmatpush3.bf16.msra.mxu1 %v26400_v49 }
 0x9a8   :  { %24478 = vmatprep.subr.bf16.mxu1 %v26407_v34 }
 0x9a9   :  { %v29511_v50 = vpop.f32.mrb[192].mxu1 }
 0x9aa   :  { %v29513_v31 = vpop.f32.mrb[193].mxu1 }
 0x9ab   :  { %v29515_v41 = vpop.f32.mrb[194].mxu1  ;;  %24479 = vmatpush3.bf16.msra.mxu1 %v26407_v34 }
 0x9ac   :  { %v29517_v44 = vpop.f32.mrb[195].mxu1  ;;  %24480 = vmatprep.subr.bf16.mxu1 %v26414_v6  ;;  %v13537_v3 = vrot.slane %v29515_v41, 7 }
 0x9ae   :  { %24273 = vmatmul.mubr.bf16.gmra.mrb[44].mxu1 %v26380_v47 }
 0x9af   :  { %24276 = vmatprep.mubr.bf16.mxu1 %v26381_v40  ;;  %24481 = vmatpush3.bf16.msra.mxu1 %v26414_v6  ;;  %v26384_v6 = vld [vmem:[#allocation2 + $0x58] sm:$0xff]   ;;  %v26385_v40 = vld [vmem:[#allocation2 + $0x60] sm:$0xff]  }
 0x9b0   :  { %24482 = vmatprep.subr.bf16.mxu1 %v26421_v25 }
 0x9b1   :  { %v29519_v48 = vpop.f32.mrb[196].mxu1 }
 0x9b2   :  { %v29521_v61 = vpop.f32.mrb[197].mxu1 }
 0x9b3   :  { %v29523_v49 = vpop.f32.mrb[198].mxu1  ;;  %24483 = vmatpush3.bf16.msra.mxu1 %v26421_v25  ;;  %v26427_v25 = vld [vmem:[#allocation2 + $0x1a0] sm:$0xff]  }
 0x9b4   :  { %v29525_v0 = vpop.f32.mrb[199].mxu1  ;;  %24464 = vmatprep.mubr.bf16.mxu0 %v26427_v25  ;;  %24580 = vmatprep.subr.bf16.mxu1 %v29559_v5 }
 0x9b5   :  { %24465 = vmatmul.mubr.bf16.gmra.mrb[220].mxu0 %v26429_v54  ;;  %v26394_v54 = vld [vmem:[#allocation2 + $0x98] sm:$0xff]   ;;  %v13539_v30 = vrot.slane %v29525_v0, 7 }
 0x9b6   :  { %24277 = vmatmul.mubr.bf16.gmra.mrb[48].mxu1 %v26382_v57 }
 0x9b7   :  { %24280 = vmatprep.mubr.bf16.mxu1 %v26383_v36 }
 0x9b9   :  { %v29527_v34 = vpop.f32.mrb[200].mxu1 }
 0x9ba   :  { %v29529_v59 = vpop.f32.mrb[201].mxu1 }
 0x9bb   :  { %v29531_v15 = vpop.f32.mrb[202].mxu1 }
 0x9bc   :  { %v29533_v47 = vpop.f32.mrb[203].mxu1 }
 0x9bd   :  { %v13543_v0 = vrot.slane %v29533_v47, 7 }
 0x9be   :  { %24281 = vmatmul.mubr.bf16.gmra.mrb[52].mxu1 %v26384_v6 }
 0x9bf   :  { %24284 = vmatprep.mubr.bf16.mxu1 %v26385_v40 }
 0x9c1   :  { %v29535_v26 = vpop.f32.mrb[204].mxu1 }
 0x9c2   :  { %v29537_v16 = vpop.f32.mrb[205].mxu1 }
 0x9c3   :  { %v29539_v36 = vpop.f32.mrb[206].mxu1 }
 0x9c4   :  { %v29541_v57 = vpop.f32.mrb[207].mxu1 }
 0x9c6   :  { %24285 = vmatmul.mubr.bf16.gmra.mrb[56].mxu1 %v26387_v24 }
 0x9c7   :  { %24288 = vmatprep.mubr.bf16.mxu1 %v26388_v23 }
 0x9c9   :  { %v29543_v20 = vpop.f32.mrb[208].mxu1 }
 0x9ca   :  { %v29545_v17 = vpop.f32.mrb[209].mxu1 }
 0x9cb   :  { %v29547_v6 = vpop.f32.mrb[210].mxu1 }
 0x9cc   :  { %v29549_v40 = vpop.f32.mrb[211].mxu1 }
 0x9ce   :  { %24289 = vmatmul.mubr.bf16.gmra.mrb[60].mxu1 %v26389_v18 }
 0x9cf   :  { %24292 = vmatprep.mubr.bf16.mxu1 %v26390_v56 }
 0x9d1   :  { %v29551_v12 = vpop.f32.mrb[212].mxu1 }
 0x9d2   :  { %v29553_v8 = vpop.f32.mrb[213].mxu1 }
 0x9d3   :  { %v29555_v24 = vpop.f32.mrb[214].mxu1 }
 0x9d4   :  { %v29557_v23 = vpop.f32.mrb[215].mxu1 }
 0x9d6   :  { %24293 = vmatmul.mubr.bf16.gmra.mrb[64].mxu1 %v26391_v14 }
 0x9d7   :  { %24296 = vmatprep.mubr.bf16.mxu1 %v26392_v32 }
 0x9d9   :  { %v29561_v18 = vpop.f32.mrb[216].mxu1 }
 0x9da   :  { %v29564_v56 = vpop.f32.mrb[217].mxu1 }
 0x9db   :  { %v29566_v25 = vpop.f32.mrb[218].mxu1 }
 0x9dc   :  { %v29568_v10 = vpop.f32.mrb[219].mxu1 }
 0x9de   :  { %24297 = vmatmul.mubr.bf16.gmra.mrb[68].mxu1 %v26394_v54  ;;  %v13535_v54 = vrot.slane %v29517_v44, 7 }
 0x9df   :  { %24300 = vmatprep.mubr.bf16.mxu1 %v26395_v55  ;;  %v13536_v55 = vrot.slane %v29511_v50, 7 }
 0x9e1   :  { %v29570_v9 = vpop.f32.mrb[220].mxu1  ;;  %v29594_v44 = vsel %vm3695_vm0, %v13536_v55, %v13537_v3 }
 0x9e2   :  { %v29572_v14 = vpop.f32.mrb[221].mxu1 }
 0x9e3   :  { %v29574_v32 = vpop.f32.mrb[222].mxu1 }
 0x9e4   :  { %v29576_v11 = vpop.f32.mrb[223].mxu1 }
 0x9e6   :  { %24301 = vmatmul.mubr.bf16.gmra.mrb[72].mxu1 %v26396_v27  ;;  %v30540_v27 = vrot.slane %v29513_v31, 7 }
 0x9e7   :  { %24304 = vmatprep.mubr.bf16.mxu1 %v26397_v62  ;;  %v13540_v62 = vrot.slane %v29519_v48, 7 }
 0x9e9   :  { %v24070_v35 = vpop.f32.mrb[224].mxu1 }
 0x9ea   :  { %v13183_v28 = vpop.f32.mrb[225].mxu1  ;;  %v13568_v52 = vrot.slane %v24070_v35, 7 }
 0x9eb   :  { %v24071_v39 = vpop.f32.mrb[226].mxu1  ;;  %v13566_v22 = vrot.slane %v13183_v28, 7  ;;  %v29600_v28 = vsel %vm3695_vm0, %v30540_v27, %v13535_v54  ;;  %v26401_v54 = vld [vmem:[#allocation2 + $0xe0] sm:$0xff]  }
 0x9ec   :  { %v13186_v13 = vpop.f32.mrb[227].mxu1 }
 0x9ed   :  { %v13567_v46 = vrot.slane %v13186_v13, 7  ;;  %v13538_v13 = vrot.slane %v29521_v61, 7  ;;  %v13544_v61 = vrot.slane %v29527_v34, 7 }
 0x9ee   :  { %24305 = vmatmul.mubr.bf16.gmra.mrb[76].mxu1 %v26398_v2 }
 0x9ef   :  { %v29586_v41 = vsel %vm3695_vm0, %v13567_v46, %v13568_v52  ;;  %v29590_v50 = vsel %vm3695_vm0, %v13566_v22, %v13567_v46  ;;  %24308 = vmatprep.mubr.bf16.mxu1 %v26399_v51  ;;  %v29604_v52 = vsel %vm3695_vm0, %v13539_v30, %v13540_v62  ;;  %v13541_v22 = vrot.slane %v29523_v49, 7 }
 0x9f0   :  { %31081 = vst [vmem:[#allocation84_spill] sm:$0xff] %v29586_v41  ;;  %31082 = vst [vmem:[#allocation35_spill] sm:$0xff] %v29590_v50  ;;  %v13569_v51 = vrot.slane %v24071_v39, 7  ;;  %v29620_v39 = vsel %vm3695_vm0, %v13537_v3, %v13538_v13  ;;  %v29632_v34 = vsel %vm3695_vm0, %v13543_v0, %v13544_v61  ;;  %v13542_v3 = vrot.slane %v29529_v59, 7 }
 0x9f1   :  { %v24074_v2 = vpop.f32.mrb[228].mxu1 }
 0x9f2   :  { %v13199_v46 = vpop.f32.mrb[229].mxu1  ;;  %v13572_v55 = vrot.slane %v24074_v2, 7  ;;  %v29646_v59 = vsel %vm3695_vm0, %v13542_v3, %v13543_v0  ;;  %v13547_v0 = vrot.slane %v29541_v57, 7 }
 0x9f3   :  { %v13570_v35 = vrot.slane %v13199_v46, 7  ;;  %v24075_v48 = vpop.f32.mrb[230].mxu1 }
 0x9f4   :  { %v13573_v50 = vrot.slane %v24075_v48, 7  ;;  %v13202_v41 = vpop.f32.mrb[231].mxu1 }
 0x9f5   :  { %v29611_v27 = vsel %vm3695_vm0, %v13569_v51, %v13570_v35  ;;  %v13571_v30 = vrot.slane %v13202_v41, 7  ;;  %v29628_v41 = vsel %vm3695_vm0, %v13540_v62, %v13541_v22 }
 0x9f6   :  { %v29616_v49 = vsel %vm3695_vm0, %v13572_v55, %v13573_v50  ;;  %24309 = vmatmul.mubr.bf16.gmra.mrb[80].mxu1 %v26401_v54 }
 0x9f7   :  { %v29624_v47 = vsel %vm3695_vm0, %v13570_v35, %v13571_v30  ;;  %24312 = vmatprep.mubr.bf16.mxu1 %v26402_v4  ;;  %v26403_v35 = vld [vmem:[#allocation2 + $0xf0] sm:$0xff]   ;;  %v13546_v4 = vrot.slane %v29537_v16, 7  ;;  %v26404_v30 = vld [vmem:[#allocation2 + $0xf8] sm:$0xff]  }
 0x9f9   :  { %v24078_v2 = vpop.f32.mrb[232].mxu1  ;;  %v29676_v57 = vsel %vm3695_vm0, %v13546_v4, %v13547_v0 }
 0x9fa   :  { %v13215_v46 = vpop.f32.mrb[233].mxu1  ;;  %v13576_v13 = vrot.slane %v24078_v2, 7  ;;  %v13545_v2 = vrot.slane %v29531_v15, 7  ;;  %v26405_v15 = vld [vmem:[#allocation2 + $0x100] sm:$0xff]  }
 0x9fb   :  { %v13574_v51 = vrot.slane %v13215_v46, 7  ;;  %v24079_v48 = vpop.f32.mrb[234].mxu1 }
 0x9fc   :  { %v13577_v55 = vrot.slane %v24079_v48, 7  ;;  %v13218_v54 = vpop.f32.mrb[235].mxu1  ;;  %v29655_v46 = vsel %vm3695_vm0, %v13545_v2, %v13546_v4  ;;  %v13549_v48 = vrot.slane %v29539_v36, 7  ;;  %v13552_v2 = vrot.slane %v29543_v20, 7  ;;  %v26408_v4 = vld [vmem:[#allocation2 + $0x110] sm:$0xff]  }
 0x9fd   :  { %v29638_v62 = vsel %vm3695_vm0, %v13573_v50, %v13574_v51  ;;  %v13575_v22 = vrot.slane %v13218_v54, 7  ;;  %v13548_v54 = vrot.slane %v29535_v26, 7 }
 0x9fe   :  { %31083 = vst [vmem:[#allocation36_spill] sm:$0xff] %v29638_v62  ;;  %v29642_v61 = vsel %vm3695_vm0, %v13576_v13, %v13577_v55  ;;  %24313 = vmatmul.mubr.bf16.gmra.mrb[84].mxu1 %v26403_v35  ;;  %v13551_v35 = vrot.slane %v29549_v40, 7 }
 0x9ff   :  { %31084 = vst [vmem:[#allocation126_spill] sm:$0xff] %v29642_v61  ;;  %v29651_v16 = vsel %vm3695_vm0, %v13575_v22, %v13576_v13  ;;  %24316 = vmatprep.mubr.bf16.mxu1 %v26404_v30  ;;  %v26406_v61 = vld [vmem:[#allocation2 + $0x108] sm:$0xff]   ;;  %v29672_v36 = vsel %vm3695_vm0, %v13548_v54, %v13549_v48  ;;  %v13555_v54 = vrot.slane %v29557_v23, 7 }
 0xa00   :  { %v29680_v20 = vsel %vm3695_vm0, %v13551_v35, %v13552_v2 }
 0xa01   :  { %v24082_v50 = vpop.f32.mrb[236].mxu1 }
 0xa02   :  { %v13231_v51 = vpop.f32.mrb[237].mxu1  ;;  %v13580_v13 = vrot.slane %v24082_v50, 7  ;;  %v13550_v50 = vrot.slane %v29545_v17, 7  ;;  %v13556_v17 = vrot.slane %v29551_v12, 7 }
 0xa03   :  { %v24083_v55 = vpop.f32.mrb[238].mxu1  ;;  %v13578_v22 = vrot.slane %v13231_v51, 7 }
 0xa04   :  { %v13234_v3 = vpop.f32.mrb[239].mxu1  ;;  %v29696_v23 = vsel %vm3695_vm0, %v13549_v48, %v13550_v50  ;;  %v29708_v12 = vsel %vm3695_vm0, %v13555_v54, %v13556_v17  ;;  %v13554_v48 = vrot.slane %v29553_v8, 7 }
 0xa05   :  { %v13579_v30 = vrot.slane %v13234_v3, 7  ;;  %v13553_v3 = vrot.slane %v29547_v6, 7 }
 0xa06   :  { %24317 = vmatmul.mubr.bf16.gmra.mrb[88].mxu1 %v26405_v15  ;;  %v13581_v15 = vrot.slane %v24083_v55, 7  ;;  %v29722_v8 = vsel %vm3695_vm0, %v13554_v48, %v13555_v54  ;;  %v13559_v54 = vrot.slane %v29568_v10, 7 }
 0xa07   :  { %v29664_v62 = vsel %vm3695_vm0, %v13579_v30, %v13580_v13  ;;  %v29668_v26 = vsel %vm3695_vm0, %v13578_v22, %v13579_v30  ;;  %24320 = vmatprep.mubr.bf16.mxu1 %v26406_v61 }
 0xa08   :  { %31085 = vst [vmem:[#allocation37_spill] sm:$0xff] %v29664_v62  ;;  %31086 = vst [vmem:[#allocation128_spill] sm:$0xff] %v29668_v26  ;;  %v26409_v62 = vld [vmem:[#allocation2 + $0x118] sm:$0xff]  }
 0xa09   :  { %v24086_v40 = vpop.f32.mrb[240].mxu1 }
 0xa0a   :  { %v13247_v51 = vpop.f32.mrb[241].mxu1  ;;  %v13584_v22 = vrot.slane %v24086_v40, 7 }
 0xa0b   :  { %v13582_v61 = vrot.slane %v13247_v51, 7  ;;  %v24087_v13 = vpop.f32.mrb[242].mxu1 }
 0xa0c   :  { %v13585_v30 = vrot.slane %v24087_v13, 7  ;;  %v13250_v26 = vpop.f32.mrb[243].mxu1 }
 0xa0d   :  { %v29687_v0 = vsel %vm3695_vm0, %v13581_v15, %v13582_v61  ;;  %v13583_v35 = vrot.slane %v13250_v26, 7  ;;  %v29704_v26 = vsel %vm3695_vm0, %v13552_v2, %v13553_v3 }
 0xa0e   :  { %v29692_v6 = vsel %vm3695_vm0, %v13584_v22, %v13585_v30  ;;  %24321 = vmatmul.mubr.bf16.gmra.mrb[92].mxu1 %v26408_v4 }
 0xa0f   :  { %v29700_v55 = vsel %vm3695_vm0, %v13582_v61, %v13583_v35  ;;  %24324 = vmatprep.mubr.bf16.mxu1 %v26409_v62  ;;  %v26410_v61 = vld [vmem:[#allocation2 + $0x120] sm:$0xff]   ;;  %v13558_v62 = vrot.slane %v29564_v56, 7  ;;  %v26411_v35 = vld [vmem:[#allocation2 + $0x128] sm:$0xff]  }
 0xa11   :  { %v24090_v40 = vpop.f32.mrb[244].mxu1 }
 0xa12   :  { %v13263_v51 = vpop.f32.mrb[245].mxu1  ;;  %v13588_v50 = vrot.slane %v24090_v40, 7  ;;  %v13557_v40 = vrot.slane %v29555_v24, 7  ;;  %v26412_v24 = vld [vmem:[#allocation2 + $0x130] sm:$0xff]  }
 0xa13   :  { %v13586_v15 = vrot.slane %v13263_v51, 7  ;;  %v24091_v13 = vpop.f32.mrb[246].mxu1 }
 0xa14   :  { %v13589_v22 = vrot.slane %v24091_v13, 7  ;;  %v13266_v4 = vpop.f32.mrb[247].mxu1  ;;  %v29731_v51 = vsel %vm3695_vm0, %v13557_v40, %v13558_v62  ;;  %v13561_v13 = vrot.slane %v29566_v25, 7  ;;  %v13564_v40 = vrot.slane %v29570_v9, 7 }
 0xa15   :  { %v29714_v2 = vsel %vm3695_vm0, %v13585_v30, %v13586_v15  ;;  %v13587_v3 = vrot.slane %v13266_v4, 7  ;;  %v13560_v4 = vrot.slane %v29561_v18, 7 }
 0xa16   :  { %31087 = vst [vmem:[#allocation130_spill] sm:$0xff] %v29714_v2  ;;  %v29718_v17 = vsel %vm3695_vm0, %v13588_v50, %v13589_v22  ;;  %24325 = vmatmul.mubr.bf16.gmra.mrb[96].mxu1 %v26410_v61  ;;  %v13563_v61 = vrot.slane %v29576_v11, 7  ;;  %v29752_v11 = vsel %vm3695_vm0, %v13558_v62, %v13559_v54 }
 0xa17   :  { %31088 = vst [vmem:[#allocation88_spill] sm:$0xff] %v29718_v17  ;;  %v29727_v56 = vsel %vm3695_vm0, %v13587_v3, %v13588_v50  ;;  %24328 = vmatprep.mubr.bf16.mxu1 %v26411_v35  ;;  %v26413_v17 = vld [vmem:[#allocation2 + $0x138] sm:$0xff]   ;;  %v29748_v10 = vsel %vm3695_vm0, %v13560_v4, %v13561_v13 }
 0xa18   :  { %v29756_v9 = vsel %vm3695_vm0, %v13563_v61, %v13564_v40 }
 0xa19   :  { %v24094_v30 = vpop.f32.mrb[248].mxu1 }
 0xa1a   :  { %v13279_v15 = vpop.f32.mrb[249].mxu1  ;;  %v13592_v50 = vrot.slane %v24094_v30, 7  ;;  %v13562_v30 = vrot.slane %v29572_v14, 7 }
 0xa1b   :  { %v24095_v22 = vpop.f32.mrb[250].mxu1  ;;  %v13590_v3 = vrot.slane %v13279_v15, 7 }
 0xa1c   :  { %v13282_v48 = vpop.f32.mrb[251].mxu1  ;;  %v29770_v14 = vsel %vm3695_vm0, %v13561_v13, %v13562_v30 }
 0xa1d   :  { %v13591_v35 = vrot.slane %v13282_v48, 7  ;;  %v13565_v48 = vrot.slane %v29574_v32, 7 }
 0xa1e   :  { %24329 = vmatmul.mubr.bf16.gmra.mrb[100].mxu1 %v26412_v24  ;;  %v13593_v24 = vrot.slane %v24095_v22, 7 }
 0xa1f   :  { %v29740_v2 = vsel %vm3695_vm0, %v13591_v35, %v13592_v50  ;;  %v29744_v18 = vsel %vm3695_vm0, %v13590_v3, %v13591_v35  ;;  %24332 = vmatprep.mubr.bf16.mxu1 %v26413_v17  ;;  %v29778_v22 = vsel %vm3695_vm0, %v13564_v40, %v13565_v48 }
 0xa20   :  { %31089 = vst [vmem:[#allocation86_spill] sm:$0xff] %v29740_v2  ;;  %31090 = vst [vmem:[#allocation87_spill] sm:$0xff] %v29744_v18  ;;  %v26415_v18 = vld [vmem:[#allocation2 + $0x140] sm:$0xff]   ;;  %v26416_v2 = vld [vmem:[#allocation2 + $0x148] sm:$0xff]  }
 0xa21   :  { %v24098_v25 = vpop.f32.mrb[252].mxu1 }
 0xa22   :  { %v13295_v15 = vpop.f32.mrb[253].mxu1  ;;  %v13596_v3 = vrot.slane %v24098_v25, 7 }
 0xa23   :  { %v13594_v17 = vrot.slane %v13295_v15, 7  ;;  %v24099_v50 = vpop.f32.mrb[254].mxu1 }
 0xa24   :  { %v13597_v4 = vrot.slane %v24099_v50, 7  ;;  %v13298_v35 = vpop.f32.mrb[255].mxu1 }
 0xa25   :  { %v29762_v62 = vsel %vm3695_vm0, %v13593_v24, %v13594_v17  ;;  %v13595_v54 = vrot.slane %v13298_v35, 7 }
 0xa26   :  { %31091 = vst [vmem:[#allocation18_spill] sm:$0xff] %v29762_v62  ;;  %v29766_v61 = vsel %vm3695_vm0, %v13596_v3, %v13597_v4  ;;  %24333 = vmatmul.mubr.bf16.gmra.mrb[104].mxu1 %v26415_v18  ;;  %v26437_v62 = vld [vmem:[#allocation9 + $0x88] sm:$0xff]  }
 0xa27   :  { %31092 = vst [vmem:[#allocation137_spill] sm:$0xff] %v29766_v61  ;;  %v29774_v32 = vsel %vm3695_vm0, %v13594_v17, %v13595_v54  ;;  %24336 = vmatprep.mubr.bf16.mxu1 %v26416_v2  ;;  %v26417_v61 = vld [vmem:[#allocation2 + $0x150] sm:$0xff]   ;;  %v26418_v17 = vld [vmem:[#allocation2 + $0x158] sm:$0xff]  }
 0xa28   :  { %31093 = vst [vmem:[#allocation138_spill] sm:$0xff] %v29774_v32 }
 0xa29   :  { %v24102_v25 = vpop.f32.mrb[0].mxu1 }
 0xa2a   :  { %v13311_v15 = vpop.f32.mrb[1].mxu1  ;;  %v13600_v3 = vrot.slane %v24102_v25, 7 }
 0xa2b   :  { %v13598_v24 = vrot.slane %v13311_v15, 7  ;;  %v24103_v50 = vpop.f32.mrb[2].mxu1 }
 0xa2c   :  { %v13601_v35 = vrot.slane %v24103_v50, 7  ;;  %v13314_v18 = vpop.f32.mrb[3].mxu1  ;;  %v26419_v50 = vld [vmem:[#allocation2 + $0x160] sm:$0xff]  }
 0xa2d   :  { %v29782_v13 = vsel %vm3695_vm0, %v13597_v4, %v13598_v24  ;;  %v13599_v30 = vrot.slane %v13314_v18, 7  ;;  %v26420_v18 = vld [vmem:[#allocation2 + $0x168] sm:$0xff]  }
 0xa2e   :  { %31094 = vst [vmem:[#allocation139_spill] sm:$0xff] %v29782_v13  ;;  %v29786_v2 = vsel %vm3695_vm0, %v13600_v3, %v13601_v35  ;;  %24337 = vmatmul.mubr.bf16.gmra.mrb[108].mxu1 %v26417_v61 }
 0xa2f   :  { %31095 = vst [vmem:[#allocation140_spill] sm:$0xff] %v29786_v2  ;;  %v29790_v40 = vsel %vm3695_vm0, %v13599_v30, %v13600_v3  ;;  %24340 = vmatprep.mubr.bf16.mxu1 %v26418_v17 }
 0xa30   :  { %31096 = vst [vmem:[#allocation141_spill] sm:$0xff] %v29790_v40 }
 0xa31   :  { %v24106_v48 = vpop.f32.mrb[4].mxu1 }
 0xa32   :  { %v13327_v54 = vpop.f32.mrb[5].mxu1  ;;  %v13604_v32 = vrot.slane %v24106_v48, 7 }
 0xa33   :  { %v24107_v25 = vpop.f32.mrb[6].mxu1  ;;  %v13602_v4 = vrot.slane %v13327_v54, 7 }
 0xa34   :  { %v13330_v15 = vpop.f32.mrb[7].mxu1  ;;  %v13605_v17 = vrot.slane %v24107_v25, 7 }
 0xa35   :  { %v13603_v24 = vrot.slane %v13330_v15, 7  ;;  %v26422_v15 = vld [vmem:[#allocation2 + $0x170] sm:$0xff]  }
 0xa36   :  { %24341 = vmatmul.mubr.bf16.gmra.mrb[112].mxu1 %v26419_v50 }
 0xa37   :  { %v29794_v35 = vsel %vm3695_vm0, %v13603_v24, %v13604_v32  ;;  %v29798_v61 = vsel %vm3695_vm0, %v13602_v4, %v13603_v24  ;;  %24344 = vmatprep.mubr.bf16.mxu1 %v26420_v18 }
 0xa38   :  { %31097 = vst [vmem:[#allocation142_spill] sm:$0xff] %v29794_v35  ;;  %31098 = vst [vmem:[#allocation143_spill] sm:$0xff] %v29798_v61  ;;  %v26423_v35 = vld [vmem:[#allocation2 + $0x178] sm:$0xff]  }
 0xa39   :  { %v24110_v3 = vpop.f32.mrb[8].mxu1 }
 0xa3a   :  { %v13343_v30 = vpop.f32.mrb[9].mxu1  ;;  %v13608_v40 = vrot.slane %v24110_v3, 7 }
 0xa3b   :  { %v13606_v2 = vrot.slane %v13343_v30, 7  ;;  %v24111_v13 = vpop.f32.mrb[10].mxu1 }
 0xa3c   :  { %v13609_v48 = vrot.slane %v24111_v13, 7  ;;  %v13346_v54 = vpop.f32.mrb[11].mxu1 }
 0xa3d   :  { %v29802_v50 = vsel %vm3695_vm0, %v13605_v17, %v13606_v2  ;;  %v13607_v32 = vrot.slane %v13346_v54, 7 }
 0xa3e   :  { %31099 = vst [vmem:[#allocation144_spill] sm:$0xff] %v29802_v50  ;;  %v29806_v4 = vsel %vm3695_vm0, %v13608_v40, %v13609_v48  ;;  %24345 = vmatmul.mubr.bf16.gmra.mrb[116].mxu1 %v26422_v15  ;;  %v26424_v50 = vld [vmem:[#allocation2 + $0x180] sm:$0xff]  }
 0xa3f   :  { %31100 = vst [vmem:[#allocation145_spill] sm:$0xff] %v29806_v4  ;;  %v29810_v25 = vsel %vm3695_vm0, %v13606_v2, %v13607_v32  ;;  %24348 = vmatprep.mubr.bf16.mxu1 %v26423_v35  ;;  %v26425_v4 = vld [vmem:[#allocation2 + $0x188] sm:$0xff]  }
 0xa40   :  { %31101 = vst [vmem:[#allocation146_spill] sm:$0xff] %v29810_v25 }
 0xa41   :  { %v24114_v24 = vpop.f32.mrb[12].mxu1 }
 0xa42   :  { %v13359_v13 = vpop.f32.mrb[13].mxu1  ;;  %v13612_v30 = vrot.slane %v24114_v24, 7 }
 0xa43   :  { %v13610_v18 = vrot.slane %v13359_v13, 7  ;;  %v24115_v3 = vpop.f32.mrb[14].mxu1 }
 0xa44   :  { %v13613_v61 = vrot.slane %v24115_v3, 7  ;;  %v13362_v17 = vpop.f32.mrb[15].mxu1  ;;  %v26426_v3 = vld [vmem:[#allocation2 + $0x190] sm:$0xff]  }
 0xa45   :  { %v29814_v54 = vsel %vm3695_vm0, %v13609_v48, %v13610_v18  ;;  %v13611_v40 = vrot.slane %v13362_v17, 7  ;;  %v26428_v17 = vld [vmem:[#allocation2 + $0xc] sm:$0xff]  }
 0xa46   :  { %31102 = vst [vmem:[#allocation147_spill] sm:$0xff] %v29814_v54  ;;  %v29818_v15 = vsel %vm3695_vm0, %v13612_v30, %v13613_v61  ;;  %24349 = vmatmul.mubr.bf16.gmra.mrb[120].mxu1 %v26424_v50 }
 0xa47   :  { %31103 = vst [vmem:[#allocation148_spill] sm:$0xff] %v29818_v15  ;;  %v29822_v2 = vsel %vm3695_vm0, %v13611_v40, %v13612_v30  ;;  %24352 = vmatprep.mubr.bf16.mxu1 %v26425_v4 }
 0xa48   :  { %31104 = vst [vmem:[#allocation149_spill] sm:$0xff] %v29822_v2 }
 0xa49   :  { %v24118_v35 = vpop.f32.mrb[16].mxu1 }
 0xa4a   :  { %v13375_v32 = vpop.f32.mrb[17].mxu1  ;;  %v13616_v25 = vrot.slane %v24118_v35, 7 }
 0xa4b   :  { %v24119_v24 = vpop.f32.mrb[18].mxu1  ;;  %v13614_v48 = vrot.slane %v13375_v32, 7 }
 0xa4c   :  { %v13378_v13 = vpop.f32.mrb[19].mxu1  ;;  %v13617_v40 = vrot.slane %v24119_v24, 7 }
 0xa4d   :  { %v13615_v18 = vrot.slane %v13378_v13, 7  ;;  %v26431_v13 = vld [vmem:[#allocation2 + $0x14] sm:$0xff]  }
 0xa4e   :  { %24353 = vmatmul.mubr.bf16.gmra.mrb[124].mxu1 %v26426_v3 }
 0xa4f   :  { %v29826_v61 = vsel %vm3695_vm0, %v13615_v18, %v13616_v25  ;;  %v29830_v50 = vsel %vm3695_vm0, %v13614_v48, %v13615_v18  ;;  %24484 = vmatprep.mubr.bf16.mxu1 %v26428_v17 }
 0xa50   :  { %31105 = vst [vmem:[#allocation150_spill] sm:$0xff] %v29826_v61  ;;  %v26432_v61 = vld [vmem:[#allocation2 + $0x1c] sm:$0xff]  }
 0xa51   :  { %v24122_v4 = vpop.f32.mrb[20].mxu1 }
 0xa52   :  { %v13391_v30 = vpop.f32.mrb[21].mxu1  ;;  %v13620_v2 = vrot.slane %v24122_v4, 7 }
 0xa53   :  { %v13618_v15 = vrot.slane %v13391_v30, 7  ;;  %v24123_v54 = vpop.f32.mrb[22].mxu1 }
 0xa54   :  { %v13621_v35 = vrot.slane %v24123_v54, 7  ;;  %v13394_v32 = vpop.f32.mrb[23].mxu1  ;;  %v26444_v54 = vld [vmem:[#allocation9 + $0x90] sm:$0xff]  }
 0xa55   :  { %v29834_v3 = vsel %vm3695_vm0, %v13617_v40, %v13618_v15  ;;  %v13619_v25 = vrot.slane %v13394_v32, 7 }
 0xa56   :  { %31106 = vst [vmem:[#allocation151_spill] sm:$0xff] %v29834_v3  ;;  %v29838_v48 = vsel %vm3695_vm0, %v13620_v2, %v13621_v35  ;;  %24485 = vmatmul.mubr.bf16.vlgmr.msra.gmra.mrb[128].mxu1 %v26431_v13  ;;  %v26433_v2 = vld [vmem:[#allocation2 + $0x24] sm:$0xff]  }
 0xa57   :  { %31107 = vst [vmem:[#allocation152_spill] sm:$0xff] %v29838_v48  ;;  %v29842_v24 = vsel %vm3695_vm0, %v13618_v15, %v13619_v25  ;;  %24581 = vmatpush3.bf16.msra.mxu1 %v29559_v5  ;;  %24488 = vmatprep.mubr.bf16.mxu1 %v26432_v61  ;;  %v26451_v13 = vld [vmem:[#allocation9 + $0x98] sm:$0xff]  }
 0xa58   :  { %31108 = vst [vmem:[#allocation153_spill] sm:$0xff] %v29842_v24  ;;  %24582 = vmatprep.subr.bf16.mxu1 %v26437_v62  ;;  %v26434_v5 = vld [vmem:[#allocation2 + $0x2c] sm:$0xff]   ;;  %v26438_v48 = vld [vmem:[#allocation2 + $0x44] sm:$0xff]  }
 0xa59   :  { %v24126_v18 = vpop.f32.mrb[24].mxu1 }
 0xa5a   :  { %v13407_v17 = vpop.f32.mrb[25].mxu1  ;;  %v13624_v40 = vrot.slane %v24126_v18, 7  ;;  %v26458_v18 = vld [vmem:[#allocation9 + $0xa0] sm:$0xff]  }
 0xa5b   :  { %v13622_v4 = vrot.slane %v13407_v17, 7  ;;  %v24127_v30 = vpop.f32.mrb[26].mxu1  ;;  %24583 = vmatpush3.bf16.msra.mxu1 %v26437_v62 }
 0xa5c   :  { %v13625_v32 = vrot.slane %v24127_v30, 7  ;;  %v13410_v3 = vpop.f32.mrb[27].mxu1  ;;  %24584 = vmatprep.subr.bf16.mxu1 %v26444_v54 }
 0xa5d   :  { %v29847_v15 = vsel %vm3695_vm0, %v13621_v35, %v13622_v4  ;;  %v13623_v25 = vrot.slane %v13410_v3, 7 }
 0xa5e   :  { %31109 = vst [vmem:[#allocation154_spill] sm:$0xff] %v29847_v15  ;;  %v29851_v61 = vsel %vm3695_vm0, %v13624_v40, %v13625_v32  ;;  %24489 = vmatmul.mubr.bf16.gmra.mrb[132].mxu1 %v26433_v2  ;;  %v26435_v32 = vld [vmem:[#allocation2 + $0x34] sm:$0xff]  }
 0xa5f   :  { %31110 = vst [vmem:[#allocation155_spill] sm:$0xff] %v29851_v61  ;;  %v29855_v62 = vsel %vm3695_vm0, %v13623_v25, %v13624_v40  ;;  %24492 = vmatprep.mubr.bf16.mxu1 %v26434_v5  ;;  %24585 = vmatpush3.bf16.msra.mxu1 %v26444_v54  ;;  %v26465_v2 = vld [vmem:[#allocation9 + $0xa8] sm:$0xff]   ;;  %v31112_v40 = vrot.slane %v29513_v31, 7  ;;  %v26472_v5 = vld [vmem:[#allocation9 + $0xb0] sm:$0xff]  }
 0xa60   :  { %31111 = vst [vmem:[#allocation156_spill] sm:$0xff] %v29855_v62  ;;  %24586 = vmatprep.subr.bf16.mxu1 %v26451_v13  ;;  %v26436_v61 = vld [vmem:[#allocation2 + $0x3c] sm:$0xff]  }
 0xa61   :  { %v29857_v17 = vpop.f32.mrb[28].mxu1 }
 0xa62   :  { %v29859_v30 = vpop.f32.mrb[29].mxu1 }
 0xa63   :  { %v24131_v35 = vpop.f32.mrb[30].mxu1  ;;  %24587 = vmatpush3.bf16.msra.mxu1 %v26451_v13 }
 0xa64   :  { %v13629_v3 = vrot.slane %v24131_v35, 7  ;;  %v29861_v4 = vpop.f32.mrb[31].mxu1  ;;  %24588 = vmatprep.subr.bf16.mxu1 %v26458_v18 }
 0xa66   :  { %v13725_v54 = vsel %vm3695_vm0, %v13629_v3, %v31112_v40  ;;  %24493 = vmatmul.mubr.bf16.gmra.mrb[136].mxu1 %v26435_v32  ;;  %v26439_v32 = vld [vmem:[#allocation2 + $0x4c] sm:$0xff]  }
 0xa67   :  { %24496 = vmatprep.mubr.bf16.mxu1 %v26436_v61  ;;  %24589 = vmatpush3.bf16.msra.mxu1 %v26458_v18 }
 0xa68   :  { %24590 = vmatprep.subr.bf16.mxu1 %v26465_v2 }
 0xa69   :  { %v24262_v25 = vpop.f32.mrb[32].mxu1 }
 0xa6a   :  { %v15171_v15 = vpop.f32.mrb[33].mxu1 }
 0xa6b   :  { %v15172_v13 = vadd.f32 %v15171_v15, %v29250_v58  ;;  %v24263_v35 = vpop.f32.mrb[34].mxu1  ;;  %24591 = vmatpush3.bf16.msra.mxu1 %v26465_v2  ;;  %v26440_v2 = vld [vmem:[#allocation2 + $0x54] sm:$0xff]  }
 0xa6c   :  { %v15183_v62 = vadd.f32 %v24263_v35, %v29252_v63  ;;  %v15174_v24 = vpop.f32.mrb[35].mxu1  ;;  %24592 = vmatprep.subr.bf16.mxu1 %v26472_v5 }
 0xa6d   :  { %v16420_v31 = vadd.f32 %v29383_v37, %v15172_v13  ;;  %v15175_v3 = vadd.f32 %v15174_v24, %v29255_v33 }
 0xa6e   :  { %v16423_v61 = vadd.f32 %v29385_v21, %v15183_v62  ;;  %24497 = vmatmul.mubr.bf16.gmra.mrb[140].mxu1 %v26438_v48 }
 0xa6f   :  { %v29872_v18 = vadd.f32 %v16420_v31, %v13725_v54  ;;  %v16421_v40 = vadd.f32 %v29387_v29, %v15175_v3  ;;  %24500 = vmatprep.mubr.bf16.mxu1 %v26439_v32  ;;  %24593 = vmatpush3.bf16.msra.mxu1 %v26472_v5  ;;  %v31113_v31 = vld [vmem:[#allocation38_spill] sm:$0xff] }
 0xa70   :  { %v29876_v58 = vadd.f32 %v16423_v61, %v29594_v44  ;;  %v26441_v44 = vld [vmem:[#allocation2 + $0x5c] sm:$0xff]  }
 0xa71   :  { %v29879_v63 = vadd.f32 %v16421_v40, %v29600_v28  ;;  %v24266_v15 = vpop.f32.mrb[36].mxu1  ;;  %v26479_v40 = vld [vmem:[#allocation9 + $0xb8] sm:$0xff]  }
 0xa72   :  { %v15196_v37 = vadd.f32 %v24266_v15, %v29257_v38  ;;  %v15187_v33 = vpop.f32.mrb[37].mxu1  ;;  %24594 = vmatprep.subr.bf16.mxu1 %v26479_v40 }
 0xa73   :  { %v15188_v24 = vadd.f32 %v15187_v33, %v29259_v45  ;;  %v24267_v21 = vpop.f32.mrb[38].mxu1  ;;  %24595 = vmatpush3.bf16.msra.mxu1 %v26479_v40 }
 0xa74   :  { %v16426_v48 = vadd.f32 %v29389_v7, %v15196_v37  ;;  %v15199_v62 = vadd.f32 %v24267_v21, %v29261_v43  ;;  %v15190_v29 = vpop.f32.mrb[39].mxu1  ;;  %v31115_v37 = vld [vmem:[#allocation39_spill] sm:$0xff] }
 0xa75   :  { %v16424_v54 = vadd.f32 %v29391_v60, %v15188_v24  ;;  %v31116_v24 = vld [vmem:[#allocation92_spill] sm:$0xff] }
 0xa76   :  { %v29887_v25 = vadd.f32 %v16426_v48, %v29604_v52  ;;  %v16427_v28 = vadd.f32 %v29393_v1, %v15199_v62  ;;  %24501 = vmatmul.mubr.bf16.gmra.mrb[144].mxu1 %v26440_v2  ;;  %v26442_v52 = vld [vmem:[#allocation2 + $0x64] sm:$0xff]   ;;  %v26443_v1 = vld [vmem:[#allocation2 + $0x6c] sm:$0xff]   ;;  %v26445_v62 = vld [vmem:[#allocation2 + $0x74] sm:$0xff]  }
 0xa77   :  { %v29891_v38 = vadd.f32 %v16424_v54, %v29620_v39  ;;  %24504 = vmatprep.mubr.bf16.mxu1 %v26441_v44  ;;  %v31114_v39 = vld [vmem:[#allocation15_spill] sm:$0xff] }
 0xa78   :  { %v29894_v45 = vadd.f32 %v16427_v28, %v29628_v41  ;;  %v31118_v2 = vld [vmem:[#allocation135_spill] sm:$0xff]  ;;  %v31119_v28 = vld [vmem:[#allocation17_spill] sm:$0xff] }
 0xa79   :  { %v24270_v7 = vpop.f32.mrb[40].mxu1  ;;  %v26446_v44 = vld [vmem:[#allocation2 + $0x7c] sm:$0xff]  }
 0xa7a   :  { %v15212_v43 = vadd.f32 %v24270_v7, %v29263_v42  ;;  %v15203_v5 = vpop.f32.mrb[41].mxu1 }
 0xa7b   :  { %v24271_v13 = vpop.f32.mrb[42].mxu1 }
 0xa7c   :  { %v16430_v60 = vadd.f32 %v29395_v19, %v15212_v43  ;;  %v15206_v35 = vpop.f32.mrb[43].mxu1  ;;  %v31120_v43 = vld [vmem:[#allocation90_spill] sm:$0xff] }
 0xa7d   :  { %v15207_v3 = vadd.f32 %v15206_v35, %v31113_v31 }
 0xa7e   :  { %v29900_v32 = vadd.f32 %v16430_v60, %v29632_v34  ;;  %24505 = vmatmul.mubr.bf16.gmra.mrb[148].mxu1 %v26442_v52  ;;  %v31117_v34 = vld [vmem:[#allocation16_spill] sm:$0xff]  ;;  %v31121_v52 = vld [vmem:[#allocation93_spill] sm:$0xff] }
 0xa7f   :  { %v16429_v61 = vadd.f32 %v31114_v39, %v15207_v3  ;;  %24508 = vmatprep.mubr.bf16.mxu1 %v26443_v1  ;;  %v31122_v1 = vld [vmem:[#allocation40_spill] sm:$0xff] }
 0xa81   :  { %v29904_v41 = vadd.f32 %v16429_v61, %v29646_v59  ;;  %v24274_v42 = vpop.f32.mrb[44].mxu1 }
 0xa82   :  { %v15219_v15 = vpop.f32.mrb[45].mxu1  ;;  %v31123_v42 = vld [vmem:[#allocation91_spill] sm:$0xff] }
 0xa83   :  { %v15220_v19 = vadd.f32 %v15219_v15, %v31115_v37  ;;  %v24275_v33 = vpop.f32.mrb[46].mxu1 }
 0xa84   :  { %v15231_v21 = vadd.f32 %v24275_v33, %v31116_v24  ;;  %v15222_v48 = vpop.f32.mrb[47].mxu1  ;;  %v31125_v33 = vld [vmem:[#allocation94_spill] sm:$0xff] }
 0xa85   :  { %v16432_v29 = vadd.f32 %v31117_v34, %v15220_v19  ;;  %v15223_v54 = vadd.f32 %v15222_v48, %v31118_v2  ;;  %v26447_v19 = vld [vmem:[#allocation2 + $0x84] sm:$0xff]   ;;  %v31127_v2 = vld [vmem:[#allocation42_spill] sm:$0xff] }
 0xa86   :  { %v16435_v59 = vadd.f32 %v31119_v28, %v15231_v21  ;;  %24509 = vmatmul.mubr.bf16.gmra.mrb[152].mxu1 %v26445_v62 }
 0xa87   :  { %v29912_v7 = vadd.f32 %v16432_v29, %v29655_v46  ;;  %v16433_v5 = vadd.f32 %v31120_v43, %v15223_v54  ;;  %24512 = vmatprep.mubr.bf16.mxu1 %v26446_v44  ;;  %v31124_v46 = vld [vmem:[#allocation41_spill] sm:$0xff] }
 0xa88   :  { %v29916_v13 = vadd.f32 %v16435_v59, %v29672_v36  ;;  %v26448_v36 = vld [vmem:[#allocation2 + $0x8c] sm:$0xff]   ;;  %v31128_v59 = vld [vmem:[#allocation59_spill] sm:$0xff] }
 0xa89   :  { %v29919_v60 = vadd.f32 %v16433_v5, %v29676_v57  ;;  %v24278_v35 = vpop.f32.mrb[48].mxu1  ;;  %v31126_v57 = vld [vmem:[#allocation57_spill] sm:$0xff] }
 0xa8a   :  { %v15244_v31 = vadd.f32 %v24278_v35, %v31121_v52  ;;  %v15235_v3 = vpop.f32.mrb[49].mxu1  ;;  %v31129_v35 = vld [vmem:[#allocation96_spill] sm:$0xff] }
 0xa8b   :  { %v15236_v39 = vadd.f32 %v15235_v3, %v31122_v1  ;;  %v24279_v61 = vpop.f32.mrb[50].mxu1 }
 0xa8c   :  { %v16438_v40 = vadd.f32 %v31123_v42, %v15244_v31  ;;  %v15247_v15 = vadd.f32 %v24279_v61, %v31124_v46  ;;  %v15238_v37 = vpop.f32.mrb[51].mxu1  ;;  %v26450_v31 = vld [vmem:[#allocation2 + $0x9c] sm:$0xff]   ;;  %v29946_v61 = vld [vmem:[#allocation9 + $0x200] sm:$0xff]  }
 0xa8d   :  { %v16436_v24 = vadd.f32 %v31125_v33, %v15236_v39  ;;  %24692 = vmatprep.subr.bf16.mxu1 %v29946_v61  ;;  %v31132_v37 = vld [vmem:[#allocation100_spill] sm:$0xff] }
 0xa8e   :  { %v29927_v21 = vadd.f32 %v16438_v40, %v29680_v20  ;;  %v16439_v48 = vadd.f32 %v31126_v57, %v15247_v15  ;;  %24513 = vmatmul.mubr.bf16.gmra.mrb[156].mxu1 %v26447_v19  ;;  %v26449_v20 = vld [vmem:[#allocation2 + $0x94] sm:$0xff]   ;;  %v26452_v33 = vld [vmem:[#allocation2 + $0xa4] sm:$0xff]  }
 0xa8f   :  { %v29931_v62 = vadd.f32 %v16436_v24, %v29696_v23  ;;  %24516 = vmatprep.mubr.bf16.mxu1 %v26448_v36  ;;  %v31130_v23 = vld [vmem:[#allocation60_spill] sm:$0xff]  ;;  %v31131_v40 = vld [vmem:[#allocation98_spill] sm:$0xff]  ;;  %v31133_v24 = vld [vmem:[#allocation19_spill] sm:$0xff] }
 0xa90   :  { %v29934_v34 = vadd.f32 %v16439_v48, %v29704_v26  ;;  %v31134_v57 = vld [vmem:[#allocation43_spill] sm:$0xff] }
 0xa91   :  { %v24282_v29 = vpop.f32.mrb[52].mxu1 }
 0xa92   :  { %v15260_v54 = vadd.f32 %v24282_v29, %v31127_v2  ;;  %v15251_v44 = vpop.f32.mrb[53].mxu1  ;;  %v26453_v29 = vld [vmem:[#allocation2 + $0xac] sm:$0xff]  }
 0xa93   :  { %v24283_v28 = vpop.f32.mrb[54].mxu1 }
 0xa94   :  { %v16442_v43 = vadd.f32 %v31128_v59, %v15260_v54  ;;  %v15254_v5 = vpop.f32.mrb[55].mxu1  ;;  %v13627_v54 = vrot.slane %v29861_v4, 7  ;;  %v31136_v28 = vld [vmem:[#allocation21_spill] sm:$0xff] }
 0xa95   :  { %v15255_v52 = vadd.f32 %v15254_v5, %v31129_v35  ;;  %v13628_v5 = vrot.slane %v29857_v17, 7 }
 0xa96   :  { %v29940_v3 = vadd.f32 %v16442_v43, %v29708_v12  ;;  %24517 = vmatmul.mubr.bf16.gmra.mrb[160].mxu1 %v26449_v20 }
 0xa97   :  { %v16441_v1 = vadd.f32 %v31130_v23, %v15255_v52  ;;  %24520 = vmatprep.mubr.bf16.mxu1 %v26450_v31  ;;  %v31137_v52 = vld [vmem:[#allocation44_spill] sm:$0xff] }
 0xa99   :  { %v29944_v26 = vadd.f32 %v16441_v1, %v29722_v8  ;;  %v24286_v39 = vpop.f32.mrb[56].mxu1  ;;  %v31135_v8 = vld [vmem:[#allocation20_spill] sm:$0xff]  ;;  %v31138_v1 = vld [vmem:[#allocation45_spill] sm:$0xff] }
 0xa9a   :  { %v15267_v42 = vpop.f32.mrb[57].mxu1 }
 0xa9b   :  { %v15268_v46 = vadd.f32 %v15267_v42, %v31131_v40  ;;  %v24287_v15 = vpop.f32.mrb[58].mxu1  ;;  %v13626_v42 = vrot.slane %v29859_v30, 7 }
 0xa9c   :  { %v15279_v19 = vadd.f32 %v24287_v15, %v31132_v37  ;;  %v15270_v12 = vpop.f32.mrb[59].mxu1  ;;  %v31141_v37 = vld [vmem:[#allocation95_spill] sm:$0xff] }
 0xa9d   :  { %v16444_v36 = vadd.f32 %v31133_v24, %v15268_v46  ;;  %v15271_v48 = vadd.f32 %v15270_v12, %v31134_v57  ;;  %v31140_v46 = vld [vmem:[#allocation104_spill] sm:$0xff]  ;;  %v29984_v30 = vsel %vm3695_vm0, %v13626_v42, %v13627_v54 }
 0xa9e   :  { %v16447_v2 = vadd.f32 %v31135_v8, %v15279_v19  ;;  %24521 = vmatmul.mubr.bf16.gmra.mrb[164].mxu1 %v26452_v33  ;;  %v26455_v12 = vld [vmem:[#allocation2 + $0xbc] sm:$0xff]   ;;  %v29976_v33 = vpop.f32.mrb[220].mxu0 }
 0xa9f   :  { %v29956_v44 = vadd.f32 %v16444_v36, %v29731_v51  ;;  %v16445_v59 = vadd.f32 %v31136_v28, %v15271_v48  ;;  %24524 = vmatprep.mubr.bf16.mxu1 %v26453_v29  ;;  %v29970_v51 = vsel %vm3695_vm0, %v13627_v54, %v13628_v5  ;;  %v31142_v36 = vld [vmem:[#allocation70_spill] sm:$0xff]  ;;  %v16405_v48 = vpop.f32.mrb[221].mxu0  ;;  %v26456_v54 = vld [vmem:[#allocation2 + $0xc4] sm:$0xff]  }
 0xaa0   :  { %v29960_v43 = vadd.f32 %v16447_v2, %v29748_v10  ;;  %v31139_v10 = vld [vmem:[#allocation97_spill] sm:$0xff]  ;;  %v24467_v8 = vpop.f32.mrb[222].mxu0  ;;  %v31146_v42 = vld [vmem:[#allocation84_spill] sm:$0xff] }
 0xaa1   :  { %v29964_v20 = vadd.f32 %v16445_v59, %v29752_v11  ;;  %v24290_v35 = vpop.f32.mrb[60].mxu1  ;;  %v26454_v11 = vld [vmem:[#allocation2 + $0xb4] sm:$0xff]   ;;  %v29992_v28 = vpop.f32.mrb[223].mxu0  ;;  %v26459_v8 = vld [vmem:[#allocation2 + $0xec] sm:$0xff]  }
 0xaa2   :  { %v15292_v31 = vadd.f32 %v24290_v35, %v31137_v52  ;;  %v15283_v23 = vpop.f32.mrb[61].mxu1  ;;  %v31143_v59 = vld [vmem:[#allocation102_spill] sm:$0xff] }
 0xaa3   :  { %v15284_v4 = vadd.f32 %v15283_v23, %v31138_v1  ;;  %v24291_v39 = vpop.f32.mrb[62].mxu1 }
 0xaa4   :  { %v16450_v40 = vadd.f32 %v31139_v10, %v15292_v31  ;;  %v15295_v17 = vadd.f32 %v24291_v39, %v31140_v46  ;;  %v15286_v15 = vpop.f32.mrb[63].mxu1  ;;  %v31144_v31 = vld [vmem:[#allocation99_spill] sm:$0xff] }
 0xaa5   :  { %v16448_v19 = vadd.f32 %v31141_v37, %v15284_v4  ;;  %v31145_v4 = vld [vmem:[#allocation103_spill] sm:$0xff]  ;;  %v31149_v37 = vld [vmem:[#allocation46_spill] sm:$0xff] }
 0xaa6   :  { %v29979_v24 = vadd.f32 %v16450_v40, %v29756_v9  ;;  %v16451_v57 = vadd.f32 %v31142_v36, %v15295_v17  ;;  %24525 = vmatmul.mubr.bf16.gmra.mrb[168].mxu1 %v26454_v11  ;;  %v31148_v46 = vld [vmem:[#allocation35_spill] sm:$0xff] }
 0xaa7   :  { %v29987_v29 = vadd.f32 %v16448_v19, %v29770_v14  ;;  %24528 = vmatprep.mubr.bf16.mxu1 %v26455_v12  ;;  %v26457_v14 = vld [vmem:[#allocation2 + $0xe4] sm:$0xff]   ;;  %v31150_v36 = vld [vmem:[#allocation47_spill] sm:$0xff] }
 0xaa8   :  { %v29990_v2 = vadd.f32 %v16451_v57, %v29778_v22  ;;  %v31147_v22 = vld [vmem:[#allocation27_spill] sm:$0xff] }
 0xaa9   :  { %v24294_v9 = vpop.f32.mrb[64].mxu1 }
 0xaaa   :  { %v15308_v5 = vadd.f32 %v24294_v9, %v31143_v59  ;;  %v15299_v35 = vpop.f32.mrb[65].mxu1  ;;  %v31151_v9 = vld [vmem:[#allocation67_spill] sm:$0xff] }
 0xaab   :  { %v24295_v52 = vpop.f32.mrb[66].mxu1 }
 0xaac   :  { %v16454_v23 = vadd.f32 %v31144_v31, %v15308_v5  ;;  %v15302_v1 = vpop.f32.mrb[67].mxu1  ;;  %v31152_v5 = vld [vmem:[#allocation108_spill] sm:$0xff]  ;;  %v26460_v52 = vld [vmem:[#allocation2 + $0xf4] sm:$0xff]  }
 0xaad   :  { %v15303_v39 = vadd.f32 %v15302_v1, %v31145_v4  ;;  %v31153_v31 = vld [vmem:[#allocation22_spill] sm:$0xff] }
 0xaae   :  { %v29998_v10 = vadd.f32 %v16454_v23, %v31146_v42  ;;  %24529 = vmatmul.mubr.bf16.gmra.mrb[172].mxu1 %v26456_v54  ;;  %v31154_v54 = vld [vmem:[#allocation76_spill] sm:$0xff] }
 0xaaf   :  { %v16453_v40 = vadd.f32 %v31147_v22, %v15303_v39  ;;  %24532 = vmatprep.mubr.bf16.mxu1 %v26457_v14  ;;  %v31155_v22 = vld [vmem:[#allocation109_spill] sm:$0xff] }
 0xab1   :  { %v30002_v17 = vadd.f32 %v16453_v40, %v31148_v46  ;;  %v24298_v15 = vpop.f32.mrb[68].mxu1 }
 0xab2   :  { %v15315_v11 = vpop.f32.mrb[69].mxu1  ;;  %v31156_v15 = vld [vmem:[#allocation48_spill] sm:$0xff] }
 0xab3   :  { %v15316_v19 = vadd.f32 %v15315_v11, %v31149_v37  ;;  %v24299_v12 = vpop.f32.mrb[70].mxu1 }
 0xab4   :  { %v15327_v57 = vadd.f32 %v24299_v12, %v31150_v36  ;;  %v15318_v48 = vpop.f32.mrb[71].mxu1 }
 0xab5   :  { %v16456_v59 = vadd.f32 %v31151_v9, %v15316_v19  ;;  %v15319_v35 = vadd.f32 %v15318_v48, %v31152_v5  ;;  %v31157_v19 = vld [vmem:[#allocation68_spill] sm:$0xff] }
 0xab6   :  { %v16459_v23 = vadd.f32 %v31153_v31, %v15327_v57  ;;  %24533 = vmatmul.mubr.bf16.gmra.mrb[176].mxu1 %v26459_v8  ;;  %v26461_v48 = vld [vmem:[#allocation2 + $0xfc] sm:$0xff]   ;;  %v31159_v8 = vld [vmem:[#allocation101_spill] sm:$0xff]  ;;  %v31162_v31 = vld [vmem:[#allocation126_spill] sm:$0xff] }
 0xab7   :  { %v30010_v1 = vadd.f32 %v16456_v59, %v29611_v27  ;;  %v16457_v4 = vadd.f32 %v31154_v54, %v15319_v35  ;;  %24536 = vmatprep.mubr.bf16.mxu1 %v26460_v52  ;;  %v31158_v27 = vld [vmem:[#allocation49_spill] sm:$0xff]  ;;  %v31161_v35 = vld [vmem:[#allocation36_spill] sm:$0xff] }
 0xab8   :  { %v30014_v39 = vadd.f32 %v16459_v23, %v29616_v49  ;;  %v26462_v49 = vld [vmem:[#allocation2 + $0x104] sm:$0xff]  }
 0xab9   :  { %v30017_v14 = vadd.f32 %v16457_v4, %v29624_v47  ;;  %v24302_v42 = vpop.f32.mrb[72].mxu1  ;;  %v31160_v47 = vld [vmem:[#allocation23_spill] sm:$0xff]  ;;  %v31163_v4 = vld [vmem:[#allocation50_spill] sm:$0xff] }
 0xaba   :  { %v15340_v40 = vadd.f32 %v24302_v42, %v31155_v22  ;;  %v15331_v46 = vpop.f32.mrb[73].mxu1 }
 0xabb   :  { %v15332_v11 = vadd.f32 %v15331_v46, %v31156_v15  ;;  %v24303_v37 = vpop.f32.mrb[74].mxu1  ;;  %v31164_v46 = vld [vmem:[#allocation72_spill] sm:$0xff] }
 0xabc   :  { %v16462_v12 = vadd.f32 %v31157_v19, %v15340_v40  ;;  %v15343_v36 = vadd.f32 %v24303_v37, %v31158_v27  ;;  %v15334_v57 = vpop.f32.mrb[75].mxu1  ;;  %v31165_v37 = vld [vmem:[#allocation112_spill] sm:$0xff]  ;;  %v31166_v27 = vld [vmem:[#allocation37_spill] sm:$0xff] }
 0xabd   :  { %v16460_v9 = vadd.f32 %v31159_v8, %v15332_v11  ;;  %v31167_v57 = vld [vmem:[#allocation105_spill] sm:$0xff]  ;;  %v31168_v8 = vld [vmem:[#allocation128_spill] sm:$0xff] }
 0xabe   :  { %v30025_v59 = vadd.f32 %v16462_v12, %v29651_v16  ;;  %v16463_v5 = vadd.f32 %v31160_v47, %v15343_v36  ;;  %24537 = vmatmul.mubr.bf16.gmra.mrb[180].mxu1 %v26461_v48  ;;  %v26463_v16 = vld [vmem:[#allocation2 + $0x10c] sm:$0xff]   ;;  %v26464_v12 = vld [vmem:[#allocation2 + $0x114] sm:$0xff]  }
 0xabf   :  { %v30029_v52 = vadd.f32 %v16460_v9, %v31161_v35  ;;  %24540 = vmatprep.mubr.bf16.mxu1 %v26462_v49 }
 0xac0   :  { %v30032_v23 = vadd.f32 %v16463_v5, %v31162_v31  ;;  %v31169_v5 = vld [vmem:[#allocation114_spill] sm:$0xff] }
 0xac1   :  { %v24306_v54 = vpop.f32.mrb[76].mxu1 }
 0xac2   :  { %v15356_v42 = vadd.f32 %v24306_v54, %v31163_v4  ;;  %v15347_v22 = vpop.f32.mrb[77].mxu1  ;;  %v31170_v54 = vld [vmem:[#allocation116_spill] sm:$0xff] }
 0xac3   :  { %v24307_v40 = vpop.f32.mrb[78].mxu1  ;;  %v26466_v22 = vld [vmem:[#allocation2 + $0x11c] sm:$0xff]  }
 0xac4   :  { %v16466_v15 = vadd.f32 %v31164_v46, %v15356_v42  ;;  %v15350_v11 = vpop.f32.mrb[79].mxu1  ;;  %v31171_v40 = vld [vmem:[#allocation73_spill] sm:$0xff] }
 0xac5   :  { %v15351_v19 = vadd.f32 %v15350_v11, %v31165_v37  ;;  %v31173_v37 = vld [vmem:[#allocation24_spill] sm:$0xff] }
 0xac6   :  { %v30038_v36 = vadd.f32 %v16466_v15, %v31166_v27  ;;  %24541 = vmatmul.mubr.bf16.gmra.mrb[184].mxu1 %v26463_v16  ;;  %v31172_v15 = vld [vmem:[#allocation51_spill] sm:$0xff]  ;;  %v26467_v16 = vld [vmem:[#allocation2 + $0x124] sm:$0xff]   ;;  %v31174_v27 = vld [vmem:[#allocation26_spill] sm:$0xff] }
 0xac7   :  { %v16465_v48 = vadd.f32 %v31167_v57, %v15351_v19  ;;  %24544 = vmatprep.mubr.bf16.mxu1 %v26464_v12 }
 0xac9   :  { %v30042_v9 = vadd.f32 %v16465_v48, %v31168_v8  ;;  %v24310_v49 = vpop.f32.mrb[80].mxu1 }
 0xaca   :  { %v15363_v47 = vpop.f32.mrb[81].mxu1 }
 0xacb   :  { %v15364_v35 = vadd.f32 %v15363_v47, %v31169_v5  ;;  %v24311_v31 = vpop.f32.mrb[82].mxu1  ;;  %v31175_v47 = vld [vmem:[#allocation54_spill] sm:$0xff] }
 0xacc   :  { %v15375_v4 = vadd.f32 %v24311_v31, %v31170_v54  ;;  %v15366_v42 = vpop.f32.mrb[83].mxu1  ;;  %v31176_v31 = vld [vmem:[#allocation55_spill] sm:$0xff] }
 0xacd   :  { %v16468_v46 = vadd.f32 %v31171_v40, %v15364_v35  ;;  %v15367_v11 = vadd.f32 %v15366_v42, %v31172_v15  ;;  %v31177_v42 = vld [vmem:[#allocation25_spill] sm:$0xff] }
 0xace   :  { %v16471_v19 = vadd.f32 %v31173_v37, %v15375_v4  ;;  %24545 = vmatmul.mubr.bf16.gmra.mrb[188].mxu1 %v26466_v22  ;;  %v26468_v15 = vld [vmem:[#allocation2 + $0x12c] sm:$0xff]  }
 0xacf   :  { %v30050_v12 = vadd.f32 %v16468_v46, %v29687_v0  ;;  %v16469_v57 = vadd.f32 %v31174_v27, %v15367_v11  ;;  %24548 = vmatprep.mubr.bf16.mxu1 %v26467_v16  ;;  %v31178_v0 = vld [vmem:[#allocation120_spill] sm:$0xff]  ;;  %v31179_v11 = vld [vmem:[#allocation106_spill] sm:$0xff] }
 0xad0   :  { %v30054_v48 = vadd.f32 %v16471_v19, %v29692_v6  ;;  %v26469_v6 = vld [vmem:[#allocation2 + $0x134] sm:$0xff]  }
 0xad1   :  { %v30057_v8 = vadd.f32 %v16469_v57, %v29700_v55  ;;  %v24314_v49 = vpop.f32.mrb[84].mxu1  ;;  %v31180_v55 = vld [vmem:[#allocation107_spill] sm:$0xff]  ;;  %v31181_v27 = vld [vmem:[#allocation130_spill] sm:$0xff] }
 0xad2   :  { %v15388_v5 = vadd.f32 %v24314_v49, %v31175_v47  ;;  %v15379_v35 = vpop.f32.mrb[85].mxu1  ;;  %v31183_v49 = vld [vmem:[#allocation88_spill] sm:$0xff] }
 0xad3   :  { %v15380_v54 = vadd.f32 %v15379_v35, %v31176_v31  ;;  %v24315_v4 = vpop.f32.mrb[86].mxu1  ;;  %v31185_v35 = vld [vmem:[#allocation118_spill] sm:$0xff] }
 0xad4   :  { %v16474_v22 = vadd.f32 %v31177_v42, %v15388_v5  ;;  %v15391_v40 = vadd.f32 %v24315_v4, %v31178_v0  ;;  %v15382_v46 = vpop.f32.mrb[87].mxu1 }
 0xad5   :  { %v16472_v16 = vadd.f32 %v31179_v11, %v15380_v54  ;;  %v31186_v54 = vld [vmem:[#allocation117_spill] sm:$0xff] }
 0xad6   :  { %v30065_v37 = vadd.f32 %v16474_v22, %v29727_v56  ;;  %v16475_v19 = vadd.f32 %v31180_v55, %v15391_v40  ;;  %24549 = vmatmul.mubr.bf16.gmra.mrb[192].mxu1 %v26468_v15  ;;  %v26470_v56 = vld [vmem:[#allocation2 + $0x13c] sm:$0xff]   ;;  %v26471_v40 = vld [vmem:[#allocation2 + $0x144] sm:$0xff]   ;;  %v31188_v15 = vld [vmem:[#allocation86_spill] sm:$0xff] }
 0xad7   :  { %v30069_v57 = vadd.f32 %v16472_v16, %v31181_v27  ;;  %24552 = vmatprep.mubr.bf16.mxu1 %v26469_v6  ;;  %v31187_v22 = vld [vmem:[#allocation119_spill] sm:$0xff] }
 0xad8   :  { %v30072_v47 = vadd.f32 %v16475_v19, %v31183_v49  ;;  %v31190_v16 = vld [vmem:[#allocation31_spill] sm:$0xff] }
 0xad9   :  { %31182 = vst [vmem:[#allocation38_spill] sm:$0xff] %v30069_v57  ;;  %v24318_v5 = vpop.f32.mrb[88].mxu1  ;;  %v31191_v19 = vld [vmem:[#allocation87_spill] sm:$0xff] }
 0xada   :  { %31184 = vst [vmem:[#allocation15_spill] sm:$0xff] %v30072_v47  ;;  %v15404_v31 = vadd.f32 %v24318_v5, %v31185_v35  ;;  %v15395_v4 = vpop.f32.mrb[89].mxu1  ;;  %v31193_v35 = vld [vmem:[#allocation56_spill] sm:$0xff] }
 0xadb   :  { %v24319_v42 = vpop.f32.mrb[90].mxu1 }
 0xadc   :  { %v16478_v0 = vadd.f32 %v31186_v54, %v15404_v31  ;;  %v15398_v46 = vpop.f32.mrb[91].mxu1  ;;  %v31194_v42 = vld [vmem:[#allocation58_spill] sm:$0xff] }
 0xadd   :  { %v15399_v11 = vadd.f32 %v15398_v46, %v31187_v22  ;;  %v26473_v46 = vld [vmem:[#allocation2 + $0x14c] sm:$0xff]  }
 0xade   :  { %v30078_v55 = vadd.f32 %v16478_v0, %v31188_v15  ;;  %24553 = vmatmul.mubr.bf16.gmra.mrb[196].mxu1 %v26470_v56  ;;  %v31195_v22 = vld [vmem:[#allocation110_spill] sm:$0xff]  ;;  %v31196_v0 = vld [vmem:[#allocation124_spill] sm:$0xff] }
 0xadf   :  { %v16477_v6 = vadd.f32 %v31190_v16, %v15399_v11  ;;  %24556 = vmatprep.mubr.bf16.mxu1 %v26471_v40  ;;  %v26474_v56 = vld [vmem:[#allocation2 + $0x154] sm:$0xff]  }
 0xae0   :  { %31189 = vst [vmem:[#allocation39_spill] sm:$0xff] %v30078_v55  ;;  %v31197_v55 = vld [vmem:[#allocation74_spill] sm:$0xff] }
 0xae1   :  { %v30082_v27 = vadd.f32 %v16477_v6, %v31191_v19  ;;  %v24322_v49 = vpop.f32.mrb[92].mxu1  ;;  %v31198_v40 = vld [vmem:[#allocation18_spill] sm:$0xff]  ;;  %v31200_v6 = vld [vmem:[#allocation75_spill] sm:$0xff] }
 0xae2   :  { %v15411_v5 = vpop.f32.mrb[93].mxu1  ;;  %v31201_v49 = vld [vmem:[#allocation137_spill] sm:$0xff] }
 0xae3   :  { %31192 = vst [vmem:[#allocation92_spill] sm:$0xff] %v30082_v27  ;;  %v15412_v4 = vadd.f32 %v15411_v5, %v31193_v35  ;;  %v24323_v31 = vpop.f32.mrb[94].mxu1  ;;  %v31203_v35 = vld [vmem:[#allocation138_spill] sm:$0xff] }
 0xae4   :  { %v15423_v54 = vadd.f32 %v24323_v31, %v31194_v42  ;;  %v15414_v47 = vpop.f32.mrb[95].mxu1 }
 0xae5   :  { %v16480_v57 = vadd.f32 %v31195_v22, %v15412_v4  ;;  %v15415_v15 = vadd.f32 %v15414_v47, %v31196_v0  ;;  %v31205_v4 = vld [vmem:[#allocation125_spill] sm:$0xff] }
 0xae6   :  { %v16483_v11 = vadd.f32 %v31197_v55, %v15423_v54  ;;  %24557 = vmatmul.mubr.bf16.gmra.mrb[200].mxu1 %v26473_v46  ;;  %v31206_v0 = vld [vmem:[#allocation61_spill] sm:$0xff]  ;;  %v31207_v54 = vld [vmem:[#allocation28_spill] sm:$0xff] }
 0xae7   :  { %v30090_v16 = vadd.f32 %v16480_v57, %v31198_v40  ;;  %v16481_v19 = vadd.f32 %v31200_v6, %v15415_v15  ;;  %24560 = vmatprep.mubr.bf16.mxu1 %v26474_v56  ;;  %v31208_v57 = vld [vmem:[#allocation62_spill] sm:$0xff]  ;;  %v26475_v15 = vld [vmem:[#allocation2 + $0x15c] sm:$0xff]   ;;  %v31209_v56 = vld [vmem:[#allocation29_spill] sm:$0xff] }
 0xae8   :  { %v30094_v5 = vadd.f32 %v16483_v11, %v31201_v49  ;;  %v26476_v11 = vld [vmem:[#allocation2 + $0x164] sm:$0xff]  }
 0xae9   :  { %31199 = vst [vmem:[#allocation16_spill] sm:$0xff] %v30090_v16  ;;  %v30097_v31 = vadd.f32 %v16481_v19, %v31203_v35  ;;  %v24326_v42 = vpop.f32.mrb[96].mxu1  ;;  %v31210_v49 = vld [vmem:[#allocation141_spill] sm:$0xff]  ;;  %v31212_v19 = vld [vmem:[#allocation80_spill] sm:$0xff] }
 0xaea   :  { %31202 = vst [vmem:[#allocation135_spill] sm:$0xff] %v30094_v5  ;;  %v15436_v22 = vadd.f32 %v24326_v42, %v31205_v4  ;;  %v15427_v47 = vpop.f32.mrb[97].mxu1  ;;  %v31213_v42 = vld [vmem:[#allocation139_spill] sm:$0xff] }
 0xaeb   :  { %31204 = vst [vmem:[#allocation17_spill] sm:$0xff] %v30097_v31  ;;  %v15428_v27 = vadd.f32 %v15427_v47, %v31206_v0  ;;  %v24327_v55 = vpop.f32.mrb[98].mxu1  ;;  %v31215_v47 = vld [vmem:[#allocation140_spill] sm:$0xff] }
 0xaec   :  { %v16486_v46 = vadd.f32 %v31207_v54, %v15436_v22  ;;  %v15439_v40 = vadd.f32 %v24327_v55, %v31208_v57  ;;  %v15430_v16 = vpop.f32.mrb[99].mxu1  ;;  %v31217_v55 = vld [vmem:[#allocation63_spill] sm:$0xff] }
 0xaed   :  { %v16484_v6 = vadd.f32 %v31209_v56, %v15428_v27  ;;  %v31218_v27 = vld [vmem:[#allocation121_spill] sm:$0xff] }
 0xaee   :  { %v30105_v5 = vadd.f32 %v16486_v46, %v31210_v49  ;;  %v16487_v35 = vadd.f32 %v31212_v19, %v15439_v40  ;;  %24561 = vmatmul.mubr.bf16.gmra.mrb[204].mxu1 %v26475_v15  ;;  %v26477_v46 = vld [vmem:[#allocation2 + $0x16c] sm:$0xff]   ;;  %v31219_v49 = vld [vmem:[#allocation127_spill] sm:$0xff] }
 0xaef   :  { %v30109_v4 = vadd.f32 %v16484_v6, %v31213_v42  ;;  %24564 = vmatprep.mubr.bf16.mxu1 %v26476_v11  ;;  %v26478_v40 = vld [vmem:[#allocation2 + $0x174] sm:$0xff]   ;;  %v31222_v6 = vld [vmem:[#allocation81_spill] sm:$0xff] }
 0xaf0   :  { %31211 = vst [vmem:[#allocation90_spill] sm:$0xff] %v30105_v5  ;;  %v30112_v0 = vadd.f32 %v16487_v35, %v31215_v47  ;;  %v31220_v15 = vld [vmem:[#allocation142_spill] sm:$0xff]  ;;  %v31223_v35 = vld [vmem:[#allocation143_spill] sm:$0xff] }
 0xaf1   :  { %31214 = vst [vmem:[#allocation93_spill] sm:$0xff] %v30109_v4  ;;  %v24330_v22 = vpop.f32.mrb[100].mxu1 }
 0xaf2   :  { %31216 = vst [vmem:[#allocation40_spill] sm:$0xff] %v30112_v0  ;;  %v15452_v16 = vadd.f32 %v24330_v22, %v31217_v55  ;;  %v15443_v54 = vpop.f32.mrb[101].mxu1  ;;  %v31225_v55 = vld [vmem:[#allocation129_spill] sm:$0xff] }
 0xaf3   :  { %v24331_v57 = vpop.f32.mrb[102].mxu1 }
 0xaf4   :  { %v16490_v56 = vadd.f32 %v31218_v27, %v15452_v16  ;;  %v15446_v31 = vpop.f32.mrb[103].mxu1  ;;  %v31226_v57 = vld [vmem:[#allocation131_spill] sm:$0xff] }
 0xaf5   :  { %v15447_v5 = vadd.f32 %v15446_v31, %v31219_v49  ;;  %v26480_v31 = vld [vmem:[#allocation2 + $0x17c] sm:$0xff]  }
 0xaf6   :  { %v30118_v19 = vadd.f32 %v16490_v56, %v31220_v15  ;;  %24565 = vmatmul.mubr.bf16.gmra.mrb[208].mxu1 %v26477_v46  ;;  %v31227_v49 = vld [vmem:[#allocation32_spill] sm:$0xff] }
 0xaf7   :  { %v16489_v11 = vadd.f32 %v31222_v6, %v15447_v5  ;;  %24568 = vmatprep.mubr.bf16.mxu1 %v26478_v40  ;;  %v31228_v56 = vld [vmem:[#allocation64_spill] sm:$0xff] }
 0xaf8   :  { %31221 = vst [vmem:[#allocation91_spill] sm:$0xff] %v30118_v19  ;;  %v26481_v46 = vld [vmem:[#allocation2 + $0x184] sm:$0xff]  }
 0xaf9   :  { %v30122_v42 = vadd.f32 %v16489_v11, %v31223_v35  ;;  %v24334_v47 = vpop.f32.mrb[104].mxu1  ;;  %v31229_v19 = vld [vmem:[#allocation33_spill] sm:$0xff]  ;;  %v31230_v40 = vld [vmem:[#allocation144_spill] sm:$0xff]  ;;  %v31232_v11 = vld [vmem:[#allocation34_spill] sm:$0xff] }
 0xafa   :  { %v15459_v22 = vpop.f32.mrb[105].mxu1  ;;  %v31233_v47 = vld [vmem:[#allocation145_spill] sm:$0xff] }
 0xafb   :  { %31224 = vst [vmem:[#allocation41_spill] sm:$0xff] %v30122_v42  ;;  %v15460_v54 = vadd.f32 %v15459_v22, %v31225_v55  ;;  %v24335_v16 = vpop.f32.mrb[106].mxu1  ;;  %v31235_v55 = vld [vmem:[#allocation146_spill] sm:$0xff] }
 0xafc   :  { %v15471_v27 = vadd.f32 %v24335_v16, %v31226_v57  ;;  %v15462_v0 = vpop.f32.mrb[107].mxu1 }
 0xafd   :  { %v16492_v4 = vadd.f32 %v31227_v49, %v15460_v54  ;;  %v15463_v15 = vadd.f32 %v15462_v0, %v31228_v56  ;;  %v31237_v54 = vld [vmem:[#allocation65_spill] sm:$0xff]  ;;  %v31238_v56 = vld [vmem:[#allocation66_spill] sm:$0xff] }
 0xafe   :  { %v16495_v5 = vadd.f32 %v31229_v19, %v15471_v27  ;;  %24569 = vmatmul.mubr.bf16.gmra.mrb[212].mxu1 %v26480_v31  ;;  %v31239_v27 = vld [vmem:[#allocation122_spill] sm:$0xff] }
 0xaff   :  { %v30130_v6 = vadd.f32 %v16492_v4, %v31230_v40  ;;  %v16493_v35 = vadd.f32 %v31232_v11, %v15463_v15  ;;  %24572 = vmatprep.mubr.bf16.mxu1 %v26481_v46  ;;  %v31240_v4 = vld [vmem:[#allocation134_spill] sm:$0xff]  ;;  %v31241_v46 = vld [vmem:[#allocation79_spill] sm:$0xff] }
 0xb00   :  { %v30134_v22 = vadd.f32 %v16495_v5, %v31233_v47  ;;  %v26482_v15 = vld [vmem:[#allocation2 + $0x18c] sm:$0xff]   ;;  %v26483_v5 = vld [vmem:[#allocation2 + $0x194] sm:$0xff]  }
 0xb01   :  { %31231 = vst [vmem:[#allocation94_spill] sm:$0xff] %v30130_v6  ;;  %v30137_v16 = vadd.f32 %v16493_v35, %v31235_v55  ;;  %v24338_v57 = vpop.f32.mrb[108].mxu1  ;;  %v31242_v47 = vld [vmem:[#allocation149_spill] sm:$0xff] }
 0xb02   :  { %31234 = vst [vmem:[#allocation57_spill] sm:$0xff] %v30134_v22  ;;  %v15484_v49 = vadd.f32 %v24338_v57, %v31237_v54  ;;  %v15475_v0 = vpop.f32.mrb[109].mxu1  ;;  %v31244_v35 = vld [vmem:[#allocation77_spill] sm:$0xff]  ;;  %v31245_v57 = vld [vmem:[#allocation147_spill] sm:$0xff] }
 0xb03   :  { %31236 = vst [vmem:[#allocation42_spill] sm:$0xff] %v30137_v16  ;;  %v15476_v42 = vadd.f32 %v15475_v0, %v31238_v56  ;;  %v24339_v19 = vpop.f32.mrb[110].mxu1  ;;  %v31246_v0 = vld [vmem:[#allocation148_spill] sm:$0xff] }
 0xb04   :  { %v16498_v31 = vadd.f32 %v31239_v27, %v15484_v49  ;;  %v15487_v40 = vadd.f32 %v24339_v19, %v31240_v4  ;;  %v15478_v6 = vpop.f32.mrb[111].mxu1  ;;  %v31248_v19 = vld [vmem:[#allocation132_spill] sm:$0xff] }
 0xb05   :  { %v16496_v11 = vadd.f32 %v31241_v46, %v15476_v42  ;;  %v26485_v42 = vld [vmem:[#allocation2] sm:$0xff]   ;;  %v31249_v46 = vld [vmem:[#allocation78_spill] sm:$0xff] }
 0xb06   :  { %v30145_v22 = vadd.f32 %v16498_v31, %v31242_v47  ;;  %v16499_v55 = vadd.f32 %v31244_v35, %v15487_v40  ;;  %24573 = vmatmul.mubr.bf16.gmra.mrb[216].mxu1 %v26482_v15  ;;  %v26484_v47 = vld [vmem:[#allocation2 + $0x19c] sm:$0xff]   ;;  %v31251_v15 = vld [vmem:[#allocation150_spill] sm:$0xff] }
 0xb07   :  { %v30149_v54 = vadd.f32 %v16496_v11, %v31245_v57  ;;  %24576 = vmatprep.mubr.bf16.mxu1 %v26483_v5  ;;  %v31253_v11 = vld [vmem:[#allocation30_spill] sm:$0xff] }
 0xb08   :  { %31243 = vst [vmem:[#allocation59_spill] sm:$0xff] %v30145_v22  ;;  %v30152_v56 = vadd.f32 %v16499_v55, %v31246_v0  ;;  %v31250_v22 = vld [vmem:[#allocation133_spill] sm:$0xff] }
 0xb09   :  { %v24342_v49 = vpop.f32.mrb[112].mxu1 }
 0xb0a   :  { %31247 = vst [vmem:[#allocation96_spill] sm:$0xff] %v30152_v56  ;;  %v15500_v6 = vadd.f32 %v24342_v49, %v31248_v19  ;;  %v15491_v27 = vpop.f32.mrb[113].mxu1  ;;  %v31254_v49 = vld [vmem:[#allocation69_spill] sm:$0xff] }
 0xb0b   :  { %v24343_v4 = vpop.f32.mrb[114].mxu1  ;;  %v26487_v56 = vld [vmem:[#allocation2 + $0x8] sm:$0xff]  }
 0xb0c   :  { %v16502_v16 = vadd.f32 %v31249_v46, %v15500_v6  ;;  %v15494_v31 = vpop.f32.mrb[115].mxu1  ;;  %v31255_v6 = vld [vmem:[#allocation71_spill] sm:$0xff] }
 0xb0d   :  { %v15495_v40 = vadd.f32 %v15494_v31, %v31250_v22  ;;  %v26493_v22 = vld [vmem:[#allocation9 + $0x208] sm:$0xff]  }
 0xb0e   :  { %v30158_v35 = vadd.f32 %v16502_v16, %v31251_v15  ;;  %24577 = vmatmul.mubr.bf16.gmra.mrb[220].mxu1 %v26484_v47  ;;  %v31256_v31 = vld [vmem:[#allocation111_spill] sm:$0xff]  ;;  %v31257_v15 = vld [vmem:[#allocation136_spill] sm:$0xff] }
 0xb0f   :  { %v16501_v5 = vadd.f32 %v31253_v11, %v15495_v40  ;;  %24596 = vmatprep.mubr.bf16.mxu1 %v26485_v42  ;;  %v31258_v40 = vld [vmem:[#allocation115_spill] sm:$0xff] }
 0xb10   :  { %31252 = vst [vmem:[#allocation60_spill] sm:$0xff] %v30158_v35  ;;  %v26488_v35 = vld [vmem:[#allocation2 + $0x10] sm:$0xff]  }
 0xb11   :  { %v30162_v55 = vadd.f32 %v16501_v5, %v29830_v50  ;;  %v24346_v57 = vpop.f32.mrb[116].mxu1  ;;  %v31259_v50 = vld [vmem:[#allocation151_spill] sm:$0xff]  ;;  %v31261_v5 = vld [vmem:[#allocation113_spill] sm:$0xff] }
 0xb12   :  { %v15507_v0 = vpop.f32.mrb[117].mxu1 }
 0xb13   :  { %v15508_v19 = vadd.f32 %v15507_v0, %v31254_v49  ;;  %v24347_v27 = vpop.f32.mrb[118].mxu1  ;;  %v31262_v0 = vld [vmem:[#allocation152_spill] sm:$0xff] }
 0xb14   :  { %v15519_v4 = vadd.f32 %v24347_v27, %v31255_v6  ;;  %v15510_v46 = vpop.f32.mrb[119].mxu1  ;;  %v26500_v27 = vld [vmem:[#allocation9 + $0x210] sm:$0xff]  }
 0xb15   :  { %v16504_v16 = vadd.f32 %v31256_v31, %v15508_v19  ;;  %v15511_v47 = vadd.f32 %v15510_v46, %v31257_v15  ;;  %v31264_v19 = vld [vmem:[#allocation153_spill] sm:$0xff]  ;;  %v31267_v15 = vld [vmem:[#allocation14_spill] sm:$0xff] }
 0xb16   :  { %v16507_v42 = vadd.f32 %v31258_v40, %v15519_v4  ;;  %24597 = vmatmul.mubr.bf16.vlgmr.msra.gmra.mrb[128].mxu1 %v26487_v56  ;;  %v31266_v31 = vld [vmem:[#allocation85_spill] sm:$0xff] }
 0xb17   :  { %v30170_v11 = vadd.f32 %v16504_v16, %v31259_v50  ;;  %v16505_v57 = vadd.f32 %v31261_v5, %v15511_v47  ;;  %24693 = vmatpush3.bf16.msra.mxu1 %v29946_v61  ;;  %24600 = vmatprep.mubr.bf16.mxu1 %v26488_v35  ;;  %v31268_v47 = vld [vmem:[#allocation123_spill] sm:$0xff]  ;;  %v31269_v61 = vld [vmem:[#allocation89_spill] sm:$0xff] }
 0xb18   :  { %v30175_v49 = vadd.f32 %v16507_v42, %v31262_v0  ;;  %24694 = vmatprep.subr.bf16.mxu1 %v26493_v22  ;;  %v26489_v42 = vld [vmem:[#allocation2 + $0x18] sm:$0xff]   ;;  %v26507_v0 = vld [vmem:[#allocation9 + $0x218] sm:$0xff]  }
 0xb19   :  { %31260 = vst [vmem:[#allocation98_spill] sm:$0xff] %v30170_v11  ;;  %v30178_v6 = vadd.f32 %v16505_v57, %v31264_v19  ;;  %v24350_v46 = vpop.f32.mrb[120].mxu1  ;;  %v26490_v57 = vld [vmem:[#allocation2 + $0x20] sm:$0xff]  }
 0xb1a   :  { %31263 = vst [vmem:[#allocation100_spill] sm:$0xff] %v30175_v49  ;;  %v15532_v4 = vadd.f32 %v24350_v46, %v31266_v31  ;;  %v15523_v56 = vpop.f32.mrb[121].mxu1  ;;  %v31270_v49 = vld [vmem:[#allocation83_spill] sm:$0xff]  ;;  %v31271_v19 = vld [vmem:[#allocation156_spill] sm:$0xff]  ;;  %v31272_v46 = vld [vmem:[#allocation82_spill] sm:$0xff] }
 0xb1b   :  { %31265 = vst [vmem:[#allocation19_spill] sm:$0xff] %v30178_v6  ;;  %v15524_v16 = vadd.f32 %v15523_v56, %v31267_v15  ;;  %v24351_v40 = vpop.f32.mrb[122].mxu1  ;;  %24695 = vmatpush3.bf16.msra.mxu1 %v26493_v22  ;;  %v31273_v56 = vld [vmem:[#allocation154_spill] sm:$0xff]  ;;  %v31274_v22 = vld [vmem:[#allocation155_spill] sm:$0xff] }
 0xb1c   :  { %v16510_v50 = vadd.f32 %v31268_v47, %v15532_v4  ;;  %v15535_v35 = vadd.f32 %v24351_v40, %v31269_v61  ;;  %v15526_v5 = vpop.f32.mrb[123].mxu1  ;;  %24696 = vmatprep.subr.bf16.mxu1 %v26500_v27  ;;  %v26514_v40 = vld [vmem:[#allocation9 + $0x220] sm:$0xff]   ;;  %v31275_v61 = vld [vmem:[#allocation52_spill] sm:$0xff] }
 0xb1d   :  { %v16508_v11 = vadd.f32 %v31270_v49, %v15524_v16 }
 0xb1e   :  { %v30186_v6 = vadd.f32 %v16510_v50, %v31271_v19  ;;  %v16511_v31 = vadd.f32 %v31272_v46, %v15535_v35  ;;  %24601 = vmatmul.mubr.bf16.gmra.mrb[132].mxu1 %v26489_v42  ;;  %v26491_v42 = vld [vmem:[#allocation2 + $0x28] sm:$0xff]  }
 0xb1f   :  { %v30190_v15 = vadd.f32 %v16508_v11, %v31273_v56  ;;  %24604 = vmatprep.mubr.bf16.mxu1 %v26490_v57  ;;  %24697 = vmatpush3.bf16.msra.mxu1 %v26500_v27  ;;  %v26521_v11 = vld [vmem:[#allocation9 + $0x228] sm:$0xff]   ;;  %v31276_v19 = vld [vmem:[#allocation53_spill] sm:$0xff]  ;;  %v26492_v27 = vld [vmem:[#allocation2 + $0x30] sm:$0xff]  }
 0xb20   :  { %v30193_v4 = vadd.f32 %v16511_v31, %v31274_v22  ;;  %24698 = vmatprep.subr.bf16.mxu1 %v26507_v0  ;;  %v26528_v56 = vld [vmem:[#allocation9 + $0x230] sm:$0xff]  }
 0xb21   :  { %v24354_v47 = vpop.f32.mrb[124].mxu1  ;;  %v26495_v22 = vld [vmem:[#allocation2 + $0x40] sm:$0xff]  }
 0xb22   :  { %v15548_v49 = vadd.f32 %v24354_v47, %v31275_v61  ;;  %v15539_v16 = vpop.f32.mrb[125].mxu1  ;;  %v26496_v47 = vld [vmem:[#allocation2 + $0x48] sm:$0xff]  }
 0xb23   :  { %v24355_v5 = vpop.f32.mrb[126].mxu1  ;;  %24699 = vmatpush3.bf16.msra.mxu1 %v26507_v0  ;;  %v26535_v61 = vld [vmem:[#allocation9 + $0x238] sm:$0xff]   ;;  %v26503_v16 = vld [vmem:[#allocation2 + $0x78] sm:$0xff]  }
 0xb24   :  { %v16514_v50 = vadd.f32 %v29976_v33, %v15548_v49  ;;  %v15542_v35 = vpop.f32.mrb[127].mxu1  ;;  %24700 = vmatprep.subr.bf16.mxu1 %v26514_v40  ;;  %v26494_v33 = vld [vmem:[#allocation2 + $0x38] sm:$0xff]   ;;  %v26502_v49 = vld [vmem:[#allocation2 + $0x70] sm:$0xff]   ;;  %v26504_v5 = vld [vmem:[#allocation2 + $0x80] sm:$0xff]  }
 0xb25   :  { %v15543_v57 = vadd.f32 %v15542_v35, %v31276_v19  ;;  %v26506_v35 = vld [vmem:[#allocation2 + $0x90] sm:$0xff]   ;;  %v26510_v19 = vld [vmem:[#allocation2 + $0xa8] sm:$0xff]  }
 0xb26   :  { %v30199_v46 = vadd.f32 %v16514_v50, %v29970_v51  ;;  %24605 = vmatmul.mubr.bf16.gmra.mrb[136].mxu1 %v26491_v42  ;;  %v26497_v51 = vld [vmem:[#allocation2 + $0x50] sm:$0xff]   ;;  %v26505_v50 = vld [vmem:[#allocation2 + $0x88] sm:$0xff]   ;;  %v26508_v42 = vld [vmem:[#allocation2 + $0x98] sm:$0xff]  }
 0xb27   :  { %v16513_v31 = vadd.f32 %v29992_v28, %v15543_v57  ;;  %24608 = vmatprep.mubr.bf16.mxu1 %v26492_v27  ;;  %24701 = vmatpush3.bf16.msra.mxu1 %v26514_v40  ;;  %v26498_v28 = vld [vmem:[#allocation2 + $0x58] sm:$0xff]   ;;  %v26499_v40 = vld [vmem:[#allocation2 + $0x60] sm:$0xff]   ;;  %v26511_v57 = vld [vmem:[#allocation2 + $0xb0] sm:$0xff]  }
 0xb28   :  { %24702 = vmatprep.subr.bf16.mxu1 %v26521_v11  ;;  %v26513_v27 = vld [vmem:[#allocation2 + $0xd8] sm:$0xff]  }
 0xb29   :  { %v30203_v0 = vadd.f32 %v16513_v31, %v29984_v30  ;;  %v26501_v30 = vld [vmem:[#allocation2 + $0x68] sm:$0xff]   ;;  %v26512_v31 = vld [vmem:[#allocation2 + $0xb8] sm:$0xff]  }
 0xb2b   :  { %24703 = vmatpush3.bf16.msra.mxu1 %v26521_v11  ;;  %v26509_v11 = vld [vmem:[#allocation2 + $0xa0] sm:$0xff]  }
 0xb2c   :  { %24704 = vmatprep.subr.bf16.mxu1 %v26528_v56 }
 0xb2e   :  { %24609 = vmatmul.mubr.bf16.gmra.mrb[140].mxu1 %v26494_v33  ;;  %v26516_v33 = vld [vmem:[#allocation2 + $0xe8] sm:$0xff]  }
 0xb2f   :  { %24612 = vmatprep.mubr.bf16.mxu1 %v26495_v22  ;;  %24705 = vmatpush3.bf16.msra.mxu1 %v26528_v56  ;;  %v26515_v56 = vld [vmem:[#allocation2 + $0xe0] sm:$0xff]   ;;  %v26517_v22 = vld [vmem:[#allocation2 + $0xf0] sm:$0xff]  }
 0xb30   :  { %24706 = vmatprep.subr.bf16.mxu1 %v26535_v61 }
 0xb33   :  { %24707 = vmatpush3.bf16.msra.mxu1 %v26535_v61  ;;  %v26520_v61 = vld [vmem:[#allocation2 + $0x108] sm:$0xff]  }
 0xb36   :  { %24613 = vmatmul.mubr.bf16.gmra.mrb[144].mxu1 %v26496_v47  ;;  %v26518_v47 = vld [vmem:[#allocation2 + $0xf8] sm:$0xff]  }
 0xb37   :  { %24616 = vmatprep.mubr.bf16.mxu1 %v26497_v51  ;;  %v26519_v51 = vld [vmem:[#allocation2 + $0x100] sm:$0xff]  }
 0xb3e   :  { %24617 = vmatmul.mubr.bf16.gmra.mrb[148].mxu1 %v26498_v28  ;;  %v26522_v28 = vld [vmem:[#allocation2 + $0x110] sm:$0xff]  }
 0xb3f   :  { %24620 = vmatprep.mubr.bf16.mxu1 %v26499_v40  ;;  %v26523_v40 = vld [vmem:[#allocation2 + $0x118] sm:$0xff]  }
 0xb46   :  { %24621 = vmatmul.mubr.bf16.gmra.mrb[152].mxu1 %v26501_v30  ;;  %v26524_v30 = vld [vmem:[#allocation2 + $0x120] sm:$0xff]  }
 0xb47   :  { %24624 = vmatprep.mubr.bf16.mxu1 %v26502_v49  ;;  %v26525_v49 = vld [vmem:[#allocation2 + $0x128] sm:$0xff]  }
 0xb4e   :  { %24625 = vmatmul.mubr.bf16.gmra.mrb[156].mxu1 %v26503_v16  ;;  %v26526_v16 = vld [vmem:[#allocation2 + $0x130] sm:$0xff]  }
 0xb4f   :  { %24628 = vmatprep.mubr.bf16.mxu1 %v26504_v5  ;;  %v26527_v5 = vld [vmem:[#allocation2 + $0x138] sm:$0xff]  }
 0xb56   :  { %24629 = vmatmul.mubr.bf16.gmra.mrb[160].mxu1 %v26505_v50  ;;  %v26529_v50 = vld [vmem:[#allocation2 + $0x140] sm:$0xff]  }
 0xb57   :  { %24632 = vmatprep.mubr.bf16.mxu1 %v26506_v35  ;;  %v26530_v35 = vld [vmem:[#allocation2 + $0x148] sm:$0xff]  }
 0xb5e   :  { %24633 = vmatmul.mubr.bf16.gmra.mrb[164].mxu1 %v26508_v42  ;;  %v26531_v42 = vld [vmem:[#allocation2 + $0x150] sm:$0xff]  }
 0xb5f   :  { %24636 = vmatprep.mubr.bf16.mxu1 %v26509_v11  ;;  %v26532_v11 = vld [vmem:[#allocation2 + $0x158] sm:$0xff]  }
 0xb66   :  { %24637 = vmatmul.mubr.bf16.gmra.mrb[168].mxu1 %v26510_v19  ;;  %v26533_v19 = vld [vmem:[#allocation2 + $0x160] sm:$0xff]  }
 0xb67   :  { %24640 = vmatprep.mubr.bf16.mxu1 %v26511_v57  ;;  %v26534_v57 = vld [vmem:[#allocation2 + $0x168] sm:$0xff]  }
 0xb6e   :  { %24641 = vmatmul.mubr.bf16.gmra.mrb[172].mxu1 %v26512_v31  ;;  %v26537_v31 = vld [vmem:[#allocation2 + $0x178] sm:$0xff]  }
 0xb6f   :  { %24644 = vmatprep.mubr.bf16.mxu1 %v26513_v27  ;;  %v26536_v27 = vld [vmem:[#allocation2 + $0x170] sm:$0xff]  }
 0xb76   :  { %24645 = vmatmul.mubr.bf16.gmra.mrb[176].mxu1 %v26515_v56  ;;  %v26538_v56 = vld [vmem:[#allocation2 + $0x180] sm:$0xff]  }
 0xb77   :  { %24648 = vmatprep.mubr.bf16.mxu1 %v26516_v33  ;;  %v26539_v33 = vld [vmem:[#allocation2 + $0x188] sm:$0xff]  }
 0xb7e   :  { %24649 = vmatmul.mubr.bf16.gmra.mrb[180].mxu1 %v26517_v22  ;;  %v26540_v22 = vld [vmem:[#allocation2 + $0x190] sm:$0xff]  }
 0xb7f   :  { %24652 = vmatprep.mubr.bf16.mxu1 %v26518_v47  ;;  %v26541_v47 = vld [vmem:[#allocation2 + $0x18] sm:$0xff]  }
 0xb86   :  { %24653 = vmatmul.mubr.bf16.gmra.mrb[184].mxu1 %v26519_v51  ;;  %v26542_v51 = vld [vmem:[#allocation2 + $0x20] sm:$0xff]  }
 0xb87   :  { %24656 = vmatprep.mubr.bf16.mxu1 %v26520_v61  ;;  %v26543_v61 = vld [vmem:[#allocation2 + $0x28] sm:$0xff]  }
 0xb8e   :  { %24657 = vmatmul.mubr.bf16.gmra.mrb[188].mxu1 %v26522_v28  ;;  %v26544_v28 = vld [vmem:[#allocation2 + $0x30] sm:$0xff]  }
 0xb8f   :  { %24660 = vmatprep.mubr.bf16.mxu1 %v26523_v40  ;;  %v26545_v40 = vld [vmem:[#allocation2 + $0x38] sm:$0xff]  }
 0xb96   :  { %24661 = vmatmul.mubr.bf16.gmra.mrb[192].mxu1 %v26524_v30  ;;  %v26546_v30 = vld [vmem:[#allocation2 + $0x40] sm:$0xff]  }
 0xb97   :  { %24664 = vmatprep.mubr.bf16.mxu1 %v26525_v49  ;;  %v26547_v49 = vld [vmem:[#allocation2 + $0x48] sm:$0xff]  }
 0xb9e   :  { %24665 = vmatmul.mubr.bf16.gmra.mrb[196].mxu1 %v26526_v16  ;;  %v26548_v16 = vld [vmem:[#allocation2 + $0x50] sm:$0xff]  }
 0xb9f   :  { %24668 = vmatprep.mubr.bf16.mxu1 %v26527_v5  ;;  %v26549_v5 = vld [vmem:[#allocation2 + $0x58] sm:$0xff]  }
 0xba6   :  { %24669 = vmatmul.mubr.bf16.gmra.mrb[200].mxu1 %v26529_v50  ;;  %v26550_v50 = vld [vmem:[#allocation2 + $0x60] sm:$0xff]  }
 0xba7   :  { %24672 = vmatprep.mubr.bf16.mxu1 %v26530_v35  ;;  %v26551_v35 = vld [vmem:[#allocation2 + $0x68] sm:$0xff]  }
 0xbae   :  { %24673 = vmatmul.mubr.bf16.gmra.mrb[204].mxu1 %v26531_v42  ;;  %v26552_v42 = vld [vmem:[#allocation2 + $0x70] sm:$0xff]  }
 0xbaf   :  { %24676 = vmatprep.mubr.bf16.mxu1 %v26532_v11  ;;  %v26553_v11 = vld [vmem:[#allocation2 + $0x78] sm:$0xff]  }
 0xbb6   :  { %24677 = vmatmul.mubr.bf16.gmra.mrb[208].mxu1 %v26533_v19  ;;  %v26554_v19 = vld [vmem:[#allocation2 + $0x80] sm:$0xff]  }
 0xbb7   :  { %24680 = vmatprep.mubr.bf16.mxu1 %v26534_v57  ;;  %v26555_v57 = vld [vmem:[#allocation2 + $0x88] sm:$0xff]  }
 0xbbe   :  { %24681 = vmatmul.mubr.bf16.gmra.mrb[212].mxu1 %v26536_v27  ;;  %v26556_v27 = vld [vmem:[#allocation2 + $0x90] sm:$0xff]  }
 0xbbf   :  { %24684 = vmatprep.mubr.bf16.mxu1 %v26537_v31  ;;  %v26557_v31 = vld [vmem:[#allocation2 + $0x98] sm:$0xff]  }
 0xbc6   :  { %24685 = vmatmul.mubr.bf16.gmra.mrb[216].mxu1 %v26538_v56  ;;  %v26558_v56 = vld [vmem:[#allocation2 + $0xa0] sm:$0xff]  }
 0xbc7   :  { %24688 = vmatprep.mubr.bf16.mxu1 %v26539_v33  ;;  %v26559_v33 = vld [vmem:[#allocation2 + $0xa8] sm:$0xff]  }
 0xbce   :  { %24689 = vmatmul.mubr.bf16.gmra.mrb[220].mxu1 %v26540_v22  ;;  %v26560_v22 = vld [vmem:[#allocation2 + $0xb0] sm:$0xff]  }
 0xbcf   :  { %24708 = vmatprep.mubr.bf16.mxu1 %v26541_v47  ;;  %v26561_v47 = vld [vmem:[#allocation2 + $0xb8] sm:$0xff]  }
 0xbd6   :  { %24709 = vmatmul.mubr.bf16.vlgmr.msra.gmra.mrb[128].mxu1 %v26542_v51  ;;  %v26563_v51 = vld [vmem:[#allocation2 + $0xc8] sm:$0xff]  }
 0xbd7   :  { %24712 = vmatprep.mubr.bf16.mxu1 %v26543_v61  ;;  %v26562_v61 = vld [vmem:[#allocation2 + $0xc0] sm:$0xff]  }
 0xbde   :  { %24713 = vmatmul.mubr.bf16.gmra.mrb[132].mxu1 %v26544_v28  ;;  %v26564_v28 = vld [vmem:[#allocation2 + $0xd0] sm:$0xff]  }
 0xbdf   :  { %24716 = vmatprep.mubr.bf16.mxu1 %v26545_v40  ;;  %v26565_v40 = vld [vmem:[#allocation2 + $0xf0] sm:$0xff]  }
 0xbe6   :  { %24717 = vmatmul.mubr.bf16.gmra.mrb[136].mxu1 %v26546_v30  ;;  %v26566_v30 = vld [vmem:[#allocation2 + $0xf8] sm:$0xff]  }
 0xbe7   :  { %24720 = vmatprep.mubr.bf16.mxu1 %v26547_v49  ;;  %v26567_v49 = vld [vmem:[#allocation2 + $0x100] sm:$0xff]  }
 0xbee   :  { %24721 = vmatmul.mubr.bf16.gmra.mrb[140].mxu1 %v26548_v16  ;;  %v26568_v16 = vld [vmem:[#allocation2 + $0x108] sm:$0xff]  }
 0xbef   :  { %24724 = vmatprep.mubr.bf16.mxu1 %v26549_v5  ;;  %v26569_v5 = vld [vmem:[#allocation2 + $0x110] sm:$0xff]  }
 0xbf6   :  { %24725 = vmatmul.mubr.bf16.gmra.mrb[144].mxu1 %v26550_v50  ;;  %v26570_v50 = vld [vmem:[#allocation2 + $0x118] sm:$0xff]  }
 0xbf7   :  { %24728 = vmatprep.mubr.bf16.mxu1 %v26551_v35  ;;  %v26571_v35 = vld [vmem:[#allocation2 + $0x120] sm:$0xff]  }
 0xbfe   :  { %24729 = vmatmul.mubr.bf16.gmra.mrb[148].mxu1 %v26552_v42  ;;  %v26572_v42 = vld [vmem:[#allocation2 + $0x128] sm:$0xff]  }
 0xbff   :  { %24732 = vmatprep.mubr.bf16.mxu1 %v26553_v11  ;;  %v26573_v11 = vld [vmem:[#allocation2 + $0x130] sm:$0xff]  }
 0xc06   :  { %24733 = vmatmul.mubr.bf16.gmra.mrb[152].mxu1 %v26554_v19  ;;  %v26574_v19 = vld [vmem:[#allocation2 + $0x138] sm:$0xff]  }
 0xc07   :  { %24736 = vmatprep.mubr.bf16.mxu1 %v26555_v57  ;;  %v26575_v57 = vld [vmem:[#allocation2 + $0x140] sm:$0xff]  }
 0xc0e   :  { %24737 = vmatmul.mubr.bf16.gmra.mrb[156].mxu1 %v26556_v27  ;;  %v26576_v27 = vld [vmem:[#allocation2 + $0x148] sm:$0xff]  }
 0xc0f   :  { %24740 = vmatprep.mubr.bf16.mxu1 %v26557_v31  ;;  %v26577_v31 = vld [vmem:[#allocation2 + $0x150] sm:$0xff]  }
 0xc16   :  { %24741 = vmatmul.mubr.bf16.gmra.mrb[160].mxu1 %v26558_v56  ;;  %v26578_v56 = vld [vmem:[#allocation2 + $0x158] sm:$0xff]  }
 0xc17   :  { %24744 = vmatprep.mubr.bf16.mxu1 %v26559_v33  ;;  %v26579_v33 = vld [vmem:[#allocation2 + $0x160] sm:$0xff]  }
 0xc1e   :  { %24745 = vmatmul.mubr.bf16.gmra.mrb[164].mxu1 %v26560_v22  ;;  %v26580_v22 = vld [vmem:[#allocation2 + $0x168] sm:$0xff]  }
 0xc1f   :  { %24748 = vmatprep.mubr.bf16.mxu1 %v26561_v47  ;;  %v26581_v47 = vld [vmem:[#allocation2 + $0x170] sm:$0xff]  }
 0xc26   :  { %24749 = vmatmul.mubr.bf16.gmra.mrb[168].mxu1 %v26562_v61  ;;  %v26583_v61 = vld [vmem:[#allocation2 + $0x180] sm:$0xff]  }
 0xc27   :  { %24752 = vmatprep.mubr.bf16.mxu1 %v26563_v51  ;;  %v26582_v51 = vld [vmem:[#allocation2 + $0x178] sm:$0xff]  }
 0xc2e   :  { %24753 = vmatmul.mubr.bf16.gmra.mrb[172].mxu1 %v26564_v28  ;;  %v26584_v28 = vld [vmem:[#allocation2 + $0x188] sm:$0xff]  }
 0xc2f   :  { %24756 = vmatprep.mubr.bf16.mxu1 %v26565_v40  ;;  %v26585_v40 = vld [vmem:[#allocation2 + $0x190] sm:$0xff]  }
 0xc36   :  { %24757 = vmatmul.mubr.bf16.gmra.mrb[176].mxu1 %v26566_v30  ;;  %v26587_v30 = vld [vmem:[#allocation2 + $0x1a0] sm:$0xff]  }
 0xc37   :  { %24760 = vmatprep.mubr.bf16.mxu1 %v26567_v49  ;;  %v26586_v49 = vld [vmem:[#allocation2 + $0x198] sm:$0xff]  }
 0xc3e   :  { %24761 = vmatmul.mubr.bf16.gmra.mrb[180].mxu1 %v26568_v16  ;;  %v26588_v16 = vld [vmem:[#allocation2 + $0x1a8] sm:$0xff]  }
 0xc3f   :  { %24764 = vmatprep.mubr.bf16.mxu1 %v26569_v5 }
 0xc46   :  { %24765 = vmatmul.mubr.bf16.gmra.mrb[184].mxu1 %v26570_v50 }
 0xc47   :  { %24768 = vmatprep.mubr.bf16.mxu1 %v26571_v35 }
 0xc4e   :  { %24769 = vmatmul.mubr.bf16.gmra.mrb[188].mxu1 %v26572_v42 }
 0xc4f   :  { %24772 = vmatprep.mubr.bf16.mxu1 %v26573_v11 }
 0xc56   :  { %24773 = vmatmul.mubr.bf16.gmra.mrb[192].mxu1 %v26574_v19 }
 0xc57   :  { %24776 = vmatprep.mubr.bf16.mxu1 %v26575_v57 }
 0xc5e   :  { %24777 = vmatmul.mubr.bf16.gmra.mrb[196].mxu1 %v26576_v27 }
 0xc5f   :  { %24780 = vmatprep.mubr.bf16.mxu1 %v26577_v31 }
 0xc66   :  { %24781 = vmatmul.mubr.bf16.gmra.mrb[200].mxu1 %v26578_v56  ;;  %v30212_v56 = vld [vmem:[%s30481_s3] ss:$0 sm:$0xff] }
 0xc67   :  { %24784 = vmatprep.mubr.bf16.mxu1 %v26579_v33 }
 0xc6e   :  { %24785 = vmatmul.mubr.bf16.gmra.mrb[204].mxu1 %v26580_v22 }
 0xc6f   :  { %24788 = vmatprep.mubr.bf16.mxu1 %v26581_v47  ;;  %v20113_v47 = vld [vmem:[#allocation4] sm:$0xff] }
 0xc76   :  { %24789 = vmatmul.mubr.bf16.gmra.mrb[208].mxu1 %v26582_v51  ;;  %v20114_v51 = vld [vmem:[#allocation4 + $0x8] sm:$0xff] }
 0xc77   :  { %24792 = vmatprep.mubr.bf16.mxu1 %v26583_v61 }
 0xc7e   :  { %24793 = vmatmul.mubr.bf16.gmra.mrb[212].mxu1 %v26584_v28 }
 0xc7f   :  { %24796 = vmatprep.mubr.bf16.mxu1 %v26585_v40 }
 0xc86   :  { %24797 = vmatmul.mubr.bf16.gmra.mrb[216].mxu1 %v26586_v49 }
 0xc87   :  { %24800 = vmatprep.mubr.bf16.mxu1 %v26587_v30 }
 0xc8e   :  { %24801 = vmatmul.mubr.bf16.gmra.mrb[220].mxu1 %v26588_v16 }
 0xca9   :  { %v24710_v5 = vpop.f32.mrb[128].mxu1 }
 0xcaa   :  { %v19019_v50 = vpop.f32.mrb[129].mxu1  ;;  %v19500_v11 = vrot.slane %v24710_v5, 1 }
 0xcab   :  { %v24711_v35 = vpop.f32.mrb[130].mxu1  ;;  %v19498_v19 = vrot.slane %v19019_v50, 1 }
 0xcac   :  { %v19022_v42 = vpop.f32.mrb[131].mxu1  ;;  %v19501_v49 = vrot.slane %v24711_v35, 1 }
 0xcad   :  { %v19499_v57 = vrot.slane %v19022_v42, 1 }
 0xcaf   :  { %v19687_v27 = vsel %vm9660_vm1, %v19499_v57, %v19500_v11  ;;  %v19688_v31 = vsel %vm9660_vm1, %v19498_v19, %v19499_v57 }
 0xcb0   :  { %v19786_v33 = vadd.f32 %v19688_v31, %v29872_v18  ;;  %v19787_v22 = vadd.f32 %v19687_v27, %v29879_v63 }
 0xcb1   :  { %v24714_v61 = vpop.f32.mrb[132].mxu1 }
 0xcb2   :  { %v20049_v28 = vadd.f32 %v30212_v56, %v19786_v33  ;;  %v20050_v40 = vadd.f32 %v30212_v56, %v19787_v22  ;;  %v19035_v30 = vpop.f32.mrb[133].mxu1  ;;  %v19504_v11 = vrot.slane %v24714_v61, 1  ;;  %v20115_v33 = vld [vmem:[#allocation4 + $0x10] sm:$0xff] }
 0xcb3   :  { %v19502_v16 = vrot.slane %v19035_v30, 1  ;;  %v24715_v5 = vpop.f32.mrb[134].mxu1 }
 0xcb4   :  { %v20177_v50 = vadd.f32 %v20113_v47, %v20049_v28  ;;  %v20178_v42 = vadd.f32 %v20114_v51, %v20050_v40  ;;  %v19505_v19 = vrot.slane %v24715_v5, 1  ;;  %v19038_v57 = vpop.f32.mrb[135].mxu1  ;;  %v20117_v51 = vld [vmem:[#allocation4 + $0x20] sm:$0xff]  ;;  %v20116_v40 = vld [vmem:[#allocation4 + $0x18] sm:$0xff] }
 0xcb5   :  { %v19685_v18 = vsel %vm9660_vm1, %v19501_v49, %v19502_v16  ;;  %v19503_v63 = vrot.slane %v19038_v57, 1 }
 0xcb6   :  { %20241 = vst [vmem:[#allocation10] sm:$0xff] %v20177_v50  ;;  %20242 = vst [vmem:[#allocation10 + $0x8] sm:$0xff] %v20178_v42  ;;  %v19789_v27 = vadd.f32 %v19685_v18, %v29876_v58  ;;  %v19682_v31 = vsel %vm9660_vm1, %v19504_v11, %v19505_v19 }
 0xcb7   :  { %v19792_v35 = vadd.f32 %v19682_v31, %v29887_v25  ;;  %v19684_v22 = vsel %vm9660_vm1, %v19502_v16, %v19503_v63 }
 0xcb8   :  { %v20051_v47 = vadd.f32 %v30212_v56, %v19789_v27  ;;  %v19790_v61 = vadd.f32 %v19684_v22, %v29891_v38 }
 0xcb9   :  { %v20053_v28 = vadd.f32 %v30212_v56, %v19792_v35  ;;  %v24718_v30 = vpop.f32.mrb[136].mxu1 }
 0xcba   :  { %v20179_v49 = vadd.f32 %v20115_v33, %v20051_v47  ;;  %v20052_v58 = vadd.f32 %v30212_v56, %v19790_v61  ;;  %v19051_v5 = vpop.f32.mrb[137].mxu1  ;;  %v19508_v57 = vrot.slane %v24718_v30, 1  ;;  %v20118_v33 = vld [vmem:[#allocation4 + $0x28] sm:$0xff] }
 0xcbb   :  { %v20181_v50 = vadd.f32 %v20117_v51, %v20053_v28  ;;  %v19506_v42 = vrot.slane %v19051_v5, 1  ;;  %v24719_v11 = vpop.f32.mrb[138].mxu1  ;;  %v20120_v51 = vld [vmem:[#allocation4 + $0x38] sm:$0xff]  ;;  %v20119_v28 = vld [vmem:[#allocation4 + $0x30] sm:$0xff] }
 0xcbc   :  { %20243 = vst [vmem:[#allocation10 + $0x10] sm:$0xff] %v20179_v49  ;;  %v20180_v25 = vadd.f32 %v20116_v40, %v20052_v58  ;;  %v19509_v16 = vrot.slane %v24719_v11, 1  ;;  %v19054_v18 = vpop.f32.mrb[139].mxu1 }
 0xcbd   :  { %20245 = vst [vmem:[#allocation10 + $0x20] sm:$0xff] %v20181_v50  ;;  %v19681_v38 = vsel %vm9660_vm1, %v19505_v19, %v19506_v42  ;;  %v19507_v63 = vrot.slane %v19054_v18, 1 }
 0xcbe   :  { %20244 = vst [vmem:[#allocation10 + $0x18] sm:$0xff] %v20180_v25  ;;  %v19793_v27 = vadd.f32 %v19681_v38, %v29894_v45  ;;  %v19678_v31 = vsel %vm9660_vm1, %v19508_v57, %v19509_v16  ;;  %v20121_v38 = vld [vmem:[#allocation4 + $0x40] sm:$0xff] }
 0xcbf   :  { %v19796_v35 = vadd.f32 %v19678_v31, %v29900_v32  ;;  %v19679_v22 = vsel %vm9660_vm1, %v19507_v63, %v19508_v57  ;;  %v20122_v63 = vld [vmem:[#allocation4 + $0x48] sm:$0xff] }
 0xcc0   :  { %v20054_v47 = vadd.f32 %v30212_v56, %v19793_v27  ;;  %v19795_v61 = vadd.f32 %v19679_v22, %v29904_v41 }
 0xcc1   :  { %v20056_v19 = vadd.f32 %v30212_v56, %v19796_v35  ;;  %v24722_v40 = vpop.f32.mrb[140].mxu1 }
 0xcc2   :  { %v20182_v30 = vadd.f32 %v20118_v33, %v20054_v47  ;;  %v20055_v45 = vadd.f32 %v30212_v56, %v19795_v61  ;;  %v19067_v49 = vpop.f32.mrb[141].mxu1  ;;  %v19512_v42 = vrot.slane %v24722_v40, 1 }
 0xcc3   :  { %v20184_v58 = vadd.f32 %v20120_v51, %v20056_v19  ;;  %v24723_v5 = vpop.f32.mrb[142].mxu1  ;;  %v19510_v11 = vrot.slane %v19067_v49, 1 }
 0xcc4   :  { %20246 = vst [vmem:[#allocation10 + $0x28] sm:$0xff] %v20182_v30  ;;  %v20183_v32 = vadd.f32 %v20119_v28, %v20055_v45  ;;  %v19070_v50 = vpop.f32.mrb[143].mxu1  ;;  %v19513_v22 = vrot.slane %v24723_v5, 1 }
 0xcc5   :  { %20248 = vst [vmem:[#allocation10 + $0x38] sm:$0xff] %v20184_v58  ;;  %v19511_v25 = vrot.slane %v19070_v50, 1  ;;  %v20123_v58 = vld [vmem:[#allocation4 + $0x50] sm:$0xff] }
 0xcc6   :  { %20247 = vst [vmem:[#allocation10 + $0x30] sm:$0xff] %v20183_v32 }
 0xcc7   :  { %v19675_v41 = vsel %vm9660_vm1, %v19511_v25, %v19512_v42  ;;  %v19676_v57 = vsel %vm9660_vm1, %v19510_v11, %v19511_v25  ;;  %v20125_v42 = vld [vmem:[#allocation4 + $0x60] sm:$0xff] }
 0xcc8   :  { %v19798_v16 = vadd.f32 %v19676_v57, %v29912_v7  ;;  %v19799_v18 = vadd.f32 %v19675_v41, %v29919_v60  ;;  %v20124_v41 = vld [vmem:[#allocation4 + $0x58] sm:$0xff] }
 0xcc9   :  { %v24726_v27 = vpop.f32.mrb[144].mxu1 }
 0xcca   :  { %v20057_v31 = vadd.f32 %v30212_v56, %v19798_v16  ;;  %v20058_v33 = vadd.f32 %v30212_v56, %v19799_v18  ;;  %v19083_v35 = vpop.f32.mrb[145].mxu1  ;;  %v19516_v28 = vrot.slane %v24726_v27, 1 }
 0xccb   :  { %v19514_v47 = vrot.slane %v19083_v35, 1  ;;  %v24727_v51 = vpop.f32.mrb[146].mxu1 }
 0xccc   :  { %v20185_v61 = vadd.f32 %v20121_v38, %v20057_v31  ;;  %v20186_v19 = vadd.f32 %v20122_v63, %v20058_v33  ;;  %v19517_v40 = vrot.slane %v24727_v51, 1  ;;  %v19086_v30 = vpop.f32.mrb[147].mxu1 }
 0xccd   :  { %v19673_v7 = vsel %vm9660_vm1, %v19513_v22, %v19514_v47  ;;  %v19515_v60 = vrot.slane %v19086_v30, 1 }
 0xcce   :  { %20249 = vst [vmem:[#allocation10 + $0x40] sm:$0xff] %v20185_v61  ;;  %20250 = vst [vmem:[#allocation10 + $0x48] sm:$0xff] %v20186_v19  ;;  %v19801_v45 = vadd.f32 %v19673_v7, %v29916_v13  ;;  %v19670_v49 = vsel %vm9660_vm1, %v19516_v28, %v19517_v40  ;;  %v20126_v61 = vld [vmem:[#allocation4 + $0x68] sm:$0xff]  ;;  %v20128_v7 = vld [vmem:[#allocation4 + $0x78] sm:$0xff] }
 0xccf   :  { %v19804_v5 = vadd.f32 %v19670_v49, %v29927_v21  ;;  %v19672_v32 = vsel %vm9660_vm1, %v19514_v47, %v19515_v60 }
 0xcd0   :  { %v20059_v50 = vadd.f32 %v30212_v56, %v19801_v45  ;;  %v19802_v11 = vadd.f32 %v19672_v32, %v29931_v62  ;;  %v20127_v45 = vld [vmem:[#allocation4 + $0x70] sm:$0xff] }
 0xcd1   :  { %v20061_v25 = vadd.f32 %v30212_v56, %v19804_v5  ;;  %v24730_v57 = vpop.f32.mrb[148].mxu1 }
 0xcd2   :  { %v20187_v16 = vadd.f32 %v20123_v58, %v20059_v50  ;;  %v20060_v13 = vadd.f32 %v30212_v56, %v19802_v11  ;;  %v19099_v18 = vpop.f32.mrb[149].mxu1  ;;  %v19520_v31 = vrot.slane %v24730_v57, 1 }
 0xcd3   :  { %v20189_v38 = vadd.f32 %v20125_v42, %v20061_v25  ;;  %v19518_v63 = vrot.slane %v19099_v18, 1  ;;  %v24731_v27 = vpop.f32.mrb[150].mxu1  ;;  %v20129_v18 = vld [vmem:[#allocation4 + $0x80] sm:$0xff] }
 0xcd4   :  { %20251 = vst [vmem:[#allocation10 + $0x50] sm:$0xff] %v20187_v16  ;;  %v20188_v21 = vadd.f32 %v20124_v41, %v20060_v13  ;;  %v19521_v33 = vrot.slane %v24731_v27, 1  ;;  %v19102_v35 = vpop.f32.mrb[151].mxu1 }
 0xcd5   :  { %20253 = vst [vmem:[#allocation10 + $0x60] sm:$0xff] %v20189_v38  ;;  %v19669_v62 = vsel %vm9660_vm1, %v19517_v40, %v19518_v63  ;;  %v19519_v22 = vrot.slane %v19102_v35, 1  ;;  %v20130_v38 = vld [vmem:[#allocation4 + $0x88] sm:$0xff] }
 0xcd6   :  { %20252 = vst [vmem:[#allocation10 + $0x58] sm:$0xff] %v20188_v21  ;;  %v19805_v47 = vadd.f32 %v19669_v62, %v29934_v34  ;;  %v19666_v51 = vsel %vm9660_vm1, %v19520_v31, %v19521_v33 }
 0xcd7   :  { %v19808_v19 = vadd.f32 %v19666_v51, %v29940_v3  ;;  %v19667_v28 = vsel %vm9660_vm1, %v19519_v22, %v19520_v31 }
 0xcd8   :  { %v20062_v30 = vadd.f32 %v30212_v56, %v19805_v47  ;;  %v19807_v60 = vadd.f32 %v19667_v28, %v29944_v26 }
 0xcd9   :  { %v20064_v40 = vadd.f32 %v30212_v56, %v19808_v19  ;;  %v24734_v49 = vpop.f32.mrb[152].mxu1 }
 0xcda   :  { %v20190_v58 = vadd.f32 %v20126_v61, %v20062_v30  ;;  %v20063_v34 = vadd.f32 %v30212_v56, %v19807_v60  ;;  %v19115_v5 = vpop.f32.mrb[153].mxu1  ;;  %v19524_v11 = vrot.slane %v24734_v49, 1  ;;  %v20133_v49 = vld [vmem:[#allocation4 + $0xa0] sm:$0xff] }
 0xcdb   :  { %v20192_v32 = vadd.f32 %v20128_v7, %v20064_v40  ;;  %v24735_v50 = vpop.f32.mrb[154].mxu1  ;;  %v19522_v25 = vrot.slane %v19115_v5, 1  ;;  %v20131_v7 = vld [vmem:[#allocation4 + $0x90] sm:$0xff]  ;;  %v20132_v5 = vld [vmem:[#allocation4 + $0x98] sm:$0xff] }
 0xcdc   :  { %20254 = vst [vmem:[#allocation10 + $0x68] sm:$0xff] %v20190_v58  ;;  %v20191_v3 = vadd.f32 %v20127_v45, %v20063_v34  ;;  %v19118_v42 = vpop.f32.mrb[155].mxu1  ;;  %v19525_v33 = vrot.slane %v24735_v50, 1 }
 0xcdd   :  { %20256 = vst [vmem:[#allocation10 + $0x78] sm:$0xff] %v20192_v32  ;;  %v19523_v41 = vrot.slane %v19118_v42, 1 }
 0xcde   :  { %20255 = vst [vmem:[#allocation10 + $0x70] sm:$0xff] %v20191_v3 }
 0xcdf   :  { %v19663_v26 = vsel %vm9660_vm1, %v19523_v41, %v19524_v11  ;;  %v19664_v57 = vsel %vm9660_vm1, %v19522_v25, %v19523_v41 }
 0xce0   :  { %v19810_v16 = vadd.f32 %v19664_v57, %v29956_v44  ;;  %v19811_v13 = vadd.f32 %v19663_v26, %v29964_v20 }
 0xce1   :  { %v24738_v63 = vpop.f32.mrb[156].mxu1 }
 0xce2   :  { %v20065_v27 = vadd.f32 %v30212_v56, %v19810_v16  ;;  %v20066_v21 = vadd.f32 %v30212_v56, %v19811_v13  ;;  %v19131_v31 = vpop.f32.mrb[157].mxu1  ;;  %v19528_v51 = vrot.slane %v24738_v63, 1 }
 0xce3   :  { %v19526_v35 = vrot.slane %v19131_v31, 1  ;;  %v24739_v62 = vpop.f32.mrb[158].mxu1  ;;  %v20136_v31 = vld [vmem:[#allocation4 + $0xb8] sm:$0xff] }
 0xce4   :  { %v20193_v22 = vadd.f32 %v20129_v18, %v20065_v27  ;;  %v20194_v47 = vadd.f32 %v20130_v38, %v20066_v21  ;;  %v19529_v61 = vrot.slane %v24739_v62, 1  ;;  %v19134_v19 = vpop.f32.mrb[159].mxu1  ;;  %v20134_v38 = vld [vmem:[#allocation4 + $0xa8] sm:$0xff]  ;;  %v20135_v62 = vld [vmem:[#allocation4 + $0xb0] sm:$0xff] }
 0xce5   :  { %v19661_v44 = vsel %vm9660_vm1, %v19525_v33, %v19526_v35  ;;  %v19527_v20 = vrot.slane %v19134_v19, 1 }
 0xce6   :  { %20257 = vst [vmem:[#allocation10 + $0x80] sm:$0xff] %v20193_v22  ;;  %20258 = vst [vmem:[#allocation10 + $0x88] sm:$0xff] %v20194_v47  ;;  %v19813_v28 = vadd.f32 %v19661_v44, %v29960_v43  ;;  %v19658_v30 = vsel %vm9660_vm1, %v19528_v51, %v19529_v61 }
 0xce7   :  { %v19816_v60 = vadd.f32 %v19658_v30, %v29979_v24  ;;  %v19660_v40 = vsel %vm9660_vm1, %v19526_v35, %v19527_v20 }
 0xce8   :  { %v20067_v45 = vadd.f32 %v30212_v56, %v19813_v28  ;;  %v19814_v58 = vadd.f32 %v19660_v40, %v29987_v29 }
 0xce9   :  { %v20069_v34 = vadd.f32 %v30212_v56, %v19816_v60  ;;  %v24742_v32 = vpop.f32.mrb[160].mxu1 }
 0xcea   :  { %v20195_v50 = vadd.f32 %v20131_v7, %v20067_v45  ;;  %v20068_v43 = vadd.f32 %v30212_v56, %v19814_v58  ;;  %v19147_v3 = vpop.f32.mrb[161].mxu1  ;;  %v19532_v41 = vrot.slane %v24742_v32, 1  ;;  %v20137_v45 = vld [vmem:[#allocation4 + $0xc0] sm:$0xff] }
 0xceb   :  { %v20197_v42 = vadd.f32 %v20133_v49, %v20069_v34  ;;  %v19530_v11 = vrot.slane %v19147_v3, 1  ;;  %v24743_v25 = vpop.f32.mrb[162].mxu1  ;;  %v20138_v49 = vld [vmem:[#allocation4 + $0xc8] sm:$0xff] }
 0xcec   :  { %20259 = vst [vmem:[#allocation10 + $0x90] sm:$0xff] %v20195_v50  ;;  %v20196_v24 = vadd.f32 %v20132_v5, %v20068_v43  ;;  %v19533_v26 = vrot.slane %v24743_v25, 1  ;;  %v19150_v57 = vpop.f32.mrb[163].mxu1 }
 0xced   :  { %20261 = vst [vmem:[#allocation10 + $0xa0] sm:$0xff] %v20197_v42  ;;  %v19657_v29 = vsel %vm9660_vm1, %v19529_v61, %v19530_v11  ;;  %v19531_v16 = vrot.slane %v19150_v57, 1 }
 0xcee   :  { %20260 = vst [vmem:[#allocation10 + $0x98] sm:$0xff] %v20196_v24  ;;  %v19817_v13 = vadd.f32 %v19657_v29, %v29990_v2  ;;  %v19654_v18 = vsel %vm9660_vm1, %v19532_v41, %v19533_v26  ;;  %v20139_v29 = vld [vmem:[#allocation4 + $0xd0] sm:$0xff] }
 0xcef   :  { %v19820_v63 = vadd.f32 %v19654_v18, %v29998_v10  ;;  %v19655_v27 = vsel %vm9660_vm1, %v19531_v16, %v19532_v41 }
 0xcf0   :  { %v20070_v21 = vadd.f32 %v30212_v56, %v19817_v13  ;;  %v19819_v33 = vadd.f32 %v19655_v27, %v30002_v17 }
 0xcf1   :  { %v20072_v35 = vadd.f32 %v30212_v56, %v19820_v63  ;;  %v24746_v22 = vpop.f32.mrb[164].mxu1 }
 0xcf2   :  { %v20198_v47 = vadd.f32 %v20134_v38, %v20070_v21  ;;  %v20071_v2 = vadd.f32 %v30212_v56, %v19819_v33  ;;  %v19163_v51 = vpop.f32.mrb[165].mxu1  ;;  %v19536_v20 = vrot.slane %v24746_v22, 1  ;;  %v20141_v38 = vld [vmem:[#allocation4 + $0xe0] sm:$0xff]  ;;  %v20140_v21 = vld [vmem:[#allocation4 + $0xd8] sm:$0xff] }
 0xcf3   :  { %v20200_v61 = vadd.f32 %v20136_v31, %v20072_v35  ;;  %v24747_v19 = vpop.f32.mrb[166].mxu1  ;;  %v19534_v28 = vrot.slane %v19163_v51, 1 }
 0xcf4   :  { %20262 = vst [vmem:[#allocation10 + $0xa8] sm:$0xff] %v20198_v47  ;;  %v20199_v10 = vadd.f32 %v20135_v62, %v20071_v2  ;;  %v19166_v44 = vpop.f32.mrb[167].mxu1  ;;  %v19537_v50 = vrot.slane %v24747_v19, 1 }
 0xcf5   :  { %20264 = vst [vmem:[#allocation10 + $0xb8] sm:$0xff] %v20200_v61  ;;  %v19535_v30 = vrot.slane %v19166_v44, 1 }
 0xcf6   :  { %20263 = vst [vmem:[#allocation10 + $0xb0] sm:$0xff] %v20199_v10 }
 0xcf7   :  { %v19651_v17 = vsel %vm9660_vm1, %v19535_v30, %v19536_v20  ;;  %v19652_v7 = vsel %vm9660_vm1, %v19534_v28, %v19535_v30  ;;  %v20142_v20 = vld [vmem:[#allocation4 + $0xe8] sm:$0xff] }
 0xcf8   :  { %v19822_v60 = vadd.f32 %v19652_v7, %v30010_v1  ;;  %v19823_v40 = vadd.f32 %v19651_v17, %v30017_v14  ;;  %v20144_v7 = vld [vmem:[#allocation4 + $0xf8] sm:$0xff] }
 0xcf9   :  { %v24750_v58 = vpop.f32.mrb[168].mxu1 }
 0xcfa   :  { %v20073_v34 = vadd.f32 %v30212_v56, %v19822_v60  ;;  %v20074_v5 = vadd.f32 %v30212_v56, %v19823_v40  ;;  %v19179_v32 = vpop.f32.mrb[169].mxu1  ;;  %v19540_v25 = vrot.slane %v24750_v58, 1 }
 0xcfb   :  { %v19538_v43 = vrot.slane %v19179_v32, 1  ;;  %v24751_v3 = vpop.f32.mrb[170].mxu1 }
 0xcfc   :  { %v20201_v42 = vadd.f32 %v20137_v45, %v20073_v34  ;;  %v20202_v11 = vadd.f32 %v20138_v49, %v20074_v5  ;;  %v19541_v24 = vrot.slane %v24751_v3, 1  ;;  %v19182_v41 = vpop.f32.mrb[171].mxu1  ;;  %v20143_v45 = vld [vmem:[#allocation4 + $0xf0] sm:$0xff] }
 0xcfd   :  { %v19649_v1 = vsel %vm9660_vm1, %v19537_v50, %v19538_v43  ;;  %v19539_v14 = vrot.slane %v19182_v41, 1  ;;  %v20145_v41 = vld [vmem:[#allocation4 + $0x100] sm:$0xff] }
 0xcfe   :  { %20265 = vst [vmem:[#allocation10 + $0xc0] sm:$0xff] %v20201_v42  ;;  %20266 = vst [vmem:[#allocation10 + $0xc8] sm:$0xff] %v20202_v11  ;;  %v19825_v26 = vadd.f32 %v19649_v1, %v30014_v39  ;;  %v19646_v57 = vsel %vm9660_vm1, %v19540_v25, %v19541_v24  ;;  %v20146_v1 = vld [vmem:[#allocation4 + $0x108] sm:$0xff] }
 0xcff   :  { %v19828_v16 = vadd.f32 %v19646_v57, %v30025_v59  ;;  %v19648_v13 = vsel %vm9660_vm1, %v19538_v43, %v19539_v14 }
 0xd00   :  { %v20075_v18 = vadd.f32 %v30212_v56, %v19825_v26  ;;  %v19826_v63 = vadd.f32 %v19648_v13, %v30029_v52 }
 0xd01   :  { %v20077_v27 = vadd.f32 %v30212_v56, %v19828_v16  ;;  %v24754_v31 = vpop.f32.mrb[172].mxu1 }
 0xd02   :  { %v20203_v33 = vadd.f32 %v20139_v29, %v20075_v18  ;;  %v20076_v39 = vadd.f32 %v30212_v56, %v19826_v63  ;;  %v19195_v35 = vpop.f32.mrb[173].mxu1  ;;  %v19544_v2 = vrot.slane %v24754_v31, 1 }
 0xd03   :  { %v20205_v62 = vadd.f32 %v20141_v38, %v20077_v27  ;;  %v19542_v22 = vrot.slane %v19195_v35, 1  ;;  %v24755_v47 = vpop.f32.mrb[174].mxu1  ;;  %v20147_v35 = vld [vmem:[#allocation4 + $0x110] sm:$0xff] }
 0xd04   :  { %20267 = vst [vmem:[#allocation10 + $0xd0] sm:$0xff] %v20203_v33  ;;  %v20204_v59 = vadd.f32 %v20140_v21, %v20076_v39  ;;  %v19545_v51 = vrot.slane %v24755_v47, 1  ;;  %v19198_v61 = vpop.f32.mrb[175].mxu1 }
 0xd05   :  { %20269 = vst [vmem:[#allocation10 + $0xe0] sm:$0xff] %v20205_v62  ;;  %v19645_v52 = vsel %vm9660_vm1, %v19541_v24, %v19542_v22  ;;  %v19543_v19 = vrot.slane %v19198_v61, 1 }
 0xd06   :  { %20268 = vst [vmem:[#allocation10 + $0xd8] sm:$0xff] %v20204_v59  ;;  %v19829_v10 = vadd.f32 %v19645_v52, %v30032_v23  ;;  %v19642_v44 = vsel %vm9660_vm1, %v19544_v2, %v19545_v51  ;;  %v20149_v59 = vld [vmem:[#allocation4 + $0x120] sm:$0xff]  ;;  %v20148_v52 = vld [vmem:[#allocation4 + $0x118] sm:$0xff] }
 0xd07   :  { %v19832_v28 = vadd.f32 %v19642_v44, %v30038_v36  ;;  %v19643_v30 = vsel %vm9660_vm1, %v19543_v19, %v19544_v2  ;;  %v31277_v2 = vld [vmem:[#allocation38_spill] sm:$0xff] }
 0xd08   :  { %v20078_v17 = vadd.f32 %v30212_v56, %v19829_v10  ;;  %v19831_v60 = vadd.f32 %v19643_v30, %v30042_v9 }
 0xd09   :  { %v20080_v40 = vadd.f32 %v30212_v56, %v19832_v28  ;;  %v24758_v49 = vpop.f32.mrb[176].mxu1 }
 0xd0a   :  { %v20206_v58 = vadd.f32 %v20142_v20, %v20078_v17  ;;  %v20079_v23 = vadd.f32 %v30212_v56, %v19831_v60  ;;  %v19211_v34 = vpop.f32.mrb[177].mxu1  ;;  %v19548_v43 = vrot.slane %v24758_v49, 1  ;;  %v31278_v49 = vld [vmem:[#allocation15_spill] sm:$0xff] }
 0xd0b   :  { %v20208_v5 = vadd.f32 %v20144_v7, %v20080_v40  ;;  %v24759_v32 = vpop.f32.mrb[178].mxu1  ;;  %v19546_v3 = vrot.slane %v19211_v34, 1  ;;  %v20150_v34 = vld [vmem:[#allocation4 + $0x128] sm:$0xff] }
 0xd0c   :  { %20270 = vst [vmem:[#allocation10 + $0xe8] sm:$0xff] %v20206_v58  ;;  %v20207_v36 = vadd.f32 %v20143_v45, %v20079_v23  ;;  %v19214_v50 = vpop.f32.mrb[179].mxu1  ;;  %v19549_v16 = vrot.slane %v24759_v32, 1 }
 0xd0d   :  { %20272 = vst [vmem:[#allocation10 + $0xf8] sm:$0xff] %v20208_v5  ;;  %v19547_v42 = vrot.slane %v19214_v50, 1  ;;  %v31279_v5 = vld [vmem:[#allocation39_spill] sm:$0xff] }
 0xd0e   :  { %20271 = vst [vmem:[#allocation10 + $0xf0] sm:$0xff] %v20207_v36 }
 0xd0f   :  { %v19639_v9 = vsel %vm9660_vm1, %v19547_v42, %v19548_v43  ;;  %v19640_v11 = vsel %vm9660_vm1, %v19546_v3, %v19547_v42  ;;  %v20152_v43 = vld [vmem:[#allocation4 + $0x138] sm:$0xff]  ;;  %v31280_v3 = vld [vmem:[#allocation92_spill] sm:$0xff] }
 0xd10   :  { %v19834_v25 = vadd.f32 %v19640_v11, %v30050_v12  ;;  %v19835_v24 = vadd.f32 %v19639_v9, %v30057_v8  ;;  %v20151_v11 = vld [vmem:[#allocation4 + $0x130] sm:$0xff] }
 0xd11   :  { %v24762_v14 = vpop.f32.mrb[180].mxu1 }
 0xd12   :  { %v20081_v26 = vadd.f32 %v30212_v56, %v19834_v25  ;;  %v20082_v57 = vadd.f32 %v30212_v56, %v19835_v24  ;;  %v19227_v29 = vpop.f32.mrb[181].mxu1  ;;  %v19552_v27 = vrot.slane %v24762_v14, 1 }
 0xd13   :  { %v19550_v13 = vrot.slane %v19227_v29, 1  ;;  %v24763_v18 = vpop.f32.mrb[182].mxu1 }
 0xd14   :  { %v20209_v38 = vadd.f32 %v20145_v41, %v20081_v26  ;;  %v20210_v63 = vadd.f32 %v20146_v1, %v20082_v57  ;;  %v19553_v21 = vrot.slane %v24763_v18, 1  ;;  %v19230_v31 = vpop.f32.mrb[183].mxu1 }
 0xd15   :  { %v19637_v12 = vsel %vm9660_vm1, %v19549_v16, %v19550_v13  ;;  %v19551_v8 = vrot.slane %v19230_v31, 1  ;;  %v31282_v31 = vld [vmem:[#allocation17_spill] sm:$0xff] }
 0xd16   :  { %20273 = vst [vmem:[#allocation10 + $0x100] sm:$0xff] %v20209_v38  ;;  %20274 = vst [vmem:[#allocation10 + $0x108] sm:$0xff] %v20210_v63  ;;  %v19837_v33 = vadd.f32 %v19637_v12, %v30054_v48  ;;  %v19634_v39 = vsel %vm9660_vm1, %v19552_v27, %v19553_v21  ;;  %v31281_v27 = vld [vmem:[#allocation16_spill] sm:$0xff] }
 0xd17   :  { %v19840_v62 = vadd.f32 %v19634_v39, %v30065_v37  ;;  %v19636_v22 = vsel %vm9660_vm1, %v19550_v13, %v19551_v8  ;;  %v20153_v8 = vld [vmem:[#allocation4 + $0x140] sm:$0xff] }
 0xd18   :  { %v20083_v47 = vadd.f32 %v30212_v56, %v19837_v33  ;;  %v19838_v51 = vadd.f32 %v19636_v22, %v31277_v2  ;;  %v20154_v33 = vld [vmem:[#allocation4 + $0x148] sm:$0xff] }
 0xd19   :  { %v20085_v61 = vadd.f32 %v30212_v56, %v19840_v62  ;;  %v24766_v19 = vpop.f32.mrb[184].mxu1 }
 0xd1a   :  { %v20211_v10 = vadd.f32 %v20147_v35, %v20083_v47  ;;  %v20084_v48 = vadd.f32 %v30212_v56, %v19838_v51  ;;  %v19243_v44 = vpop.f32.mrb[185].mxu1  ;;  %v19556_v17 = vrot.slane %v24766_v19, 1 }
 0xd1b   :  { %v20213_v20 = vadd.f32 %v20149_v59, %v20085_v61  ;;  %v19554_v28 = vrot.slane %v19243_v44, 1  ;;  %v24767_v30 = vpop.f32.mrb[186].mxu1 }
 0xd1c   :  { %20275 = vst [vmem:[#allocation10 + $0x110] sm:$0xff] %v20211_v10  ;;  %v20212_v37 = vadd.f32 %v20148_v52, %v20084_v48  ;;  %v19557_v7 = vrot.slane %v24767_v30, 1  ;;  %v19246_v60 = vpop.f32.mrb[187].mxu1 }
 0xd1d   :  { %20277 = vst [vmem:[#allocation10 + $0x120] sm:$0xff] %v20213_v20  ;;  %v19633_v40 = vsel %vm9660_vm1, %v19553_v21, %v19554_v28  ;;  %v19555_v45 = vrot.slane %v19246_v60, 1  ;;  %v31283_v20 = vld [vmem:[#allocation135_spill] sm:$0xff] }
 0xd1e   :  { %20276 = vst [vmem:[#allocation10 + $0x118] sm:$0xff] %v20212_v37  ;;  %v19841_v58 = vadd.f32 %v19633_v40, %v31278_v49  ;;  %v19630_v23 = vsel %vm9660_vm1, %v19556_v17, %v19557_v7  ;;  %v20155_v37 = vld [vmem:[#allocation4 + $0x150] sm:$0xff]  ;;  %v31285_v49 = vld [vmem:[#allocation93_spill] sm:$0xff] }
 0xd1f   :  { %v19844_v32 = vadd.f32 %v19630_v23, %v31279_v5  ;;  %v19631_v36 = vsel %vm9660_vm1, %v19555_v45, %v19556_v17  ;;  %v31284_v17 = vld [vmem:[#allocation90_spill] sm:$0xff] }
 0xd20   :  { %v20086_v50 = vadd.f32 %v30212_v56, %v19841_v58  ;;  %v19843_v42 = vadd.f32 %v19631_v36, %v31280_v3  ;;  %v20157_v45 = vld [vmem:[#allocation4 + $0x160] sm:$0xff] }
 0xd21   :  { %v20088_v9 = vadd.f32 %v30212_v56, %v19844_v32  ;;  %v24770_v25 = vpop.f32.mrb[188].mxu1 }
 0xd22   :  { %v20214_v24 = vadd.f32 %v20150_v34, %v20086_v50  ;;  %v20087_v41 = vadd.f32 %v30212_v56, %v19843_v42  ;;  %v19259_v1 = vpop.f32.mrb[189].mxu1  ;;  %v19560_v16 = vrot.slane %v24770_v25, 1  ;;  %v20156_v34 = vld [vmem:[#allocation4 + $0x158] sm:$0xff] }
 0xd23   :  { %v20216_v14 = vadd.f32 %v20152_v43, %v20088_v9  ;;  %v24771_v26 = vpop.f32.mrb[190].mxu1  ;;  %v19558_v13 = vrot.slane %v19259_v1, 1 }
 0xd24   :  { %20278 = vst [vmem:[#allocation10 + $0x128] sm:$0xff] %v20214_v24  ;;  %v20215_v57 = vadd.f32 %v20151_v11, %v20087_v41  ;;  %v19262_v29 = vpop.f32.mrb[191].mxu1  ;;  %v19561_v47 = vrot.slane %v24771_v26, 1 }
 0xd25   :  { %20280 = vst [vmem:[#allocation10 + $0x138] sm:$0xff] %v20216_v14  ;;  %v19559_v18 = vrot.slane %v19262_v29, 1  ;;  %v31286_v14 = vld [vmem:[#allocation40_spill] sm:$0xff]  ;;  %v20158_v29 = vld [vmem:[#allocation4 + $0x168] sm:$0xff] }
 0xd26   :  { %20279 = vst [vmem:[#allocation10 + $0x130] sm:$0xff] %v20215_v57 }
 0xd27   :  { %v19627_v38 = vsel %vm9660_vm1, %v19559_v18, %v19560_v16  ;;  %v19628_v63 = vsel %vm9660_vm1, %v19558_v13, %v19559_v18  ;;  %v31287_v16 = vld [vmem:[#allocation91_spill] sm:$0xff] }
 0xd28   :  { %v19846_v21 = vadd.f32 %v19628_v63, %v31281_v27  ;;  %v19847_v12 = vadd.f32 %v19627_v38, %v31282_v31  ;;  %v20160_v63 = vld [vmem:[#allocation4 + $0x178] sm:$0xff] }
 0xd29   :  { %v24774_v39 = vpop.f32.mrb[192].mxu1  ;;  %v31288_v27 = vld [vmem:[#allocation41_spill] sm:$0xff] }
 0xd2a   :  { %v20089_v35 = vadd.f32 %v30212_v56, %v19846_v21  ;;  %v20090_v62 = vadd.f32 %v30212_v56, %v19847_v12  ;;  %v19275_v22 = vpop.f32.mrb[193].mxu1  ;;  %v19564_v52 = vrot.slane %v24774_v39, 1  ;;  %v20159_v12 = vld [vmem:[#allocation4 + $0x170] sm:$0xff] }
 0xd2b   :  { %v19562_v59 = vrot.slane %v19275_v22, 1  ;;  %v24775_v2 = vpop.f32.mrb[194].mxu1 }
 0xd2c   :  { %v20217_v51 = vadd.f32 %v20153_v8, %v20089_v35  ;;  %v20218_v61 = vadd.f32 %v20154_v33, %v20090_v62  ;;  %v19565_v19 = vrot.slane %v24775_v2, 1  ;;  %v19278_v10 = vpop.f32.mrb[195].mxu1 }
 0xd2d   :  { %v19625_v48 = vsel %vm9660_vm1, %v19561_v47, %v19562_v59  ;;  %v19563_v44 = vrot.slane %v19278_v10, 1  ;;  %v31289_v10 = vld [vmem:[#allocation94_spill] sm:$0xff] }
 0xd2e   :  { %20281 = vst [vmem:[#allocation10 + $0x140] sm:$0xff] %v20217_v51  ;;  %20282 = vst [vmem:[#allocation10 + $0x148] sm:$0xff] %v20218_v61  ;;  %v19849_v28 = vadd.f32 %v19625_v48, %v31283_v20  ;;  %v19622_v30 = vsel %vm9660_vm1, %v19564_v52, %v19565_v19 }
 0xd2f   :  { %v19852_v7 = vadd.f32 %v19622_v30, %v31284_v17  ;;  %v19624_v60 = vsel %vm9660_vm1, %v19562_v59, %v19563_v44  ;;  %v31290_v44 = vld [vmem:[#allocation42_spill] sm:$0xff]  ;;  %v20162_v30 = vld [vmem:[#allocation4 + $0x188] sm:$0xff] }
 0xd30   :  { %v20091_v40 = vadd.f32 %v30212_v56, %v19849_v28  ;;  %v19850_v58 = vadd.f32 %v19624_v60, %v31285_v49  ;;  %v20161_v28 = vld [vmem:[#allocation4 + $0x180] sm:$0xff] }
 0xd31   :  { %v20093_v23 = vadd.f32 %v30212_v56, %v19852_v7  ;;  %v24778_v5 = vpop.f32.mrb[196].mxu1 }
 0xd32   :  { %v20219_v32 = vadd.f32 %v20155_v37, %v20091_v40  ;;  %v20092_v36 = vadd.f32 %v30212_v56, %v19850_v58  ;;  %v19291_v50 = vpop.f32.mrb[197].mxu1  ;;  %v19568_v11 = vrot.slane %v24778_v5, 1 }
 0xd33   :  { %v20221_v43 = vadd.f32 %v20157_v45, %v20093_v23  ;;  %v19566_v3 = vrot.slane %v19291_v50, 1  ;;  %v24779_v42 = vpop.f32.mrb[198].mxu1 }
 0xd34   :  { %20283 = vst [vmem:[#allocation10 + $0x150] sm:$0xff] %v20219_v32  ;;  %v20220_v9 = vadd.f32 %v20156_v34, %v20092_v36  ;;  %v19569_v25 = vrot.slane %v24779_v42, 1  ;;  %v19294_v24 = vpop.f32.mrb[199].mxu1 }
 0xd35   :  { %20285 = vst [vmem:[#allocation10 + $0x160] sm:$0xff] %v20221_v43  ;;  %v19621_v41 = vsel %vm9660_vm1, %v19565_v19, %v19566_v3  ;;  %v19567_v1 = vrot.slane %v19294_v24, 1  ;;  %v31291_v43 = vld [vmem:[#allocation57_spill] sm:$0xff] }
 0xd36   :  { %20284 = vst [vmem:[#allocation10 + $0x158] sm:$0xff] %v20220_v9  ;;  %v19853_v26 = vadd.f32 %v19621_v41, %v31286_v14  ;;  %v19618_v57 = vsel %vm9660_vm1, %v19568_v11, %v19569_v25  ;;  %v20163_v9 = vld [vmem:[#allocation4 + $0x190] sm:$0xff] }
 0xd37   :  { %v19856_v13 = vadd.f32 %v19618_v57, %v31287_v16  ;;  %v19619_v18 = vsel %vm9660_vm1, %v19567_v1, %v19568_v11  ;;  %v31292_v11 = vld [vmem:[#allocation59_spill] sm:$0xff]  ;;  %v20165_v1 = vld [vmem:[#allocation4 + $0x1a0] sm:$0xff]  ;;  %v20164_v57 = vld [vmem:[#allocation4 + $0x198] sm:$0xff] }
 0xd38   :  { %v20094_v38 = vadd.f32 %v30212_v56, %v19853_v26  ;;  %v19855_v21 = vadd.f32 %v19619_v18, %v31288_v27 }
 0xd39   :  { %v20096_v31 = vadd.f32 %v30212_v56, %v19856_v13  ;;  %v24782_v8 = vpop.f32.mrb[200].mxu1 }
 0xd3a   :  { %v20222_v33 = vadd.f32 %v20158_v29, %v20094_v38  ;;  %v20095_v39 = vadd.f32 %v30212_v56, %v19855_v21  ;;  %v19307_v35 = vpop.f32.mrb[201].mxu1  ;;  %v19572_v2 = vrot.slane %v24782_v8, 1 }
 0xd3b   :  { %v20224_v62 = vadd.f32 %v20160_v63, %v20096_v31  ;;  %v24783_v22 = vpop.f32.mrb[202].mxu1  ;;  %v19570_v51 = vrot.slane %v19307_v35, 1 }
 0xd3c   :  { %20286 = vst [vmem:[#allocation10 + $0x168] sm:$0xff] %v20222_v33  ;;  %v20223_v47 = vadd.f32 %v20159_v12, %v20095_v39  ;;  %v19310_v59 = vpop.f32.mrb[203].mxu1  ;;  %v19573_v40 = vrot.slane %v24783_v22, 1  ;;  %v31293_v39 = vld [vmem:[#allocation96_spill] sm:$0xff]  ;;  %v20166_v22 = vld [vmem:[#allocation4 + $0x1a8] sm:$0xff] }
 0xd3d   :  { %20288 = vst [vmem:[#allocation10 + $0x178] sm:$0xff] %v20224_v62  ;;  %v19571_v61 = vrot.slane %v19310_v59, 1 }
 0xd3e   :  { %20287 = vst [vmem:[#allocation10 + $0x170] sm:$0xff] %v20223_v47  ;;  %v31294_v47 = vld [vmem:[#allocation60_spill] sm:$0xff] }
 0xd3f   :  { %v19615_v52 = vsel %vm9660_vm1, %v19571_v61, %v19572_v2  ;;  %v19616_v19 = vsel %vm9660_vm1, %v19570_v51, %v19571_v61  ;;  %v20168_v61 = vld [vmem:[#allocation4 + $0x1b8] sm:$0xff] }
 0xd40   :  { %v19858_v48 = vadd.f32 %v19616_v19, %v31289_v10  ;;  %v19859_v20 = vadd.f32 %v19615_v52, %v31290_v44  ;;  %v20167_v10 = vld [vmem:[#allocation4 + $0x1b0] sm:$0xff] }
 0xd41   :  { %v24786_v37 = vpop.f32.mrb[204].mxu1 }
 0xd42   :  { %v20097_v17 = vadd.f32 %v30212_v56, %v19858_v48  ;;  %v20098_v7 = vadd.f32 %v30212_v56, %v19859_v20  ;;  %v19323_v60 = vpop.f32.mrb[205].mxu1  ;;  %v19576_v34 = vrot.slane %v24786_v37, 1 }
 0xd43   :  { %v19574_v45 = vrot.slane %v19323_v60, 1  ;;  %v24787_v49 = vpop.f32.mrb[206].mxu1 }
 0xd44   :  { %v20225_v58 = vadd.f32 %v20161_v28, %v20097_v17  ;;  %v20226_v23 = vadd.f32 %v20162_v30, %v20098_v7  ;;  %v19577_v5 = vrot.slane %v24787_v49, 1  ;;  %v19326_v32 = vpop.f32.mrb[207].mxu1 }
 0xd45   :  { %v19613_v36 = vsel %vm9660_vm1, %v19573_v40, %v19574_v45  ;;  %v19575_v50 = vrot.slane %v19326_v32, 1  ;;  %v20169_v32 = vld [vmem:[#allocation4 + $0x1c0] sm:$0xff] }
 0xd46   :  { %20289 = vst [vmem:[#allocation10 + $0x180] sm:$0xff] %v20225_v58  ;;  %20290 = vst [vmem:[#allocation10 + $0x188] sm:$0xff] %v20226_v23  ;;  %v19861_v3 = vadd.f32 %v19613_v36, %v31291_v43  ;;  %v19610_v42 = vsel %vm9660_vm1, %v19576_v34, %v19577_v5  ;;  %v31295_v58 = vld [vmem:[#allocation98_spill] sm:$0xff]  ;;  %v31296_v34 = vld [vmem:[#allocation19_spill] sm:$0xff] }
 0xd47   :  { %v19864_v25 = vadd.f32 %v19610_v42, %v31292_v11  ;;  %v19612_v24 = vsel %vm9660_vm1, %v19574_v45, %v19575_v50  ;;  %v20170_v36 = vld [vmem:[#allocation4 + $0x1c8] sm:$0xff] }
 0xd48   :  { %v20099_v41 = vadd.f32 %v30212_v56, %v19861_v3  ;;  %v19862_v14 = vadd.f32 %v19612_v24, %v30149_v54 }
 0xd49   :  { %v20101_v26 = vadd.f32 %v30212_v56, %v19864_v25  ;;  %v24790_v29 = vpop.f32.mrb[208].mxu1 }
 0xd4a   :  { %v20227_v16 = vadd.f32 %v20163_v9, %v20099_v41  ;;  %v20100_v13 = vadd.f32 %v30212_v56, %v19862_v14  ;;  %v19339_v18 = vpop.f32.mrb[209].mxu1  ;;  %v19580_v31 = vrot.slane %v24790_v29, 1 }
 0xd4b   :  { %v20229_v38 = vadd.f32 %v20165_v1, %v20101_v26  ;;  %v19578_v63 = vrot.slane %v19339_v18, 1  ;;  %v24791_v27 = vpop.f32.mrb[210].mxu1  ;;  %v20171_v18 = vld [vmem:[#allocation4 + $0x1d0] sm:$0xff] }
 0xd4c   :  { %20291 = vst [vmem:[#allocation10 + $0x190] sm:$0xff] %v20227_v16  ;;  %v20228_v21 = vadd.f32 %v20164_v57, %v20100_v13  ;;  %v19581_v12 = vrot.slane %v24791_v27, 1  ;;  %v19342_v8 = vpop.f32.mrb[211].mxu1  ;;  %v31297_v16 = vld [vmem:[#allocation100_spill] sm:$0xff] }
 0xd4d   :  { %20293 = vst [vmem:[#allocation10 + $0x1a0] sm:$0xff] %v20229_v38  ;;  %v19609_v54 = vsel %vm9660_vm1, %v19577_v5, %v19578_v63  ;;  %v19579_v33 = vrot.slane %v19342_v8, 1  ;;  %v26619_v27 = vld [vmem:[%s30481_s3] ss:$0 sm:$0xff]  ;;  %s26722_s3 = smov [#allocation10]  }
 0xd4e   :  { %20292 = vst [vmem:[#allocation10 + $0x198] sm:$0xff] %v20228_v21  ;;  %v19865_v35 = vadd.f32 %v19609_v54, %v31293_v39  ;;  %v19606_v62 = vsel %vm9660_vm1, %v19580_v31, %v19581_v12  ;;  %v20172_v54 = vld [vmem:[#allocation4 + $0x1d8] sm:$0xff]  ;;  %s20310_s30 = sshll.u32 %s26722_s3, 4  ;;  %s20311_s30 = int_to_ptr.vmem [resolvable:$true] %s20310_s30 }
 0xd4f   :  { %v19868_v59 = vadd.f32 %v19606_v62, %v31294_v47  ;;  %v19607_v2 = vsel %vm9660_vm1, %v19579_v33, %v19580_v31  ;;  %v20173_v31 = vld [vmem:[#allocation4 + $0x1e0] sm:$0xff]  ;;  %s26686_s5 = scalar_lea.vmem %s20311_s30, 8192  ;;  %p26691_p11 = scmp.lt.s32.totalorder %s20311_s30, %s20311_s30 }
 0xd50   :  { %v20102_v51 = vadd.f32 %v30212_v56, %v19865_v35  ;;  %v19867_v52 = vadd.f32 %v19607_v2, %v30162_v55  ;;  %p26687_p10 = scmp.ne.s32.totalorder %s20311_s30, %s26686_s5  ;;  %p26692_p12 = scmp.lt.s32.totalorder %s26686_s5, %s26686_s5 }
 0xd51   :  { %v20104_v19 = vadd.f32 %v30212_v56, %v19868_v59  ;;  %v24794_v48 = vpop.f32.mrb[212].mxu1 }
 0xd52   :  { %v20230_v44 = vadd.f32 %v20166_v22, %v20102_v51  ;;  %v20103_v20 = vadd.f32 %v30212_v56, %v19867_v52  ;;  %v19355_v28 = vpop.f32.mrb[213].mxu1  ;;  %v19584_v60 = vrot.slane %v24794_v48, 1  ;;  %v20174_v48 = vld [vmem:[#allocation4 + $0x1e8] sm:$0xff]  ;;  %p26693_p13 = por %p26692_p12, %p26691_p11 }
 0xd53   :  { %v20232_v30 = vadd.f32 %v20168_v61, %v20104_v19  ;;  %v24795_v37 = vpop.f32.mrb[214].mxu1  ;;  %v19582_v40 = vrot.slane %v19355_v28, 1 }
 0xd54   :  { %20294 = vst [vmem:[#allocation10 + $0x1a8] sm:$0xff] %v20230_v44  ;;  %v20231_v17 = vadd.f32 %v20167_v10, %v20103_v20  ;;  %v19358_v7 = vpop.f32.mrb[215].mxu1  ;;  %v19585_v9 = vrot.slane %v24795_v37, 1  ;;  %p26694_p0 = pnand %p26693_p13, %p26687_p10 }
 0xd55   :  { %20296 = vst [vmem:[#allocation10 + $0x1b8] sm:$0xff] %v20232_v30  ;;  %v19583_v45 = vrot.slane %v19358_v7, 1  ;;  %v20176_v30 = vld [vmem:[#allocation4 + $0x1f8] sm:$0xff]  ;;  %v20175_v7 = vld [vmem:[#allocation4 + $0x1f0] sm:$0xff] }
 0xd56   :  { %20295 = vst [vmem:[#allocation10 + $0x1b0] sm:$0xff] %v20231_v17 }
 0xd57   :  { %v19603_v55 = vsel %vm9660_vm1, %v19583_v45, %v19584_v60  ;;  %v19604_v49 = vsel %vm9660_vm1, %v19582_v40, %v19583_v45 }
 0xd58   :  { %v19870_v23 = vadd.f32 %v19604_v49, %v31295_v58  ;;  %v19871_v5 = vadd.f32 %v19603_v55, %v31296_v34 }
 0xd59   :  { %v24798_v50 = vpop.f32.mrb[216].mxu1 }
 0xd5a   :  { %v20105_v43 = vadd.f32 %v30212_v56, %v19870_v23  ;;  %v20106_v3 = vadd.f32 %v30212_v56, %v19871_v5  ;;  %v19371_v42 = vpop.f32.mrb[217].mxu1  ;;  %v19588_v1 = vrot.slane %v24798_v50, 1 }
 0xd5b   :  { %v19586_v11 = vrot.slane %v19371_v42, 1  ;;  %v24799_v25 = vpop.f32.mrb[218].mxu1 }
 0xd5c   :  { %v20233_v24 = vadd.f32 %v20169_v32, %v20105_v43  ;;  %v20234_v41 = vadd.f32 %v20170_v36, %v20106_v3  ;;  %v19589_v14 = vrot.slane %v24799_v25, 1  ;;  %v19374_v26 = vpop.f32.mrb[219].mxu1 }
 0xd5d   :  { %v19601_v57 = vsel %vm9660_vm1, %v19585_v9, %v19586_v11  ;;  %v19587_v29 = vrot.slane %v19374_v26, 1 }
 0xd5e   :  { %20297 = vst [vmem:[#allocation10 + $0x1c0] sm:$0xff] %v20233_v24  ;;  %20298 = vst [vmem:[#allocation10 + $0x1c8] sm:$0xff] %v20234_v41  ;;  %v19873_v13 = vadd.f32 %v19601_v57, %v31297_v16  ;;  %v19598_v56 = vsel %vm9660_vm1, %v19588_v1, %v19589_v14 }
 0xd5f   :  { %v19876_v38 = vadd.f32 %v19598_v56, %v30186_v6  ;;  %v19600_v63 = vsel %vm9660_vm1, %v19586_v11, %v19587_v29 }
 0xd60   :  { %v20107_v21 = vadd.f32 %v26619_v27, %v19873_v13  ;;  %v19874_v12 = vadd.f32 %v19600_v63, %v30190_v15 }
 0xd61   :  { %v20109_v8 = vadd.f32 %v26619_v27, %v19876_v38  ;;  %v24802_v33 = vpop.f32.mrb[220].mxu1 }
 0xd62   :  { %v20235_v39 = vadd.f32 %v20171_v18, %v20107_v21  ;;  %v20108_v35 = vadd.f32 %v26619_v27, %v19874_v12  ;;  %v19387_v62 = vpop.f32.mrb[221].mxu1  ;;  %v19592_v2 = vrot.slane %v24802_v33, 1 }
 0xd63   :  { %v20237_v22 = vadd.f32 %v20173_v31, %v20109_v8  ;;  %v19590_v47 = vrot.slane %v19387_v62, 1  ;;  %v24803_v6 = vpop.f32.mrb[222].mxu1 }
 0xd64   :  { %20299 = vst [vmem:[#allocation10 + $0x1d0] sm:$0xff] %v20235_v39  ;;  %v20236_v59 = vadd.f32 %v20172_v54, %v20108_v35  ;;  %v19593_v51 = vrot.slane %v24803_v6, 1  ;;  %v19390_v61 = vpop.f32.mrb[223].mxu1 }
 0xd65   :  { %20301 = vst [vmem:[#allocation10 + $0x1e0] sm:$0xff] %v20237_v22  ;;  %v19597_v52 = vsel %vm9660_vm1, %v19589_v14, %v19590_v47  ;;  %v19591_v19 = vrot.slane %v19390_v61, 1 }
 0xd66   :  { %20300 = vst [vmem:[#allocation10 + $0x1d8] sm:$0xff] %v20236_v59  ;;  %v19877_v15 = vadd.f32 %v19597_v52, %v30193_v4  ;;  %v19594_v10 = vsel %vm9660_vm1, %v19592_v2, %v19593_v51 }
 0xd67   :  { %v19880_v44 = vadd.f32 %v19594_v10, %v30199_v46  ;;  %v19595_v20 = vsel %vm9660_vm1, %v19591_v19, %v19592_v2 }
 0xd68   :  { %v20110_v28 = vadd.f32 %v26619_v27, %v19877_v15  ;;  %v19879_v37 = vadd.f32 %v19595_v20, %v30203_v0 }
 0xd69   :  { %v20112_v17 = vadd.f32 %v26619_v27, %v19880_v44 }
 0xd6a   :  { %v20238_v60 = vadd.f32 %v20174_v48, %v20110_v28  ;;  %v20111_v40 = vadd.f32 %v26619_v27, %v19879_v37 }
 0xd6b   :  { %v20240_v4 = vadd.f32 %v20176_v30, %v20112_v17 }
 0xd6c   :  { %20302 = vst [vmem:[#allocation10 + $0x1e8] sm:$0xff] %v20238_v60  ;;  %v20239_v45 = vadd.f32 %v20175_v7, %v20111_v40 }
 0xd6d   :  { %20304 = vst [vmem:[#allocation10 + $0x1f8] sm:$0xff] %v20240_v4 }
 0xd6e   :  { %20303 = vst [vmem:[#allocation10 + $0x1f0] sm:$0xff] %v20239_v45 }
 0xd6f   :  { %26697 = shalt.err (!%p26694_p0)
}
 0xd70   :  { %s26698_s8 = scalar_lea.hbm %s30482_s4, 8192 }
 0xd71   :  { %p26699_p1 = scmp.ne.s32.totalorder %s30482_s4, %s26698_s8  ;;  %p26702_p2 = scmp.lt.u32.totalorder %s26698_s8, %s30482_s4 }
 0xd73   :  { %p26704_p3 = pnand %p26702_p2, %p26699_p1 }
 0xd75   :  { %26707 = shalt.err (!%p26704_p3)
}
 0xd76   :  { %20316 = dma.vmem_to_hbm [thread:$0]  %s20311_s30, 8192, %s30482_s4, [#allocation6], %s26718_s1, %s26718_s1, %s26719_s13  }
 0xd77   :  { %26712 = dma.done.wait [#allocation6], 8192  }
 0xd78   :  { %26713 = vsyncadd [#allocation6], 4294959104 }
 0xd79   :  { %20320 = vsyncpa [#allocation5], 1 }
 0xd7a   :  { %20321 = vsyncpa [#allocation8], 1 }
 0xd7b   :  { %20322 = vsyncpa [#allocation6], 1 }

</bundles_post_ra>
